<compile_context>
chip_gen: v5e
topology: v5e:2x2
jax: 0.10.0
libtpu: 0.0.40
codegen_flags: <defaults>
</compile_context>

<pallas_src>
import functools
import math

import jax
import jax.numpy as jnp
from jax.experimental import pallas as pl
from jax.experimental.pallas import tpu as pltpu

_NSP_PAD = 128  # NSP logits padded to a full lane width; real logits live in [:, :2]

# rows of the packed per-layer vector block (L, 16, max(H, F))
_ROW_BQ, _ROW_BK, _ROW_BV, _ROW_BO = 0, 1, 2, 3
_ROW_G1, _ROW_BE1 = 4, 5
_ROW_BF1, _ROW_BF2 = 6, 7
_ROW_G2, _ROW_BE2 = 8, 9


def _round_up(x, m):
    return ((x + m - 1) // m) * m


def _vmem_limit_bytes():
    """Generation-aware scoped-VMEM limit (75% of physical capacity, fallback 64 MiB)."""
    cap = None
    try:
        info = pltpu.get_tpu_info()
        cap = getattr(info, "vmem_capacity_bytes", None)
    except Exception:
        cap = None
    if not cap:
        cap = 64 * 1024 * 1024
    return int(cap) * 3 // 4


# ----------------------------- in-kernel helpers -----------------------------

def _layernorm(x, gamma, beta, eps=1e-5):
    mu = jnp.mean(x, axis=-1, keepdims=True)
    var = jnp.mean((x - mu) ** 2, axis=-1, keepdims=True)
    return (x - mu) * jax.lax.rsqrt(var + eps) * gamma + beta


# ----------------------------- fused multi-layer encoder (+ NSP epilogue) kernel -----------------------------

def encoder_kernel(num_heads,
                   vlen_ref,                                   # SMEM (B,) int32 (scalar prefetch)
                   x_ref,                                      # VMEM (B_blk, S, H) f32
                   wq_ref, wk_ref, wv_ref, wo_ref,             # VMEM (1, H, H) bf16
                   w1_ref, w2_ref,                             # VMEM (1, H, F) / (1, F, H) bf16
                   vec_ref,                                    # VMEM (1, 16, max(H,F)) f32 packed vectors
                   hidw_ref, nspw_ref, headvec_ref,            # NSP-head weights (constant blocks)
                   o_ref,                                      # VMEM (B_blk, S, H) f32 — X carried across layers
                   nsp_ref):                                   # VMEM (B_blk, 128) f32
    bb = pl.program_id(0)
    l = pl.program_id(1)
    n_layers = pl.num_programs(1)

    # Layer 0: seed the resident output block with the embeddings; afterwards o_ref *is* X.
    @pl.when(l == 0)
    def _():
        o_ref[...] = x_ref[...]

    xb = o_ref[...]                                            # (B_blk, S, H) f32
    Bb, S, H = xb.shape
    BS = Bb * S
    d = H // num_heads
    F = w1_ref.shape[2]
    x = xb.reshape(BS, H)

    # unpack the per-layer vectors (one DMA stream instead of ten)
    vec = vec_ref[0]                                           # (16, max(H, F)) f32
    bq = vec[_ROW_BQ:_ROW_BQ + 1, :H]
    bk = vec[_ROW_BK:_ROW_BK + 1, :H]
    bv = vec[_ROW_BV:_ROW_BV + 1, :H]
    bo = vec[_ROW_BO:_ROW_BO + 1, :H]
    g1 = vec[_ROW_G1:_ROW_G1 + 1, :H]
    be1 = vec[_ROW_BE1:_ROW_BE1 + 1, :H]
    bf1 = vec[_ROW_BF1:_ROW_BF1 + 1, :F]
    bf2 = vec[_ROW_BF2:_ROW_BF2 + 1, :H]
    g2 = vec[_ROW_G2:_ROW_G2 + 1, :H]
    be2 = vec[_ROW_BE2:_ROW_BE2 + 1, :H]

    # QKV projections on the whole (B_blk*S, H) block (bf16 MXU, f32 accumulate);
    # 1/sqrt(d) folded into q here (O(BS*H)) instead of scaling the (h,S,S) scores.
    inv_sqrt_d = 1.0 / math.sqrt(d)
    x_bf = x.astype(jnp.bfloat16)
    q = (jnp.dot(x_bf, wq_ref[0], preferred_element_type=jnp.float32) + bq) * inv_sqrt_d
    k = jnp.dot(x_bf, wk_ref[0], preferred_element_type=jnp.float32) + bk
    v = jnp.dot(x_bf, wv_ref[0], preferred_element_type=jnp.float32) + bv

    # Attention per sequence (static loop over the batch block; 3-D einsums, batched heads).
    # d2l masked_softmax semantics: keys >= valid_len filled with -1e6 before softmax.
    key_idx = jax.lax.broadcasted_iota(jnp.int32, (1, 1, S), 2)
    ctx_rows = []
    for i in range(Bb):
        r0 = i * S
        qi = q[r0:r0 + S, :].reshape(S, num_heads, d).astype(jnp.bfloat16)
        ki = k[r0:r0 + S, :].reshape(S, num_heads, d).astype(jnp.bfloat16)
        vi = v[r0:r0 + S, :].reshape(S, num_heads, d).astype(jnp.bfloat16)
        vlen = vlen_ref[bb * Bb + i]

        s_i = jnp.einsum("qhd,khd->hqk", qi, ki, preferred_element_type=jnp.float32)
        s_i = jnp.where(key_idx < vlen, s_i, -1e6)

        # explicit softmax: exp + approximate reciprocal land on the EUP slot
        m = jnp.max(s_i, axis=-1, keepdims=True)
        e = jnp.exp(s_i - m)
        p_i = (e * pl.reciprocal(jnp.sum(e, axis=-1, keepdims=True), approx=True)
               ).astype(jnp.bfloat16)

        c_i = jnp.einsum("hqk,khd->qhd", p_i, vi, preferred_element_type=jnp.float32)
        ctx_rows.append(c_i.reshape(S, H))
    ctx = ctx_rows[0] if Bb == 1 else jnp.concatenate(ctx_rows, axis=0)   # (BS, H)

    attn = jnp.dot(ctx.astype(jnp.bfloat16), wo_ref[0],
                   preferred_element_type=jnp.float32) + bo

    # AddNorm 1 (f32)
    y = _layernorm(x + attn, g1, be1)

    # Position-wise FFN (bf16 MXU, f32 accumulate)
    f = jnp.dot(y.astype(jnp.bfloat16), w1_ref[0],
                preferred_element_type=jnp.float32) + bf1
    f = jnp.maximum(f, 0.0)
    f = jnp.dot(f.astype(jnp.bfloat16), w2_ref[0],
                preferred_element_type=jnp.float32) + bf2

    # AddNorm 2 (f32) -> carried X
    z = _layernorm(y + f, g2, be2)
    o_ref[...] = z.reshape(Bb, S, H)

    # NSP head fused into the last-layer epilogue using CLS rows already resident in VMEM.
    @pl.when(l == n_layers - 1)
    def _():
        cls = o_ref[:, 0, :]                                   # (B_blk, H)
        hid_b = headvec_ref[0:1, :H]
        nsp_b = headvec_ref[1:2, :_NSP_PAD]
        h = jnp.tanh(jnp.dot(cls.astype(jnp.bfloat16), hidw_ref[...],
                             preferred_element_type=jnp.float32) + hid_b)
        nsp_ref[...] = (jnp.dot(h.astype(jnp.bfloat16), nspw_ref[...],
                                preferred_element_type=jnp.float32) + nsp_b
                        ).astype(nsp_ref.dtype)


def bert_encoder(x, valid_lens, p, num_heads, vmem_limit):
    B, S, H = x.shape
    L = p["wq"].shape[0]

    # Fold the whole batch into one tile (toy-scale B). For large B, block the batch so that
    # B_blk*S >= 128 (v5e) / 256 (v6e/v7x) while ~6 f32 (B_blk,S,H) activations fit VMEM; the
    # fused NSP output block then wants B_blk % 8 == 0.
    B_blk = B
    nb = B // B_blk

    def wspec(arr):  # stacked per-layer weight: leading dim indexed by the layer grid axis
        return pl.BlockSpec((1,) + arr.shape[1:], lambda bb, l, vl: (l, 0, 0))

    def cspec(arr):  # constant (fetched once) 2-D block
        return pl.BlockSpec(arr.shape, lambda bb, l, vl: (0, 0))

    kernel = functools.partial(encoder_kernel, num_heads)
    encoded, nsp_pad = pl.pallas_call(
        kernel,
        out_shape=(jax.ShapeDtypeStruct((B, S, H), jnp.float32),
                   jax.ShapeDtypeStruct((B, _NSP_PAD), jnp.float32)),
        grid_spec=pltpu.PrefetchScalarGridSpec(
            num_scalar_prefetch=1,
            grid=(nb, L),
            in_specs=[pl.BlockSpec((B_blk, S, H), lambda bb, l, vl: (bb, 0, 0)),
                      wspec(p["wq"]), wspec(p["wk"]), wspec(p["wv"]), wspec(p["wo"]),
                      wspec(p["w_ffn1"]), wspec(p["w_ffn2"]), wspec(p["enc_vec"]),
                      cspec(p["hid_w"]), cspec(p["nsp_w_pad"]), cspec(p["head_vec"])],
            out_specs=[pl.BlockSpec((B_blk, S, H), lambda bb, l, vl: (bb, 0, 0)),
                       pl.BlockSpec((B_blk, _NSP_PAD), lambda bb, l, vl: (bb, 0))],
        ),
        compiler_params=pltpu.CompilerParams(
            dimension_semantics=("parallel", "arbitrary"),
            vmem_limit_bytes=vmem_limit),
    )(valid_lens, x,
      p["wq"], p["wk"], p["wv"], p["wo"], p["w_ffn1"], p["w_ffn2"], p["enc_vec"],
      p["hid_w"], p["nsp_w_pad"], p["head_vec"])
    return encoded, nsp_pad[:, :2]


# ----------------------------- MaskLM head kernel (budget-driven vocab tiling) -----------------------------

def mlm_kernel(x_ref, w1_ref, vec_ref, w2_ref, b2_ref, o_ref, h_scr):
    # hidden MLP (Linear -> ReLU -> LayerNorm) is vocab-invariant: compute once, keep in VMEM
    @pl.when(pl.program_id(0) == 0)
    def _():
        h = jnp.dot(x_ref[...].astype(jnp.bfloat16), w1_ref[...],
                    preferred_element_type=jnp.float32) + vec_ref[0:1, :]
        h = jnp.maximum(h, 0.0)
        h_scr[...] = _layernorm(h, vec_ref[1:2, :], vec_ref[2:3, :])

    o_ref[...] = (jnp.dot(h_scr[...].astype(jnp.bfloat16), w2_ref[...],
                          preferred_element_type=jnp.float32)
                  + b2_ref[...]).astype(o_ref.dtype)


def mlm_head(masked_x, p, vmem_limit):
    N, H = masked_x.shape
    w2 = p["mlm_w2"]
    b2 = p["mlm_b2"]
    V = w2.shape[1]

    # Budget-driven lane-dense vocab tile: per 128 output lanes we stream a double-buffered
    # bf16 w2 column block, a double-buffered f32 output tile and the bias tile.
    budget = max(vmem_limit // 2, 1 << 20)
    bytes_per_128 = 2 * (H * 128 * 2) + 2 * (N * 128 * 4) + 2 * (128 * 4)
    tile_v = max(128, (budget // bytes_per_128) * 128)
    tile_v = min(tile_v, _round_up(V, 128))
    V_pad = _round_up(V, tile_v)
    if V_pad != V:  # padded logit columns are sliced away below
        w2 = jnp.pad(w2, ((0, 0), (0, V_pad - V)))
        b2 = jnp.pad(b2, ((0, 0), (0, V_pad - V)))
    nv = V_pad // tile_v

    out = pl.pallas_call(
        mlm_kernel,
        out_shape=jax.ShapeDtypeStruct((N, V_pad), jnp.float32),
        grid_spec=pltpu.PrefetchScalarGridSpec(
            num_scalar_prefetch=0,
            grid=(nv,),
            in_specs=[
                pl.BlockSpec((N, H), lambda v: (0, 0)),
                pl.BlockSpec((H, H), lambda v: (0, 0)),
                pl.BlockSpec((8, H), lambda v: (0, 0)),          # packed b1/gamma/beta
                pl.BlockSpec((H, tile_v), lambda v: (0, v)),
                pl.BlockSpec((1, tile_v), lambda v: (0, v)),
            ],
            out_specs=pl.BlockSpec((N, tile_v), lambda v: (0, v)),
            scratch_shapes=[pltpu.VMEM((N, H), jnp.float32)],
        ),
        compiler_params=pltpu.CompilerParams(
            dimension_semantics=("arbitrary",),
            vmem_limit_bytes=vmem_limit),
    )(masked_x, p["mlm_w1"], p["mlm_vec"], w2, b2)
    return out[:, :V]


# ----------------------------- full model forward -----------------------------

def bert_model_forward(params, tokens, segments, valid_lens=None,
                       pred_positions=None, *, num_heads=2):
    B, S = tokens.shape

    # embeddings (gathers = glue in plain JAX)
    X = (params["tok_emb"][tokens]
         + params["seg_emb"][segments]
         + params["pos_emb"][:, :S, :])

    if valid_lens is None:
        valid_lens = jnp.full((B,), S, dtype=jnp.int32)
    valid_lens = valid_lens.astype(jnp.int32)

    vmem_limit = _vmem_limit_bytes()

    # encoder + fused NSP head (tanh MLP + 2-way linear on the CLS rows)
    encoded_X, nsp_Y_hat = bert_encoder(X, valid_lens, params, num_heads, vmem_limit)

    mlm_Y_hat = None
    if pred_positions is not None:
        P = pred_positions.shape[1]
        batch_idx = jnp.repeat(jnp.arange(B), P)
        flat_pos = pred_positions.reshape(-1)
        masked_X = encoded_X[batch_idx, flat_pos]        # (B*P, H), gather = glue
        mlm_Y_hat = mlm_head(masked_X, params, vmem_limit).reshape(B, P, -1)

    return encoded_X, mlm_Y_hat, nsp_Y_hat


# ----------------------------- deterministic parameter init -----------------------------

def init_params(key, vocab, H, F, num_layers, max_len):
    keys = iter(jax.random.split(key, 64))
    bf16 = jnp.bfloat16
    L = num_layers
    Fp = max(H, F)
    hw = max(H, _NSP_PAD)

    def nrm(shape, scale=0.02, dtype=jnp.float32):
        return (jax.random.normal(next(keys), shape, jnp.float32) * scale).astype(dtype)

    # per-layer small vectors packed into a single (L, 16, Fp) array (see _ROW_* indices)
    bq, bk, bv, bo = nrm((L, 1, H)), nrm((L, 1, H)), nrm((L, 1, H)), nrm((L, 1, H))
    g1, be1 = jnp.ones((L, 1, H), jnp.float32), jnp.zeros((L, 1, H), jnp.float32)
    bf1, bf2 = nrm((L, 1, F)), nrm((L, 1, H))
    g2, be2 = jnp.ones((L, 1, H), jnp.float32), jnp.zeros((L, 1, H), jnp.float32)

    def row(v):
        return jnp.pad(v, ((0, 0), (0, 0), (0, Fp - v.shape[-1])))

    enc_vec = jnp.concatenate(
        [row(v) for v in (bq, bk, bv, bo, g1, be1, bf1, bf2, g2, be2)]
        + [jnp.zeros((L, 6, Fp), jnp.float32)], axis=1)          # (L, 16, Fp)

    # hidden (Linear + Tanh) and NSP (Linear -> 2) head; NSP output zero-padded to 128 lanes
    hid_b = nrm((1, H))
    nsp_w = nrm((H, 2))
    nsp_b = nrm((1, 2))
    head_vec = jnp.zeros((8, hw), jnp.float32)
    head_vec = head_vec.at[0, :H].set(hid_b[0]).at[1, :2].set(nsp_b[0])

    # MaskLM head vectors packed into one (8, H) block: rows 0=b1, 1=gamma, 2=beta
    mlm_b1 = nrm((1, H))
    mlm_vec = jnp.zeros((8, H), jnp.float32)
    mlm_vec = mlm_vec.at[0].set(mlm_b1[0]).at[1].set(jnp.ones((H,), jnp.float32))

    params = {
        "tok_emb": nrm((vocab, H), 0.1),
        "seg_emb": nrm((2, H), 0.1),
        "pos_emb": nrm((1, max_len, H), 0.1),
        # stacked per-layer encoder matmul weights (bf16 for the MXU)
        "wq": nrm((L, H, H), dtype=bf16), "wk": nrm((L, H, H), dtype=bf16),
        "wv": nrm((L, H, H), dtype=bf16), "wo": nrm((L, H, H), dtype=bf16),
        "w_ffn1": nrm((L, H, F), dtype=bf16), "w_ffn2": nrm((L, F, H), dtype=bf16),
        "enc_vec": enc_vec,
        # fused NSP head
        "hid_w": nrm((H, H), dtype=bf16),
        "nsp_w_pad": jnp.pad(nsp_w, ((0, 0), (0, _NSP_PAD - 2))).astype(bf16),
        "head_vec": head_vec,
        # MaskLM head: Linear(H->H), ReLU, LayerNorm(H), Linear(H->vocab)
        "mlm_w1": nrm((H, H), dtype=bf16),
        "mlm_vec": mlm_vec,
        "mlm_w2": nrm((H, vocab), dtype=bf16),
        "mlm_b2": nrm((1, vocab)),
    }
    return params


# ----------------------------- main -----------------------------

if __name__ == "__main__":
    # Small but lane-dense shapes consistent with the module defaults
    # (num_hiddens=128, ffn_num_hiddens=256, num_heads=2, num_layers=2, vocab=20256).
    B, S, H = 2, 8, 128
    NUM_HEADS, NUM_LAYERS = 2, 2
    FFN_HIDDENS = 256
    VOCAB = 20256
    MAX_LEN = 16
    P = 3                      # num masked prediction positions per sequence

    root = jax.random.PRNGKey(0)
    k_tok, k_seg, k_pos, k_params = jax.random.split(root, 4)

    tokens = jax.random.randint(k_tok, (B, S), 0, VOCAB, dtype=jnp.int32)
    segments = jax.random.randint(k_seg, (B, S), 0, 2, dtype=jnp.int32)
    valid_lens = jnp.array([6, 8], dtype=jnp.int32)
    pred_positions = jax.random.randint(k_pos, (B, P), 0, S, dtype=jnp.int32)

    params = init_params(k_params, VOCAB, H, FFN_HIDDENS, NUM_LAYERS, MAX_LEN)

    encoded_X, mlm_Y_hat, nsp_Y_hat = bert_model_forward(
        params, tokens, segments, valid_lens, pred_positions, num_heads=NUM_HEADS)

    jax.block_until_ready((encoded_X, mlm_Y_hat, nsp_Y_hat))
    assert encoded_X.shape == (B, S, H)
    assert mlm_Y_hat.shape == (B, P, VOCAB)
    assert nsp_Y_hat.shape == (B, 2)
    assert bool(jnp.all(jnp.isfinite(encoded_X)))
    assert bool(jnp.all(jnp.isfinite(mlm_Y_hat)))
    assert bool(jnp.all(jnp.isfinite(nsp_Y_hat)))
    print("KERNEL_OK")
</pallas_src>

<mosaic_0001>
module attributes {stable_mosaic.version = 11 : i64} {
  func.func @encoder_kernel(%arg0: i32, %arg1: i32, %arg2: memref<2xi32, #tpu.memory_space<smem>>, %arg3: memref<2x8x128xf32, #tpu.memory_space<vmem>>, %arg4: memref<1x128x128xbf16, #tpu.memory_space<vmem>>, %arg5: memref<1x128x128xbf16, #tpu.memory_space<vmem>>, %arg6: memref<1x128x128xbf16, #tpu.memory_space<vmem>>, %arg7: memref<1x128x128xbf16, #tpu.memory_space<vmem>>, %arg8: memref<1x128x256xbf16, #tpu.memory_space<vmem>>, %arg9: memref<1x256x128xbf16, #tpu.memory_space<vmem>>, %arg10: memref<1x16x256xf32, #tpu.memory_space<vmem>>, %arg11: memref<128x128xbf16, #tpu.memory_space<vmem>>, %arg12: memref<128x128xbf16, #tpu.memory_space<vmem>>, %arg13: memref<8x128xf32, #tpu.memory_space<vmem>>, %arg14: memref<2x8x128xf32, #tpu.memory_space<vmem>>, %arg15: memref<2x128xf32, #tpu.memory_space<vmem>>) attributes {dimension_semantics = [#tpu.dimension_semantics<parallel>, #tpu.dimension_semantics<arbitrary>], iteration_bounds = array<i64: 1, 2>, scalar_prefetch = 1 : i64, scratch_operands = 0 : i64, tpu.core_type = #tpu.core_type<tc>, window_params = [{transform_indices = @transform_0, window_bounds = array<i64: 2, 8, 128>}, {transform_indices = @transform_1, window_bounds = array<i64: 1, 128, 128>}, {transform_indices = @transform_2, window_bounds = array<i64: 1, 128, 128>}, {transform_indices = @transform_3, window_bounds = array<i64: 1, 128, 128>}, {transform_indices = @transform_4, window_bounds = array<i64: 1, 128, 128>}, {transform_indices = @transform_5, window_bounds = array<i64: 1, 128, 256>}, {transform_indices = @transform_6, window_bounds = array<i64: 1, 256, 128>}, {transform_indices = @transform_7, window_bounds = array<i64: 1, 16, 256>}, {pipeline_mode = #tpu.pipeline_mode<synchronous>, transform_indices = @transform_8, window_bounds = array<i64: 128, 128>}, {pipeline_mode = #tpu.pipeline_mode<synchronous>, transform_indices = @transform_9, window_bounds = array<i64: 128, 128>}, {pipeline_mode = #tpu.pipeline_mode<synchronous>, transform_indices = @transform_10, window_bounds = array<i64: 8, 128>}, {transform_indices = @transform_11, window_bounds = array<i64: 2, 8, 128>}, {transform_indices = @transform_12, window_bounds = array<i64: 2, 128>}]} {
    %c0_i32 = arith.constant 0 : i32
    %0 = arith.cmpi eq, %arg1, %c0_i32 : i32
    %1 = arith.extui %0 : i1 to i32
    %c0_i32_0 = arith.constant 0 : i32
    %2 = arith.cmpi ne, %1, %c0_i32_0 : i32
    scf.if %2 {
      %c0_58 = arith.constant 0 : index
      %c0_59 = arith.constant 0 : index
      %c0_60 = arith.constant 0 : index
      %176 = vector.load %arg3[%c0_58, %c0_59, %c0_60] : memref<2x8x128xf32, #tpu.memory_space<vmem>>, vector<2x8x128xf32>
      %c0_61 = arith.constant 0 : index
      %c0_62 = arith.constant 0 : index
      %c0_63 = arith.constant 0 : index
      %177 = vector.load %arg14[%c0_61, %c0_62, %c0_63] : memref<2x8x128xf32, #tpu.memory_space<vmem>>, vector<2x8x128xf32>
      tpu.vector_store %arg14[%c0_61, %c0_62, %c0_63], %176 {strides = array<i32>} : memref<2x8x128xf32, #tpu.memory_space<vmem>>, vector<2x8x128xf32>,
    } else {
    }
    %c0 = arith.constant 0 : index
    %c0_1 = arith.constant 0 : index
    %c0_2 = arith.constant 0 : index
    %3 = vector.load %arg14[%c0, %c0_1, %c0_2] : memref<2x8x128xf32, #tpu.memory_space<vmem>>, vector<2x8x128xf32>
    %4 = vector.shape_cast %3 : vector<2x8x128xf32> to vector<16x128xf32>
    %c0_3 = arith.constant 0 : index
    %c0_4 = arith.constant 0 : index
    %c0_5 = arith.constant 0 : index
    %5 = vector.load %arg10[%c0_3, %c0_4, %c0_5] : memref<1x16x256xf32, #tpu.memory_space<vmem>>, vector<1x16x256xf32>
    %6 = vector.shape_cast %5 : vector<1x16x256xf32> to vector<16x256xf32>
    %7 = vector.extract_strided_slice %6 {offsets = [0, 0], sizes = [1, 128], strides = [1, 1]} : vector<16x256xf32> to vector<1x128xf32>
    %8 = vector.extract_strided_slice %6 {offsets = [1, 0], sizes = [1, 128], strides = [1, 1]} : vector<16x256xf32> to vector<1x128xf32>
    %9 = vector.extract_strided_slice %6 {offsets = [2, 0], sizes = [1, 128], strides = [1, 1]} : vector<16x256xf32> to vector<1x128xf32>
    %10 = vector.extract_strided_slice %6 {offsets = [3, 0], sizes = [1, 128], strides = [1, 1]} : vector<16x256xf32> to vector<1x128xf32>
    %11 = vector.extract_strided_slice %6 {offsets = [4, 0], sizes = [1, 128], strides = [1, 1]} : vector<16x256xf32> to vector<1x128xf32>
    %12 = vector.extract_strided_slice %6 {offsets = [5, 0], sizes = [1, 128], strides = [1, 1]} : vector<16x256xf32> to vector<1x128xf32>
    %13 = vector.extract_strided_slice %6 {offsets = [6, 0], sizes = [1, 256], strides = [1, 1]} : vector<16x256xf32> to vector<1x256xf32>
    %14 = vector.extract_strided_slice %6 {offsets = [7, 0], sizes = [1, 128], strides = [1, 1]} : vector<16x256xf32> to vector<1x128xf32>
    %15 = vector.extract_strided_slice %6 {offsets = [8, 0], sizes = [1, 128], strides = [1, 1]} : vector<16x256xf32> to vector<1x128xf32>
    %16 = vector.extract_strided_slice %6 {offsets = [9, 0], sizes = [1, 128], strides = [1, 1]} : vector<16x256xf32> to vector<1x128xf32>
    %17 = arith.truncf %4 : vector<16x128xf32> to vector<16x128xbf16>
    %c0_6 = arith.constant 0 : index
    %c0_7 = arith.constant 0 : index
    %c0_8 = arith.constant 0 : index
    %18 = vector.load %arg4[%c0_6, %c0_7, %c0_8] : memref<1x128x128xbf16, #tpu.memory_space<vmem>>, vector<1x128x128xbf16>
    %19 = vector.shape_cast %18 : vector<1x128x128xbf16> to vector<128x128xbf16>
    %cst = arith.constant dense<0.000000e+00> : vector<16x128xf32>
    %20 = tpu.matmul %17, %19, %cst {dimension_numbers = #tpu.dot_dimension_numbers<[1], [0], [0], [1], [0, 0, 1, 1], [], []>} : vector<16x128xbf16>, vector<128x128xbf16>, vector<16x128xf32> -> vector<16x128xf32>
    %21 = vector.broadcast %7 : vector<1x128xf32> to vector<16x128xf32>
    %22 = arith.addf %20, %21 : vector<16x128xf32>
    %cst_9 = arith.constant 1.250000e-01 : f32
    %23 = vector.broadcast %cst_9 : f32 to vector<16x128xf32>
    %24 = arith.mulf %22, %23 : vector<16x128xf32>
    %c0_10 = arith.constant 0 : index
    %c0_11 = arith.constant 0 : index
    %c0_12 = arith.constant 0 : index
    %25 = vector.load %arg5[%c0_10, %c0_11, %c0_12] : memref<1x128x128xbf16, #tpu.memory_space<vmem>>, vector<1x128x128xbf16>
    %26 = vector.shape_cast %25 : vector<1x128x128xbf16> to vector<128x128xbf16>
    %cst_13 = arith.constant dense<0.000000e+00> : vector<16x128xf32>
    %27 = tpu.matmul %17, %26, %cst_13 {dimension_numbers = #tpu.dot_dimension_numbers<[1], [0], [0], [1], [0, 0, 1, 1], [], []>} : vector<16x128xbf16>, vector<128x128xbf16>, vector<16x128xf32> -> vector<16x128xf32>
    %28 = vector.broadcast %8 : vector<1x128xf32> to vector<16x128xf32>
    %29 = arith.addf %27, %28 : vector<16x128xf32>
    %c0_14 = arith.constant 0 : index
    %c0_15 = arith.constant 0 : index
    %c0_16 = arith.constant 0 : index
    %30 = vector.load %arg6[%c0_14, %c0_15, %c0_16] : memref<1x128x128xbf16, #tpu.memory_space<vmem>>, vector<1x128x128xbf16>
    %31 = vector.shape_cast %30 : vector<1x128x128xbf16> to vector<128x128xbf16>
    %cst_17 = arith.constant dense<0.000000e+00> : vector<16x128xf32>
    %32 = tpu.matmul %17, %31, %cst_17 {dimension_numbers = #tpu.dot_dimension_numbers<[1], [0], [0], [1], [0, 0, 1, 1], [], []>} : vector<16x128xbf16>, vector<128x128xbf16>, vector<16x128xf32> -> vector<16x128xf32>
    %33 = vector.broadcast %9 : vector<1x128xf32> to vector<16x128xf32>
    %34 = arith.addf %32, %33 : vector<16x128xf32>
    %35 = tpu.iota {dimensions = array<i32: 2>} : vector<1x1x8xi32>
    %36 = vector.extract_strided_slice %24 {offsets = [0, 0], sizes = [8, 128], strides = [1, 1]} : vector<16x128xf32> to vector<8x128xf32>
    %37 = vector.shape_cast %36 : vector<8x128xf32> to vector<8x2x64xf32>
    %38 = arith.truncf %37 : vector<8x2x64xf32> to vector<8x2x64xbf16>
    %39 = vector.extract_strided_slice %29 {offsets = [0, 0], sizes = [8, 128], strides = [1, 1]} : vector<16x128xf32> to vector<8x128xf32>
    %40 = vector.shape_cast %39 : vector<8x128xf32> to vector<8x2x64xf32>
    %41 = arith.truncf %40 : vector<8x2x64xf32> to vector<8x2x64xbf16>
    %42 = vector.extract_strided_slice %34 {offsets = [0, 0], sizes = [8, 128], strides = [1, 1]} : vector<16x128xf32> to vector<8x128xf32>
    %43 = vector.shape_cast %42 : vector<8x128xf32> to vector<8x2x64xf32>
    %44 = arith.truncf %43 : vector<8x2x64xf32> to vector<8x2x64xbf16>
    %c2_i32 = arith.constant 2 : i32
    %45 = arith.muli %arg0, %c2_i32 : i32
    %c0_i32_18 = arith.constant 0 : i32
    %46 = arith.addi %45, %c0_i32_18 : i32
    %47 = arith.index_cast %46 : i32 to index
    %48 = memref.load %arg2[%47] : memref<2xi32, #tpu.memory_space<smem>>
    "tpu.trace_start"() <{level = 10 : i32, message = "qhd,khd->hqk"}> : () -> ()
    %cst_19 = arith.constant dense<0.000000e+00> : vector<2x8x8xf32>
    %49 = tpu.matmul %38, %41, %cst_19 {dimension_numbers = #tpu.dot_dimension_numbers<[2], [2], [0], [0], [0, 1, 0, 0, 1, 0], [1], [1]>} : vector<8x2x64xbf16>, vector<8x2x64xbf16>, vector<2x8x8xf32> -> vector<2x8x8xf32>
    "tpu.trace_stop"() : () -> ()
    %50 = vector.broadcast %48 : i32 to vector<1x1x8xi32>
    %51 = arith.cmpi slt, %35, %50 : vector<1x1x8xi32>
    %cst_20 = arith.constant -1.000000e+06 : f32
    %52 = vector.shape_cast %51 : vector<1x1x8xi1> to vector<1x1x8xi1>
    %53 = vector.broadcast %52 : vector<1x1x8xi1> to vector<2x8x8xi1>
    %54 = vector.broadcast %cst_20 : f32 to vector<2x8x8xf32>
    %55 = arith.select %53, %49, %54 : vector<2x8x8xi1>, vector<2x8x8xf32>
    %cst_21 = arith.constant dense<0xFF800000> : vector<2x8xf32>
    %56 = vector.multi_reduction <maximumf>, %55, %cst_21 [2] : vector<2x8x8xf32> to vector<2x8xf32>
    %57 = vector.shape_cast %56 : vector<2x8xf32> to vector<2x8x1xf32>
    %58 = vector.broadcast %57 : vector<2x8x1xf32> to vector<2x8x8xf32>
    %59 = arith.subf %55, %58 : vector<2x8x8xf32>
    %60 = math.exp %59 : vector<2x8x8xf32>
    %cst_22 = arith.constant dense<0.000000e+00> : vector<2x8xf32>
    %61 = vector.multi_reduction <add>, %60, %cst_22 [2] : vector<2x8x8xf32> to vector<2x8xf32>
    %62 = vector.shape_cast %61 : vector<2x8xf32> to vector<2x8x1xf32>
    %63 = tpu.reciprocal %62 {approx = true} : vector<2x8x1xf32> -> vector<2x8x1xf32>
    %64 = vector.broadcast %63 : vector<2x8x1xf32> to vector<2x8x8xf32>
    %65 = arith.mulf %60, %64 : vector<2x8x8xf32>
    %66 = arith.truncf %65 : vector<2x8x8xf32> to vector<2x8x8xbf16>
    "tpu.trace_start"() <{level = 10 : i32, message = "hqk,khd->qhd"}> : () -> ()
    %cst_23 = arith.constant dense<0.000000e+00> : vector<2x64x8xf32>
    %67 = tpu.matmul %44, %66, %cst_23 {dimension_numbers = #tpu.dot_dimension_numbers<[0], [2], [2], [1], [0, 1, 0, 2, 1, 1], [1], [0]>} : vector<8x2x64xbf16>, vector<2x8x8xbf16>, vector<2x64x8xf32> -> vector<2x64x8xf32>
    %68 = tpu.transpose %67, [2, 0, 1] : vector<2x64x8xf32> -> vector<8x2x64xf32>
    "tpu.trace_stop"() : () -> ()
    %69 = vector.shape_cast %68 : vector<8x2x64xf32> to vector<8x128xf32>
    %70 = vector.extract_strided_slice %24 {offsets = [8, 0], sizes = [8, 128], strides = [1, 1]} : vector<16x128xf32> to vector<8x128xf32>
    %71 = vector.shape_cast %70 : vector<8x128xf32> to vector<8x2x64xf32>
    %72 = arith.truncf %71 : vector<8x2x64xf32> to vector<8x2x64xbf16>
    %73 = vector.extract_strided_slice %29 {offsets = [8, 0], sizes = [8, 128], strides = [1, 1]} : vector<16x128xf32> to vector<8x128xf32>
    %74 = vector.shape_cast %73 : vector<8x128xf32> to vector<8x2x64xf32>
    %75 = arith.truncf %74 : vector<8x2x64xf32> to vector<8x2x64xbf16>
    %76 = vector.extract_strided_slice %34 {offsets = [8, 0], sizes = [8, 128], strides = [1, 1]} : vector<16x128xf32> to vector<8x128xf32>
    %77 = vector.shape_cast %76 : vector<8x128xf32> to vector<8x2x64xf32>
    %78 = arith.truncf %77 : vector<8x2x64xf32> to vector<8x2x64xbf16>
    %c2_i32_24 = arith.constant 2 : i32
    %79 = arith.muli %arg0, %c2_i32_24 : i32
    %c1_i32 = arith.constant 1 : i32
    %80 = arith.addi %79, %c1_i32 : i32
    %81 = arith.index_cast %80 : i32 to index
    %82 = memref.load %arg2[%81] : memref<2xi32, #tpu.memory_space<smem>>
    "tpu.trace_start"() <{level = 10 : i32, message = "qhd,khd->hqk"}> : () -> ()
    %cst_25 = arith.constant dense<0.000000e+00> : vector<2x8x8xf32>
    %83 = tpu.matmul %72, %75, %cst_25 {dimension_numbers = #tpu.dot_dimension_numbers<[2], [2], [0], [0], [0, 1, 0, 0, 1, 0], [1], [1]>} : vector<8x2x64xbf16>, vector<8x2x64xbf16>, vector<2x8x8xf32> -> vector<2x8x8xf32>
    "tpu.trace_stop"() : () -> ()
    %84 = vector.broadcast %82 : i32 to vector<1x1x8xi32>
    %85 = arith.cmpi slt, %35, %84 : vector<1x1x8xi32>
    %cst_26 = arith.constant -1.000000e+06 : f32
    %86 = vector.shape_cast %85 : vector<1x1x8xi1> to vector<1x1x8xi1>
    %87 = vector.broadcast %86 : vector<1x1x8xi1> to vector<2x8x8xi1>
    %88 = vector.broadcast %cst_26 : f32 to vector<2x8x8xf32>
    %89 = arith.select %87, %83, %88 : vector<2x8x8xi1>, vector<2x8x8xf32>
    %cst_27 = arith.constant dense<0xFF800000> : vector<2x8xf32>
    %90 = vector.multi_reduction <maximumf>, %89, %cst_27 [2] : vector<2x8x8xf32> to vector<2x8xf32>
    %91 = vector.shape_cast %90 : vector<2x8xf32> to vector<2x8x1xf32>
    %92 = vector.broadcast %91 : vector<2x8x1xf32> to vector<2x8x8xf32>
    %93 = arith.subf %89, %92 : vector<2x8x8xf32>
    %94 = math.exp %93 : vector<2x8x8xf32>
    %cst_28 = arith.constant dense<0.000000e+00> : vector<2x8xf32>
    %95 = vector.multi_reduction <add>, %94, %cst_28 [2] : vector<2x8x8xf32> to vector<2x8xf32>
    %96 = vector.shape_cast %95 : vector<2x8xf32> to vector<2x8x1xf32>
    %97 = tpu.reciprocal %96 {approx = true} : vector<2x8x1xf32> -> vector<2x8x1xf32>
    %98 = vector.broadcast %97 : vector<2x8x1xf32> to vector<2x8x8xf32>
    %99 = arith.mulf %94, %98 : vector<2x8x8xf32>
    %100 = arith.truncf %99 : vector<2x8x8xf32> to vector<2x8x8xbf16>
    "tpu.trace_start"() <{level = 10 : i32, message = "hqk,khd->qhd"}> : () -> ()
    %cst_29 = arith.constant dense<0.000000e+00> : vector<2x64x8xf32>
    %101 = tpu.matmul %78, %100, %cst_29 {dimension_numbers = #tpu.dot_dimension_numbers<[0], [2], [2], [1], [0, 1, 0, 2, 1, 1], [1], [0]>} : vector<8x2x64xbf16>, vector<2x8x8xbf16>, vector<2x64x8xf32> -> vector<2x64x8xf32>
    %102 = tpu.transpose %101, [2, 0, 1] : vector<2x64x8xf32> -> vector<8x2x64xf32>
    "tpu.trace_stop"() : () -> ()
    %103 = vector.shape_cast %102 : vector<8x2x64xf32> to vector<8x128xf32>
    %104 = tpu.concatenate %69, %103 in 0 : vector<8x128xf32>, vector<8x128xf32> -> vector<16x128xf32>
    %105 = arith.truncf %104 : vector<16x128xf32> to vector<16x128xbf16>
    %c0_30 = arith.constant 0 : index
    %c0_31 = arith.constant 0 : index
    %c0_32 = arith.constant 0 : index
    %106 = vector.load %arg7[%c0_30, %c0_31, %c0_32] : memref<1x128x128xbf16, #tpu.memory_space<vmem>>, vector<1x128x128xbf16>
    %107 = vector.shape_cast %106 : vector<1x128x128xbf16> to vector<128x128xbf16>
    %cst_33 = arith.constant dense<0.000000e+00> : vector<16x128xf32>
    %108 = tpu.matmul %105, %107, %cst_33 {dimension_numbers = #tpu.dot_dimension_numbers<[1], [0], [0], [1], [0, 0, 1, 1], [], []>} : vector<16x128xbf16>, vector<128x128xbf16>, vector<16x128xf32> -> vector<16x128xf32>
    %109 = vector.broadcast %10 : vector<1x128xf32> to vector<16x128xf32>
    %110 = arith.addf %108, %109 : vector<16x128xf32>
    %111 = arith.addf %4, %110 : vector<16x128xf32>
    %cst_34 = arith.constant dense<0.000000e+00> : vector<16xf32>
    %112 = vector.multi_reduction <add>, %111, %cst_34 [1] : vector<16x128xf32> to vector<16xf32>
    %113 = vector.shape_cast %112 : vector<16xf32> to vector<16x1xf32>
    %cst_35 = arith.constant 1.280000e+02 : f32
    %114 = vector.broadcast %cst_35 : f32 to vector<16x1xf32>
    %115 = arith.divf %113, %114 : vector<16x1xf32>
    %116 = vector.broadcast %115 : vector<16x1xf32> to vector<16x128xf32>
    %117 = arith.subf %111, %116 : vector<16x128xf32>
    %118 = arith.mulf %117, %117 : vector<16x128xf32>
    %cst_36 = arith.constant dense<0.000000e+00> : vector<16xf32>
    %119 = vector.multi_reduction <add>, %118, %cst_36 [1] : vector<16x128xf32> to vector<16xf32>
    %120 = vector.shape_cast %119 : vector<16xf32> to vector<16x1xf32>
    %cst_37 = arith.constant 1.280000e+02 : f32
    %121 = vector.broadcast %cst_37 : f32 to vector<16x1xf32>
    %122 = arith.divf %120, %121 : vector<16x1xf32>
    %123 = vector.broadcast %115 : vector<16x1xf32> to vector<16x128xf32>
    %124 = arith.subf %111, %123 : vector<16x128xf32>
    %cst_38 = arith.constant 9.99999974E-6 : f32
    %125 = vector.broadcast %cst_38 : f32 to vector<16x1xf32>
    %126 = arith.addf %122, %125 : vector<16x1xf32>
    %127 = math.rsqrt %126 : vector<16x1xf32>
    %128 = vector.broadcast %127 : vector<16x1xf32> to vector<16x128xf32>
    %129 = arith.mulf %124, %128 : vector<16x128xf32>
    %130 = vector.broadcast %11 : vector<1x128xf32> to vector<16x128xf32>
    %131 = arith.mulf %129, %130 : vector<16x128xf32>
    %132 = vector.broadcast %12 : vector<1x128xf32> to vector<16x128xf32>
    %133 = arith.addf %131, %132 : vector<16x128xf32>
    %134 = arith.truncf %133 : vector<16x128xf32> to vector<16x128xbf16>
    %c0_39 = arith.constant 0 : index
    %c0_40 = arith.constant 0 : index
    %c0_41 = arith.constant 0 : index
    %135 = vector.load %arg8[%c0_39, %c0_40, %c0_41] : memref<1x128x256xbf16, #tpu.memory_space<vmem>>, vector<1x128x256xbf16>
    %136 = vector.shape_cast %135 : vector<1x128x256xbf16> to vector<128x256xbf16>
    %cst_42 = arith.constant dense<0.000000e+00> : vector<16x256xf32>
    %137 = tpu.matmul %134, %136, %cst_42 {dimension_numbers = #tpu.dot_dimension_numbers<[1], [0], [0], [1], [0, 0, 1, 1], [], []>} : vector<16x128xbf16>, vector<128x256xbf16>, vector<16x256xf32> -> vector<16x256xf32>
    %138 = vector.broadcast %13 : vector<1x256xf32> to vector<16x256xf32>
    %139 = arith.addf %137, %138 : vector<16x256xf32>
    %cst_43 = arith.constant 0.000000e+00 : f32
    %140 = vector.broadcast %cst_43 : f32 to vector<16x256xf32>
    %141 = arith.maximumf %139, %140 : vector<16x256xf32>
    %142 = arith.truncf %141 : vector<16x256xf32> to vector<16x256xbf16>
    %c0_44 = arith.constant 0 : index
    %c0_45 = arith.constant 0 : index
    %c0_46 = arith.constant 0 : index
    %143 = vector.load %arg9[%c0_44, %c0_45, %c0_46] : memref<1x256x128xbf16, #tpu.memory_space<vmem>>, vector<1x256x128xbf16>
    %144 = vector.shape_cast %143 : vector<1x256x128xbf16> to vector<256x128xbf16>
    %cst_47 = arith.constant dense<0.000000e+00> : vector<16x128xf32>
    %145 = tpu.matmul %142, %144, %cst_47 {dimension_numbers = #tpu.dot_dimension_numbers<[1], [0], [0], [1], [0, 0, 1, 1], [], []>} : vector<16x256xbf16>, vector<256x128xbf16>, vector<16x128xf32> -> vector<16x128xf32>
    %146 = vector.broadcast %14 : vector<1x128xf32> to vector<16x128xf32>
    %147 = arith.addf %145, %146 : vector<16x128xf32>
    %148 = arith.addf %133, %147 : vector<16x128xf32>
    %cst_48 = arith.constant dense<0.000000e+00> : vector<16xf32>
    %149 = vector.multi_reduction <add>, %148, %cst_48 [1] : vector<16x128xf32> to vector<16xf32>
    %150 = vector.shape_cast %149 : vector<16xf32> to vector<16x1xf32>
    %cst_49 = arith.constant 1.280000e+02 : f32
    %151 = vector.broadcast %cst_49 : f32 to vector<16x1xf32>
    %152 = arith.divf %150, %151 : vector<16x1xf32>
    %153 = vector.broadcast %152 : vector<16x1xf32> to vector<16x128xf32>
    %154 = arith.subf %148, %153 : vector<16x128xf32>
    %155 = arith.mulf %154, %154 : vector<16x128xf32>
    %cst_50 = arith.constant dense<0.000000e+00> : vector<16xf32>
    %156 = vector.multi_reduction <add>, %155, %cst_50 [1] : vector<16x128xf32> to vector<16xf32>
    %157 = vector.shape_cast %156 : vector<16xf32> to vector<16x1xf32>
    %cst_51 = arith.constant 1.280000e+02 : f32
    %158 = vector.broadcast %cst_51 : f32 to vector<16x1xf32>
    %159 = arith.divf %157, %158 : vector<16x1xf32>
    %160 = vector.broadcast %152 : vector<16x1xf32> to vector<16x128xf32>
    %161 = arith.subf %148, %160 : vector<16x128xf32>
    %cst_52 = arith.constant 9.99999974E-6 : f32
    %162 = vector.broadcast %cst_52 : f32 to vector<16x1xf32>
    %163 = arith.addf %159, %162 : vector<16x1xf32>
    %164 = math.rsqrt %163 : vector<16x1xf32>
    %165 = vector.broadcast %164 : vector<16x1xf32> to vector<16x128xf32>
    %166 = arith.mulf %161, %165 : vector<16x128xf32>
    %167 = vector.broadcast %15 : vector<1x128xf32> to vector<16x128xf32>
    %168 = arith.mulf %166, %167 : vector<16x128xf32>
    %169 = vector.broadcast %16 : vector<1x128xf32> to vector<16x128xf32>
    %170 = arith.addf %168, %169 : vector<16x128xf32>
    %171 = vector.shape_cast %170 : vector<16x128xf32> to vector<2x8x128xf32>
    %c0_53 = arith.constant 0 : index
    %c0_54 = arith.constant 0 : index
    %c0_55 = arith.constant 0 : index
    %172 = vector.load %arg14[%c0_53, %c0_54, %c0_55] : memref<2x8x128xf32, #tpu.memory_space<vmem>>, vector<2x8x128xf32>
    tpu.vector_store %arg14[%c0_53, %c0_54, %c0_55], %171 {strides = array<i32>} : memref<2x8x128xf32, #tpu.memory_space<vmem>>, vector<2x8x128xf32>,
    %c1_i32_56 = arith.constant 1 : i32
    %173 = arith.cmpi eq, %arg1, %c1_i32_56 : i32
    %174 = arith.extui %173 : i1 to i32
    %c0_i32_57 = arith.constant 0 : i32
    %175 = arith.cmpi ne, %174, %c0_i32_57 : i32
    scf.if %175 {
      %c0_58 = arith.constant 0 : index
      %c0_59 = arith.constant 0 : index
      %c0_60 = arith.constant 0 : index
      %176 = vector.load %arg14[%c0_58, %c0_59, %c0_60] : memref<2x8x128xf32, #tpu.memory_space<vmem>>, vector<2x1x128xf32>
      %177 = vector.shape_cast %176 : vector<2x1x128xf32> to vector<2x128xf32>
      %c0_61 = arith.constant 0 : index
      %c0_62 = arith.constant 0 : index
      %178 = vector.load %arg13[%c0_61, %c0_62] : memref<8x128xf32, #tpu.memory_space<vmem>>, vector<1x128xf32>
      %c1 = arith.constant 1 : index
      %c0_63 = arith.constant 0 : index
      %179 = vector.load %arg13[%c1, %c0_63] : memref<8x128xf32, #tpu.memory_space<vmem>>, vector<1x128xf32>
      %180 = arith.truncf %177 : vector<2x128xf32> to vector<2x128xbf16>
      %c0_64 = arith.constant 0 : index
      %c0_65 = arith.constant 0 : index
      %181 = vector.load %arg11[%c0_64, %c0_65] : memref<128x128xbf16, #tpu.memory_space<vmem>>, vector<128x128xbf16>
      %cst_66 = arith.constant dense<0.000000e+00> : vector<2x128xf32>
      %182 = tpu.matmul %180, %181, %cst_66 {dimension_numbers = #tpu.dot_dimension_numbers<[1], [0], [0], [1], [0, 0, 1, 1], [], []>} : vector<2x128xbf16>, vector<128x128xbf16>, vector<2x128xf32> -> vector<2x128xf32>
      %183 = vector.broadcast %178 : vector<1x128xf32> to vector<2x128xf32>
      %184 = arith.addf %182, %183 : vector<2x128xf32>
      %185 = math.tanh %184 : vector<2x128xf32>
      %186 = arith.truncf %185 : vector<2x128xf32> to vector<2x128xbf16>
      %c0_67 = arith.constant 0 : index
      %c0_68 = arith.constant 0 : index
      %187 = vector.load %arg12[%c0_67, %c0_68] : memref<128x128xbf16, #tpu.memory_space<vmem>>, vector<128x128xbf16>
      %cst_69 = arith.constant dense<0.000000e+00> : vector<2x128xf32>
      %188 = tpu.matmul %186, %187, %cst_69 {dimension_numbers = #tpu.dot_dimension_numbers<[1], [0], [0], [1], [0, 0, 1, 1], [], []>} : vector<2x128xbf16>, vector<128x128xbf16>, vector<2x128xf32> -> vector<2x128xf32>
      %189 = vector.broadcast %179 : vector<1x128xf32> to vector<2x128xf32>
      %190 = arith.addf %188, %189 : vector<2x128xf32>
      %c0_70 = arith.constant 0 : index
      %c0_71 = arith.constant 0 : index
      %191 = vector.load %arg15[%c0_70, %c0_71] : memref<2x128xf32, #tpu.memory_space<vmem>>, vector<2x128xf32>
      tpu.vector_store %arg15[%c0_70, %c0_71], %190 {strides = array<i32>} : memref<2x128xf32, #tpu.memory_space<vmem>>, vector<2x128xf32>,
    } else {
    }
    return
  }
  func.func @transform_0(%arg0: i32, %arg1: i32, %arg2: memref<2xi32, #tpu.memory_space<smem>>) -> (i32, i32, i32) {
    %c0_i32 = arith.constant 0 : i32
    %c0_i32_0 = arith.constant 0 : i32
    %c0_i32_1 = arith.constant 0 : i32
    return %arg0, %c0_i32, %c0_i32_0 : i32, i32, i32
  }
  func.func @transform_1(%arg0: i32, %arg1: i32, %arg2: memref<2xi32, #tpu.memory_space<smem>>) -> (i32, i32, i32) {
    %c0_i32 = arith.constant 0 : i32
    %c0_i32_0 = arith.constant 0 : i32
    %c0_i32_1 = arith.constant 0 : i32
    return %arg1, %c0_i32, %c0_i32_0 : i32, i32, i32
  }
  func.func @transform_2(%arg0: i32, %arg1: i32, %arg2: memref<2xi32, #tpu.memory_space<smem>>) -> (i32, i32, i32) {
    %c0_i32 = arith.constant 0 : i32
    %c0_i32_0 = arith.constant 0 : i32
    %c0_i32_1 = arith.constant 0 : i32
    return %arg1, %c0_i32, %c0_i32_0 : i32, i32, i32
  }
  func.func @transform_3(%arg0: i32, %arg1: i32, %arg2: memref<2xi32, #tpu.memory_space<smem>>) -> (i32, i32, i32) {
    %c0_i32 = arith.constant 0 : i32
    %c0_i32_0 = arith.constant 0 : i32
    %c0_i32_1 = arith.constant 0 : i32
    return %arg1, %c0_i32, %c0_i32_0 : i32, i32, i32
  }
  func.func @transform_4(%arg0: i32, %arg1: i32, %arg2: memref<2xi32, #tpu.memory_space<smem>>) -> (i32, i32, i32) {
    %c0_i32 = arith.constant 0 : i32
    %c0_i32_0 = arith.constant 0 : i32
    %c0_i32_1 = arith.constant 0 : i32
    return %arg1, %c0_i32, %c0_i32_0 : i32, i32, i32
  }
  func.func @transform_5(%arg0: i32, %arg1: i32, %arg2: memref<2xi32, #tpu.memory_space<smem>>) -> (i32, i32, i32) {
    %c0_i32 = arith.constant 0 : i32
    %c0_i32_0 = arith.constant 0 : i32
    %c0_i32_1 = arith.constant 0 : i32
    return %arg1, %c0_i32, %c0_i32_0 : i32, i32, i32
  }
  func.func @transform_6(%arg0: i32, %arg1: i32, %arg2: memref<2xi32, #tpu.memory_space<smem>>) -> (i32, i32, i32) {
    %c0_i32 = arith.constant 0 : i32
    %c0_i32_0 = arith.constant 0 : i32
    %c0_i32_1 = arith.constant 0 : i32
    return %arg1, %c0_i32, %c0_i32_0 : i32, i32, i32
  }
  func.func @transform_7(%arg0: i32, %arg1: i32, %arg2: memref<2xi32, #tpu.memory_space<smem>>) -> (i32, i32, i32) {
    %c0_i32 = arith.constant 0 : i32
    %c0_i32_0 = arith.constant 0 : i32
    %c0_i32_1 = arith.constant 0 : i32
    return %arg1, %c0_i32, %c0_i32_0 : i32, i32, i32
  }
  func.func @transform_8(%arg0: i32, %arg1: i32, %arg2: memref<2xi32, #tpu.memory_space<smem>>) -> (i32, i32) {
    %c0_i32 = arith.constant 0 : i32
    %c0_i32_0 = arith.constant 0 : i32
    %c0_i32_1 = arith.constant 0 : i32
    return %c0_i32, %c0_i32_0 : i32, i32
  }
  func.func @transform_9(%arg0: i32, %arg1: i32, %arg2: memref<2xi32, #tpu.memory_space<smem>>) -> (i32, i32) {
    %c0_i32 = arith.constant 0 : i32
    %c0_i32_0 = arith.constant 0 : i32
    %c0_i32_1 = arith.constant 0 : i32
    return %c0_i32, %c0_i32_0 : i32, i32
  }
  func.func @transform_10(%arg0: i32, %arg1: i32, %arg2: memref<2xi32, #tpu.memory_space<smem>>) -> (i32, i32) {
    %c0_i32 = arith.constant 0 : i32
    %c0_i32_0 = arith.constant 0 : i32
    %c0_i32_1 = arith.constant 0 : i32
    return %c0_i32, %c0_i32_0 : i32, i32
  }
  func.func @transform_11(%arg0: i32, %arg1: i32, %arg2: memref<2xi32, #tpu.memory_space<smem>>) -> (i32, i32, i32) {
    %c0_i32 = arith.constant 0 : i32
    %c0_i32_0 = arith.constant 0 : i32
    %c0_i32_1 = arith.constant 0 : i32
    return %arg0, %c0_i32, %c0_i32_0 : i32, i32, i32
  }
  func.func @transform_12(%arg0: i32, %arg1: i32, %arg2: memref<2xi32, #tpu.memory_space<smem>>) -> (i32, i32) {
    %c0_i32 = arith.constant 0 : i32
    %c0_i32_0 = arith.constant 0 : i32
    return %arg0, %c0_i32 : i32, i32
  }
}

</mosaic_0001>

<bundles_post_ra>
// kernel: tpu_custom_call.1
= control target key start
LH: loop header
LB: loop body
LE: loop exit
PB: predicated region body
PF: predicated region fallthrough
CT: control target
= control target key end

     0   :  { %s12955_s28 = smov [#allocation3]   ;;  %s16180_s0 = inlined_call_operand.hbm [shape: s32[2], index: 0, kind: input, shape index: {}]   ;;  %s16181_s1 = inlined_call_operand.hbm [shape: f32[2,8,128], index: 1, kind: input, shape index: {}]   ;;  %s16182_s2 = inlined_call_operand.hbm [shape: bf16[2,128,128], index: 2, kind: input, shape index: {}]   ;;  %s16183_s3 = inlined_call_operand.hbm [shape: bf16[2,128,128], index: 3, kind: input, shape index: {}]   ;;  %s16184_s4 = inlined_call_operand.hbm [shape: bf16[2,128,128], index: 4, kind: input, shape index: {}]   ;;  %s16185_s5 = inlined_call_operand.hbm [shape: bf16[2,128,128], index: 5, kind: input, shape index: {}]   ;;  %s16186_s6 = inlined_call_operand.hbm [shape: bf16[2,128,256], index: 6, kind: input, shape index: {}]   ;;  %s16187_s7 = inlined_call_operand.hbm [shape: bf16[2,256,128], index: 7, kind: input, shape index: {}]   ;;  %s16188_s8 = inlined_call_operand.hbm [shape: f32[2,16,256], index: 8, kind: input, shape index: {}]   ;;  %s16189_s9 = inlined_call_operand.hbm [shape: bf16[128,128], index: 9, kind: input, shape index: {}]   ;;  %s16190_s10 = inlined_call_operand.hbm [shape: bf16[128,128], index: 10, kind: input, shape index: {}]   ;;  %s16191_s11 = inlined_call_operand.vmem [shape: f32[8,128], index: 11, kind: input, shape index: {}]   ;;  %s16192_s12 = inlined_call_operand.hbm [shape: f32[2,8,128], index: 12, kind: output, shape index: {0}]   ;;  %s16193_s13 = inlined_call_operand.hbm [shape: f32[2,128], index: 13, kind: output, shape index: {1}]  }
   0x1   :  { %16223 = sst [smem:[#allocation56_spill]] %s16182_s2  ;;  %s20_s27 = sshll.u32 %s16180_s0, 4  ;;  %s21_s27 = int_to_ptr.hbm [resolvable:$true] %s20_s27 }
   0x2   :  { %16224 = sst [smem:[#allocation57_spill]] %s16184_s4 }
   0x3   :  { %16225 = sst [smem:[#allocation58_spill]] %s16186_s6 }
   0x4   :  { %16226 = sst [smem:[#allocation59_spill]] %s16189_s9 }
   0x5   :  { %16227 = sst [smem:[#allocation60_spill]] %s16191_s11 }
   0x6   :  { %16228 = sst [smem:[#allocation61_spill]] %s16192_s12 }
   0x7   :  { %16229 = sst [smem:[#allocation62_spill]] %s16193_s13 }
   0x8   :  { %23 = dma.hbm_to_smem %s21_s27, 16, %s12955_s28, [#allocation2] }
   0x9   :  { %12893 = dma.done.wait [#allocation2], 16 }
   0xa   :  { %12894 = vsyncadd [#allocation2], 4294967280 }
   0xb   :  { %26 = sfence }
   0xc   :  { %27 = vsyncpa [#allocation5], 0 }
   0xd   :  { %28 = vsyncpa [#allocation8], 0 }
   0xe   :  { %30 = vsyncpa [#allocation8 + $0x1], 0 }
   0xf   :  { %31 = vsyncpa [#allocation11], 0 }
  0x10   :  { %33 = vsyncpa [#allocation11 + $0x1], 0 }
  0x11   :  { %34 = vsyncpa [#allocation14], 0 }
  0x12   :  { %36 = vsyncpa [#allocation14 + $0x1], 0 }
  0x13   :  { %37 = vsyncpa [#allocation17], 0 }
  0x14   :  { %39 = vsyncpa [#allocation17 + $0x1], 0 }
  0x15   :  { %40 = vsyncpa [#allocation20], 0 }
  0x16   :  { %41 = vsyncpa [#allocation6], 0 }
  0x17   :  { %42 = vsyncpa [#allocation23], 0  ;;  %s13046_s29 = smov 0   ;;  %s13048_s0 = smov 0  }
  0x18   :  { %s13050_s30 = smov 0   ;;  %s13052_s14 = smov 0  }
  0x19   :  { %s13054_s15 = smov 0   ;;  %s13056_s16 = smov 0  }
  0x1a LB: > { %16230 = sst [smem:[#allocation34_spill]] %s12937_s0  ;;  %s13075_s17 = sadd.s32 4294967295, %s12953_s16   ;;  %s12953_s16 = sphi %s13056_s16, %s48_s16   ;;  %s12949_s15 = sphi %s13054_s15, %s16308_s15   ;;  %s12945_s14 = sphi %s13052_s14, %s16307_s14   ;;  %s12941_s30 = sphi %s13050_s30, %s16305_s30   ;;  %s12937_s0 = sphi %s13048_s0, %s16304_s0   ;;  %s12933_s29 = sphi %s13046_s29, %s16303_s29  }
  0x1b   : > { %16231 = sst [smem:[#allocation35_spill]] %s12941_s30  ;;  %p106_p0 = scmp.ne.s32.totalorder %s12937_s0, %s12933_s29 }
  0x1c   : > { %16232 = sst [smem:[#allocation36_spill]] %s12945_s14  ;;  %p107_p1 = scmp.eq.s32.totalorder %s13075_s17, 0 }
  0x1d   : > { %16233 = sst [smem:[#allocation37_spill]] %s12953_s16  ;;  %p11264_p2 = scmp.ge.s32.totalorder %s12953_s16, 1 }
  0x1e   : > { %16234 = sst [smem:[#allocation38_spill]] %s13075_s17  ;;  %p388_p3 = scmp.lt.s32.totalorder %s12953_s16, 3 }
  0x1f   : > { %p13083_p4 = por %p107_p1, %p106_p0  ;;  %s16237_s9 = sld [smem:[#allocation59_spill]] }
  0x20   : > { %p13090_p5 = pnand %p11264_p2, %p388_p3  ;;  %s12956_s23 = smov [#allocation18]  }
  0x21   : > { %s16235_s18 = scalar_select %p13083_p4, 1, 0 }
  0x22   : > { %s16238_s22 = scalar_select %p13090_p5, 1, 0 }
  0x23   : > { %16236 = sst [smem:[#allocation39_spill]] %s16235_s18  ;;  %p11772_p6 = pneg %p13090_p5 }
  0x24   : > { %16239 = sst [smem:[#allocation40_spill]] %s16238_s22  ;;  %s418_s24 = sshll.u32 %s12956_s23, 4  ;;  %s419_s24 = int_to_ptr.vmem [resolvable:$true] %s418_s24 }
  0x25   : > { %s416_s21 = sshll.u32 %s16237_s9, 4  ;;  %p13098_p7 = pnand %p11772_p6, %p107_p1  ;;  %s417_s21 = int_to_ptr.hbm [resolvable:$true] %s416_s21 }
  0x26   : > { %s16194_s26 = smov 64   ;;  %s16196_s27 = smov 4  }
  0x27   : > { %11778 = dma.hbm_to_vmem [thread:$0]  (!%p13098_p7), %s417_s21, 1024, %s419_s24, [#allocation17], %s16194_s26, %s16194_s26, %s16196_s27  }
  0x28   : > { %s57_s28 = sadd.s32 1, %s12949_s15  ;;  %s93_s29 = sadd.s32 1, %s12941_s30 }
  0x29   : > { %p58_p8 = scmp.ge.s32.totalorder %s57_s28, 2  ;;  %p100_p9 = scmp.ne.s32.totalorder %s12941_s30, %s12937_s0 }
  0x2a   : > { %p101_p10 = scmp.eq.s32.totalorder %s12953_s16, 0  ;;  %p11807_p12 = scmp.lt.s32.totalorder %s12953_s16, 2 }
  0x2b   : > { %s16310_s28 = smov (%p58_p8, %s57_s28), 0  ;;  %s13122_s23 = sand.u32 1, %s12953_s16  }
  0x2c   : > { %16241 = sst [smem:[#allocation41_spill]] %s16310_s28  ;;  %p13114_p11 = por %p101_p10, %p100_p9 }
  0x2d   : > { %s90_s20 = ssub.s32 %s12949_s15, %s16310_s28  ;;  %s13125_s21 = sand.u32 1, %s12941_s30  }
  0x2e   : > { %p91_p13 = scmp.eq.s32.totalorder %s90_s20, 0  ;;  %s13128_s24 = sshll.u32 %s12949_s15, 6 }
  0x2f   : > { %s13134_s27 = sshll.u32 %s13125_s21, 6  ;;  %s16244_s2 = sld [smem:[#allocation56_spill]] }
  0x30   : > { %s13131_s26 = scalar_select %p91_p13, %s12941_s30, %s93_s29  }
  0x31   : > { %s453_s12 = scalar_lea.vmem [#allocation7], %s13134_s27  ;;  %p13145_p0 = pnand %p11807_p12, %p13114_p11 }
  0x32   : > { %16243 = sst [smem:[#allocation42_spill]] %s13131_s26  ;;  %s461_s11 = sshll.u32 %s453_s12, 4  ;;  %s462_s11 = int_to_ptr.vmem [resolvable:$true] %s461_s11 }
  0x33   : > { %s16246_s4 = sld [smem:[#allocation57_spill]]  ;;  %s16248_s30 = smov 64  }
  0x34   : > { %s497_s19 = scalar_lea.vmem [#allocation10], %s13134_s27  ;;  %s16210_s14 = scalar_lea.sflag [#allocation11], %s13122_s23 }
  0x35   : > { %s458_s28 = scalar_lea.hbm %s16244_s2, %s13128_s24  ;;  %s16204_s2 = scalar_lea.sflag [#allocation8], %s13122_s23 }
  0x36   : > { %s459_s20 = sshll.u32 %s458_s28, 4  ;;  %s16247_s28 = smov 4   ;;  %s460_s20 = int_to_ptr.hbm [resolvable:$true] %s459_s20 }
  0x37   : > { %11785 = dma.hbm_to_vmem [thread:$0]  (!%p13145_p0), %s460_s20, 1024, %s462_s11, %s16204_s2, %s16248_s30, %s16248_s30, %s16247_s28  }
  0x38   : > { %s505_s16 = sshll.u32 %s497_s19, 4  ;;  %s11281_s26 = sshll.u32 %s13125_s21, 7  ;;  %s506_s16 = int_to_ptr.vmem [resolvable:$true] %s505_s16 }
  0x39   : > { %s502_s13 = scalar_lea.hbm %s16246_s4, %s13128_s24  ;;  %s11654_s9 = sshll.u32 %s12949_s15, 7 }
  0x3a   : > { %s503_s12 = sshll.u32 %s502_s13, 4  ;;  %s16249_s6 = sld [smem:[#allocation58_spill]]  ;;  %s504_s12 = int_to_ptr.hbm [resolvable:$true] %s503_s12 }
  0x3b   : > { %11791 = dma.hbm_to_vmem [thread:$0]  (!%p13145_p0), %s504_s12, 1024, %s506_s16, %s16210_s14, %s16248_s30, %s16248_s30, %s16247_s28  }
  0x3c   : > { %s541_s20 = scalar_lea.vmem [#allocation13], %s11281_s26  ;;  %s538_s2 = scalar_lea.sflag [#allocation14], %s13122_s23 }
  0x3d   : > { %s549_s13 = sshll.u32 %s541_s20, 4  ;;  %s12959_s0 = smov 128   ;;  %s550_s13 = int_to_ptr.vmem [resolvable:$true] %s549_s13 }
  0x3e   : > { %s12960_s17 = smov 8   ;;  %s568_s12 = scalar_lea.hbm %s16187_s7, %s11654_s9 }
  0x3f   : > { %s563_s14 = scalar_lea.vmem [#allocation15], %s11281_s26  ;;  %s569_s18 = sshll.u32 %s568_s12, 4  ;;  %s13185_s18 = int_to_ptr.hbm [resolvable:$true] %s569_s18 }
  0x40   : > { %s546_s11 = scalar_lea.hbm %s16249_s6, %s11654_s9  ;;  %s571_s4 = sshll.u32 %s563_s14, 4  ;;  %s13183_s4 = int_to_ptr.vmem [resolvable:$true] %s571_s4 }
  0x41   : > { %s547_s19 = sshll.u32 %s546_s11, 4  ;;  %s402_s6 = sshll.u32 %s16181_s1, 4  ;;  %s548_s19 = int_to_ptr.hbm [resolvable:$true] %s547_s19  ;;  %s403_s6 = int_to_ptr.hbm [resolvable:$true] %s402_s6 }
  0x42   : > { %11797 = dma.hbm_to_vmem [thread:$0]  (!%p13145_p0), %s548_s19, 2048, %s550_s13, %s538_s2, %s12959_s0, %s12959_s0, %s12960_s17  }
  0x43   : > { %s12961_s13 = smov [#allocation4]   ;;  %s430_s14 = sshll.u32 %s16190_s10, 4  ;;  %s431_s14 = int_to_ptr.hbm [resolvable:$true] %s430_s14 }
  0x44   : > { %s404_s22 = sshll.u32 %s12961_s13, 4  ;;  %s12962_s26 = smov [#allocation19]   ;;  %s405_s22 = int_to_ptr.vmem [resolvable:$true] %s404_s22 }
  0x45   : > { %11775 = dma.hbm_to_vmem [thread:$0]  (!%p13098_p7), %s403_s6, 256, %s405_s22, [#allocation5], %s12959_s0, %s12959_s0, %s12960_s17  }
  0x46   : > { %s432_s16 = sshll.u32 %s12962_s26, 4  ;;  %s480_s20 = scalar_lea.hbm %s16183_s3, %s13128_s24  ;;  %s433_s16 = int_to_ptr.vmem [resolvable:$true] %s432_s16 }
  0x47   : > { %s481_s13 = sshll.u32 %s480_s20, 4  ;;  %s475_s6 = scalar_lea.vmem [#allocation9], %s13134_s27  ;;  %s482_s13 = int_to_ptr.hbm [resolvable:$true] %s481_s13 }
  0x48   : > { %11781 = dma.hbm_to_vmem [thread:$0]  (!%p13098_p7), %s431_s14, 1024, %s433_s16, [#allocation20], %s16248_s30, %s16248_s30, %s16247_s28  }
  0x49   : > { %s483_s0 = sshll.u32 %s475_s6, 4  ;;  %s16250_s17 = scalar_lea.sflag [#allocation8], %s13122_s23  ;;  %s484_s0 = int_to_ptr.vmem [resolvable:$true] %s483_s0 }
  0x4a   : > { %11788 = dma.hbm_to_vmem [thread:$0]  (!%p13145_p0), %s482_s13, 1024, %s484_s0, %s16250_s17, %s16248_s30, %s16248_s30, %s16247_s28  }
  0x4b   : > { %s524_s19 = scalar_lea.hbm %s16185_s5, %s13128_s24  ;;  %s519_s25 = scalar_lea.vmem [#allocation12], %s13134_s27 }
  0x4c   : > { %s527_s26 = sshll.u32 %s519_s25, 4  ;;  %s525_s12 = sshll.u32 %s524_s19, 4  ;;  %s528_s26 = int_to_ptr.vmem [resolvable:$true] %s527_s26  ;;  %s526_s12 = int_to_ptr.hbm [resolvable:$true] %s525_s12 }
  0x4d   : > { %s16251_s14 = scalar_lea.sflag [#allocation11], %s13122_s23  ;;  %s11287_s24 = sshll.u32 %s13125_s21, 5 }
  0x4e   : > { %11794 = dma.hbm_to_vmem [thread:$0]  (!%p13145_p0), %s526_s12, 1024, %s528_s26, %s16251_s14, %s16248_s30, %s16248_s30, %s16247_s28  }
  0x4f   : > { %11800 = dma.hbm_to_vmem [thread:$0]  (!%p13145_p0), %s13185_s18, 2048, %s13183_s4, %s538_s2, %s16248_s30, %s16248_s30, %s16247_s28  }
  0x50   : > { %s11656_s16 = sshll.u32 %s12949_s15, 5  ;;  %s585_s6 = scalar_lea.vmem [#allocation16], %s11287_s24 }
  0x51   : > { %s590_s20 = scalar_lea.hbm %s16188_s8, %s11656_s16  ;;  %s593_s0 = sshll.u32 %s585_s6, 4  ;;  %s594_s0 = int_to_ptr.vmem [resolvable:$true] %s593_s0 }
  0x52   : > { %s591_s13 = sshll.u32 %s590_s20, 4  ;;  %s582_s17 = scalar_lea.sflag [#allocation17], %s13122_s23  ;;  %s592_s13 = int_to_ptr.hbm [resolvable:$true] %s591_s13 }
  0x53   : > { %s12963_s22 = smov 256   ;;  %s12964_s9 = smov 16  }
  0x54   : > { %11803 = dma.hbm_to_vmem [thread:$0]  (!%p13145_p0), %s592_s13, 512, %s594_s0, %s582_s17, %s12963_s22, %s12963_s22, %s12964_s9  }
  0x55   : > { %605 = sbr.rel (%p13090_p5) target bundleno = 5024 (0x13a0), region = 64 }
  0x5a   : > { %s16253_s2 = sld [smem:[#allocation38_spill]] }
  0x5b   : > { %12896 = dma.done.wait (%p107_p1), [#allocation5], 256  }
  0x5c   : > { %12898 = vsyncadd (%p107_p1), [#allocation5], 4294967040  ;;  %s16254_s30 = sld [smem:[#allocation34_spill]] }
  0x60   : > { %s612_s28 = sand.u32 1, %s16253_s2  }
  0x61   : > { %s613_s23 = scalar_lea.sflag [#allocation8], %s612_s28 }
  0x62   : > { %s614_s4 = sand.u32 1, %s16254_s30  }
  0x63   : > { %s11292_s18 = sshll.u32 %s614_s4, 6 }
  0x64   : > { %s13249_s25 = scalar_lea.vmem [#allocation7], %s11292_s18 }
  0x65   : > { %12900 = dma.done.wait (%p13083_p4), %s613_s23, 2048  }
  0x66   : > { %12902 = vsyncadd (%p13083_p4), %s613_s23, 4294965248  ;;  %s13255_s29 = scalar_lea.vmem [#allocation9], %s11292_s18  ;;  %s633_s26 = scalar_lea.sflag [#allocation11], %s612_s28 }
  0x67   : > { %s13257_s12 = scalar_lea.vmem [#allocation10], %s11292_s18 }
  0x68   : > { %12904 = dma.done.wait (%p13083_p4), %s633_s26, 2048  }
  0x69   : > { %12906 = vsyncadd (%p13083_p4), %s633_s26, 4294965248  ;;  %s11296_s14 = sshll.u32 %s614_s4, 7  ;;  %s13263_s24 = scalar_lea.vmem [#allocation12], %s11292_s18 }
  0x6a   : > { %s653_s16 = scalar_lea.sflag [#allocation14], %s612_s28  ;;  %s13265_s27 = scalar_lea.vmem [#allocation13], %s11296_s14 }
  0x6b   : > { %12908 = dma.done.wait (%p13083_p4), %s653_s16, 4096  }
  0x6c   : > { %12910 = vsyncadd (%p13083_p4), %s653_s16, 4294963200  ;;  %s11298_s11 = sshll.u32 %s614_s4, 5  ;;  %s13271_s20 = scalar_lea.vmem [#allocation15], %s11296_s14 }
  0x6d   : > { %s673_s13 = scalar_lea.sflag [#allocation17], %s612_s28  ;;  %s13273_s6 = scalar_lea.vmem [#allocation16], %s11298_s11 }
  0x6e   : > { %12912 = dma.done.wait (%p13083_p4), %s673_s13, 512  }
  0x6f   : > { %12914 = vsyncadd (%p13083_p4), %s673_s13, 4294966784 }
  0x70   : > { %12916 = dma.done.wait (%p107_p1), [#allocation17], 1024  }
  0x71   : > { %12918 = vsyncadd (%p107_p1), [#allocation17], 4294966272 }
  0x72   : > { %12920 = dma.done.wait (%p107_p1), [#allocation20], 1024  }
  0x73   : > { %12922 = vsyncadd (%p107_p1), [#allocation20], 4294966272  ;;  %s16256_s0 = sld [smem:[#allocation36_spill]] }
  0x79   : > { %p11301_p2 = scmp.ne.s32.totalorder %s16256_s0, 0 }
  0x7b   : > { %759 = sbr.rel (%p11301_p2) target bundleno = 131 (0x83), region = 108 }
  0x80   : > { %v760_v0 = vld [vmem:[#allocation4] sm:$0xff]  ;;  %v761_v1 = vld [vmem:[#allocation4 + $0x8] sm:$0xff] }
  0x81   : > { %762 = vst [vmem:[#allocation21] sm:$0xff] %v760_v0 }
  0x82   : > { %763 = vst [vmem:[#allocation21 + $0x8] sm:$0xff] %v761_v1 }
  0x83 PF: > { %v11664_v2 = vld [vmem:[%s13249_s25 + $0x38] sm:$0xff]  ;;  %v11663_v5 = vld [vmem:[%s13249_s25 + $0x30] sm:$0xff]  ;;  %v11662_v8 = vld [vmem:[%s13249_s25 + $0x28] sm:$0xff]  ;;  %s12965_s17 = smov 64   ;;  %v12966_v47 = vmov 1983009808  }
  0x84   : > { %v11672_v3 = vld [vmem:[%s13255_s29 + $0x38] sm:$0xff]  ;;  %835 = vmatpush.bf16.msra.mxu0 %v11664_v2  ;;  %v11671_v6 = vld [vmem:[%s13255_s29 + $0x30] sm:$0xff]  ;;  %v11670_v9 = vld [vmem:[%s13255_s29 + $0x28] sm:$0xff]  ;;  %v1019_v48 = vunpack.c.l.s4 %v12966_v47  ;;  %vm1016_vm0 = vcmask 1047556   ;;  %v12967_v54 = vmov 1934713408  }
  0x85   : > { %v11680_v4 = vld [vmem:[%s13257_s12 + $0x38] sm:$0xff]  ;;  %916 = vmatpush.bf16.msra.mxu1 %v11672_v3  ;;  %v11679_v7 = vld [vmem:[%s13257_s12 + $0x30] sm:$0xff]  ;;  %v11678_v10 = vld [vmem:[%s13257_s12 + $0x28] sm:$0xff]  ;;  %v1041_v55 = vunpack.c.l.s4 %v12967_v54  ;;  %vm3313_vm1 = vcmask 523264   ;;  %s1205_s22 = sld [smem:[#allocation3]]  ;;  %vm3352_vm3 = vcmask 64512  }
  0x86   : > { %995 = vmatpush.bf16.msra.mxu2 %v11680_v4  ;;  %v11661_v11 = vld [vmem:[%s13249_s25 + $0x20] sm:$0xff]  ;;  %v11660_v14 = vld [vmem:[%s13249_s25 + $0x18] sm:$0xff]  ;;  %v11659_v17 = vld [vmem:[%s13249_s25 + $0x10] sm:$0xff]  ;;  %v13331_v49 = vunpack.c.0.s8 %v1019_v48  ;;  %s11408_s9 = sld [smem:[#allocation3 + $0x1]] }
  0x87   : > { %v11669_v12 = vld [vmem:[%s13255_s29 + $0x20] sm:$0xff]  ;;  %v11668_v15 = vld [vmem:[%s13255_s29 + $0x18] sm:$0xff]  ;;  %v11667_v18 = vld [vmem:[%s13255_s29 + $0x10] sm:$0xff]  ;;  %v13339_v60 = vunpack.c.0.s8 %v1041_v55  ;;  %s16297_s19 = sld [smem:[#allocation36_spill]] }
  0x88   : > { %836 = vmatpush.bf16.msra.mxu0 %v11663_v5  ;;  %v11677_v13 = vld [vmem:[%s13257_s12 + $0x20] sm:$0xff]  ;;  %v11676_v16 = vld [vmem:[%s13257_s12 + $0x18] sm:$0xff]  ;;  %v11675_v19 = vld [vmem:[%s13257_s12 + $0x10] sm:$0xff] }
  0x89   : > { %917 = vmatpush.bf16.msra.mxu1 %v11671_v6  ;;  %v11658_v20 = vld [vmem:[%s13249_s25 + $0x8] sm:$0xff]  ;;  %v11657_v23 = vld [vmem:[%s13249_s25] sm:$0xff] }
  0x8a   : > { %996 = vmatpush.bf16.msra.mxu2 %v11679_v7  ;;  %v11666_v21 = vld [vmem:[%s13255_s29 + $0x8] sm:$0xff]  ;;  %v11665_v24 = vld [vmem:[%s13255_s29] sm:$0xff] }
  0x8b   : > { %v11674_v22 = vld [vmem:[%s13257_s12 + $0x8] sm:$0xff]  ;;  %v764_v25 = vld [vmem:[#allocation21] sm:$0xff] }
  0x8c   : > { %837 = vmatpush.bf16.msra.mxu0 %v11662_v8  ;;  %v765_v26 = vld [vmem:[#allocation21 + $0x8] sm:$0xff]  ;;  %v11673_v27 = vld [vmem:[%s13257_s12] sm:$0xff] }
  0x8d   : > { %918 = vmatpush.bf16.msra.mxu1 %v11670_v9  ;;  %v769_v28 = vpack.c.bf16 %v765_v26, %v764_v25  ;;  %v13313_v29 = vld [vmem:[%s13273_s6] sm:$0xff]  ;;  %p11579_p1 = scmp.ne.s32.totalorder %s16297_s19, 1 }
  0x8e   : > { %997 = vmatpush.bf16.msra.mxu2 %v11678_v10  ;;  %16257 = vst [vmem:[#allocation43_spill] sm:$0xff] %v13313_v29  ;;  %v786_v30 = vperm.slane %v13313_v29, 0  ;;  %v16211_v31 = vperm.slane %v13313_v29, 1  ;;  %v946_v39 = vperm.slane %v13313_v29, 2  ;;  %s16298_s21 = sld [smem:[#allocation60_spill]] (!%p11579_p1) }
  0x90   : > { %838 = vmatpush.bf16.msra.mxu0 %v11661_v11 }
  0x91   : > { %919 = vmatpush.bf16.msra.mxu1 %v11669_v12 }
  0x92   : > { %998 = vmatpush.bf16.msra.mxu2 %v11677_v13 }
  0x94   : > { %839 = vmatpush.bf16.msra.mxu0 %v11660_v14 }
  0x95   : > { %920 = vmatpush.bf16.msra.mxu1 %v11668_v15 }
  0x96   : > { %999 = vmatpush.bf16.msra.mxu2 %v11676_v16 }
  0x98   : > { %840 = vmatpush.bf16.msra.mxu0 %v11659_v17 }
  0x99   : > { %921 = vmatpush.bf16.msra.mxu1 %v11667_v18 }
  0x9a   : > { %1000 = vmatpush.bf16.msra.mxu2 %v11675_v19 }
  0x9c   : > { %841 = vmatpush.bf16.msra.mxu0 %v11658_v20 }
  0x9d   : > { %922 = vmatpush.bf16.msra.mxu1 %v11666_v21 }
  0x9e   : > { %1001 = vmatpush.bf16.msra.mxu2 %v11674_v22 }
  0xa0   : > { %842 = vmatpush.bf16.msra.mxu0 %v11657_v23 }
  0xa1   : > { %923 = vmatpush.bf16.msra.mxu1 %v11665_v24 }
  0xa2   : > { %1002 = vmatpush.bf16.msra.mxu2 %v11673_v27 }
  0xa3   : > { %843 = vmatmul.bf16.vlgmr.msra.gmra.mxu0 %v769_v28 }
  0xa4   : > { %924 = vmatmul.bf16.vlgmr.msra.gmra.mxu1 %v769_v28 }
  0xa5   : > { %1003 = vmatmul.bf16.vlgmr.msra.gmra.mxu2 %v769_v28 }
 0x120   : > { %v844_v32 = vpop.f32.mrf.mxu0 }
 0x121   : > { %v845_v33 = vadd.f32 %v844_v32, %v786_v30  ;;  %v925_v34 = vpop.f32.mrf.mxu1 }
 0x122   : > { %v926_v35 = vadd.f32 %v925_v34, %v16211_v31 }
 0x123   : > { %v13319_v36 = vmul.f32 0.125, %v845_v33 }
 0x124   : > { %v1080_v51 = vrot.slane %v926_v35, 4  ;;  %v1085_v52 = vperm.slane %v926_v35, %v13331_v49 }
 0x125   : > { %16258 = vst [vmem:[#allocation44_spill] sm:$0xff] %v13319_v36  ;;  %v11883_v37 = vpack.i.bf16 %v926_v35, %v13319_v36 }
 0x126   : > { %v1081_v58 = vsel %vm1016_vm0, 0.0, %v1080_v51  ;;  %v1102_v59 = vrot.slane %v1085_v52, 4 }
 0x127   : > { %11884 = vrot.lane.b32.xlu0 %v11883_v37, %s12965_s17  ;;  %v1089_v63 = vperm.slane %v1081_v58, %v13331_v49 }
 0x128   : > { %v1004_v38 = vpop.f32.mrf.mxu2  ;;  %v846_v40 = vpop.f32.mrf.mxu0 }
 0x129   : > { %v1005_v41 = vadd.f32 %v1004_v38, %v946_v39  ;;  %v847_v42 = vadd.f32 %v846_v40, %v786_v30  ;;  %v1114_v6 = vrot.slane %v1089_v63, 4 }
 0x12b   : > { %v13324_v44 = vmul.f32 0.125, %v847_v42  ;;  %v1149_v0 = vperm.slane %v1005_v41, %v13331_v49  ;;  %v1144_v23 = vrot.slane %v1005_v41, 4 }
 0x12d   : > { %16259 = vst [vmem:[#allocation45_spill] sm:$0xff] %v13324_v44  ;;  %v1166_v5 = vrot.slane %v1149_v0, 4  ;;  %v1145_v25 = vsel %vm1016_vm0, 0.0, %v1144_v23 }
 0x12e   : > { %v1153_v28 = vperm.slane %v1145_v25, %v13331_v49 }
 0x12f   : > { %1141 = vrot.lane.b32.xlu0 %v1005_v41, %s12965_s17 }
 0x130   : > { %v1006_v43 = vpop.f32.mrf.mxu2  ;;  %v1178_v34 = vrot.slane %v1153_v28, 4 }
 0x131   : > { %v13326_v45 = vadd.f32 %v1006_v43, %v946_v39 }
 0x133   : > { %16260 = vst [vmem:[#allocation46_spill] sm:$0xff] %v13326_v45 }
 0x199   : > { %v13333_v50 = vpop.permute.xlu0 %11884 }
 0x19a   : > { %16261 = vst [vmem:[#allocation47_spill] sm:$0xff] %v13333_v50  ;;  %v11887_v53 = vunpack.i.h.bf16 %v13333_v50 }
 0x19c   : > { %v1090_v56 = vrot.slane %v11887_v53, 4  ;;  %v1095_v57 = vperm.slane %v11887_v53, %v13331_v49 }
 0x19e   : > { %v1091_v61 = vsel %vm1016_vm0, 0.0, %v1090_v56  ;;  %v1103_v62 = vsel %vm1016_vm0, %v1095_v57, %v1102_v59  ;;  %v1100_v26 = vrot.slane %v1095_v57, 4 }
 0x19f   : > { %v1099_v2 = vperm.slane %v1091_v61, %v13331_v49  ;;  %v1111_v4 = vperm.slane %v1103_v62, %v13339_v60 }
 0x1a0   : > { %v1101_v33 = vsel %vm1016_vm0, %v1100_v26, %v1085_v52 }
 0x1a1   : > { %v1142_v1 = vpop.permute.xlu0 %1141  ;;  %v1126_v8 = vrot.slane %v1111_v4, 4  ;;  %v1115_v9 = vsel %vm1016_vm0, %v1099_v2, %v1114_v6  ;;  %v1134_v13 = vpack.c.bf16 %v1111_v4, %v1111_v4  ;;  %v1112_v30 = vrot.slane %v1099_v2, 4 }
 0x1a2   : > { %v1159_v3 = vperm.slane %v1142_v1, %v13331_v49  ;;  %v1123_v10 = vperm.slane %v1115_v9, %v13339_v60  ;;  %v1154_v24 = vrot.slane %v1142_v1, 4  ;;  %v1107_v35 = vperm.slane %v1101_v33, %v13339_v60 }
 0x1a3   : > { %v1127_v12 = vsel %vm1016_vm0, 0.0, %v1126_v8  ;;  %v1113_v37 = vsel %vm1016_vm0, %v1112_v30, %v1089_v63 }
 0x1a4   : > { %v1167_v7 = vsel %vm1016_vm0, %v1159_v3, %v1166_v5  ;;  %v1135_v14 = vpack.c.bf16 %v1127_v12, %v1127_v12  ;;  %v1130_v15 = vrot.slane %v1123_v10, 4  ;;  %v1138_v19 = vpack.c.bf16 %v1123_v10, %v1123_v10 }
 0x1a5   : > { %v1175_v11 = vperm.slane %v1167_v7, %v13339_v60  ;;  %v1155_v27 = vsel %vm1016_vm0, 0.0, %v1154_v24  ;;  %v1119_v39 = vperm.slane %v1113_v37, %v13339_v60  ;;  %v1124_v40 = vrot.slane %v1107_v35, 4 }
 0x1a6   : > { %11888 = vxpose.binary.xlu1.c.b16.start.end [1/2] (short) (narrow) %v1135_v14, %v1134_v13, 64  ;;  %v1131_v17 = vsel %vm1016_vm0, 0.0, %v1130_v15  ;;  %v1163_v32 = vperm.slane %v1155_v27, %v13331_v49  ;;  %v1132_v48 = vpack.c.bf16 %v1107_v35, %v1107_v35  ;;  %v1164_v58 = vrot.slane %v1159_v3, 4 }
 0x1a7   : > { %v1190_v16 = vrot.slane %v1175_v11, 4  ;;  %v1139_v20 = vpack.c.bf16 %v1131_v17, %v1131_v17  ;;  %v1198_v22 = vpack.c.bf16 %v1175_v11, %v1175_v11  ;;  %v1128_v42 = vrot.slane %v1119_v39, 4 }
 0x1a8   : > { %v1179_v38 = vsel %vm1016_vm0, %v1163_v32, %v1178_v34  ;;  %v1125_v43 = vsel %vm1016_vm0, 0.0, %v1124_v40  ;;  %v1136_v54 = vpack.c.bf16 %v1119_v39, %v1119_v39  ;;  %v1176_v59 = vrot.slane %v1163_v32, 4 }
 0x1a9   : > { %v1191_v18 = vsel %vm1016_vm0, 0.0, %v1190_v16  ;;  %11906 = vxpose.binary.xlu2.c.b16.start.end [1/2] (short) (narrow) %v1139_v20, %v1138_v19, 64  ;;  %v1187_v41 = vperm.slane %v1179_v38, %v13339_v60  ;;  %v1133_v51 = vpack.c.bf16 %v1125_v43, %v1125_v43  ;;  %v1129_v52 = vsel %vm1016_vm0, 0.0, %v1128_v42 }
 0x1aa   : > { %v1199_v21 = vpack.c.bf16 %v1191_v18, %v1191_v18  ;;  %v1137_v55 = vpack.c.bf16 %v1129_v52, %v1129_v52  ;;  %v1165_v61 = vsel %vm1016_vm0, %v1164_v58, %v1149_v0  ;;  %v1177_v63 = vsel %vm1016_vm0, %v1176_v59, %v1153_v28 }
 0x1ab   : > { %v1194_v47 = vrot.slane %v1187_v41, 4  ;;  %v1202_v56 = vpack.c.bf16 %v1187_v41, %v1187_v41  ;;  %v1171_v62 = vperm.slane %v1165_v61, %v13339_v60  ;;  %v1183_v1 = vperm.slane %v1177_v63, %v13339_v60 }
 0x1ac   : > { %11924 = vxpose.binary.xlu0.c.b16.start.end [1/2] (short) (narrow) %v1199_v21, %v1198_v22, 64 }
 0x1ad   : > { %v1195_v53 = vsel %vm1016_vm0, 0.0, %v1194_v47  ;;  %v1188_v2 = vrot.slane %v1171_v62, 4  ;;  %v1192_v4 = vrot.slane %v1183_v1, 4  ;;  %v1196_v6 = vpack.c.bf16 %v1171_v62, %v1171_v62 }
 0x1ae   : > { %v1203_v57 = vpack.c.bf16 %v1195_v53, %v1195_v53  ;;  %v1200_v9 = vpack.c.bf16 %v1183_v1, %v1183_v1 }
 0x1af   : > { %v1189_v5 = vsel %vm1016_vm0, 0.0, %v1188_v2  ;;  %v1193_v8 = vsel %vm1016_vm0, 0.0, %v1192_v4 }
 0x1b0   : > { %v1197_v7 = vpack.c.bf16 %v1189_v5, %v1189_v5  ;;  %v1201_v3 = vpack.c.bf16 %v1193_v8, %v1193_v8 }
 0x1e6   : > { %11897 = vxpose.binary.xlu1.c.b16.start.end [1/2] (short) (narrow) %v1133_v51, %v1132_v48, 64 }
 0x1e9   : > { %11915 = vxpose.binary.xlu2.c.b16.start.end [1/2] (short) (narrow) %v1137_v55, %v1136_v54, 64 }
 0x1ec   : > { %11942 = vxpose.binary.xlu0.c.b16.start.end [1/2] (short) (narrow) %v1203_v57, %v1202_v56, 64 }
 0x226   : > { %11933 = vxpose.binary.xlu1.c.b16.start.end [1/2] (short) (narrow) %v1197_v7, %v1196_v6, 64 }
 0x229   : > { %11951 = vxpose.binary.xlu2.c.b16.start.end [1/2] (short) (narrow) %v1201_v3, %v1200_v9, 64 }
 0x24a   : > { %v11907_v10 = vpop.trf.xlu2 }
 0x24b   : > { %v1405_v14 = vshrl.u32 %v11907_v10, 16 }
 0x252   : > { %v11889_v0 = vpop.trf.xlu1  ;;  %v11908_v11 = vpop.trf.xlu2 }
 0x253   : > { %v1406_v12 = vshrl.u32 %v11908_v11, 16  ;;  %v1403_v15 = vpack.i.b16 %v11908_v11, %v11907_v10  ;;  %v1389_v19 = vshrl.u32 %v11889_v0, 16 }
 0x255   : > { %v1407_v16 = vpack.i.b16 %v1406_v12, %v1405_v14  ;;  %v1517_v20 = vrot.slane %v1403_v15, 4 }
 0x257   : > { %v1573_v23 = vrot.slane %v1407_v16, 4 }
 0x258   : > { %v13374_v13 = vpop.trf.xlu0 }
 0x25a   : > { %v11890_v17 = vpop.trf.xlu1  ;;  %v11909_v18 = vpop.trf.xlu2 }
 0x25b   : > { %v1387_v21 = vpack.i.b16 %v11890_v17, %v11889_v0  ;;  %v1390_v22 = vshrl.u32 %v11890_v17, 16  ;;  %v1437_v39 = vshrl.u32 %v11909_v18, 16 }
 0x25d   : > { %v1391_v24 = vpack.i.b16 %v1390_v22, %v1389_v19  ;;  %v13377_v25 = vsel %vm1016_vm0, %v1517_v20, %v1387_v21  ;;  %v1519_v26 = vrot.slane %v1387_v21, 4 }
 0x25f   : > { %v13382_v28 = vsel %vm1016_vm0, %v1403_v15, %v1519_v26  ;;  %v13385_v30 = vsel %vm1016_vm0, %v1573_v23, %v1391_v24  ;;  %v1575_v32 = vrot.slane %v1391_v24, 4 }
 0x260   : > { %v13379_v27 = vpop.trf.xlu0 }
 0x261   : > { %v13388_v33 = vsel %vm1016_vm0, %v1407_v16, %v1575_v32 }
 0x262   : > { %v11891_v34 = vpop.trf.xlu1  ;;  %v11910_v35 = vpop.trf.xlu2 }
 0x263   : > { %v1438_v37 = vshrl.u32 %v11910_v35, 16  ;;  %v1435_v40 = vpack.i.b16 %v11910_v35, %v11909_v18  ;;  %v1421_v47 = vshrl.u32 %v11891_v34, 16 }
 0x265   : > { %v1439_v41 = vpack.i.b16 %v1438_v37, %v1437_v39  ;;  %v1629_v48 = vrot.slane %v1435_v40, 4 }
 0x267   : > { %v1685_v53 = vrot.slane %v1439_v41, 4 }
 0x268   : > { %v13390_v38 = vpop.trf.xlu0 }
 0x26a   : > { %v11892_v42 = vpop.trf.xlu1  ;;  %v11911_v43 = vpop.trf.xlu2 }
 0x26b   : > { %v1419_v51 = vpack.i.b16 %v11892_v42, %v11891_v34  ;;  %v1422_v52 = vshrl.u32 %v11892_v42, 16  ;;  %v1469_v5 = vshrl.u32 %v11911_v43, 16 }
 0x26d   : > { %v1423_v54 = vpack.i.b16 %v1422_v52, %v1421_v47  ;;  %v13393_v55 = vsel %vm1016_vm0, %v1629_v48, %v1419_v51  ;;  %v1631_v56 = vrot.slane %v1419_v51, 4 }
 0x26f   : > { %v13398_v58 = vsel %vm1016_vm0, %v1435_v40, %v1631_v56  ;;  %v13401_v59 = vsel %vm1016_vm0, %v1685_v53, %v1423_v54  ;;  %v1687_v61 = vrot.slane %v1423_v54, 4 }
 0x270   : > { %v13395_v57 = vpop.trf.xlu0 }
 0x271   : > { %v13404_v62 = vsel %vm1016_vm0, %v1439_v41, %v1687_v61 }
 0x272   : > { %v11893_v63 = vpop.trf.xlu1  ;;  %v11912_v1 = vpop.trf.xlu2 }
 0x273   : > { %v1470_v2 = vshrl.u32 %v11912_v1, 16  ;;  %v1467_v6 = vpack.i.b16 %v11912_v1, %v11911_v43  ;;  %v1453_v3 = vshrl.u32 %v11893_v63, 16 }
 0x275   : > { %v1471_v7 = vpack.i.b16 %v1470_v2, %v1469_v5  ;;  %v1741_v10 = vrot.slane %v1467_v6, 4 }
 0x277   : > { %v1797_v12 = vrot.slane %v1471_v7, 4 }
 0x278   : > { %v13406_v4 = vpop.trf.xlu0 }
 0x27a   : > { %v11894_v8 = vpop.trf.xlu1  ;;  %v11913_v9 = vpop.trf.xlu2 }
 0x27b   : > { %v1451_v0 = vpack.i.b16 %v11894_v8, %v11893_v63  ;;  %v1454_v11 = vshrl.u32 %v11894_v8, 16  ;;  %v1501_v32 = vshrl.u32 %v11913_v9, 16 }
 0x27d   : > { %v1455_v14 = vpack.i.b16 %v1454_v11, %v1453_v3  ;;  %v13409_v15 = vsel %vm1016_vm0, %v1741_v10, %v1451_v0  ;;  %v1743_v16 = vrot.slane %v1451_v0, 4 }
 0x27f   : > { %v13414_v18 = vsel %vm1016_vm0, %v1467_v6, %v1743_v16  ;;  %v13417_v19 = vsel %vm1016_vm0, %v1797_v12, %v1455_v14  ;;  %v1799_v20 = vrot.slane %v1455_v14, 4  ;;  %v1524_v16 = vperm.slane %v13377_v25, %v13331_v49 }
 0x280   : > { %v13411_v17 = vpop.trf.xlu0  ;;  %v1528_v25 = vperm.slane %v13382_v28, %v13331_v49  ;;  %v13568_v50 = vperm.slane %v13414_v18, %v13331_v49 }
 0x281   : > { %v13420_v21 = vsel %vm1016_vm0, %v1471_v7, %v1799_v20  ;;  %v1580_v20 = vperm.slane %v13385_v30, %v13331_v49 }
 0x282   : > { %v11895_v22 = vpop.trf.xlu1  ;;  %v11914_v23 = vpop.trf.xlu2 }
 0x283   : > { %v1502_v24 = vshrl.u32 %v11914_v23, 16  ;;  %v1499_v34 = vpack.i.b16 %v11914_v23, %v11913_v9  ;;  %v1485_v40 = vshrl.u32 %v11895_v22, 16 }
 0x285   : > { %v1503_v35 = vpack.i.b16 %v1502_v24, %v1501_v32  ;;  %v1853_v41 = vrot.slane %v1499_v34, 4 }
 0x287   : > { %v1909_v47 = vrot.slane %v1503_v35, 4 }
 0x288   : > { %v13422_v26 = vpop.trf.xlu0 }
 0x28a   : > { %v11896_v37 = vpop.trf.xlu1  ;;  %v11916_v39 = vpop.trf.xlu2 }
 0x28b   : > { %v1483_v42 = vpack.i.b16 %v11896_v37, %v11895_v22  ;;  %v1486_v43 = vshrl.u32 %v11896_v37, 16  ;;  %v1397_v7 = vshrl.u32 %v11916_v39, 16 }
 0x28d   : > { %v1487_v48 = vpack.i.b16 %v1486_v43, %v1485_v40  ;;  %v13425_v51 = vsel %vm1016_vm0, %v1853_v41, %v1483_v42  ;;  %v1855_v52 = vrot.slane %v1483_v42, 4  ;;  %v1529_v41 = vrot.slane %v1524_v16, 4 }
 0x28e   : > { %v1585_v42 = vrot.slane %v1580_v20, 4  ;;  %v1584_v43 = vperm.slane %v13388_v33, %v13331_v49 }
 0x28f   : > { %v13430_v54 = vsel %vm1016_vm0, %v1499_v34, %v1855_v52  ;;  %v13433_v56 = vsel %vm1016_vm0, %v1909_v47, %v1487_v48  ;;  %v1911_v61 = vrot.slane %v1487_v48, 4 }
 0x290   : > { %v13427_v53 = vpop.trf.xlu0 }
 0x291   : > { %v13436_v63 = vsel %vm1016_vm0, %v1503_v35, %v1911_v61 }
 0x292   : > { %v11898_v1 = vpop.trf.xlu1  ;;  %v11917_v2 = vpop.trf.xlu2 }
 0x293   : > { %v1398_v5 = vshrl.u32 %v11917_v2, 16  ;;  %v1395_v8 = vpack.i.b16 %v11917_v2, %v11916_v39  ;;  %v1381_v0 = vshrl.u32 %v11898_v1, 16 }
 0x295   : > { %v1399_v9 = vpack.i.b16 %v1398_v5, %v1397_v7  ;;  %v1505_v11 = vrot.slane %v1395_v8, 4  ;;  %v1541_v5 = vrot.slane %v1528_v25, 4 }
 0x297   : > { %v1561_v22 = vrot.slane %v1399_v9, 4 }
 0x298   : > { %v13438_v6 = vpop.trf.xlu0 }
 0x29a   : > { %v11899_v3 = vpop.trf.xlu1  ;;  %v13440_v10 = vpop.trf.xlu2 }
 0x29b   : > { %v1379_v12 = vpack.i.b16 %v11899_v3, %v11898_v1  ;;  %v1382_v14 = vshrl.u32 %v11899_v3, 16 }
 0x29d   : > { %v1383_v23 = vpack.i.b16 %v1382_v14, %v1381_v0  ;;  %v1506_v24 = vsel %vm1016_vm0, %v1505_v11, %v1379_v12  ;;  %v1507_v32 = vrot.slane %v1379_v12, 4  ;;  %v1597_v0 = vrot.slane %v1584_v43, 4 }
 0x29e   : > { %v1512_v34 = vperm.slane %v1506_v24, %v13331_v49 }
 0x29f   : > { %v1508_v37 = vsel %vm1016_vm0, %v1395_v8, %v1507_v32  ;;  %v1562_v39 = vsel %vm1016_vm0, %v1561_v22, %v1383_v23  ;;  %v1563_v40 = vrot.slane %v1383_v23, 4 }
 0x2a0   : > { %v13448_v35 = vpop.trf.xlu0  ;;  %v1568_v30 = vperm.slane %v1562_v39, %v13331_v49  ;;  %v1516_v47 = vperm.slane %v1508_v37, %v13331_v49  ;;  %v1531_v48 = vrot.slane %v1512_v34, 4  ;;  %v1530_v1 = vsel %vm1016_vm0, %v1529_v41, %v1512_v34 }
 0x2a1   : > { %v1564_v28 = vsel %vm1016_vm0, %v1399_v9, %v1563_v40  ;;  %v13466_v7 = vperm.slane %v1530_v1, %v13339_v60  ;;  %v3550_v40 = vshrl.u32 %v13395_v57, 16 }
 0x2a2   : > { %v13458_v52 = vpop.trf.xlu1  ;;  %v13460_v61 = vpop.trf.xlu2  ;;  %v1586_v2 = vsel %vm1016_vm0, %v1585_v42, %v1568_v30  ;;  %v1542_v33 = vsel %vm1016_vm0, %v1541_v5, %v1516_v47  ;;  %v1572_v3 = vperm.slane %v1564_v28, %v13331_v49  ;;  %v1532_v12 = vsel %vm1016_vm0, %v1524_v16, %v1531_v48 }
 0x2a3   : > { %v13469_v8 = vperm.slane %v1586_v2, %v13339_v60  ;;  %v13477_v9 = vperm.slane %v1532_v12, %v13339_v60  ;;  %v1427_v14 = vpack.i.b16 %v13460_v61, %v13440_v10  ;;  %v1587_v23 = vrot.slane %v1568_v30, 4 }
 0x2a4   : > { %v1598_v22 = vsel %vm1016_vm0, %v1597_v0, %v1572_v3  ;;  %v13483_v24 = vperm.slane %v1542_v33, %v13339_v60  ;;  %v3549_v16 = vshrl.u32 %v13390_v38, 16  ;;  %v3547_v48 = vpack.i.b16 %v13395_v57, %v13390_v38 }
 0x2a5   : > { %11963 = vxpose.binary.xlu0.c.b16.start.end [1/2] (short) (narrow) %v13469_v8, %v13466_v7, 16  ;;  %v13486_v32 = vperm.slane %v1598_v22, %v13339_v60  ;;  %v1588_v37 = vsel %vm1016_vm0, %v1580_v20, %v1587_v23  ;;  %v1555_v30 = vrot.slane %v13477_v9, 4  ;;  %v1617_v1 = vrot.slane %v1427_v14, 4 }
 0x2a6   : > { %v13499_v42 = vperm.slane %v1588_v37, %v13339_v60  ;;  %v1543_v28 = vrot.slane %v1516_v47, 4  ;;  %v1599_v5 = vrot.slane %v1572_v3, 4  ;;  %v3551_v12 = vpack.i.b16 %v3550_v40, %v3549_v16 }
 0x2a7   : > { %11960 = vxpose.binary.xlu2.c.b16.start.end [1/2] (short) (narrow) %v13486_v32, %v13483_v24, 16  ;;  %v1556_v23 = vsel %vm1016_vm0, 0, %v1555_v30  ;;  %v13509_v37 = vperm.slane %v13398_v58, %v13331_v49  ;;  %v3759_v38 = vrot.slane %v3547_v48, 4  ;;  %v1636_v40 = vperm.slane %v13393_v55, %v13331_v49 }
 0x2a8   : > { %v11945_v11 = vpop.trf.xlu0  ;;  %v1611_v20 = vrot.slane %v13499_v42, 4  ;;  %v1600_v16 = vsel %vm1016_vm0, %v1584_v43, %v1599_v5  ;;  %v3815_v29 = vrot.slane %v3551_v12, 4  ;;  %v1613_v18 = vrot.slane %v13486_v32, 4 }
 0x2a9   : > { %v3565_v22 = vshrl.u32 %v11945_v11, 16  ;;  %v13530_v43 = vperm.slane %v1600_v16, %v13339_v60  ;;  %v1653_v55 = vrot.slane %v13509_v37, 4 }
 0x2aa   : > { %v13489_v34 = vpop.trf.xlu1  ;;  %v11920_v39 = vpop.trf.xlu2  ;;  %v1612_v31 = vsel %vm1016_vm0, 0, %v1611_v20 }
 0x2ab   : > { %v1411_v41 = vpack.i.b16 %v13489_v34, %v13458_v52  ;;  %11981 = vxpose.binary.xlu1.c.b16.start.end [1/2] (short) (narrow) %v1612_v31, %v1556_v23, 16 }
 0x2ad   : > { %v1619_v2 = vrot.slane %v1411_v41, 4  ;;  %v1618_v33 = vsel %vm1016_vm0, %v1617_v1, %v1411_v41  ;;  %v1544_v41 = vsel %vm1016_vm0, %v1528_v25, %v1543_v28 }
 0x2ae   : > { %v1624_v47 = vperm.slane %v1618_v33, %v13331_v49  ;;  %v13527_v25 = vperm.slane %v1544_v41, %v13339_v60  ;;  %v1641_v33 = vrot.slane %v1636_v40, 4  ;;  %v3581_v41 = vshrl.u32 %v13406_v4, 16 }
 0x2af   : > { %v1620_v57 = vsel %vm1016_vm0, %v1427_v14, %v1619_v2 }
 0x2b0   : > { %v11946_v0 = vpop.trf.xlu0  ;;  %v13521_v31 = vperm.slane %v1620_v57, %v13331_v49  ;;  %v13546_v57 = vsel %vm1016_vm0, %v1641_v33, %v1624_v47 }
 0x2b1   : > { %v3563_v46 = vpack.i.b16 %v11946_v0, %v11945_v11  ;;  %v3566_v3 = vshrl.u32 %v11946_v0, 16 }
 0x2b2   : > { %v11902_v58 = vpop.trf.xlu1  ;;  %v11921_v20 = vpop.trf.xlu2 }
 0x2b3   : > { %v3757_v30 = vrot.slane %v3563_v46, 4  ;;  %v13518_v1 = vsel %vm1016_vm0, %v3563_v46, %v3759_v38  ;;  %v3567_v11 = vpack.i.b16 %v3566_v3, %v3565_v22  ;;  %v1643_v46 = vrot.slane %v1624_v47, 4 }
 0x2b4   : > { %16262 = vst [vmem:[#allocation48_spill] sm:$0xff] %v13518_v1  ;;  %v1462_v5 = vshrl.u32 %v11921_v20, 16  ;;  %v1461_v22 = vshrl.u32 %v11920_v39, 16  ;;  %v1459_v23 = vpack.i.b16 %v11921_v20, %v11920_v39  ;;  %v13543_v38 = vsel %vm1016_vm0, %v1653_v55, %v13521_v31 }
 0x2b5   : > { %v13524_v14 = vsel %vm1016_vm0, %v3757_v30, %v3547_v48  ;;  %v3813_v2 = vrot.slane %v3567_v11, 4  ;;  %v13534_v28 = vsel %vm1016_vm0, %v3567_v11, %v3815_v29  ;;  %11966 = vxpose.binary.xlu0.c.b16.start.end [1/2] (short) (narrow) %v13530_v43, %v13527_v25, 16  ;;  %v13549_v3 = vsel %vm1016_vm0, %v1636_v40, %v1643_v46 }
 0x2b6   : > { %16263 = vst [vmem:[#allocation49_spill] sm:$0xff] %v13524_v14  ;;  %v1463_v29 = vpack.i.b16 %v1462_v5, %v1461_v22  ;;  %v3582_v39 = vshrl.u32 %v13411_v17, 16  ;;  %v1445_v20 = vshrl.u32 %v11902_v58, 16  ;;  %v1729_v11 = vrot.slane %v1459_v23, 4 }
 0x2b7   : > { %16264 = vst [vmem:[#allocation50_spill] sm:$0xff] %v13534_v28  ;;  %v13537_v48 = vsel %vm1016_vm0, %v3813_v2, %v3551_v12  ;;  %v3579_v12 = vpack.i.b16 %v13411_v17, %v13406_v4  ;;  %v13557_v47 = vperm.slane %v13409_v15, %v13331_v49  ;;  %v13561_v40 = vperm.slane %v13417_v19, %v13331_v49 }
 0x2b8   : > { %v11947_v0 = vpop.trf.xlu0  ;;  %16265 = vst [vmem:[#allocation51_spill] sm:$0xff] %v13537_v48  ;;  %v1785_v46 = vrot.slane %v1463_v29, 4  ;;  %v3583_v17 = vpack.i.b16 %v3582_v39, %v3581_v41  ;;  %v13582_v28 = vpack.i.b16 %v13427_v53, %v13422_v26  ;;  %v3533_v14 = vshrl.u32 %v13438_v6, 16 }
 0x2b9   : > { %v3871_v22 = vrot.slane %v3579_v12, 4  ;;  %v3597_v44 = vshrl.u32 %v11947_v0, 16  ;;  %v1753_v19 = vrot.slane %v13557_v47, 4 }
 0x2ba   : > { %v11903_v16 = vpop.trf.xlu1  ;;  %v11922_v30 = vpop.trf.xlu2 }
 0x2bb   : > { %v1443_v55 = vpack.i.b16 %v11903_v16, %v11902_v58  ;;  %v1446_v2 = vshrl.u32 %v11903_v16, 16 }
 0x2bd   : > { %v1447_v5 = vpack.i.b16 %v1446_v2, %v1445_v20  ;;  %v1730_v4 = vsel %vm1016_vm0, %v1729_v11, %v1443_v55  ;;  %v1731_v33 = vrot.slane %v1443_v55, 4  ;;  %v1809_v11 = vrot.slane %v13561_v40, 4 }
 0x2be   : > { %v3927_v2 = vrot.slane %v3583_v17, 4 }
 0x2bf   : > { %v1732_v58 = vsel %vm1016_vm0, %v1459_v23, %v1731_v33  ;;  %v1786_v16 = vsel %vm1016_vm0, %v1785_v46, %v1447_v5  ;;  %v1787_v36 = vrot.slane %v1447_v5, 4  ;;  %v1557_v23 = vrot.slane %v13483_v24, 4 }
 0x2c0   : > { %v11948_v45 = vpop.trf.xlu0  ;;  %v1655_v33 = vrot.slane %v13521_v31, 4  ;;  %v13589_v24 = vperm.slane %v13420_v21, %v13331_v49  ;;  %v13595_v32 = vperm.slane %v1786_v16, %v13331_v49  ;;  %v1740_v21 = vperm.slane %v1732_v58, %v13331_v49 }
 0x2c1   : > { %v3595_v15 = vpack.i.b16 %v11948_v45, %v11947_v0  ;;  %v3598_v20 = vshrl.u32 %v11948_v45, 16  ;;  %v1788_v41 = vsel %vm1016_vm0, %v1463_v29, %v1787_v36  ;;  %v3613_v45 = vshrl.u32 %v13422_v26, 16 }
 0x2c2   : > { %v11904_v0 = vpop.trf.xlu1  ;;  %v11923_v5 = vpop.trf.xlu2  ;;  %v3614_v26 = vshrl.u32 %v13427_v53, 16  ;;  %v3517_v53 = vshrl.u32 %v13374_v13, 16  ;;  %v3518_v58 = vshrl.u32 %v13379_v27, 16 }
 0x2c3   : > { %v3869_v39 = vrot.slane %v3595_v15, 4  ;;  %v13574_v55 = vsel %vm1016_vm0, %v3595_v15, %v3871_v22  ;;  %v3599_v46 = vpack.i.b16 %v3598_v20, %v3597_v44  ;;  %v13592_v44 = vperm.slane %v1730_v4, %v13331_v49 }
 0x2c4   : > { %16266 = vst [vmem:[#allocation52_spill] sm:$0xff] %v13574_v55  ;;  %v1494_v22 = vshrl.u32 %v11923_v5, 16  ;;  %v13604_v15 = vsel %vm1016_vm0, %v13509_v37, %v1655_v33  ;;  %v1796_v4 = vperm.slane %v1788_v41, %v13331_v49  ;;  %v1614_v20 = vsel %vm1016_vm0, 0, %v1613_v18 }
 0x2c5   : > { %v13585_v36 = vsel %vm1016_vm0, %v3869_v39, %v3579_v12  ;;  %v3925_v31 = vrot.slane %v3599_v46, 4  ;;  %v13598_v29 = vsel %vm1016_vm0, %v3599_v46, %v3927_v2  ;;  %v1558_v12 = vsel %vm1016_vm0, 0, %v1557_v23 }
 0x2c6   : > { %16267 = vst [vmem:[#allocation53_spill] sm:$0xff] %v13585_v36  ;;  %v1493_v2 = vshrl.u32 %v11922_v30, 16  ;;  %v1491_v46 = vpack.i.b16 %v11923_v5, %v11922_v30  ;;  %11969 = vxpose.binary.xlu0.c.b16.start.end [1/2] (short) (narrow) %v1614_v20, %v1558_v12, 16  ;;  %v13615_v23 = vpack.i.b16 %v13379_v27, %v13374_v13  ;;  %v1765_v30 = vrot.slane %v13568_v50, 4 }
 0x2c7   : > { %16268 = vst [vmem:[#allocation54_spill] sm:$0xff] %v13598_v29  ;;  %v13609_v16 = vsel %vm1016_vm0, %v3925_v31, %v3583_v17  ;;  %v13619_v37 = vsel %vm1016_vm0, %v1753_v19, %v13592_v44  ;;  %v13623_v17 = vsel %vm1016_vm0, %v1809_v11, %v13595_v32  ;;  %v1821_v5 = vrot.slane %v13589_v24, 4 }
 0x2c8   : > { %16269 = vst [vmem:[#allocation55_spill] sm:$0xff] %v13609_v16  ;;  %v11949_v39 = vpop.trf.xlu0  ;;  %v1495_v41 = vpack.i.b16 %v1494_v22, %v1493_v2  ;;  %v3615_v18 = vpack.i.b16 %v3614_v26, %v3613_v45  ;;  %v3983_v33 = vrot.slane %v13582_v28, 4  ;;  %v1767_v12 = vrot.slane %v1740_v21, 4 }
 0x2c9   : > { %v1823_v19 = vrot.slane %v1796_v4, 4  ;;  %v1477_v20 = vshrl.u32 %v11904_v0, 16  ;;  %v1841_v1 = vrot.slane %v1491_v46, 4  ;;  %v3534_v27 = vshrl.u32 %v13448_v35, 16 }
 0x2ca   : > { %v11905_v13 = vpop.trf.xlu1  ;;  %v13629_v31 = vpop.trf.xlu2  ;;  %v13635_v22 = vsel %vm1016_vm0, %v13568_v50, %v1767_v12  ;;  %v1897_v26 = vrot.slane %v1495_v41, 4  ;;  %v3629_v55 = vshrl.u32 %v11949_v39, 16  ;;  %v13648_v50 = vsel %vm1016_vm0, %v1765_v30, %v1740_v21 }
 0x2cb   : > { %v1475_v48 = vpack.i.b16 %v11905_v13, %v11904_v0  ;;  %v1478_v11 = vshrl.u32 %v11905_v13, 16  ;;  %v13639_v45 = vsel %vm1016_vm0, %v13589_v24, %v1823_v19  ;;  %v13644_v0 = vpack.i.b16 %v13448_v35, %v13438_v6 }
 0x2cc   : > { %v1755_v13 = vrot.slane %v13592_v44, 4  ;;  %v13658_v6 = vperm.slane %v13430_v54, %v13331_v49  ;;  %v13660_v35 = vpack.i.b16 %v3534_v27, %v3533_v14  ;;  %v13664_v44 = vperm.slane %v13433_v56, %v13331_v49 }
 0x2cd   : > { %v1479_v2 = vpack.i.b16 %v1478_v11, %v1477_v20  ;;  %v1842_v29 = vsel %vm1016_vm0, %v1841_v1, %v1475_v48  ;;  %v1843_v16 = vrot.slane %v1475_v48, 4  ;;  %v13654_v1 = vperm.slane %v13425_v51, %v13331_v49 }
 0x2ce   : > { %v13671_v54 = vsel %vm1016_vm0, %v1821_v5, %v1796_v4  ;;  %v13675_v14 = vsel %vm1016_vm0, %v13557_v47, %v1755_v13  ;;  %v3647_v56 = vrot.slane %v13615_v23, 4  ;;  %v3701_v4 = vrot.slane %v13660_v35, 4 }
 0x2cf   : > { %v1844_v12 = vsel %vm1016_vm0, %v1491_v46, %v1843_v16  ;;  %v1898_v24 = vsel %vm1016_vm0, %v1897_v26, %v1479_v2  ;;  %v1899_v19 = vrot.slane %v1479_v2, 4  ;;  %v4039_v46 = vrot.slane %v3615_v18, 4 }
 0x2d0   : > { %v11950_v36 = vpop.trf.xlu0  ;;  %v1865_v27 = vrot.slane %v13654_v1, 4  ;;  %v13695_v26 = vperm.slane %v1842_v29, %v13331_v49  ;;  %v1921_v13 = vrot.slane %v13664_v44, 4 }
 0x2d1   : > { %v3627_v20 = vpack.i.b16 %v11950_v36, %v11949_v39  ;;  %v3630_v48 = vshrl.u32 %v11950_v36, 16  ;;  %v1900_v21 = vsel %vm1016_vm0, %v1495_v41, %v1899_v19  ;;  %v13680_v36 = vperm.slane %v13436_v63, %v13331_v49 }
 0x2d2   : > { %v11934_v30 = vpop.trf.xlu1  ;;  %v11953_v11 = vpop.trf.xlu2  ;;  %v3645_v41 = vrot.slane %v13644_v0, 4  ;;  %v13698_v63 = vperm.slane %v1844_v12, %v13331_v49 }
 0x2d3   : > { %v3981_v16 = vrot.slane %v3627_v20, 4  ;;  %v13668_v39 = vsel %vm1016_vm0, %v3627_v20, %v3983_v33  ;;  %v3631_v51 = vpack.i.b16 %v3630_v48, %v3629_v55  ;;  %v13687_v33 = vpack.i.b16 %v3518_v58, %v3517_v53 }
 0x2d4   : > { %v3526_v2 = vshrl.u32 %v11953_v11, 16  ;;  %v1877_v58 = vrot.slane %v13658_v6, 4  ;;  %v3646_v19 = vsel %vm1016_vm0, %v3645_v41, %v13615_v23  ;;  %v3525_v20 = vshrl.u32 %v13629_v31, 16 }
 0x2d5   : > { %v13685_v55 = vsel %vm1016_vm0, %v3981_v16, %v13582_v28  ;;  %v4037_v5 = vrot.slane %v3631_v51, 4  ;;  %v13691_v47 = vsel %vm1016_vm0, %v3631_v51, %v4039_v46  ;;  %v1414_v28 = vshrl.u32 %v13489_v34, 16 }
 0x2d6   : > { %v3523_v29 = vpack.i.b16 %v11953_v11, %v13629_v31  ;;  %11972 = vxpose.binary.xlu0.c.b16.start.end [1/2] (short) (narrow) %v13499_v42, %v13477_v9, 16  ;;  %v1933_v12 = vrot.slane %v13680_v36, 4  ;;  %v3702_v34 = vsel %vm1016_vm0, %v3701_v4, %v13687_v33  ;;  %v1430_v48 = vshrl.u32 %v13460_v61, 16 }
 0x2d7   : > { %v13702_v53 = vsel %vm1016_vm0, %v4037_v5, %v3615_v18  ;;  %v1413_v18 = vshrl.u32 %v13458_v52, 16  ;;  %v1811_v16 = vrot.slane %v13595_v32, 4  ;;  %v3527_v46 = vpack.i.b16 %v3526_v2, %v3525_v20 }
 0x2d8   : > { %v13720_v23 = vsel %vm1016_vm0, %v1877_v58, %v13698_v63  ;;  %v13723_v31 = vperm.slane %v1900_v21, %v13331_v49  ;;  %v13727_v9 = vsel %vm1016_vm0, %v1865_v27, %v13695_v26  ;;  %v3652_v42 = vperm.slane %v3646_v19, %v13331_v49 }
 0x2d9   : > { %v13730_v51 = vpack.i.b16 %v1414_v28, %v1413_v18  ;;  %v13733_v52 = vperm.slane %v1898_v24, %v13331_v49  ;;  %v13739_v11 = vsel %vm1016_vm0, %v13561_v40, %v1811_v16  ;;  %v3509_v21 = vshrl.u32 %v11934_v30, 16 }
 0x2da   : > { %v11935_v61 = vpop.trf.xlu1  ;;  %v13735_v32 = vpop.trf.xlu2  ;;  %v3633_v41 = vrot.slane %v3523_v29, 4  ;;  %v1429_v27 = vshrl.u32 %v13440_v10, 16  ;;  %v3648_v2 = vsel %vm1016_vm0, %v13644_v0, %v3647_v56  ;;  %v3708_v28 = vperm.slane %v3702_v34, %v13331_v49 }
 0x2db   : > { %v3507_v4 = vpack.i.b16 %v11935_v61, %v11934_v30  ;;  %v3510_v5 = vshrl.u32 %v11935_v61, 16  ;;  %v13747_v24 = vsel %vm1016_vm0, %v1933_v12, %v13723_v31  ;;  %v3689_v58 = vrot.slane %v3527_v46, 4 }
 0x2dc   : > { %v1675_v18 = vrot.slane %v13730_v51, 4  ;;  %v3657_v16 = vrot.slane %v3652_v42, 4  ;;  %v13754_v10 = vsel %vm1016_vm0, %v1921_v13, %v13733_v52  ;;  %v1431_v0 = vpack.i.b16 %v1430_v48, %v1429_v27 }
 0x2dd   : > { %v3511_v19 = vpack.i.b16 %v3510_v5, %v3509_v21  ;;  %v3634_v40 = vsel %vm1016_vm0, %v3633_v41, %v3507_v4  ;;  %v3635_v20 = vrot.slane %v3507_v4, 4  ;;  %v3713_v4 = vrot.slane %v3708_v28, 4 }
 0x2de   : > { %v3640_v30 = vperm.slane %v3634_v40, %v13331_v49  ;;  %v1553_v40 = vrot.slane %v13466_v7, 4  ;;  %v1609_v13 = vrot.slane %v13469_v8, 4 }
 0x2df   : > { %v3636_v56 = vsel %vm1016_vm0, %v3523_v29, %v3635_v20  ;;  %v3690_v12 = vsel %vm1016_vm0, %v3689_v58, %v3511_v19  ;;  %v3691_v34 = vrot.slane %v3511_v19, 4  ;;  %v1676_v29 = vsel %vm1016_vm0, %v1431_v0, %v1675_v18 }
 0x2e0   : > { %v3659_v61 = vrot.slane %v3640_v30, 4  ;;  %v3658_v21 = vsel %vm1016_vm0, %v3657_v16, %v3640_v30  ;;  %v3696_v41 = vperm.slane %v3690_v12, %v13331_v49  ;;  %v13781_v16 = vperm.slane %v3648_v2, %v13331_v49 }
 0x2e1   : > { %v13761_v5 = vsel %vm1016_vm0, %v3527_v46, %v3691_v34  ;;  %v3664_v48 = vperm.slane %v3658_v21, %v13339_v60  ;;  %v13777_v46 = vperm.slane %v13404_v62, %v13331_v49  ;;  %v1554_v12 = vsel %vm1016_vm0, 0, %v1553_v40 }
 0x2e2   : > { %v13767_v27 = vpop.trf.xlu1  ;;  %v3714_v58 = vsel %vm1016_vm0, %v3713_v4, %v3696_v41  ;;  %v13770_v19 = vpop.trf.xlu2  ;;  %v13773_v20 = vsel %vm1016_vm0, %v3652_v42, %v3659_v61  ;;  %v3715_v30 = vrot.slane %v3696_v41, 4  ;;  %v13788_v42 = vperm.slane %v1676_v29, %v13331_v49 }
 0x2e3   : > { %v3720_v7 = vperm.slane %v3714_v58, %v13339_v60  ;;  %v3681_v8 = vrot.slane %v3664_v48, 4  ;;  %v13791_v61 = vperm.slane %v3636_v56, %v13331_v49  ;;  %v1610_v62 = vsel %vm1016_vm0, 0, %v1609_v13 }
 0x2e4   : > { %v13784_v18 = vsel %vm1016_vm0, %v3708_v28, %v3715_v30  ;;  %v1879_v21 = vrot.slane %v13698_v63, 4  ;;  %v1935_v2 = vrot.slane %v13723_v31, 4  ;;  %v1709_v4 = vrot.slane %v13777_v46, 4 }
 0x2e5   : > { %11984 = vxpose.binary.xlu2.c.b16.start.end [1/2] (short) (narrow) %v3720_v7, %v3664_v48, 16  ;;  %v3737_v34 = vrot.slane %v3720_v7, 4  ;;  %v3682_v28 = vsel %vm1016_vm0, 0, %v3681_v8  ;;  %v3669_v40 = vrot.slane %v13781_v16, 4  ;;  %v1660_v58 = vperm.slane %v13543_v38, %v13339_v60 }
 0x2e6   : > { %11975 = vxpose.binary.xlu0.c.b16.start.end [1/2] (short) (narrow) %v1610_v62, %v1554_v12, 16  ;;  %v13802_v56 = vsel %vm1016_vm0, %v13658_v6, %v1879_v21  ;;  %v13806_v13 = vsel %vm1016_vm0, %v13680_v36, %v1935_v2  ;;  %v1710_v63 = vsel %vm1016_vm0, %v1709_v4, %v13788_v42  ;;  %v1867_v30 = vrot.slane %v13695_v26, 4 }
 0x2e7   : > { %v3738_v41 = vsel %vm1016_vm0, 0, %v3737_v34  ;;  %v13814_v29 = vsel %vm1016_vm0, %v3669_v40, %v13791_v61  ;;  %v1716_v6 = vperm.slane %v1710_v63, %v13339_v60  ;;  %v1669_v7 = vrot.slane %v1660_v58, 4 }
 0x2e8   : > { %11987 = vxpose.binary.xlu1.c.b16.start.end [1/2] (short) (narrow) %v3738_v41, %v3682_v28, 16  ;;  %v1559_v34 = vrot.slane %v13527_v25, 4  ;;  %v1615_v62 = vrot.slane %v13530_v43, 4  ;;  %v1673_v2 = vrot.slane %v1431_v0, 4  ;;  %v13826_v40 = vsel %vm1016_vm0, %v13654_v1, %v1867_v30 }
 0x2e9   : > { %v1725_v36 = vrot.slane %v1716_v6, 4  ;;  %v1670_v4 = vsel %vm1016_vm0, 0, %v1669_v7  ;;  %v1923_v26 = vrot.slane %v13733_v52, 4  ;;  %v1692_v43 = vperm.slane %v13401_v59, %v13331_v49 }
 0x2ea   : > { %v13810_v31 = vpop.trf.xlu1  ;;  %v11956_v48 = vpop.trf.xlu2  ;;  %v1674_v63 = vsel %vm1016_vm0, %v1673_v2, %v13730_v51  ;;  %v1560_v0 = vsel %vm1016_vm0, 0, %v1559_v34 }
 0x2eb   : > { %v3589_v8 = vshrl.u32 %v11956_v48, 16  ;;  %v1726_v38 = vsel %vm1016_vm0, 0, %v1725_v36  ;;  %v13837_v7 = vsel %vm1016_vm0, %v13664_v44, %v1923_v26  ;;  %v1680_v1 = vperm.slane %v1674_v63, %v13331_v49 }
 0x2f2   : > { %v11938_v12 = vpop.trf.xlu1  ;;  %v11957_v21 = vpop.trf.xlu2 }
 0x2f3   : > { %v3587_v28 = vpack.i.b16 %v11957_v21, %v11956_v48  ;;  %v3590_v41 = vshrl.u32 %v11957_v21, 16  ;;  %v1616_v48 = vsel %vm1016_vm0, 0, %v1615_v62  ;;  %v3573_v52 = vshrl.u32 %v11938_v12, 16 }
 0x2f4   : > { %v3703_v21 = vrot.slane %v13687_v33, 4 }
 0x2f5   : > { %11999 = vxpose.binary.xlu2.c.b16.start.end [1/2] (short) (narrow) %v1726_v38, %v1670_v4, 16  ;;  %v3591_v25 = vpack.i.b16 %v3590_v41, %v3589_v8  ;;  %v3857_v30 = vrot.slane %v3587_v28, 4  ;;  %v1697_v8 = vrot.slane %v1692_v43, 4  ;;  %v1699_v41 = vrot.slane %v1680_v1, 4 }
 0x2f6   : > { %11978 = vxpose.binary.xlu0.c.b16.start.end [1/2] (short) (narrow) %v1616_v48, %v1560_v0, 16  ;;  %v3704_v44 = vsel %vm1016_vm0, %v13660_v35, %v3703_v21 }
 0x2f7   : > { %v3913_v59 = vrot.slane %v3591_v25, 4  ;;  %v1698_v62 = vsel %vm1016_vm0, %v1697_v8, %v1680_v1  ;;  %v3712_v0 = vperm.slane %v3704_v44, %v13331_v49  ;;  %v1700_v48 = vsel %vm1016_vm0, %v1692_v43, %v1699_v41 }
 0x2f8   : > { %11990 = vxpose.binary.xlu1.c.b16.start.end [1/2] (short) (narrow) %v1716_v6, %v1660_v58, 16  ;;  %v1648_v6 = vperm.slane %v13546_v57, %v13339_v60  ;;  %v13862_v8 = vperm.slane %v1700_v48, %v13339_v60 }
 0x2f9   : > { %v3725_v43 = vrot.slane %v3712_v0, 4 }
 0x2fa   : > { %v11939_v51 = vpop.trf.xlu1  ;;  %v11958_v36 = vpop.trf.xlu2  ;;  %v1665_v57 = vrot.slane %v1648_v6, 4 }
 0x2fb   : > { %v3571_v2 = vpack.i.b16 %v11939_v51, %v11938_v12  ;;  %v3574_v34 = vshrl.u32 %v11939_v51, 16  ;;  %v1704_v12 = vperm.slane %v1698_v62, %v13339_v60  ;;  %v3621_v51 = vshrl.u32 %v11958_v36, 16 }
 0x2fc   : > { %v1666_v62 = vsel %vm1016_vm0, 0, %v1665_v57 }
 0x2fd   : > { %v3575_v4 = vpack.i.b16 %v3574_v34, %v3573_v52  ;;  %v3858_v38 = vsel %vm1016_vm0, %v3857_v30, %v3571_v2  ;;  %v3859_v58 = vrot.slane %v3571_v2, 4  ;;  %v13857_v52 = vperm.slane %v13549_v3, %v13339_v60 }
 0x2fe   : > { %v1721_v21 = vrot.slane %v1704_v12, 4 }
 0x2ff   : > { %v3860_v26 = vsel %vm1016_vm0, %v3587_v28, %v3859_v58  ;;  %v3914_v33 = vsel %vm1016_vm0, %v3913_v59, %v3575_v4  ;;  %v3915_v63 = vrot.slane %v3575_v4, 4  ;;  %v3700_v28 = vperm.slane %v13761_v5, %v13331_v49 }
 0x300   : > { %v1722_v41 = vsel %vm1016_vm0, 0, %v1721_v21 }
 0x301   : > { %v13853_v35 = vsel %vm1016_vm0, %v3591_v25, %v3915_v63  ;;  %v3671_v25 = vrot.slane %v13791_v61, 4  ;;  %v13868_v3 = vsel %vm1016_vm0, %v3725_v43, %v3700_v28  ;;  %v3727_v5 = vrot.slane %v3700_v28, 4 }
 0x302   : > { %v11940_v1 = vpop.trf.xlu1  ;;  %v11959_v30 = vpop.trf.xlu2  ;;  %v1711_v61 = vrot.slane %v13788_v42, 4  ;;  %v13897_v43 = vperm.slane %v13623_v17, %v13339_v60 }
 0x303   : > { %v3622_v59 = vshrl.u32 %v11959_v30, 16  ;;  %v3619_v2 = vpack.i.b16 %v11959_v30, %v11958_v36  ;;  %v13872_v34 = vsel %vm1016_vm0, %v13781_v16, %v3671_v25  ;;  %v13878_v4 = vsel %vm1016_vm0, %v3712_v0, %v3727_v5 }
 0x304   : > { %v3605_v36 = vshrl.u32 %v11940_v1, 16 }
 0x305   : > { %12002 = vxpose.binary.xlu2.c.b16.start.end [1/2] (short) (narrow) %v13862_v8, %v13857_v52, 16  ;;  %v3623_v44 = vpack.i.b16 %v3622_v59, %v3621_v51  ;;  %v3969_v58 = vrot.slane %v3619_v2, 4  ;;  %v1664_v51 = vperm.slane %v13604_v15, %v13339_v60 }
 0x306   : > { %11993 = vxpose.binary.xlu0.c.b16.start.end [1/2] (short) (narrow) %v1704_v12, %v1648_v6, 16  ;;  %v1712_v6 = vsel %vm1016_vm0, %v13777_v46, %v1711_v61  ;;  %v13893_v46 = vperm.slane %v13619_v37, %v13339_v60  ;;  %v3864_v37 = vperm.slane %v3858_v38, %v13331_v49  ;;  %v16272_v61 = vld [vmem:[#allocation55_spill] sm:$0xff]  ;;  %v16273_v38 = vld [vmem:[#allocation54_spill] sm:$0xff] }
 0x307   : > { %v4025_v48 = vrot.slane %v3623_v44, 4  ;;  %v1720_v59 = vperm.slane %v1712_v6, %v13339_v60  ;;  %v1671_v25 = vrot.slane %v1664_v51, 4  ;;  %v3936_v6 = vperm.slane %v16273_v38, %v13331_v49 }
 0x308   : > { %12005 = vxpose.binary.xlu1.c.b16.start.end [1/2] (short) (narrow) %v1722_v41, %v1666_v62, 16  ;;  %v16270_v62 = vld [vmem:[#allocation53_spill] sm:$0xff]  ;;  %v1764_v38 = vperm.slane %v13675_v14, %v13339_v60  ;;  %v4048_v14 = vperm.slane %v13691_v47, %v13331_v49 }
 0x309   : > { %v1727_v15 = vrot.slane %v1720_v59, 4  ;;  %v3876_v41 = vperm.slane %v16270_v62, %v13331_v49 }
 0x30a   : > { %v11941_v63 = vpop.trf.xlu1 }
 0x30b   : > { %v3603_v30 = vpack.i.b16 %v11941_v63, %v11940_v1  ;;  %v3606_v16 = vshrl.u32 %v11941_v63, 16  ;;  %v1728_v5 = vsel %vm1016_vm0, 0, %v1727_v15  ;;  %v3920_v63 = vperm.slane %v3914_v33, %v13331_v49 }
 0x30c   : > { %v3924_v33 = vperm.slane %v13853_v35, %v13331_v49  ;;  %v13933_v15 = vperm.slane %v13639_v45, %v13339_v60 }
 0x30d   : > { %v3607_v12 = vpack.i.b16 %v3606_v16, %v3605_v36  ;;  %v3970_v57 = vsel %vm1016_vm0, %v3969_v58, %v3603_v30  ;;  %v3971_v28 = vrot.slane %v3603_v30, 4  ;;  %v3932_v36 = vperm.slane %v16272_v61, %v13331_v49 }
 0x30e   : > { %v3868_v58 = vperm.slane %v3860_v26, %v13331_v49  ;;  %v1828_v30 = vperm.slane %v13671_v54, %v13339_v60  ;;  %v3881_v16 = vrot.slane %v3876_v41, 4  ;;  %v13929_v54 = vperm.slane %v13635_v22, %v13339_v60 }
 0x30f   : > { %v3972_v42 = vsel %vm1016_vm0, %v3619_v2, %v3971_v28  ;;  %v4026_v0 = vsel %vm1016_vm0, %v4025_v48, %v3607_v12  ;;  %v4027_v21 = vrot.slane %v3607_v12, 4  ;;  %v1672_v2 = vsel %vm1016_vm0, 0, %v1671_v25 }
 0x310   : > { %v13914_v48 = vperm.slane %v13648_v50, %v13339_v60  ;;  %v3883_v12 = vrot.slane %v3864_v37, 4  ;;  %v3937_v26 = vrot.slane %v3932_v36, 4  ;;  %v3939_v50 = vrot.slane %v3920_v63, 4 }
 0x311   : > { %v13889_v1 = vsel %vm1016_vm0, %v3623_v44, %v4027_v21  ;;  %v16271_v44 = vld [vmem:[#allocation52_spill] sm:$0xff]  ;;  %v1723_v21 = vrot.slane %v13862_v8, 4  ;;  %v13925_v25 = vsel %vm1016_vm0, %v3881_v16, %v3864_v37  ;;  %v1837_v8 = vrot.slane %v1828_v30, 4 }
 0x312   : > { %v3880_v17 = vperm.slane %v16271_v44, %v13331_v49  ;;  %v13943_v62 = vsel %vm1016_vm0, %v3876_v41, %v3883_v12  ;;  %v13953_v44 = vsel %vm1016_vm0, %v3932_v36, %v3939_v50  ;;  %v3988_v36 = vperm.slane %v13685_v55, %v13331_v49 }
 0x313   : > { %v1724_v37 = vsel %vm1016_vm0, 0, %v1723_v21  ;;  %v3976_v12 = vperm.slane %v3970_v57, %v13331_v49  ;;  %v4032_v21 = vperm.slane %v4026_v0, %v13331_v49 }
 0x314   : > { %v3893_v28 = vrot.slane %v3880_v17, 4  ;;  %v3993_v55 = vrot.slane %v3988_v36, 4 }
 0x315   : > { %12017 = vxpose.binary.xlu2.c.b16.start.end [1/2] (short) (narrow) %v13897_v43, %v13893_v46, 16 }
 0x316   : > { %11996 = vxpose.binary.xlu0.c.b16.start.end [1/2] (short) (narrow) %v1720_v59, %v1664_v51, 16  ;;  %v1667_v51 = vrot.slane %v13857_v52, 4  ;;  %v3895_v59 = vrot.slane %v3868_v58, 4  ;;  %v1781_v52 = vrot.slane %v13914_v48, 4  ;;  %v13940_v35 = vsel %vm1016_vm0, %v3893_v28, %v3868_v58 }
 0x317   : > { %v3951_v58 = vrot.slane %v3924_v33, 4  ;;  %v3992_v28 = vperm.slane %v13668_v39, %v13331_v49  ;;  %v4036_v39 = vperm.slane %v13889_v1, %v13331_v49 }
 0x318   : > { %12008 = vxpose.binary.xlu1.c.b16.start.end [1/2] (short) (narrow) %v1728_v5, %v1672_v2, 16  ;;  %v3949_v2 = vrot.slane %v3936_v6, 4  ;;  %v13937_v5 = vsel %vm1016_vm0, %v3937_v26, %v3920_v63  ;;  %v1668_v22 = vsel %vm1016_vm0, 0, %v1667_v51  ;;  %v13956_v61 = vsel %vm1016_vm0, %v3880_v17, %v3895_v59 }
 0x319   : > { %v1782_v41 = vsel %vm1016_vm0, 0, %v1781_v52  ;;  %v1838_v63 = vsel %vm1016_vm0, 0, %v1837_v8  ;;  %v13961_v16 = vsel %vm1016_vm0, %v3936_v6, %v3951_v58  ;;  %v1820_v17 = vperm.slane %v13739_v11, %v13339_v60 }
 0x31a   : > { %v13950_v45 = vsel %vm1016_vm0, %v3949_v2, %v3924_v33  ;;  %v4044_v51 = vperm.slane %v13702_v53, %v13331_v49  ;;  %v3980_v6 = vperm.slane %v3972_v42, %v13331_v49  ;;  %v1779_v26 = vrot.slane %v1764_v38, 4 }
 0x31b   : > { %v3995_v59 = vrot.slane %v3976_v12, 4  ;;  %v1835_v57 = vrot.slane %v1820_v17, 4  ;;  %v4005_v33 = vrot.slane %v3992_v28, 4  ;;  %v4051_v52 = vrot.slane %v4032_v21, 4 }
 0x31c   : > { %v4049_v50 = vrot.slane %v4044_v51, 4  ;;  %v4007_v11 = vrot.slane %v3980_v6, 4  ;;  %v13981_v53 = vsel %vm1016_vm0, %v3993_v55, %v3976_v12  ;;  %v4061_v42 = vrot.slane %v4048_v14, 4 }
 0x31d   : > { %v1780_v0 = vsel %vm1016_vm0, 0, %v1779_v26  ;;  %v1836_v8 = vsel %vm1016_vm0, 0, %v1835_v57  ;;  %v13986_v47 = vsel %vm1016_vm0, %v3988_v36, %v3995_v59  ;;  %v13995_v1 = vsel %vm1016_vm0, %v4044_v51, %v4051_v52 }
 0x31e   : > { %v13989_v2 = vsel %vm1016_vm0, %v4049_v50, %v4032_v21  ;;  %v14001_v58 = vsel %vm1016_vm0, %v3992_v28, %v4007_v11  ;;  %v1777_v36 = vrot.slane %v13893_v46, 4  ;;  %v1833_v12 = vrot.slane %v13897_v43, 4 }
 0x31f   : > { %v1884_v51 = vperm.slane %v13720_v23, %v13339_v60  ;;  %v14021_v46 = vperm.slane %v13754_v10, %v13339_v60  ;;  %v14027_v23 = vperm.slane %v13773_v20, %v13339_v60  ;;  %v1839_v10 = vrot.slane %v13933_v15, 4 }
 0x320   : > { %v1778_v28 = vsel %vm1016_vm0, 0, %v1777_v36  ;;  %v1834_v21 = vsel %vm1016_vm0, 0, %v1833_v12  ;;  %v14045_v26 = vperm.slane %v13802_v56, %v13339_v60  ;;  %v3676_v55 = vperm.slane %v13814_v29, %v13339_v60 }
 0x321   : > { %v3683_v43 = vrot.slane %v14027_v23, 4  ;;  %v3732_v59 = vperm.slane %v13868_v3, %v13339_v60  ;;  %v1893_v50 = vrot.slane %v1884_v51, 4  ;;  %v3680_v12 = vperm.slane %v13872_v34, %v13339_v60 }
 0x322   : > { %v3685_v57 = vrot.slane %v3676_v55, 4  ;;  %v1876_v34 = vperm.slane %v13826_v40, %v13339_v60 }
 0x324   : > { %v3686_v52 = vsel %vm1016_vm0, 0, %v3685_v57 }
 0x325   : > { %12020 = vxpose.binary.xlu2.c.b16.start.end [1/2] (short) (narrow) %v13933_v15, %v13929_v54, 16 }
 0x326   : > { %12011 = vxpose.binary.xlu0.c.b16.start.end [1/2] (short) (narrow) %v1724_v37, %v1668_v22, 16  ;;  %v13992_v22 = vsel %vm1016_vm0, %v4005_v33, %v3980_v6  ;;  %v13998_v37 = vsel %vm1016_vm0, %v4061_v42, %v4036_v39  ;;  %v1940_v6 = vperm.slane %v13747_v24, %v13339_v60  ;;  %v3741_v33 = vrot.slane %v3732_v59, 4 }
 0x327   : > { %v14031_v24 = vperm.slane %v13784_v18, %v13339_v60  ;;  %v1840_v18 = vsel %vm1016_vm0, 0, %v1839_v10 }
 0x328   : > { %12023 = vxpose.binary.xlu1.c.b16.start.end [1/2] (short) (narrow) %v1838_v63, %v1782_v41, 16  ;;  %v4063_v41 = vrot.slane %v4036_v39, 4  ;;  %v1949_v11 = vrot.slane %v1940_v6, 4  ;;  %v3742_v42 = vsel %vm1016_vm0, 0, %v3741_v33 }
 0x32a   : > { %v14005_v63 = vsel %vm1016_vm0, %v4048_v14, %v4063_v41 }
 0x335   : > { %12035 = vxpose.binary.xlu2.c.b16.start.end [1/2] (short) (narrow) %v1836_v8, %v1780_v0, 16  ;;  %v1894_v0 = vsel %vm1016_vm0, 0, %v1893_v50  ;;  %v1950_v8 = vsel %vm1016_vm0, 0, %v1949_v11  ;;  %v1945_v11 = vrot.slane %v14021_v46, 4 }
 0x336   : > { %12014 = vxpose.binary.xlu0.c.b16.start.end [1/2] (short) (narrow) %v1828_v30, %v13914_v48, 16  ;;  %v14017_v48 = vperm.slane %v13727_v9, %v13339_v60  ;;  %v3739_v9 = vrot.slane %v14031_v24, 4  ;;  %v1783_v30 = vrot.slane %v13929_v54, 4  ;;  %v14049_v54 = vperm.slane %v13806_v13, %v13339_v60 }
 0x338   : > { %12026 = vxpose.binary.xlu1.c.b16.start.end [1/2] (short) (narrow) %v1820_v17, %v1764_v38, 16  ;;  %v3684_v17 = vsel %vm1016_vm0, 0, %v3683_v43  ;;  %v3740_v14 = vsel %vm1016_vm0, 0, %v3739_v9  ;;  %v1784_v20 = vsel %vm1016_vm0, 0, %v1783_v30  ;;  %v3557_v9 = vshrl.u32 %v13735_v32, 16 }
 0x339   : > { %v3558_v30 = vshrl.u32 %v13770_v19, 16  ;;  %v1889_v50 = vrot.slane %v14017_v48, 4 }
 0x345   : > { %12038 = vxpose.binary.xlu2.c.b16.start.end [1/2] (short) (narrow) %v1940_v6, %v1884_v51, 16  ;;  %v3736_v51 = vperm.slane %v13878_v4, %v13339_v60  ;;  %v1932_v4 = vperm.slane %v13837_v7, %v13339_v60  ;;  %v3539_v7 = vpack.i.b16 %v13810_v31, %v13767_v27 }
 0x346   : > { %12029 = vxpose.binary.xlu0.c.b16.start.end [1/2] (short) (narrow) %v1834_v21, %v1778_v28, 16  ;;  %v3687_v28 = vrot.slane %v3680_v12, 4 }
 0x347   : > { %v3743_v21 = vrot.slane %v3736_v51, 4 }
 0x348   : > { %12041 = vxpose.binary.xlu1.c.b16.start.end [1/2] (short) (narrow) %v14021_v46, %v14017_v48, 16  ;;  %v11961_v56 = vpop.trf.xlu2  ;;  %v3688_v10 = vsel %vm1016_vm0, 0, %v3687_v28 }
 0x350   : > { %v11962_v41 = vpop.trf.xlu2 }
 0x351   : > { %v14037_v38 = vpop.trf.xlu0 }
 0x355   : > { %12056 = vxpose.binary.xlu2.c.b16.start.end [1/2] (short) (narrow) %v3740_v14, %v3684_v17, 16  ;;  %v3744_v17 = vsel %vm1016_vm0, 0, %v3743_v21  ;;  %v3541_v14 = vshrl.u32 %v13767_v27, 16  ;;  %v1890_v27 = vsel %vm1016_vm0, 0, %v1889_v50  ;;  %v16275_v21 = vld [vmem:[#allocation51_spill] sm:$0xff] }
 0x356   : > { %12032 = vxpose.binary.xlu0.c.b16.start.end [1/2] (short) (narrow) %v1840_v18, %v1784_v20, 16  ;;  %v14086_v20 = vpack.i.b16 %v13770_v19, %v13735_v32  ;;  %v14088_v18 = vpack.i.b16 %v3558_v30, %v3557_v9  ;;  %v3820_v9 = vperm.slane %v16275_v21, %v13331_v49 }
 0x357   : > { %v11982_v19 = vpop.trf.xlu1 }
 0x358   : > { %12044 = vxpose.binary.xlu1.c.b16.start.end [1/2] (short) (narrow) %v14049_v54, %v14045_v26, 16  ;;  %v3745_v40 = vrot.slane %v14086_v20, 4  ;;  %v3801_v57 = vrot.slane %v14088_v18, 4 }
 0x359   : > { %v14053_v15 = vpop.trf.xlu0 }
 0x35f   : > { %v11983_v30 = vpop.trf.xlu1 }
 0x361   : > { %v11967_v39 = vpop.trf.xlu0 }
 0x362   : > { %v2989_v13 = vrot.slane %v11967_v39, 4 }
 0x364   : > { %v14064_v29 = vsel %vm1016_vm0, %v2989_v13, %v11961_v56  ;;  %v3746_v56 = vsel %vm1016_vm0, %v3745_v40, %v3539_v7  ;;  %v1951_v40 = vrot.slane %v14049_v54, 4 }
 0x365   : > { %12062 = vxpose.binary.xlu2.c.b16.start.end [1/2] (short) (narrow) %v3742_v42, %v3686_v52, 16  ;;  %v3752_v39 = vperm.slane %v3746_v56, %v13331_v49  ;;  %v1891_v42 = vrot.slane %v1876_v34, 4  ;;  %v3825_v56 = vrot.slane %v3820_v9, 4 }
 0x366   : > { %12047 = vxpose.binary.xlu0.c.b16.start.end [1/2] (short) (narrow) %v1950_v8, %v1894_v0, 16  ;;  %v1947_v0 = vrot.slane %v1932_v4, 4  ;;  %v1952_v54 = vsel %vm1016_vm0, 0, %v1951_v40 }
 0x367   : > { %v3771_v48 = vrot.slane %v3752_v39, 4  ;;  %v1892_v46 = vsel %vm1016_vm0, 0, %v1891_v42 }
 0x368   : > { %12059 = vxpose.binary.xlu1.c.b16.start.end [1/2] (short) (narrow) %v3732_v59, %v3676_v55, 16  ;;  %v3542_v55 = vshrl.u32 %v13810_v31, 16  ;;  %v1946_v31 = vsel %vm1016_vm0, 0, %v1945_v11 }
 0x369   : > { %v11968_v3 = vpop.trf.xlu0 }
 0x36a   : > { %v3027_v36 = vrot.slane %v11968_v3, 4  ;;  %v3543_v33 = vpack.i.b16 %v3542_v55, %v3541_v14  ;;  %v1895_v55 = vrot.slane %v14045_v26, 4 }
 0x36c   : > { %v14071_v6 = vsel %vm1016_vm0, %v3027_v36, %v11962_v41  ;;  %v3802_v32 = vsel %vm1016_vm0, %v3801_v57, %v3543_v33  ;;  %v1948_v36 = vsel %vm1016_vm0, 0, %v1947_v0  ;;  %v3803_v42 = vrot.slane %v3543_v33, 4 }
 0x36d   : > { %v3808_v13 = vperm.slane %v3802_v32, %v13331_v49  ;;  %v2983_v32 = vrot.slane %v11982_v19, 4  ;;  %v1896_v26 = vsel %vm1016_vm0, 0, %v1895_v55 }
 0x372   : > { %v14073_v43 = vpop.trf.xlu0 }
 0x375   : > { %12068 = vxpose.binary.xlu2.c.b16.start.end [1/2] (short) (narrow) %v3744_v17, %v3688_v10, 16 }
 0x376   : > { %12050 = vxpose.binary.xlu0.c.b16.start.end [1/2] (short) (narrow) %v1932_v4, %v1876_v34, 16 }
 0x378   : > { %12065 = vxpose.binary.xlu1.c.b16.start.end [1/2] (short) (narrow) %v3736_v51, %v3680_v12, 16  ;;  %v3827_v12 = vrot.slane %v3808_v13, 4  ;;  %v16274_v51 = vld [vmem:[#allocation49_spill] sm:$0xff] }
 0x379   : > { %v3764_v28 = vperm.slane %v16274_v51, %v13331_v49 }
 0x37a   : > { %v14091_v59 = vpop.trf.xlu0  ;;  %v3828_v17 = vsel %vm1016_vm0, %v3820_v9, %v3827_v12 }
 0x37b   : > { %v3772_v10 = vsel %vm1016_vm0, %v3764_v28, %v3771_v48  ;;  %v3836_v14 = vperm.slane %v3828_v17, %v13339_v60  ;;  %v3769_v57 = vrot.slane %v3764_v28, 4 }
 0x37c   : > { %v3780_v4 = vperm.slane %v3772_v10, %v13339_v60 }
 0x37d   : > { %v3851_v11 = vrot.slane %v3836_v14, 4 }
 0x37e   : > { %v3795_v50 = vrot.slane %v3780_v4, 4 }
 0x380   : > { %v3796_v19 = vsel %vm1016_vm0, 0, %v3795_v50  ;;  %v16277_v50 = vld [vmem:[#allocation50_spill] sm:$0xff] }
 0x382   : > { %v11973_v52 = vpop.trf.xlu0 }
 0x383   : > { %v2977_v8 = vrot.slane %v11973_v52, 4  ;;  %v3747_v52 = vrot.slane %v3539_v7, 4  ;;  %v3852_v7 = vsel %vm1016_vm0, 0, %v3851_v11 }
 0x385   : > { %12071 = vxpose.binary.xlu2.c.b16.start.end [1/2] (short) (narrow) %v1946_v31, %v1890_v27, 16  ;;  %v2978_v3 = vsel %vm1016_vm0, %v2977_v8, %v14037_v38  ;;  %v3826_v8 = vsel %vm1016_vm0, %v3825_v56, %v3808_v13  ;;  %v16276_v56 = vld [vmem:[#allocation48_spill] sm:$0xff] }
 0x386   : > { %v14107_v41 = vpop.trf.xlu2  ;;  %12053 = vxpose.binary.xlu0.c.b16.start.end [1/2] (short) (narrow) %v14031_v24, %v14027_v23, 16  ;;  %v3832_v13 = vperm.slane %v3826_v8, %v13339_v60  ;;  %v2982_v12 = vperm.slane %v2978_v3, %v13331_v49 }
 0x388   : > { %12077 = vxpose.binary.xlu1.c.b16.start.end [1/2] (short) (narrow) %v1948_v36, %v1892_v46, 16  ;;  %v3748_v46 = vsel %vm1016_vm0, %v14086_v20, %v3747_v52  ;;  %v3804_v36 = vsel %vm1016_vm0, %v14088_v18, %v3803_v42  ;;  %v3849_v52 = vrot.slane %v3832_v13, 4 }
 0x389   : > { %v3756_v21 = vperm.slane %v3748_v46, %v13331_v49  ;;  %v3812_v9 = vperm.slane %v3804_v36, %v13331_v49 }
 0x38a   : > { %v11974_v38 = vpop.trf.xlu0 }
 0x38b   : > { %v3015_v34 = vrot.slane %v11974_v38, 4  ;;  %v3021_v38 = vrot.slane %v11983_v30, 4  ;;  %v3783_v3 = vrot.slane %v3756_v21, 4  ;;  %v3839_v55 = vrot.slane %v3812_v9, 4 }
 0x38c   : > { %v3824_v30 = vperm.slane %v16277_v50, %v13331_v49 }
 0x38d   : > { %v3016_v23 = vsel %vm1016_vm0, %v3015_v34, %v14053_v15  ;;  %v3770_v15 = vsel %vm1016_vm0, %v3769_v57, %v3752_v39 }
 0x38e   : > { %v14121_v24 = vpop.trf.xlu2  ;;  %v3776_v39 = vperm.slane %v3770_v15, %v13339_v60  ;;  %v3020_v40 = vperm.slane %v3016_v23, %v13331_v49  ;;  %v3840_v15 = vsel %vm1016_vm0, %v3824_v30, %v3839_v55 }
 0x390   : > { %v3793_v11 = vrot.slane %v3776_v39, 4 }
 0x392   : > { %v11976_v0 = vpop.trf.xlu0  ;;  %v3794_v23 = vsel %vm1016_vm0, 0, %v3793_v11 }
 0x393   : > { %v2984_v27 = vsel %vm1016_vm0, %v2983_v32, %v11976_v0  ;;  %v3768_v32 = vperm.slane %v16276_v56, %v13331_v49 }
 0x394   : > { %v14130_v31 = vpop.trf.xlu1  ;;  %v2988_v48 = vperm.slane %v2984_v27, %v13331_v49 }
 0x395   : > { %12074 = vxpose.binary.xlu2.c.b16.start.end [1/2] (short) (narrow) %v1952_v54, %v1896_v26, 16  ;;  %v3784_v0 = vsel %vm1016_vm0, %v3768_v32, %v3783_v3  ;;  %v3850_v26 = vsel %vm1016_vm0, 0, %v3849_v52 }
 0x396   : > { %v14137_v33 = vpop.trf.xlu2  ;;  %v3001_v51 = vrot.slane %v2988_v48, 4  ;;  %12089 = vxpose.binary.xlu0.c.b16.start.end [1/2] (short) (narrow) %v3852_v7, %v3796_v19, 16  ;;  %v3792_v54 = vperm.slane %v3784_v0, %v13339_v60  ;;  %v3848_v48 = vperm.slane %v3840_v15, %v13339_v60  ;;  %v3781_v7 = vrot.slane %v3768_v32, 4 }
 0x398   : > { %12080 = vxpose.binary.xlu1.c.b16.start.end [1/2] (short) (narrow) %v3832_v13, %v3776_v39, 16  ;;  %v14147_v28 = vsel %vm1016_vm0, %v3001_v51, %v2982_v12  ;;  %v3837_v39 = vrot.slane %v3824_v30, 4  ;;  %v3782_v12 = vsel %vm1016_vm0, %v3781_v7, %v3756_v21  ;;  %v3855_v7 = vrot.slane %v3848_v48, 4 }
 0x39a   : > { %v11977_v10 = vpop.trf.xlu0  ;;  %v3838_v51 = vsel %vm1016_vm0, %v3837_v39, %v3812_v9 }
 0x39b   : > { %v3022_v17 = vsel %vm1016_vm0, %v3021_v38, %v11977_v10 }
 0x39c   : > { %v14152_v20 = vpop.trf.xlu1  ;;  %v3026_v18 = vperm.slane %v3022_v17, %v13331_v49  ;;  %v3888_v17 = vperm.slane %v13925_v25, %v13339_v60 }
 0x39e   : > { %v14155_v34 = vpop.trf.xlu2  ;;  %v3039_v57 = vrot.slane %v3026_v18, 4  ;;  %v3844_v18 = vperm.slane %v3838_v51, %v13339_v60  ;;  %v3905_v3 = vrot.slane %v3888_v17, 4  ;;  %v3900_v51 = vperm.slane %v13940_v35, %v13339_v60 }
 0x3a0   : > { %v14163_v42 = vsel %vm1016_vm0, %v3039_v57, %v3020_v40  ;;  %v3853_v9 = vrot.slane %v3844_v18, 4 }
 0x3a2   : > { %v11979_v8 = vpop.trf.xlu0  ;;  %v3854_v32 = vsel %vm1016_vm0, 0, %v3853_v9  ;;  %v3960_v9 = vperm.slane %v13961_v16, %v13339_v60 }
 0x3a3   : > { %v2995_v11 = vrot.slane %v11979_v8, 4  ;;  %v3856_v8 = vsel %vm1016_vm0, 0, %v3855_v7 }
 0x3a4   : > { %v14167_v27 = vpop.trf.xlu1 }
 0x3a5   : > { %12083 = vxpose.binary.xlu2.c.b16.start.end [1/2] (short) (narrow) %v3850_v26, %v3794_v23, 16  ;;  %v2996_v23 = vsel %vm1016_vm0, %v2995_v11, %v14073_v43  ;;  %v3799_v26 = vrot.slane %v3792_v54, 4 }
 0x3a6   : > { %v14173_v19 = vpop.trf.xlu2  ;;  %12098 = vxpose.binary.xlu0.c.b16.start.end [1/2] (short) (narrow) %v3848_v48, %v3792_v54, 16  ;;  %v3000_v39 = vperm.slane %v2996_v23, %v13331_v49  ;;  %v2994_v54 = vperm.slane %v14064_v29, %v13331_v49 }
 0x3a8   : > { %12086 = vxpose.binary.xlu1.c.b16.start.end [1/2] (short) (narrow) %v3836_v14, %v3780_v4, 16  ;;  %v3944_v4 = vperm.slane %v13937_v5, %v13339_v60  ;;  %v3788_v14 = vperm.slane %v3782_v12, %v13339_v60  ;;  %v3800_v12 = vsel %vm1016_vm0, 0, %v3799_v26  ;;  %v3007_v43 = vrot.slane %v3000_v39, 4 }
 0x3aa   : > { %v11980_v13 = vpop.trf.xlu0  ;;  %v3961_v55 = vrot.slane %v3944_v4, 4  ;;  %v3797_v21 = vrot.slane %v3788_v14, 4 }
 0x3ab   : > { %v3033_v46 = vrot.slane %v11980_v13, 4 }
 0x3ac   : > { %v14175_v36 = vpop.trf.xlu1  ;;  %v3962_v25 = vsel %vm1016_vm0, 0, %v3961_v55  ;;  %v3798_v5 = vsel %vm1016_vm0, 0, %v3797_v21 }
 0x3ad   : > { %v3034_v38 = vsel %vm1016_vm0, %v3033_v46, %v14091_v59  ;;  %v3906_v59 = vsel %vm1016_vm0, 0, %v3905_v3  ;;  %v3008_v3 = vsel %vm1016_vm0, %v3007_v43, %v2994_v54 }
 0x3ae   : > { %v12004_v10 = vpop.trf.xlu2  ;;  %v3038_v48 = vperm.slane %v3034_v38, %v13331_v49  ;;  %v3012_v35 = vperm.slane %v3008_v3, %v13339_v60  ;;  %v3892_v38 = vperm.slane %v13943_v62, %v13339_v60 }
 0x3af   : > { %v3091_v50 = vrot.slane %v12004_v10, 4  ;;  %v3956_v10 = vperm.slane %v13950_v45, %v13339_v60  ;;  %v3904_v45 = vperm.slane %v13956_v61, %v13339_v60  ;;  %v3032_v61 = vperm.slane %v14071_v6, %v13331_v49 }
 0x3b0   : > { %v3013_v29 = vrot.slane %v3012_v35, 4  ;;  %v3044_v6 = vperm.slane %v14163_v42, %v13339_v60 }
 0x3b2   : > { %v14187_v40 = vpop.trf.xlu0 }
 0x3b4   : > { %v14189_v57 = vpop.trf.xlu1 }
 0x3b5   : > { %12092 = vxpose.binary.xlu2.c.b16.start.end [1/2] (short) (narrow) %v3844_v18, %v3788_v14, 16 }
 0x3b6   : > { %v14193_v56 = vpop.trf.xlu2  ;;  %12107 = vxpose.binary.xlu0.c.b16.start.end [1/2] (short) (narrow) %v3962_v25, %v3906_v59, 16  ;;  %v3948_v59 = vperm.slane %v13953_v44, %v13339_v60 }
 0x3b8   : > { %12095 = vxpose.binary.xlu1.c.b16.start.end [1/2] (short) (narrow) %v3854_v32, %v3798_v5, 16  ;;  %v3911_v5 = vrot.slane %v3904_v45, 4  ;;  %v3967_v32 = vrot.slane %v3960_v9, 4 }
 0x3ba   : > { %v11995_v30 = vpop.trf.xlu0  ;;  %v3912_v44 = vsel %vm1016_vm0, 0, %v3911_v5  ;;  %v3968_v23 = vsel %vm1016_vm0, 0, %v3967_v32 }
 0x3bb   : > { %v14198_v52 = vsel %vm1016_vm0, %v3091_v50, %v11995_v30  ;;  %v3907_v50 = vrot.slane %v3892_v38, 4  ;;  %v3963_v30 = vrot.slane %v3948_v59, 4 }
 0x3bc   : > { %v14200_v0 = vpop.trf.xlu1 }
 0x3bd   : > { %v3908_v39 = vsel %vm1016_vm0, 0, %v3907_v50 }
 0x3be   : > { %v14202_v15 = vpop.trf.xlu2 }
 0x3c2   : > { %v14207_v13 = vpop.trf.xlu0 }
 0x3c4   : > { %v12009_v46 = vpop.trf.xlu1 }
 0x3c5   : > { %12101 = vxpose.binary.xlu2.c.b16.start.end [1/2] (short) (narrow) %v3856_v8, %v3800_v12, 16  ;;  %v3964_v12 = vsel %vm1016_vm0, 0, %v3963_v30  ;;  %v3065_v30 = vrot.slane %v14207_v13, 4 }
 0x3c6   : > { %v14215_v14 = vpop.trf.xlu2  ;;  %12116 = vxpose.binary.xlu0.c.b16.start.end [1/2] (short) (narrow) %v3956_v10, %v3900_v51, 16 }
 0x3c7   : > { %v3066_v13 = vsel %vm1016_vm0, %v3065_v30, %v14167_v27 }
 0x3c8   : > { %12104 = vxpose.binary.xlu1.c.b16.start.end [1/2] (short) (narrow) %v3944_v4, %v3888_v17, 16  ;;  %v3006_v17 = vperm.slane %v14147_v28, %v13339_v60  ;;  %v3045_v4 = vrot.slane %v3038_v48, 4 }
 0x3ca   : > { %v14220_v18 = vpop.trf.xlu0  ;;  %v14235_v25 = vsel %vm1016_vm0, %v3013_v29, %v3006_v17  ;;  %v3046_v28 = vsel %vm1016_vm0, %v3045_v4, %v3032_v61  ;;  %v3071_v29 = vrot.slane %v12009_v46, 4  ;;  %v3909_v4 = vrot.slane %v3900_v51, 4 }
 0x3cb   : > { %v3050_v62 = vperm.slane %v3046_v28, %v13339_v60  ;;  %v3285_v54 = vshrl.u32 %v14235_v25, 16  ;;  %v14275_v28 = vperm.slane %v13986_v47, %v13339_v60  ;;  %v14279_v46 = vperm.slane %v13995_v1, %v13339_v60 }
 0x3cc   : > { %v12010_v55 = vpop.trf.xlu1  ;;  %v3910_v32 = vsel %vm1016_vm0, 0, %v3909_v4  ;;  %v3070_v1 = vperm.slane %v3066_v13, %v13331_v49 }
 0x3cd   : > { %v3051_v7 = vrot.slane %v3050_v62, 4 }
 0x3ce   : > { %v12022_v21 = vpop.trf.xlu2 }
 0x3cf   : > { %v14252_v8 = vsel %vm1016_vm0, %v3051_v7, %v3044_v6 }
 0x3d0   : > { %v3283_v43 = vpack.i.b16 %v14252_v8, %v14235_v25  ;;  %v3286_v48 = vshrl.u32 %v14252_v8, 16 }
 0x3d2   : > { %v12012_v16 = vpop.trf.xlu0  ;;  %v14258_v35 = vpack.i.b16 %v3286_v48, %v3285_v54 }
 0x3d3   : > { %v3059_v6 = vrot.slane %v12012_v16, 4 }
 0x3d4   : > { %v14240_v11 = vpop.trf.xlu1 }
 0x3d5   : > { %12110 = vxpose.binary.xlu2.c.b16.start.end [1/2] (short) (narrow) %v3948_v59, %v3892_v38, 16  ;;  %v3965_v38 = vrot.slane %v3956_v10, 4  ;;  %v3072_v59 = vsel %vm1016_vm0, %v3071_v29, %v14137_v33  ;;  %v3109_v10 = vrot.slane %v12010_v55, 4  ;;  %v3060_v16 = vsel %vm1016_vm0, %v3059_v6, %v14189_v57 }
 0x3d6   : > { %v14245_v26 = vpop.trf.xlu2  ;;  %12125 = vxpose.binary.xlu0.c.b16.start.end [1/2] (short) (narrow) %v3968_v23, %v3912_v44, 16  ;;  %v3076_v33 = vperm.slane %v3072_v59, %v13331_v49  ;;  %v3179_v44 = vrot.slane %v12022_v21, 4  ;;  %v4000_v21 = vperm.slane %v13981_v53, %v13339_v60 }
 0x3d7   : > { %v3966_v50 = vsel %vm1016_vm0, 0, %v3965_v38  ;;  %v3110_v47 = vsel %vm1016_vm0, %v3109_v10, %v14155_v34  ;;  %v4056_v34 = vperm.slane %v13989_v2, %v13339_v60  ;;  %v3053_v38 = vrot.slane %v14173_v19, 4 }
 0x3d8   : > { %12113 = vxpose.binary.xlu1.c.b16.start.end [1/2] (short) (narrow) %v3964_v12, %v3908_v39, 16  ;;  %v3083_v62 = vrot.slane %v3076_v33, 4  ;;  %v3103_v39 = vrot.slane %v14220_v18, 4  ;;  %v3064_v18 = vperm.slane %v3060_v16, %v13331_v49  ;;  %v4017_v29 = vrot.slane %v4000_v21, 4 }
 0x3d9   : > { %v4073_v4 = vrot.slane %v4056_v34, 4  ;;  %v3054_v2 = vsel %vm1016_vm0, %v3053_v38, %v14187_v40  ;;  %v4075_v16 = vrot.slane %v14279_v46, 4 }
 0x3da   : > { %v12013_v3 = vpop.trf.xlu0  ;;  %v3084_v27 = vsel %vm1016_vm0, %v3083_v62, %v3070_v1  ;;  %v3104_v12 = vsel %vm1016_vm0, %v3103_v39, %v14175_v36  ;;  %v4018_v30 = vsel %vm1016_vm0, 0, %v4017_v29  ;;  %v3058_v13 = vperm.slane %v3054_v2, %v13331_v49 }
 0x3db   : > { %v3108_v53 = vperm.slane %v3104_v12, %v13331_v49  ;;  %v3097_v59 = vrot.slane %v12013_v3, 4  ;;  %v4074_v33 = vsel %vm1016_vm0, 0, %v4073_v4  ;;  %v3088_v3 = vperm.slane %v3084_v27, %v13339_v60 }
 0x3dc   : > { %v14260_v42 = vpop.trf.xlu1 }
 0x3dd   : > { %v3098_v19 = vsel %vm1016_vm0, %v3097_v59, %v14200_v0  ;;  %v4076_v59 = vsel %vm1016_vm0, 0, %v4075_v16  ;;  %v16278_v16 = vld [vmem:[#allocation47_spill] sm:$0xff] }
 0x3de   : > { %v14262_v17 = vpop.trf.xlu2  ;;  %v3102_v62 = vperm.slane %v3098_v19, %v13331_v49 }
 0x3df   : > { %v3173_v40 = vrot.slane %v14262_v17, 4 }
 0x3e0   : > { %v3115_v27 = vrot.slane %v3102_v62, 4 }
 0x3e2   : > { %v14266_v61 = vpop.trf.xlu0 }
 0x3e4   : > { %v14268_v5 = vpop.trf.xlu1 }
 0x3e5   : > { %12119 = vxpose.binary.xlu2.c.b16.start.end [1/2] (short) (narrow) %v3966_v50, %v3910_v32, 16  ;;  %v3077_v50 = vrot.slane %v3064_v18, 4 }
 0x3e6   : > { %v14282_v51 = vpop.trf.xlu2  ;;  %12134 = vxpose.binary.xlu0.c.b16.start.end [1/2] (short) (narrow) %v14279_v46, %v14275_v28, 16 }
 0x3e8   : > { %12122 = vxpose.binary.xlu1.c.b16.start.end [1/2] (short) (narrow) %v3960_v9, %v3904_v45, 16  ;;  %v3114_v45 = vperm.slane %v3110_v47, %v13331_v49  ;;  %v3078_v47 = vsel %vm1016_vm0, %v3077_v50, %v3058_v13  ;;  %v4016_v13 = vperm.slane %v14001_v58, %v13339_v60 }
 0x3e9   : > { %v3082_v0 = vperm.slane %v3078_v47, %v13339_v60 }
 0x3ea   : > { %v12016_v23 = vpop.trf.xlu0  ;;  %v3121_v54 = vrot.slane %v3114_v45, 4 }
 0x3eb   : > { %v14292_v7 = vsel %vm1016_vm0, %v3179_v44, %v12016_v23 }
 0x3ec   : > { %v12028_v55 = vpop.trf.xlu1  ;;  %v3122_v36 = vsel %vm1016_vm0, %v3121_v54, %v3108_v53  ;;  %v3096_v54 = vperm.slane %v14198_v52, %v13331_v49  ;;  %v14359_v52 = vperm.slane %v13992_v22, %v13339_v60 }
 0x3ed   : > { %v3167_v10 = vrot.slane %v12028_v55, 4  ;;  %v3089_v55 = vrot.slane %v3088_v3, 4  ;;  %v3126_v12 = vperm.slane %v3122_v36, %v13339_v60  ;;  %v14363_v36 = vperm.slane %v13998_v37, %v13339_v60 }
 0x3ee   : > { %v14296_v9 = vpop.trf.xlu2  ;;  %v3116_v4 = vsel %vm1016_vm0, %v3115_v27, %v3096_v54 }
 0x3ef   : > { %v3168_v23 = vsel %vm1016_vm0, %v3167_v10, %v14202_v15  ;;  %v14338_v17 = vsel %vm1016_vm0, %v3089_v55, %v3082_v0  ;;  %v4019_v15 = vrot.slane %v14275_v28, 4  ;;  %v3120_v28 = vperm.slane %v3116_v4, %v13339_v60 }
 0x3f0   : > { %v3127_v46 = vrot.slane %v3126_v12, 4  ;;  %v11886_v12 = vunpack.i.l.bf16 %v16278_v16 }
 0x3f1   : > { %v4020_v53 = vsel %vm1016_vm0, 0, %v4019_v15 }
 0x3f2   : > { %v14308_v48 = vpop.trf.xlu0  ;;  %v14366_v50 = vsel %vm1016_vm0, %v3127_v46, %v3120_v28 }
 0x3f3   : > { %v3294_v19 = vshrl.u32 %v14366_v50, 16 }
 0x3f4   : > { %v14312_v32 = vpop.trf.xlu1 }
 0x3f5   : > { %12128 = vxpose.binary.xlu2.c.b16.start.end [1/2] (short) (narrow) %v4056_v34, %v4000_v21, 16  ;;  %v3172_v21 = vperm.slane %v3168_v23, %v13331_v49 }
 0x3f6   : > { %v14316_v57 = vpop.trf.xlu2 }
 0x3f8   : > { %12131 = vxpose.binary.xlu1.c.b16.start.end [1/2] (short) (narrow) %v4074_v33, %v4018_v30, 16  ;;  %v3291_v30 = vpack.i.b16 %v14366_v50, %v14338_v17  ;;  %v3293_v33 = vshrl.u32 %v14338_v17, 16 }
 0x3fa   : > { %v12031_v44 = vpop.trf.xlu0  ;;  %v14374_v10 = vpack.i.b16 %v3294_v19, %v3293_v33 }
 0x3fb   : > { %v3174_v1 = vsel %vm1016_vm0, %v3173_v40, %v12031_v44  ;;  %v4072_v40 = vperm.slane %v14005_v63, %v13339_v60  ;;  %v4023_v44 = vrot.slane %v4016_v13, 4  ;;  %v3135_v63 = vrot.slane %v14245_v26, 4 }
 0x3fc   : > { %v14331_v6 = vpop.trf.xlu1  ;;  %v3178_v39 = vperm.slane %v3174_v1, %v13331_v49 }
 0x3fd   : > { %v4079_v47 = vrot.slane %v4072_v40, 4  ;;  %v4024_v0 = vsel %vm1016_vm0, 0, %v4023_v44  ;;  %v3136_v54 = vsel %vm1016_vm0, %v3135_v63, %v14308_v48  ;;  %v1026_v48 = vrot.slane %v11886_v12, 4 }
 0x3fe   : > { %v14335_v45 = vpop.trf.xlu2  ;;  %v3191_v34 = vrot.slane %v3178_v39, 4  ;;  %v3140_v26 = vperm.slane %v3136_v54, %v13331_v49  ;;  %v3184_v54 = vperm.slane %v14292_v7, %v13331_v49 }
 0x3ff   : > { %v4080_v55 = vsel %vm1016_vm0, 0, %v4079_v47 }
 0x400   : > { %v14347_v18 = vsel %vm1016_vm0, %v3191_v34, %v3172_v21 }
 0x402   : > { %v12033_v29 = vpop.trf.xlu0 }
 0x403   : > { %v3147_v27 = vrot.slane %v12033_v29, 4  ;;  %v3129_v29 = vrot.slane %v14268_v5, 4 }
 0x404   : > { %v14350_v38 = vpop.trf.xlu1 }
 0x405   : > { %12137 = vxpose.binary.xlu2.c.b16.start.end [1/2] (short) (narrow) %v4076_v59, %v4020_v53, 16  ;;  %v3148_v4 = vsel %vm1016_vm0, %v3147_v27, %v14240_v11  ;;  %v16279_v59 = vld [vmem:[#allocation44_spill] sm:$0xff]  ;;  %v3130_v5 = vsel %vm1016_vm0, %v3129_v29, %v14193_v56 }
 0x406   : > { %v14355_v2 = vpop.trf.xlu2  ;;  %v1015_v28 = vrot.slane %v16279_v59, 4  ;;  %v3152_v46 = vperm.slane %v3148_v4, %v13331_v49  ;;  %v3134_v63 = vperm.slane %v3130_v5, %v13331_v49  ;;  %v1021_v56 = vperm.slane %v16279_v59, %v13331_v49 }
 0x408   : > { %12140 = vxpose.binary.xlu1.c.b16.start.end [1/2] (short) (narrow) %v14363_v36, %v14359_v52, 16  ;;  %v1017_v47 = vsel %vm1016_vm0, 0.0, %v1015_v28  ;;  %v1031_v28 = vperm.slane %v11886_v12, %v13331_v49  ;;  %v3196_v12 = vperm.slane %v14347_v18, %v13339_v60 }
 0x40a   : > { %v12034_v22 = vpop.trf.xlu0  ;;  %v1036_v5 = vrot.slane %v1031_v28, 4 }
 0x40b   : > { %v3185_v34 = vrot.slane %v12034_v22, 4  ;;  %v3141_v22 = vrot.slane %v14215_v14, 4  ;;  %v1027_v14 = vsel %vm1016_vm0, 0.0, %v1026_v48 }
 0x40c   : > { %v14376_v3 = vpop.trf.xlu1 }
 0x40d   : > { %v3186_v33 = vsel %vm1016_vm0, %v3185_v34, %v14260_v42  ;;  %v3159_v42 = vrot.slane %v3152_v46, 4  ;;  %v1035_v34 = vperm.slane %v1027_v14, %v13331_v49  ;;  %v5149_v14 = vrot.slane %v14335_v45, 4 }
 0x40e   : > { %v12064_v37 = vpop.trf.xlu2 }
 0x412   : > { %v14382_v62 = vpop.trf.xlu0 }
 0x414   : > { %v12060_v23 = vpop.trf.xlu1 }
 0x415   : > { %12146 = vxpose.binary.xlu2.c.b16.start.end [1/2] (short) (narrow) %v4072_v40, %v4016_v13, 16  ;;  %v3190_v40 = vperm.slane %v3186_v33, %v13331_v49 }
 0x416   : > { %v14384_v1 = vpop.trf.xlu2 }
 0x418   : > { %12149 = vxpose.binary.xlu1.c.b16.start.end [1/2] (short) (narrow) %v4080_v55, %v4024_v0, 16  ;;  %v3153_v0 = vrot.slane %v3140_v26, 4 }
 0x41a   : > { %v14388_v39 = vpop.trf.xlu0 }
 0x41c   : > { %v14390_v58 = vpop.trf.xlu1 }
 0x41e   : > { %v12070_v21 = vpop.trf.xlu2 }
 0x41f   : > { %v5161_v15 = vrot.slane %v12070_v21, 4  ;;  %v3197_v21 = vrot.slane %v3190_v40, 4 }
 0x421   : > { %v14399_v53 = vsel %vm1016_vm0, %v5161_v15, %v12064_v37  ;;  %v3142_v37 = vsel %vm1016_vm0, %v3141_v22, %v14266_v61  ;;  %v1025_v61 = vperm.slane %v1017_v47, %v13331_v49  ;;  %v3154_v15 = vsel %vm1016_vm0, %v3153_v0, %v3134_v63 }
 0x422   : > { %v14407_v19 = vpop.trf.xlu0  ;;  %v3146_v27 = vperm.slane %v3142_v37, %v13331_v49  ;;  %v3158_v59 = vperm.slane %v3154_v15, %v13339_v60  ;;  %v3198_v48 = vsel %vm1016_vm0, %v3197_v21, %v3184_v54  ;;  %v1038_v22 = vrot.slane %v1021_v56, 4 }
 0x423   : > { %v1050_v26 = vrot.slane %v1025_v61, 4 }
 0x424   : > { %v12066_v11 = vpop.trf.xlu1  ;;  %v1039_v40 = vsel %vm1016_vm0, %v1031_v28, %v1038_v22  ;;  %v5150_v28 = vsel %vm1016_vm0, %v5149_v14, %v14152_v20 }
 0x425   : > { %v5117_v13 = vrot.slane %v12066_v11, 4  ;;  %v1048_v11 = vrot.slane %v1035_v34, 4  ;;  %v1051_v37 = vsel %vm1016_vm0, %v1035_v34, %v1050_v26  ;;  %v14457_v21 = vperm.slane %v1039_v40, %v13339_v60 }
 0x426   : > { %v12072_v44 = vpop.trf.xlu2  ;;  %v3217_v34 = vrot.slane %v14350_v38, 4 }
 0x427   : > { %v14417_v55 = vsel %vm1016_vm0, %v5117_v13, %v12060_v23  ;;  %v3160_v23 = vsel %vm1016_vm0, %v3159_v42, %v3146_v27  ;;  %v3202_v13 = vperm.slane %v3198_v48, %v13339_v60  ;;  %v1049_v0 = vsel %vm1016_vm0, %v1048_v11, %v1025_v61 }
 0x428   : > { %v3164_v29 = vperm.slane %v3160_v23, %v13339_v60  ;;  %v14448_v42 = vperm.slane %v1051_v37, %v13339_v60  ;;  %v1037_v61 = vsel %vm1016_vm0, %v1036_v5, %v1021_v56  ;;  %v14464_v54 = vperm.slane %v1049_v0, %v13339_v60 }
 0x429   : > { %v3203_v47 = vrot.slane %v3202_v13, 4  ;;  %v1062_v38 = vrot.slane %v14457_v21, 4  ;;  %v5154_v13 = vperm.slane %v5150_v28, %v13331_v49 }
 0x42a   : > { %v14427_v16 = vpop.trf.xlu0  ;;  %v3165_v33 = vrot.slane %v3164_v29, 4  ;;  %v1066_v29 = vrot.slane %v14448_v42, 4  ;;  %v1064_v20 = vrot.slane %v14464_v54, 4 }
 0x42b   : > { %v14454_v63 = vsel %vm1016_vm0, %v3203_v47, %v3196_v12 }
 0x42c   : > { %v14432_v4 = vpop.trf.xlu1  ;;  %v14441_v7 = vsel %vm1016_vm0, %v3165_v33, %v3158_v59  ;;  %v14470_v59 = vperm.slane %v1037_v61, %v13339_v60  ;;  %v3218_v33 = vsel %vm1016_vm0, %v3217_v34, %v14282_v51  ;;  %v3302_v11 = vshrl.u32 %v14454_v63, 16 }
 0x42d   : > { %v3299_v18 = vpack.i.b16 %v14454_v63, %v14441_v7  ;;  %v3301_v22 = vshrl.u32 %v14441_v7, 16  ;;  %v1067_v5 = vsel %vm1016_vm0, 0.0, %v1066_v29  ;;  %v3222_v40 = vperm.slane %v3218_v33, %v13331_v49 }
 0x42e   : > { %v12073_v46 = vpop.trf.xlu2  ;;  %v3205_v51 = vrot.slane %v14407_v19, 4  ;;  %v1063_v61 = vsel %vm1016_vm0, 0.0, %v1062_v38  ;;  %v5167_v29 = vrot.slane %v5154_v13, 4 }
 0x42f   : > { %v14486_v12 = vpack.i.b16 %v3302_v11, %v3301_v22 }
 0x430   : > { %v3206_v33 = vsel %vm1016_vm0, %v3205_v51, %v14312_v32 }
 0x432   : > { %v14451_v27 = vpop.trf.xlu0 }
 0x434   : > { %v12078_v15 = vpop.trf.xlu1 }
 0x435   : > { %v3211_v23 = vrot.slane %v12078_v15, 4  ;;  %v1060_v15 = vrot.slane %v14470_v59, 4 }
 0x436   : > { %v12075_v45 = vpop.trf.xlu2 }
 0x437   : > { %v3223_v26 = vrot.slane %v12075_v45, 4  ;;  %v3212_v56 = vsel %vm1016_vm0, %v3211_v23, %v12072_v44  ;;  %v3243_v23 = vrot.slane %v14427_v16, 4 }
 0x438   : > { %v3216_v47 = vperm.slane %v3212_v56, %v13331_v49 }
 0x439   : > { %v3224_v48 = vsel %vm1016_vm0, %v3223_v26, %v14382_v62  ;;  %v3255_v62 = vrot.slane %v14376_v3, 4  ;;  %v1075_v3 = vpack.c.bf16 %v1067_v5, %v1067_v5  ;;  %v3244_v13 = vsel %vm1016_vm0, %v3243_v23, %v14331_v6 }
 0x43a   : > { %v3228_v37 = vperm.slane %v3224_v48, %v13331_v49  ;;  %v12055_v44 = vpop.trf.xlu0  ;;  %v3229_v38 = vrot.slane %v3216_v47, 4  ;;  %v1074_v5 = vpack.c.bf16 %v14448_v42, %v14448_v42 }
 0x43b   : > { %v5143_v14 = vrot.slane %v12055_v44, 4  ;;  %v3256_v16 = vsel %vm1016_vm0, %v3255_v62, %v14296_v9  ;;  %v3210_v9 = vperm.slane %v3206_v33, %v13331_v49  ;;  %v1231_v44 = vrot.slane %v1075_v3, 4 }
 0x43c   : > { %v3235_v0 = vrot.slane %v3228_v37, 4  ;;  %v12079_v34 = vpop.trf.xlu1  ;;  %v3260_v6 = vperm.slane %v3256_v16, %v13331_v49  ;;  %v3248_v62 = vperm.slane %v3244_v13, %v13331_v49  ;;  %v1213_v23 = vrot.slane %v1074_v5, 4 }
 0x43d   : > { %v3249_v45 = vrot.slane %v12079_v34, 4  ;;  %v5144_v19 = vsel %vm1016_vm0, %v5143_v14, %v14121_v24  ;;  %v1065_v24 = vsel %vm1016_vm0, 0.0, %v1064_v20  ;;  %v1071_v14 = vpack.c.bf16 %v1063_v61, %v1063_v61 }
 0x43e   : > { %v12076_v28 = vpop.trf.xlu2  ;;  %v3236_v26 = vsel %vm1016_vm0, %v3235_v0, %v3222_v40  ;;  %v5148_v56 = vperm.slane %v5144_v19, %v13331_v49  ;;  %v1073_v20 = vpack.c.bf16 %v1065_v24, %v1065_v24  ;;  %v3230_v0 = vsel %vm1016_vm0, %v3229_v38, %v3210_v9 }
 0x43f   : > { %v3250_v48 = vsel %vm1016_vm0, %v3249_v45, %v12073_v46  ;;  %v3261_v22 = vrot.slane %v12076_v28, 4  ;;  %v3240_v46 = vperm.slane %v3236_v26, %v13339_v60  ;;  %v3234_v19 = vperm.slane %v3230_v0, %v13339_v60 }
 0x440   : > { %v3254_v11 = vperm.slane %v3250_v48, %v13331_v49  ;;  %v14507_v37 = vsel %vm1016_vm0, %v5167_v29, %v5148_v56  ;;  %v1072_v29 = vpack.c.bf16 %v14464_v54, %v14464_v54  ;;  %v1225_v26 = vrot.slane %v1073_v20, 4 }
 0x441   : > { %v3262_v32 = vsel %vm1016_vm0, %v3261_v22, %v14388_v39  ;;  %v1061_v39 = vsel %vm1016_vm0, 0.0, %v1060_v15  ;;  %v3241_v34 = vrot.slane %v3240_v46, 4  ;;  %v1070_v3 = vpack.c.bf16 %v14457_v21, %v14457_v21 }
 0x442   : > { %v3267_v40 = vrot.slane %v3254_v11, 4  ;;  %v3266_v51 = vperm.slane %v3262_v32, %v13331_v49  ;;  %v1232_v15 = vsel %vm1016_vm0, %v1231_v44, %v1071_v14  ;;  %v1069_v48 = vpack.c.bf16 %v1061_v39, %v1061_v39  ;;  %v14545_v44 = vpop.trf.xlu0 }
 0x443   : > { %v3242_v61 = vsel %vm1016_vm0, %v3241_v34, %v3234_v19  ;;  %v1206_v22 = vrot.slane %v1072_v29, 4  ;;  %v1214_v16 = vsel %vm1016_vm0, %v1213_v23, %v1070_v3  ;;  %v1068_v54 = vpack.c.bf16 %v14470_v59, %v14470_v59 }
 0x444   : > { %v3273_v47 = vrot.slane %v3266_v51, 4  ;;  %v3268_v42 = vsel %vm1016_vm0, %v3267_v40, %v3248_v62  ;;  %v1226_v11 = vsel %vm1016_vm0, %v1225_v26, %v1069_v48  ;;  %v1236_v21 = vperm.slane %v1232_v15, %v13331_v49  ;;  %v14541_v40 = vpop.trf.xlu1 }
 0x445   : > { %v3272_v33 = vperm.slane %v3268_v42, %v13339_v60  ;;  %v5123_v24 = vrot.slane %v14384_v1, 4  ;;  %v3309_v32 = vshrl.u32 %v3242_v61, 16  ;;  %v1218_v5 = vperm.slane %v1214_v16, %v13331_v49 }
 0x446   : > { %v3274_v45 = vsel %vm1016_vm0, %v3273_v47, %v3260_v6  ;;  %v14539_v9 = vpop.trf.xlu2  ;;  %v5111_v51 = vrot.slane %v14316_v57, 4  ;;  %v1208_v20 = vsel %vm1016_vm0, %v1206_v22, %v1068_v54  ;;  %v1230_v6 = vperm.slane %v1226_v11, %v13331_v49 }
 0x447   : > { %v3278_v28 = vperm.slane %v3274_v45, %v13339_v60  ;;  %v1237_v1 = vrot.slane %v1236_v21, 4  ;;  %v5124_v62 = vsel %vm1016_vm0, %v5123_v24, %v14355_v2  ;;  %v5155_v47 = vrot.slane %v14432_v4, 4 }
 0x448   : > { %v5105_v0 = vrot.slane %v14451_v27, 4  ;;  %v1212_v39 = vperm.slane %v1208_v20, %v13331_v49  ;;  %v1219_v14 = vrot.slane %v1218_v5, 4  ;;  %v5112_v57 = vsel %vm1016_vm0, %v5111_v51, %v14130_v31 }
 0x449   : > { %v3279_v56 = vrot.slane %v3278_v28, 4  ;;  %v5128_v34 = vperm.slane %v5124_v62, %v13331_v49  ;;  %v1238_v23 = vsel %vm1016_vm0, %v1237_v1, %v1230_v6  ;;  %v5156_v2 = vsel %vm1016_vm0, %v5155_v47, %v14390_v58 }
 0x44a   : > { %v5106_v4 = vsel %vm1016_vm0, %v5105_v0, %v14107_v41  ;;  %v5116_v27 = vperm.slane %v5112_v57, %v13331_v49  ;;  %v5166_v42 = vperm.slane %v14399_v53, %v13331_v49  ;;  %v5122_v31 = vperm.slane %v14417_v55, %v13331_v49  ;;  %v12091_v45 = vpop.trf.xlu0 }
 0x44b   : > { %v3280_v38 = vsel %vm1016_vm0, %v3279_v56, %v3272_v33  ;;  %v1220_v7 = vsel %vm1016_vm0, %v1219_v14, %v1212_v39  ;;  %v1242_v58 = vperm.slane %v1238_v23, %v13339_v60  ;;  %v5135_v41 = vrot.slane %v5128_v34, 4 }
 0x44c   : > { %v3307_v13 = vpack.i.b16 %v3280_v38, %v3242_v61  ;;  %v3310_v46 = vshrl.u32 %v3280_v38, 16  ;;  %v5160_v29 = vperm.slane %v5156_v2, %v13331_v49  ;;  %v5110_v19 = vperm.slane %v5106_v4, %v13331_v49 }
 0x44d   : > { %v5225_v53 = vrot.slane %v12091_v45, 4  ;;  %v1224_v28 = vperm.slane %v1220_v7, %v13339_v60  ;;  %v5129_v55 = vrot.slane %v5116_v27, 4  ;;  %v5173_v26 = vrot.slane %v5166_v42, 4 }
 0x44e   : > { %3321 = vmatpush.bf16.msra.mxu3 %v3307_v13  ;;  %v3311_v59 = vpack.i.b16 %v3310_v46, %v3309_v32  ;;  %v12085_v63 = vpop.trf.xlu2  ;;  %v5136_v3 = vsel %vm1016_vm0, %v5135_v41, %v5122_v31  ;;  %v1247_v46 = vshrl.u32 %v1242_v58, 16 }
 0x44f   : > { %v14579_v15 = vsel %vm1016_vm0, %v5225_v53, %v12085_v63  ;;  %v5174_v17 = vsel %vm1016_vm0, %v5173_v26, %v5160_v29  ;;  %v5130_v50 = vsel %vm1016_vm0, %v5129_v55, %v5110_v19  ;;  %v5140_v61 = vperm.slane %v5136_v3, %v13339_v60 }
 0x450   : > { %v5178_v48 = vperm.slane %v5174_v17, %v13339_v60  ;;  %v5134_v22 = vperm.slane %v5130_v50, %v13339_v60 }
 0x451   : > { %v5141_v8 = vrot.slane %v5140_v61, 4  ;;  %v1009_v61 = vlaneseq }
 0x452   : > { %3322 = vmatpush.bf16.msra.mxu3 %v3299_v18  ;;  %v12082_v18 = vpop.trf.xlu1  ;;  %v12099_v25 = vpop.trf.xlu0  ;;  %v5179_v54 = vrot.slane %v5178_v48, 4 }
 0x453   : > { %v14596_v16 = vsel %vm1016_vm0, %v5141_v8, %v5134_v22  ;;  %v5193_v6 = vrot.slane %v12099_v25, 4  ;;  %v14642_v48 = vand.u32 127, %v1009_v61  ;;  %v3346_v8 = vstv %s1205_s22 }
 0x455   : > { %16280 = vst [vmem:[#allocation53_spill] sm:$0xff] %v14642_v48  ;;  %vm14648_vm2 = vcmp.lt.s32.totalorder %v14642_v48, %v3346_v8  ;;  %v4021_v8 = vrot.slane %v14359_v52, 4 }
 0x456   : > { %3323 = vmatpush.bf16.msra.mxu3 %v3291_v30  ;;  %v1245_v30 = vpack.i.b16 %v1242_v58, %v1224_v28  ;;  %v12093_v33 = vpop.trf.xlu2 }
 0x457   : > { %v5194_v0 = vsel %vm1016_vm0, %v5193_v6, %v12093_v33 }
 0x458   : > { %v5198_v14 = vperm.slane %v5194_v0, %v13331_v49 }
 0x45a   : > { %3324 = vmatpush.bf16.msra.mxu3 %v3283_v43  ;;  %v14588_v56 = vpop.trf.xlu1  ;;  %v5172_v43 = vperm.slane %v14507_v37, %v13339_v60  ;;  %v12100_v37 = vpop.trf.xlu0 }
 0x45b   : > { %v5231_v5 = vrot.slane %v12100_v37, 4 }
 0x45c   : > { %v14600_v38 = vsel %vm1016_vm0, %v5179_v54, %v5172_v43 }
 0x45d   : > { %11398 = vmatmul.msk.bf16.vlgmr.msra.gmra.mxu3 %vm3313_vm1, %v1245_v30  ;;  %v5411_v24 = vpack.i.b16 %v14600_v38, %v14596_v16  ;;  %v5413_v13 = vshrl.u32 %v14600_v38, 16 }
 0x45e   : > { %3337 = vmatpush.bf16.msrb.mxu3 %v3311_v59  ;;  %v12094_v11 = vpop.trf.xlu2  ;;  %v1246_v59 = vshrl.u32 %v1224_v28, 16 }
 0x45f   : > { %v5232_v20 = vsel %vm1016_vm0, %v5231_v5, %v12094_v11  ;;  %v4022_v11 = vsel %vm1016_vm0, 0, %v4021_v8 }
 0x460   : > { %v1248_v1 = vpack.i.b16 %v1247_v46, %v1246_v59  ;;  %v5236_v31 = vperm.slane %v5232_v20, %v13331_v49 }
 0x462   : > { %3338 = vmatpush.bf16.msrb.mxu3 %v14486_v12  ;;  %v12088_v21 = vpop.trf.xlu1  ;;  %v5412_v12 = vshrl.u32 %v14596_v16, 16  ;;  %v14625_v58 = vpop.trf.xlu0 }
 0x463   : > { %v5219_v32 = vrot.slane %v12088_v21, 4  ;;  %v14823_v16 = vpop.f32.mrf.mxu1 }
 0x464   : > { %v14607_v51 = vpack.i.b16 %v5413_v13, %v5412_v12 }
 0x466   : > { %3339 = vmatpush.bf16.msrb.mxu3 %v14374_v10  ;;  %v14610_v10 = vsel %vm1016_vm0, %v5219_v32, %v12082_v18  ;;  %v12102_v62 = vpop.trf.xlu2 }
 0x467   : > { %v5199_v39 = vrot.slane %v12102_v62, 4 }
 0x46a   : > { %3340 = vmatpush.bf16.msrb.mxu3 %v14258_v35  ;;  %v12096_v47 = vpop.trf.xlu1  ;;  %v14629_v41 = vpop.trf.xlu0 }
 0x46b   : > { %v5200_v35 = vsel %vm1016_vm0, %v5199_v39, %v12096_v47  ;;  %v5187_v39 = vrot.slane %v14545_v44, 4 }
 0x46c   : > { %v5204_v57 = vperm.slane %v5200_v35, %v13331_v49 }
 0x46d   : > { %11399 = vmatmul.msk.bf16.vlgmr.msrb.gmra.mxu3 %vm3313_vm1, %v1248_v1 }
 0x46e   : > { %v5211_v34 = vrot.slane %v5204_v57, 4  ;;  %v12103_v2 = vpop.trf.xlu2  ;;  %v5181_v57 = vrot.slane %v14588_v56, 4 }
 0x46f   : > { %v5237_v27 = vrot.slane %v12103_v2, 4 }
 0x470   : > { %v14619_v23 = vsel %vm1016_vm0, %v5211_v34, %v5198_v14  ;;  %v5188_v14 = vsel %vm1016_vm0, %v5187_v39, %v14539_v9  ;;  %v5182_v44 = vsel %vm1016_vm0, %v5181_v57, %v14541_v40 }
 0x471   : > { %v5216_v9 = vperm.slane %v14619_v23, %v13339_v60 }
 0x472   : > { %v12097_v4 = vpop.trf.xlu1  ;;  %v14631_v19 = vpop.trf.xlu0 }
 0x473   : > { %v5238_v42 = vsel %vm1016_vm0, %v5237_v27, %v12097_v4  ;;  %v5192_v4 = vperm.slane %v5188_v14, %v13331_v49  ;;  %v5230_v27 = vperm.slane %v14579_v15, %v13331_v49 }
 0x474   : > { %v5242_v7 = vperm.slane %v5238_v42, %v13331_v49 }
 0x475   : > { %v5205_v42 = vrot.slane %v5192_v4, 4 }
 0x476   : > { %v5249_v63 = vrot.slane %v5242_v7, 4  ;;  %v14633_v53 = vpop.trf.xlu2  ;;  %v5243_v7 = vrot.slane %v5230_v27, 4 }
 0x478   : > { %v5250_v18 = vsel %vm1016_vm0, %v5249_v63, %v5236_v31  ;;  %v5186_v31 = vperm.slane %v5182_v44, %v13331_v49  ;;  %v5224_v63 = vperm.slane %v14610_v10, %v13331_v49 }
 0x479   : > { %v5254_v56 = vperm.slane %v5250_v18, %v13339_v60 }
 0x47a   : > { %v14627_v45 = vpop.trf.xlu1  ;;  %v12118_v55 = vpop.trf.xlu0  ;;  %v5206_v15 = vsel %vm1016_vm0, %v5205_v42, %v5186_v31 }
 0x47b   : > { %v5210_v40 = vperm.slane %v5206_v15, %v13339_v60 }
 0x47e   : > { %v12112_v3 = vpop.trf.xlu2 }
 0x47f   : > { %v5295_v17 = vrot.slane %v12112_v3, 4  ;;  %v5255_v3 = vrot.slane %v5254_v56, 4 }
 0x482   : > { %v12106_v29 = vpop.trf.xlu1  ;;  %v12126_v50 = vpop.trf.xlu0 }
 0x483   : > { %v14640_v30 = vsel %vm1016_vm0, %v5295_v17, %v12106_v29  ;;  %v5275_v33 = vrot.slane %v12126_v50, 4  ;;  %v5244_v17 = vsel %vm1016_vm0, %v5243_v7, %v5224_v63 }
 0x484   : > { %v5248_v23 = vperm.slane %v5244_v17, %v13339_v60 }
 0x486   : > { %v12120_v25 = vpop.trf.xlu2  ;;  %v14692_v50 = vsel %vm1016_vm0, %v5255_v3, %v5248_v23 }
 0x487   : > { %v5276_v43 = vsel %vm1016_vm0, %v5275_v33, %v12120_v25  ;;  %v5419_v33 = vshrl.u32 %v14692_v50, 16 }
 0x48a   : > { %v14635_v28 = vpop.trf.xlu1  ;;  %v12127_v54 = vpop.trf.xlu0 }
 0x48b   : > { %v5313_v21 = vrot.slane %v12127_v54, 4  ;;  %v4077_v54 = vrot.slane %v14363_v36, 4 }
 0x48e   : > { %v12121_v46 = vpop.trf.xlu2 }
 0x48f   : > { %v5314_v59 = vsel %vm1016_vm0, %v5313_v21, %v12121_v46  ;;  %v4078_v21 = vsel %vm1016_vm0, 0, %v4077_v54 }
 0x490   : > { %v5318_v20 = vperm.slane %v5314_v59, %v13331_v49  ;;  %v5263_v59 = vrot.slane %v14635_v28, 4 }
 0x492   : > { %v14637_v26 = vpop.trf.xlu1  ;;  %v5325_v62 = vrot.slane %v5318_v20, 4 }
 0x493   : > { %v5301_v52 = vrot.slane %v14637_v26, 4 }
 0x49a   : > { %v14644_v22 = vpop.trf.xlu1 }
 0x49b   : > { %v5269_v46 = vrot.slane %v14644_v22, 4  ;;  %v5302_v22 = vsel %vm1016_vm0, %v5301_v52, %v14629_v41  ;;  %v5300_v41 = vperm.slane %v14640_v30, %v13331_v49 }
 0x49c   : > { %v5306_v28 = vperm.slane %v5302_v22, %v13331_v49 }
 0x49d   : > { %v5270_v36 = vsel %vm1016_vm0, %v5269_v46, %v14631_v19 }
 0x49e   : > { %v5274_v20 = vperm.slane %v5270_v36, %v13331_v49 }
 0x4a2   : > { %v12124_v37 = vpop.trf.xlu1 }
 0x4a3   : > { %v5307_v5 = vrot.slane %v12124_v37, 4 }
 0x4a5   : > { %v5308_v6 = vsel %vm1016_vm0, %v5307_v5, %v12118_v55  ;;  %v5217_v55 = vrot.slane %v5216_v9, 4  ;;  %v5280_v5 = vperm.slane %v5276_v43, %v13331_v49 }
 0x4a6   : > { %v5312_v1 = vperm.slane %v5308_v6, %v13331_v49 }
 0x4a7   : > { %v14689_v18 = vsel %vm1016_vm0, %v5217_v55, %v5210_v40  ;;  %v5287_v6 = vrot.slane %v5280_v5, 4 }
 0x4a8   : > { %v5326_v0 = vsel %vm1016_vm0, %v5325_v62, %v5312_v1  ;;  %v5417_v10 = vpack.i.b16 %v14692_v50, %v14689_v18  ;;  %v5418_v61 = vshrl.u32 %v14689_v18, 16  ;;  %v5264_v1 = vsel %vm1016_vm0, %v5263_v59, %v14625_v58 }
 0x4a9   : > { %v5257_v62 = vrot.slane %v14633_v53, 4  ;;  %v5268_v43 = vperm.slane %v5264_v1, %v13331_v49  ;;  %v5288_v26 = vsel %vm1016_vm0, %v5287_v6, %v5274_v20  ;;  %v5330_v39 = vperm.slane %v5326_v0, %v13339_v60  ;;  %v12129_v20 = vpop.trf.xlu2 }
 0x4aa   : > { %v14698_v25 = vpack.i.b16 %v5419_v33, %v5418_v61  ;;  %v5319_v53 = vrot.slane %v5306_v28, 4  ;;  %v12132_v14 = vpop.trf.xlu1 }
 0x4ab   : > { %v5258_v19 = vsel %vm1016_vm0, %v5257_v62, %v14627_v45 }
 0x4ac   : > { %v5262_v58 = vperm.slane %v5258_v19, %v13331_v49  ;;  %v5320_v27 = vsel %vm1016_vm0, %v5319_v53, %v5300_v41 }
 0x4ad   : > { %v5324_v44 = vperm.slane %v5320_v27, %v13339_v60 }
 0x4b1   : > { %v12130_v6 = vpop.trf.xlu2 }
 0x4b2   : > { %v12133_v7 = vpop.trf.xlu1 }
 0x4b9   : > { %v12138_v1 = vpop.trf.xlu2 }
 0x4ba   : > { %v12141_v63 = vpop.trf.xlu1 }
 0x4c1   : > { %v12139_v62 = vpop.trf.xlu2 }
 0x4c2   : > { %v12142_v55 = vpop.trf.xlu1  ;;  %v5377_v28 = vrot.slane %v12139_v62, 4 }
 0x4c9   : > { %v12147_v22 = vpop.trf.xlu2 }
 0x4ca   : > { %v12150_v15 = vpop.trf.xlu1 }
 0x4cb   : > { %v5351_v19 = vrot.slane %v12150_v15, 4 }
 0x4d2   : > { %v12151_v61 = vpop.trf.xlu1 }
 0x4e0   : > { %v3326_v12 = vpop.f32.mrf.mxu3 }
 0x4e1   : > { %v14654_v13 = vsel %vm14648_vm2, %v3326_v12, -1000000.0  ;;  %v16283_v12 = vld [vmem:[#allocation46_spill] sm:$0xff] }
 0x4e2   : > { %v3353_v32 = vsel %vm3352_vm3, %v14654_v13, -inf }
 0x4e3   : > { %3354 = vmax.xlane.f32.xlu0 %v3353_v32  ;;  %v16284_v32 = vld [vmem:[#allocation45_spill] sm:$0xff] }
 0x4e4   : > { %v16285_v37 = vpack.i.bf16 %v16283_v12, %v16284_v32 }
 0x4e8   : > { %v3328_v47 = vpop.f32.mrf.mxu3 }
 0x4e9   : > { %v5292_v47 = vperm.slane %v5288_v26, %v13339_v60  ;;  %v5345_v26 = vrot.slane %v12147_v22, 4 }
 0x4eb   : > { %v5293_v57 = vrot.slane %v5292_v47, 4 }
 0x4f0   : > { %v3342_v35 = vpop.f32.mrf.mxu3 }
 0x4f1   : > { %v14669_v34 = vsel %vm14648_vm2, %v3342_v35, -1000000.0  ;;  %v5281_v35 = vrot.slane %v5268_v43, 4  ;;  %v5339_v43 = vrot.slane %v12138_v1, 4 }
 0x4f2   : > { %v3356_v2 = vsel %vm3352_vm3, %v14669_v34, -inf }
 0x4f3   : > { %3357 = vmax.xlane.f32.xlu1 %v3356_v2  ;;  %v5331_v2 = vrot.slane %v5330_v39, 4  ;;  %v5282_v4 = vsel %vm1016_vm0, %v5281_v35, %v5262_v58  ;;  %v12148_v58 = vpop.trf.xlu2  ;;  %v5340_v41 = vsel %vm1016_vm0, %v5339_v43, %v12132_v14 }
 0x4f4   : > { %v5286_v45 = vperm.slane %v5282_v4, %v13339_v60  ;;  %v5346_v4 = vsel %vm1016_vm0, %v5345_v26, %v12141_v63 }
 0x4f5   : > { %v14738_v9 = vsel %vm1016_vm0, %v5331_v2, %v5324_v44  ;;  %v5378_v2 = vsel %vm1016_vm0, %v5377_v28, %v12133_v7 }
 0x4f6   : > { %v14735_v0 = vsel %vm1016_vm0, %v5293_v57, %v5286_v45  ;;  %v5425_v42 = vshrl.u32 %v14738_v9, 16  ;;  %v5383_v45 = vrot.slane %v12148_v58, 4 }
 0x4f7   : > { %v5423_v30 = vpack.i.b16 %v14738_v9, %v14735_v0  ;;  %v5424_v56 = vshrl.u32 %v14735_v0, 16 }
 0x4f8   : > { %v3344_v29 = vpop.f32.mrf.mxu3  ;;  %v5384_v63 = vsel %vm1016_vm0, %v5383_v45, %v12142_v55 }
 0x4f9   : > { %v14744_v31 = vpack.i.b16 %v5425_v42, %v5424_v56  ;;  %v12135_v29 = vpop.trf.xlu0  ;;  %v5344_v56 = vperm.slane %v5340_v41, %v13331_v49  ;;  %v5382_v42 = vperm.slane %v5378_v2, %v13331_v49 }
 0x4fa   : > { %v5333_v35 = vrot.slane %v12135_v29, 4  ;;  %v5350_v29 = vperm.slane %v5346_v4, %v13331_v49 }
 0x4fc   : > { %v5334_v44 = vsel %vm1016_vm0, %v5333_v35, %v12129_v20 }
 0x4fd   : > { %v5338_v7 = vperm.slane %v5334_v44, %v13331_v49 }
 0x501   : > { %v12136_v3 = vpop.trf.xlu0 }
 0x502   : > { %v5371_v57 = vrot.slane %v12136_v3, 4 }
 0x504   : > { %v5372_v15 = vsel %vm1016_vm0, %v5371_v57, %v12130_v6 }
 0x50c   : > { %12143 = vxpose.binary.xlu0.c.b16.start.end [1/2] (short) (narrow) %v4078_v21, %v4022_v11, 16 }
 0x50d   : > { %12153 = vrot.lane.b32.xlu1 %v16285_v37, %s12965_s17 }
 0x556   : > { %v3355_v17 = vpop.xlane.xlu0 %3354 }
 0x557   : > { %v3359_v40 = vsub.f32 %v14654_v13, %v3355_v17  ;;  %v14758_v13 = vperm.slane %v16283_v12, %v13331_v49  ;;  %v5389_v17 = vrot.slane %v12151_v61, 4 }
 0x559   : > { %v3361_v23 = vmul.f32 1.442695, %v3359_v40  ;;  %v5834_v52 = vrot.slane %v14758_v13, 4 }
 0x55b   : > { %12468 = vpow2.f32 %v3361_v23  ;;  %v5357_v23 = vrot.slane %v5344_v56, 4 }
 0x561   : > { %v14747_v33 = vpop.eup %12468 }
 0x562   : > { %v3365_v8 = vsel %vm3352_vm3, %v14747_v33, 0.0 }
 0x563   : > { %3366 = vadd.xlane.f32.xlu2 %v3365_v8  ;;  %v5376_v8 = vperm.slane %v5372_v15, %v13331_v49 }
 0x566   : > { %v3358_v54 = vpop.xlane.xlu1 %3357 }
 0x567   : > { %v3360_v11 = vsub.f32 %v14669_v34, %v3358_v54  ;;  %v5395_v54 = vrot.slane %v5382_v42, 4 }
 0x569   : > { %v3363_v21 = vmul.f32 1.442695, %v3360_v11  ;;  %v5396_v20 = vsel %vm1016_vm0, %v5395_v54, %v5376_v8 }
 0x56a   : > { %v5400_v22 = vperm.slane %v5396_v20, %v13339_v60 }
 0x56b   : > { %12470 = vpow2.f32 %v3363_v21 }
 0x571   : > { %v14752_v37 = vpop.eup %12470 }
 0x572   : > { %v3368_v46 = vsel %vm3352_vm3, %v14752_v37, 0.0 }
 0x573   : > { %3369 = vadd.xlane.f32.xlu1 %v3368_v46  ;;  %v5388_v46 = vperm.slane %v5384_v63, %v13331_v49 }
 0x57f   : > { %v14760_v5 = vpop.permute.xlu1 %12153 }
 0x580   : > { %v16220_v59 = vunpack.i.h.bf16 %v14760_v5 }
 0x582   : > { %v14767_v34 = vperm.slane %v16220_v59, %v13331_v49 }
 0x584   : > { %v14771_v36 = vsel %vm1016_vm0, %v14767_v34, %v5834_v52  ;;  %v5358_v52 = vsel %vm1016_vm0, %v5357_v23, %v5338_v7 }
 0x585   : > { %v5362_v62 = vperm.slane %v5358_v52, %v13339_v60 }
 0x5b8   : > { %v12144_v47 = vpop.trf.xlu0 }
 0x5b9   : > { %v5352_v39 = vsel %vm1016_vm0, %v5351_v19, %v12144_v47 }
 0x5ba   : > { %v5356_v53 = vperm.slane %v5352_v39, %v13331_v49 }
 0x5bc   : > { %v5363_v27 = vrot.slane %v5356_v53, 4 }
 0x5be   : > { %v5364_v14 = vsel %vm1016_vm0, %v5363_v27, %v5350_v29 }
 0x5bf   : > { %v5368_v21 = vperm.slane %v5364_v14, %v13339_v60 }
 0x5c0   : > { %v12145_v3 = vpop.trf.xlu0 }
 0x5c1   : > { %v5390_v40 = vsel %vm1016_vm0, %v5389_v17, %v12145_v3  ;;  %v5369_v55 = vrot.slane %v5368_v21, 4 }
 0x5c2   : > { %v5394_v11 = vperm.slane %v5390_v40, %v13331_v49 }
 0x5c3   : > { %v5370_v28 = vsel %vm1016_vm0, %v5369_v55, %v5362_v62 }
 0x5c4   : > { %v5401_v61 = vrot.slane %v5394_v11, 4  ;;  %v5430_v4 = vshrl.u32 %v5370_v28, 16 }
 0x5c6   : > { %v5402_v6 = vsel %vm1016_vm0, %v5401_v61, %v5388_v46 }
 0x5c7   : > { %v5406_v1 = vperm.slane %v5402_v6, %v13339_v60 }
 0x5c9   : > { %v5407_v43 = vrot.slane %v5406_v1, 4 }
 0x5cb   : > { %v5408_v26 = vsel %vm1016_vm0, %v5407_v43, %v5400_v22 }
 0x5cc   : > { %v5429_v19 = vpack.i.b16 %v5408_v26, %v5370_v28  ;;  %v5431_v27 = vshrl.u32 %v5408_v26, 16 }
 0x5ce   : > { %v5432_v45 = vpack.i.b16 %v5431_v27, %v5430_v4 }
 0x5d6   : > { %v3367_v47 = vpop.xlane.xlu2 %3366 }
 0x5d7   : > { %12472 = vrcp.f32 %v3367_v47 }
 0x5dd   : > { %v12473_v39 = vpop.eup %12472 }
 0x5de   : > { %v3373_v35 = vmul.f32 %v12473_v39, %v14747_v33 }
 0x5e0   : > { %v3375_v58 = vpack.c.bf16 %v3373_v35, %v3373_v35 }
 0x5e2   : > { %v5446_v53 = vsel %vm3352_vm3, %v3375_v58, 0 }
 0x5e3   : > { %5455 = vmatpush.bf16.xpose.msrb.mxu0 %v5446_v53  ;;  %11737 = vmatpush.bf16.xpose.msrb.mxu1 %v5446_v53 }
 0x5e6   : > { %v3370_v41 = vpop.xlane.xlu1 %3369 }
 0x5e7   : > { %12474 = vrcp.f32 %v3370_v41 }
 0x5ea   : > { %11400 = vmatmul.msk.bf16.vlgmr.msrb.gmra.mxu0 %vm3352_vm3, %v5411_v24  ;;  %11403 = vmatmul.msk.bf16.vlgmr.msrb.gmra.mxu1 %vm3352_vm3, %v5429_v19 }
 0x5ed   : > { %v12475_v57 = vpop.eup %12474 }
 0x5ee   : > { %v3374_v2 = vmul.f32 %v12475_v57, %v14752_v37 }
 0x5f0   : > { %v3376_v33 = vpack.c.bf16 %v3374_v2, %v3374_v2 }
 0x5f2   : > { %v5490_v44 = vsel %vm3352_vm3, %v3376_v33, 0 }
 0x5f3   : > { %5499 = vmatpush.bf16.xpose.msra.mxu1 %v5490_v44 }
 0x5fa   : > { %11401 = vmatmul.msk.bf16.gmra.mxu0 %vm3352_vm3, %v5417_v10  ;;  %11404 = vmatmul.msk.bf16.vlgmr.msra.gmra.mxu1 %vm3352_vm3, %v14607_v51 }
 0x60a   : > { %11402 = vmatmul.msk.bf16.gmra.mxu0 %vm3352_vm3, %v5423_v30  ;;  %11405 = vmatmul.msk.bf16.gmra.mxu1 %vm3352_vm3, %v14698_v25 }
 0x61a   : > { %11406 = vmatmul.msk.bf16.gmra.mxu1 %vm3352_vm3, %v14744_v31 }
 0x62a   : > { %11407 = vmatmul.msk.bf16.gmra.mxu1 %vm3352_vm3, %v5432_v45 }
 0x667   : > { %v5472_v38 = vpop.f32.mrf.mxu1  ;;  %v5457_v24 = vpop.f32.mrf.mxu0 }
 0x66f   : > { %v5474_v18 = vpop.f32.mrf.mxu1  ;;  %v5459_v50 = vpop.f32.mrf.mxu0 }
 0x677   : > { %v5501_v51 = vpop.f32.mrf.mxu1  ;;  %v5462_v30 = vpop.f32.mrf.mxu0 }
 0x678   : > { %v12157_v10 = vpack.i.bf16 %v5501_v51, %v5457_v24 }
 0x67a   : > { %12158 = vxpose.xlu0.b32.start [1/8] (short) (narrow) %v12157_v10, 8 }
 0x67f   : > { %v5503_v0 = vpop.f32.mrf.mxu1  ;;  %v5464_v56 = vpop.f32.mrf.mxu0 }
 0x680   : > { %v12159_v9 = vpack.i.bf16 %v5503_v0, %v5459_v50 }
 0x682   : > { %12160 = vxpose.xlu0.b32.cont [2/8] (short) (narrow) %v12159_v9, 8 }
 0x687   : > { %v5506_v37 = vpop.f32.mrf.mxu1  ;;  %v5467_v29 = vpop.f32.mrf.mxu0 }
 0x688   : > { %v12161_v25 = vpack.i.bf16 %v5506_v37, %v5462_v30 }
 0x68a   : > { %12162 = vxpose.xlu0.b32.cont [3/8] (short) (narrow) %v12161_v25, 8 }
 0x68f   : > { %v5508_v31 = vpop.f32.mrf.mxu1  ;;  %v5469_v14 = vpop.f32.mrf.mxu0 }
 0x690   : > { %v12163_v42 = vpack.i.bf16 %v5508_v31, %v5464_v56 }
 0x692   : > { %12164 = vxpose.xlu0.b32.cont [4/8] (short) (narrow) %v12163_v42, 8 }
 0x697   : > { %v5511_v15 = vpop.f32.mrf.mxu1 }
 0x698   : > { %v12165_v17 = vpack.i.bf16 %v5511_v15, %v5467_v29 }
 0x69a   : > { %12166 = vxpose.xlu0.b32.cont [5/8] (short) (narrow) %v12165_v17, 8 }
 0x69f   : > { %v5513_v3 = vpop.f32.mrf.mxu1 }
 0x6a0   : > { %v12167_v7 = vpack.i.bf16 %v5513_v3, %v5469_v14 }
 0x6a2   : > { %12168 = vxpose.xlu0.b32.cont [6/8] (short) (narrow) %v12167_v7, 8  ;;  %v16286_v7 = vld [vmem:[#allocation43_spill] sm:$0xff] }
 0x6a7   : > { %v5516_v63 = vpop.f32.mrf.mxu1 }
 0x6a8   : > { %v12169_v40 = vpack.i.bf16 %v5516_v63, %v5472_v38  ;;  %v16287_v63 = vperm.slane %v16286_v7, 1 }
 0x6aa   : > { %12170 = vxpose.xlu0.b32.cont [7/8] (short) (narrow) %v12169_v40, 8  ;;  %v928_v40 = vadd.f32 %v14823_v16, %v16287_v63 }
 0x6af   : > { %v5518_v23 = vpop.f32.mrf.mxu1 }
 0x6b0   : > { %v12171_v8 = vpack.i.bf16 %v5518_v23, %v5474_v18 }
 0x6b2   : > { %12172 = vxpose.xlu0.b32.end [8/8] (short) (narrow) %v12171_v8, 8 }
 0x71e   : > { %v12173_v54 = vpop.trf.xlu0 }
 0x71f   : > { %v12177_v11 = vunpack.i.h.bf16 %v12173_v54  ;;  %v12174_v21 = vunpack.i.l.bf16 %v12173_v54 }
 0x721   : > { %v5595_v46 = vrot.slane %v12177_v11, 4  ;;  %v5600_v61 = vperm.slane %v12177_v11, %v13331_v49  ;;  %v5585_v52 = vrot.slane %v12174_v21, 4  ;;  %v5590_v20 = vperm.slane %v12174_v21, %v13331_v49 }
 0x722   : > { %v5748_v21 = vrot.slane %v928_v40, 4 }
 0x723   : > { %v5596_v6 = vsel %vm1016_vm0, 0.0, %v5595_v46  ;;  %v5605_v55 = vrot.slane %v5600_v61, 4  ;;  %v5586_v1 = vsel %vm1016_vm0, 0.0, %v5585_v52  ;;  %v5607_v62 = vrot.slane %v5590_v20, 4 }
 0x724   : > { %v5604_v22 = vperm.slane %v5596_v6, %v13331_v49  ;;  %v5594_v43 = vperm.slane %v5586_v1, %v13331_v49  ;;  %v5749_v46 = vsel %vm1016_vm0, 0.0, %v5748_v21 }
 0x725   : > { %v5606_v28 = vsel %vm1016_vm0, %v5605_v55, %v5590_v20  ;;  %v5608_v26 = vsel %vm1016_vm0, %v5600_v61, %v5607_v62  ;;  %v5757_v20 = vperm.slane %v5749_v46, %v13331_v49  ;;  %v5753_v55 = vperm.slane %v928_v40, %v13331_v49 }
 0x726   : > { %v5617_v19 = vrot.slane %v5604_v22, 4  ;;  %v5612_v47 = vperm.slane %v5606_v28, %v13339_v60  ;;  %v5616_v39 = vperm.slane %v5608_v26, %v13339_v60  ;;  %v5619_v35 = vrot.slane %v5594_v43, 4 }
 0x728   : > { %v5618_v58 = vsel %vm1016_vm0, %v5617_v19, %v5594_v43  ;;  %v5620_v53 = vsel %vm1016_vm0, %v5604_v22, %v5619_v35  ;;  %v5629_v41 = vrot.slane %v5612_v47, 4  ;;  %v5631_v57 = vrot.slane %v5616_v39, 4 }
 0x729   : > { %v5624_v2 = vperm.slane %v5618_v58, %v13339_v60  ;;  %v5628_v4 = vperm.slane %v5620_v53, %v13339_v60  ;;  %v5782_v22 = vrot.slane %v5757_v20, 4 }
 0x72a   : > { %v5632_v27 = vsel %vm1016_vm0, 0.0, %v5631_v57  ;;  %v5630_v38 = vsel %vm1016_vm0, 0.0, %v5629_v41  ;;  %v5637_v18 = vsel %vm1016_vm0, %v5631_v57, %v5612_v47 }
 0x72b   : > { %v5633_v33 = vrot.slane %v5624_v2, 4  ;;  %v5635_v45 = vrot.slane %v5628_v4, 4  ;;  %v5642_v44 = vrot.slane %v5632_v27, 4  ;;  %v5641_v9 = vperm.slane %v5637_v18, %v13331_v49 }
 0x72d   : > { %v5636_v24 = vsel %vm1016_vm0, 0.0, %v5635_v45  ;;  %v5643_v50 = vsel %vm1016_vm0, %v5642_v44, %v5630_v38  ;;  %v5634_v0 = vsel %vm1016_vm0, 0.0, %v5633_v33  ;;  %v5648_v30 = vsel %vm1016_vm0, %v5635_v45, %v5624_v2 }
 0x72e   : > { %v5653_v51 = vrot.slane %v5636_v24, 4  ;;  %v5647_v10 = vperm.slane %v5643_v50, %v13331_v49  ;;  %v5652_v42 = vperm.slane %v5648_v30, %v13331_v49  ;;  %v5770_v50 = vrot.slane %v5753_v55, 4 }
 0x730   : > { %v5654_v37 = vsel %vm1016_vm0, %v5653_v51, %v5634_v0  ;;  %v5659_v25 = vrot.slane %v5647_v10, 4 }
 0x731   : > { %v5658_v56 = vperm.slane %v5654_v37, %v13331_v49 }
 0x732   : > { %v5660_v31 = vsel %vm1016_vm0, %v5659_v25, %v5641_v9 }
 0x733   : > { %v5664_v29 = vperm.slane %v5660_v31, %v13339_v60  ;;  %v5665_v15 = vrot.slane %v5658_v56, 4 }
 0x735   : > { %v5666_v17 = vsel %vm1016_vm0, %v5665_v15, %v5652_v42  ;;  %v5673_v14 = vrot.slane %v5664_v29, 4 }
 0x736   : > { %v5670_v3 = vperm.slane %v5666_v17, %v13339_v60 }
 0x738   : > { %v5674_v23 = vsel %vm1016_vm0, %v5670_v3, %v5673_v14  ;;  %v5671_v54 = vrot.slane %v5670_v3, 4 }
 0x739   : > { %v12178_v8 = vpack.i.bf16 %v928_v40, %v5674_v23 }
 0x73a   : > { %v14861_v11 = vsel %vm1016_vm0, %v5671_v54, %v5664_v29 }
 0x73b   : > { %12179 = vrot.lane.b32.xlu2 %v12178_v8, %s12965_s17  ;;  %16288 = vst [vmem:[#allocation52_spill] sm:$0xff] %v14861_v11 }
 0x795   : > { %v14864_v61 = vpop.permute.xlu2 %12179 }
 0x796   : > { %16289 = vst [vmem:[#allocation55_spill] sm:$0xff] %v14864_v61  ;;  %v12182_v52 = vunpack.i.h.bf16 %v14864_v61 }
 0x798   : > { %v5758_v6 = vrot.slane %v12182_v52, 4  ;;  %v5763_v16 = vperm.slane %v12182_v52, %v13331_v49 }
 0x79a   : > { %v5759_v1 = vsel %vm1016_vm0, 0.0, %v5758_v6  ;;  %v5768_v62 = vrot.slane %v5763_v16, 4  ;;  %v5771_v51 = vsel %vm1016_vm0, %v5763_v16, %v5770_v50 }
 0x79b   : > { %v5767_v43 = vperm.slane %v5759_v1, %v13331_v49  ;;  %v5779_v10 = vperm.slane %v5771_v51, %v13339_v60 }
 0x79c   : > { %v5769_v28 = vsel %vm1016_vm0, %v5768_v62, %v5753_v55 }
 0x79d   : > { %v5780_v26 = vrot.slane %v5767_v43, 4  ;;  %v5783_v19 = vsel %vm1016_vm0, %v5767_v43, %v5782_v22  ;;  %v5775_v47 = vperm.slane %v5769_v28, %v13339_v60  ;;  %v5794_v0 = vrot.slane %v5779_v10, 4 }
 0x79e   : > { %v5791_v39 = vperm.slane %v5783_v19, %v13339_v60  ;;  %v5802_v30 = vpack.c.bf16 %v5779_v10, %v5779_v10 }
 0x79f   : > { %v5781_v35 = vsel %vm1016_vm0, %v5780_v26, %v5757_v20  ;;  %v5792_v58 = vrot.slane %v5775_v47, 4  ;;  %v5800_v2 = vpack.c.bf16 %v5775_v47, %v5775_v47  ;;  %v5795_v9 = vsel %vm1016_vm0, 0.0, %v5794_v0 }
 0x7a0   : > { %v5798_v53 = vrot.slane %v5791_v39, 4  ;;  %v5787_v41 = vperm.slane %v5781_v35, %v13339_v60  ;;  %v5806_v45 = vpack.c.bf16 %v5791_v39, %v5791_v39  ;;  %v5803_v37 = vpack.c.bf16 %v5795_v9, %v5795_v9 }
 0x7a1   : > { %v5793_v57 = vsel %vm1016_vm0, 0.0, %v5792_v58 }
 0x7a2   : > { %v5801_v4 = vpack.c.bf16 %v5793_v57, %v5793_v57  ;;  %v5799_v27 = vsel %vm1016_vm0, 0.0, %v5798_v53  ;;  %v5796_v33 = vrot.slane %v5787_v41, 4  ;;  %v5804_v24 = vpack.c.bf16 %v5787_v41, %v5787_v41 }
 0x7a3   : > { %v5807_v44 = vpack.c.bf16 %v5799_v27, %v5799_v27 }
 0x7a4   : > { %12183 = vxpose.binary.xlu0.c.b16.start.end [1/2] (short) (narrow) %v5801_v4, %v5800_v2, 64  ;;  %v5797_v38 = vsel %vm1016_vm0, 0.0, %v5796_v33 }
 0x7a5   : > { %12210 = vxpose.binary.xlu2.c.b16.start.end [1/2] (short) (narrow) %v5807_v44, %v5806_v45, 64  ;;  %v5805_v18 = vpack.c.bf16 %v5797_v38, %v5797_v38 }
 0x7a7   : > { %12201 = vxpose.binary.xlu1.c.b16.start.end [1/2] (short) (narrow) %v5805_v18, %v5804_v24, 64 }
 0x7e4   : > { %12192 = vxpose.binary.xlu0.c.b16.start.end [1/2] (short) (narrow) %v5803_v37, %v5802_v30, 64 }
 0x846   : > { %v12211_v44 = vpop.trf.xlu2 }
 0x847   : > { %v6072_v24 = vshrl.u32 %v12211_v44, 16 }
 0x84e   : > { %v12212_v18 = vpop.trf.xlu2 }
 0x84f   : > { %v6070_v50 = vpack.i.b16 %v12212_v18, %v12211_v44  ;;  %v6073_v51 = vshrl.u32 %v12212_v18, 16 }
 0x850   : > { %v12184_v25 = vpop.trf.xlu0 }
 0x851   : > { %v6048_v42 = vshrl.u32 %v12184_v25, 16  ;;  %v6074_v10 = vpack.i.b16 %v6073_v51, %v6072_v24 }
 0x853   : > { %v12202_v56 = vpop.trf.xlu1 }
 0x854   : > { %v6064_v17 = vshrl.u32 %v12202_v56, 16 }
 0x856   : > { %v12213_v9 = vpop.trf.xlu2 }
 0x857   : > { %v6104_v37 = vshrl.u32 %v12213_v9, 16 }
 0x858   : > { %v12185_v31 = vpop.trf.xlu0 }
 0x859   : > { %v6046_v29 = vpack.i.b16 %v12185_v31, %v12184_v25  ;;  %v6049_v15 = vshrl.u32 %v12185_v31, 16 }
 0x85b   : > { %v6050_v14 = vpack.i.b16 %v6049_v15, %v6048_v42  ;;  %v6174_v3 = vrot.slane %v6046_v29, 4  ;;  %v12203_v7 = vpop.trf.xlu1 }
 0x85c   : > { %v6062_v63 = vpack.i.b16 %v12203_v7, %v12202_v56  ;;  %v6065_v40 = vshrl.u32 %v12203_v7, 16 }
 0x85d   : > { %v6230_v23 = vrot.slane %v6050_v14, 4 }
 0x85e   : > { %v6066_v8 = vpack.i.b16 %v6065_v40, %v6064_v17  ;;  %v6172_v54 = vrot.slane %v6062_v63, 4  ;;  %v14885_v21 = vsel %vm1016_vm0, %v6062_v63, %v6174_v3  ;;  %v12214_v25 = vpop.trf.xlu2  ;;  %v6184_v3 = vrot.slane %v6070_v50, 4 }
 0x85f   : > { %v6102_v56 = vpack.i.b16 %v12214_v25, %v12213_v9  ;;  %v6105_v31 = vshrl.u32 %v12214_v25, 16  ;;  %v6240_v40 = vrot.slane %v6074_v10, 4 }
 0x860   : > { %v14888_v46 = vsel %vm1016_vm0, %v6172_v54, %v6046_v29  ;;  %v6228_v52 = vrot.slane %v6066_v8, 4  ;;  %v14891_v20 = vsel %vm1016_vm0, %v6066_v8, %v6230_v23  ;;  %v12186_v6 = vpop.trf.xlu0 }
 0x861   : > { %v6080_v62 = vshrl.u32 %v12186_v6, 16  ;;  %v6106_v42 = vpack.i.b16 %v6105_v31, %v6104_v37  ;;  %v6183_v31 = vperm.slane %v14885_v21, %v13331_v49 }
 0x862   : > { %v14894_v16 = vsel %vm1016_vm0, %v6228_v52, %v6050_v14 }
 0x863   : > { %v12204_v55 = vpop.trf.xlu1 }
 0x864   : > { %v6096_v28 = vshrl.u32 %v12204_v55, 16 }
 0x868   : > { %v12187_v1 = vpop.trf.xlu0 }
 0x869   : > { %v6078_v22 = vpack.i.b16 %v12187_v1, %v12186_v6  ;;  %v6081_v43 = vshrl.u32 %v12187_v1, 16 }
 0x86b   : > { %v6082_v26 = vpack.i.b16 %v6081_v43, %v6080_v62  ;;  %v6286_v19 = vrot.slane %v6078_v22, 4  ;;  %v12205_v47 = vpop.trf.xlu1 }
 0x86c   : > { %v6094_v39 = vpack.i.b16 %v12205_v47, %v12204_v55  ;;  %v6097_v35 = vshrl.u32 %v12205_v47, 16 }
 0x86d   : > { %v6342_v58 = vrot.slane %v6082_v26, 4 }
 0x86e   : > { %v6098_v53 = vpack.i.b16 %v6097_v35, %v6096_v28  ;;  %v6284_v41 = vrot.slane %v6094_v39, 4  ;;  %v14897_v57 = vsel %vm1016_vm0, %v6094_v39, %v6286_v19  ;;  %v6296_v19 = vrot.slane %v6102_v56, 4 }
 0x86f   : > { %v6352_v35 = vrot.slane %v6106_v42, 4  ;;  %v14956_v21 = vperm.slane %v14897_v57, %v13331_v49 }
 0x870   : > { %v14900_v2 = vsel %vm1016_vm0, %v6284_v41, %v6078_v22  ;;  %v6340_v4 = vrot.slane %v6098_v53, 4  ;;  %v14903_v27 = vsel %vm1016_vm0, %v6098_v53, %v6342_v58  ;;  %v12188_v33 = vpop.trf.xlu0  ;;  %v14920_v22 = vpop.trf.xlu2 }
 0x872   : > { %v14906_v45 = vsel %vm1016_vm0, %v6340_v4, %v6082_v26 }
 0x873   : > { %v12206_v15 = vpop.trf.xlu1 }
 0x878   : > { %v12189_v38 = vpop.trf.xlu0  ;;  %v14925_v4 = vpop.trf.xlu2 }
 0x879   : > { %v14938_v9 = vpack.i.b16 %v12189_v38, %v12188_v33  ;;  %v6113_v37 = vshrl.u32 %v12189_v38, 16 }
 0x87b   : > { %v12207_v43 = vpop.trf.xlu1 }
 0x87c   : > { %v6129_v38 = vshrl.u32 %v12207_v43, 16 }
 0x880   : > { %v14908_v0 = vpop.trf.xlu0  ;;  %v14940_v25 = vpop.trf.xlu2 }
 0x883   : > { %v12208_v44 = vpop.trf.xlu1 }
 0x888   : > { %v14910_v30 = vpop.trf.xlu0 }
 0x890   : > { %v12193_v29 = vpop.trf.xlu0 }
 0x891   : > { %v6056_v14 = vshrl.u32 %v12193_v29, 16 }
 0x898   : > { %v12194_v17 = vpop.trf.xlu0 }
 0x899   : > { %v6054_v7 = vpack.i.b16 %v12194_v17, %v12193_v29  ;;  %v6057_v63 = vshrl.u32 %v12194_v17, 16  ;;  %v6112_v29 = vshrl.u32 %v12188_v33, 16  ;;  %v12209_v17 = vpop.trf.xlu1  ;;  %v6144_v33 = vshrl.u32 %v14908_v0, 16 }
 0x89b   : > { %v6058_v23 = vpack.i.b16 %v6057_v63, %v6056_v14  ;;  %v6185_v8 = vsel %vm1016_vm0, %v6184_v3, %v6054_v7  ;;  %v6186_v54 = vrot.slane %v6054_v7, 4  ;;  %v6128_v14 = vshrl.u32 %v12206_v15, 16 }
 0x89c   : > { %v6145_v3 = vshrl.u32 %v14910_v30, 16  ;;  %v6398_v7 = vrot.slane %v14938_v9, 4  ;;  %v14950_v63 = vpack.i.b16 %v12207_v43, %v12206_v15  ;;  %v6160_v15 = vshrl.u32 %v12208_v44, 16 }
 0x89d   : > { %v6187_v52 = vsel %vm1016_vm0, %v6070_v50, %v6186_v54  ;;  %v14915_v6 = vsel %vm1016_vm0, %v6240_v40, %v6058_v23  ;;  %v6242_v55 = vrot.slane %v6058_v23, 4  ;;  %v6158_v23 = vpack.i.b16 %v12209_v17, %v12208_v44 }
 0x89e   : > { %v6179_v54 = vperm.slane %v14888_v46, %v13331_v49  ;;  %v6161_v43 = vshrl.u32 %v12209_v17, 16  ;;  %v6399_v57 = vsel %vm1016_vm0, %v14950_v63, %v6398_v7  ;;  %v6235_v46 = vperm.slane %v14894_v16, %v13331_v49 }
 0x89f   : > { %v14918_v1 = vsel %vm1016_vm0, %v6074_v10, %v6242_v55  ;;  %v14987_v16 = vperm.slane %v6399_v57, %v13331_v49  ;;  %v6168_v7 = vshrl.u32 %v14940_v25, 16 }
 0x8a0   : > { %v12195_v62 = vpop.trf.xlu0  ;;  %v6198_v44 = vrot.slane %v6179_v54, 4 }
 0x8a1   : > { %v6088_v26 = vshrl.u32 %v12195_v62, 16 }
 0x8a8   : > { %v12196_v28 = vpop.trf.xlu0 }
 0x8a9   : > { %v6086_v47 = vpack.i.b16 %v12196_v28, %v12195_v62  ;;  %v6089_v39 = vshrl.u32 %v12196_v28, 16  ;;  %v6239_v62 = vperm.slane %v14891_v20, %v13331_v49  ;;  %v6146_v28 = vpack.i.b16 %v6145_v3, %v6144_v33 }
 0x8ab   : > { %v6090_v58 = vpack.i.b16 %v6089_v39, %v6088_v26  ;;  %v14923_v53 = vsel %vm1016_vm0, %v6296_v19, %v6086_v47  ;;  %v6298_v41 = vrot.slane %v6086_v47, 4  ;;  %v14964_v19 = vpack.i.b16 %v6129_v38, %v6128_v14 }
 0x8ac   : > { %v14973_v47 = vperm.slane %v14900_v2, %v13331_v49  ;;  %v6508_v39 = vrot.slane %v6158_v23, 4  ;;  %v6566_v2 = vrot.slane %v6146_v28, 4  ;;  %v6266_v14 = vrot.slane %v6239_v62, 4 }
 0x8ad   : > { %v14928_v24 = vsel %vm1016_vm0, %v6102_v56, %v6298_v41  ;;  %v14931_v18 = vsel %vm1016_vm0, %v6352_v35, %v6090_v58  ;;  %v6354_v50 = vrot.slane %v6090_v58, 4  ;;  %v6142_v56 = vpack.i.b16 %v14910_v30, %v14908_v0 }
 0x8ae   : > { %v6210_v30 = vrot.slane %v6183_v31, 4  ;;  %v6191_v0 = vperm.slane %v6185_v8, %v13331_v49  ;;  %v14978_v35 = vperm.slane %v14903_v27, %v13331_v49  ;;  %v6195_v41 = vperm.slane %v6187_v52, %v13331_v49 }
 0x8af   : > { %v14934_v51 = vsel %vm1016_vm0, %v6106_v42, %v6354_v50  ;;  %v14947_v42 = vpack.i.b16 %v6113_v37, %v6112_v29  ;;  %v6510_v55 = vrot.slane %v6142_v56, 4  ;;  %v14984_v8 = vperm.slane %v14906_v45, %v13331_v49  ;;  %v12218_v37 = vpop.trf.xlu2 }
 0x8b0   : > { %v14936_v10 = vpop.trf.xlu0  ;;  %v6162_v50 = vpack.i.b16 %v6161_v43, %v6160_v15  ;;  %v6247_v27 = vperm.slane %v14915_v6, %v13331_v49  ;;  %v14994_v52 = vsel %vm1016_vm0, %v6191_v0, %v6198_v44  ;;  %v6509_v45 = vsel %vm1016_vm0, %v6508_v39, %v6142_v56 }
 0x8b1   : > { %v6454_v26 = vrot.slane %v14947_v42, 4  ;;  %v6511_v58 = vsel %vm1016_vm0, %v6158_v23, %v6510_v55  ;;  %v6254_v38 = vrot.slane %v6235_v46, 4  ;;  %v6169_v33 = vshrl.u32 %v12218_v37, 16 }
 0x8b2   : > { %v14998_v3 = vperm.slane %v6511_v58, %v13331_v49  ;;  %v15002_v23 = vsel %vm1016_vm0, %v6195_v41, %v6210_v30  ;;  %v6251_v6 = vperm.slane %v14918_v1, %v13331_v49  ;;  %v6208_v55 = vrot.slane %v6195_v41, 4 }
 0x8b3   : > { %v6455_v29 = vsel %vm1016_vm0, %v14964_v19, %v6454_v26  ;;  %v6564_v15 = vrot.slane %v6162_v50, 4  ;;  %v6567_v43 = vsel %vm1016_vm0, %v6162_v50, %v6566_v2  ;;  %v6196_v26 = vrot.slane %v6191_v0, 4 }
 0x8b4   : > { %v6166_v56 = vpack.i.b16 %v12218_v37, %v14940_v25  ;;  %v15009_v57 = vsel %vm1016_vm0, %v6251_v6, %v6266_v14  ;;  %v15012_v39 = vsel %vm1016_vm0, %v6208_v55, %v6183_v31  ;;  %v6264_v58 = vrot.slane %v6251_v6, 4 }
 0x8b5   : > { %v15015_v30 = vsel %vm1016_vm0, %v6247_v27, %v6254_v38  ;;  %v15019_v1 = vperm.slane %v6455_v29, %v13331_v49  ;;  %v15022_v41 = vperm.slane %v6509_v45, %v13331_v49  ;;  %v6546_v0 = vrot.slane %v14998_v3, 4 }
 0x8b6   : > { %v6575_v2 = vperm.slane %v6567_v43, %v13331_v49  ;;  %v6170_v31 = vpack.i.b16 %v6169_v33, %v6168_v7  ;;  %v15028_v50 = vsel %vm1016_vm0, %v6264_v58, %v6239_v62  ;;  %v6565_v37 = vsel %vm1016_vm0, %v6564_v15, %v6146_v28 }
 0x8b7   : > { %v6136_v14 = vshrl.u32 %v14920_v22, 16  ;;  %v6120_v29 = vshrl.u32 %v14936_v10, 16  ;;  %v6137_v38 = vshrl.u32 %v14925_v4, 16  ;;  %v6520_v6 = vrot.slane %v6166_v56, 4 }
 0x8b8   : > { %v14952_v40 = vpop.trf.xlu0  ;;  %v15039_v43 = vsel %vm1016_vm0, %v6196_v26, %v6179_v54  ;;  %v6252_v7 = vrot.slane %v6247_v27, 4  ;;  %v15044_v58 = vperm.slane %v6565_v37, %v13331_v49  ;;  %v6576_v59 = vrot.slane %v6170_v31, 4 }
 0x8b9   : > { %v6121_v25 = vshrl.u32 %v14952_v40, 16  ;;  %v15035_v45 = vpack.i.b16 %v14952_v40, %v14936_v10  ;;  %v15054_v26 = vpack.i.b16 %v14925_v4, %v14920_v22  ;;  %v6534_v37 = vrot.slane %v15022_v41, 4 }
 0x8ba   : > { %v15048_v40 = vsel %vm1016_vm0, %v6252_v7, %v6235_v46  ;;  %v6590_v4 = vrot.slane %v15044_v58, 4 }
 0x8bb   : > { %v15041_v62 = vpack.i.b16 %v6121_v25, %v6120_v29  ;;  %v6410_v44 = vrot.slane %v15035_v45, 4 }
 0x8bd   : > { %v6466_v46 = vrot.slane %v15041_v62, 4 }
 0x8c0   : > { %v12199_v17 = vpop.trf.xlu0 }
 0x8c1   : > { %v6152_v33 = vshrl.u32 %v12199_v17, 16 }
 0x8c8   : > { %v12200_v55 = vpop.trf.xlu0 }
 0x8c9   : > { %v6150_v28 = vpack.i.b16 %v12200_v55, %v12199_v17  ;;  %v6153_v15 = vshrl.u32 %v12200_v55, 16  ;;  %v15056_v17 = vpack.i.b16 %v6137_v38, %v6136_v14  ;;  %v6411_v14 = vsel %vm1016_vm0, %v15054_v26, %v6410_v44 }
 0x8cb   : > { %v6154_v20 = vpack.i.b16 %v6153_v15, %v6152_v33  ;;  %v6521_v54 = vsel %vm1016_vm0, %v6520_v6, %v6150_v28  ;;  %v6522_v27 = vrot.slane %v6150_v28, 4 }
 0x8cc   : > { %v15059_v25 = vperm.slane %v6521_v54, %v13331_v49 }
 0x8cd   : > { %v6523_v29 = vsel %vm1016_vm0, %v6166_v56, %v6522_v27  ;;  %v6577_v55 = vsel %vm1016_vm0, %v6576_v59, %v6154_v20  ;;  %v6578_v7 = vrot.slane %v6154_v20, 4  ;;  %v6602_v56 = vrot.slane %v6575_v2, 4 }
 0x8ce   : > { %v6531_v6 = vperm.slane %v6523_v29, %v13331_v49  ;;  %v6583_v33 = vperm.slane %v6577_v55, %v13331_v49  ;;  %v6535_v22 = vsel %vm1016_vm0, %v15059_v25, %v6534_v37  ;;  %v6467_v27 = vsel %vm1016_vm0, %v15056_v17, %v6466_v46 }
 0x8cf   : > { %v6579_v38 = vsel %vm1016_vm0, %v6170_v31, %v6578_v7  ;;  %v15074_v28 = vperm.slane %v6535_v22, %v13339_v60  ;;  %v6307_v29 = vperm.slane %v14928_v24, %v13331_v49  ;;  %v6303_v46 = vperm.slane %v14923_v53, %v13331_v49 }
 0x8d0   : > { %v6591_v59 = vsel %vm1016_vm0, %v6583_v33, %v6590_v4  ;;  %v6547_v20 = vsel %vm1016_vm0, %v6531_v6, %v6546_v0  ;;  %v6587_v15 = vperm.slane %v6579_v38, %v13331_v49  ;;  %v6544_v54 = vrot.slane %v6531_v6, 4 }
 0x8d1   : > { %v6558_v37 = vrot.slane %v15074_v28, 4  ;;  %v15083_v44 = vperm.slane %v6591_v59, %v13339_v60  ;;  %v15086_v31 = vperm.slane %v6547_v20, %v13339_v60  ;;  %v15099_v38 = vperm.slane %v6411_v14, %v13331_v49 }
 0x8d2   : > { %v6603_v55 = vsel %vm1016_vm0, %v6587_v15, %v6602_v56  ;;  %v6545_v0 = vsel %vm1016_vm0, %v6544_v54, %v14998_v3  ;;  %v6600_v7 = vrot.slane %v6587_v15, 4  ;;  %v15106_v3 = vperm.slane %v6467_v27, %v13331_v49 }
 0x8d3   : > { %v6614_v6 = vrot.slane %v15083_v44, 4  ;;  %v6562_v22 = vrot.slane %v15086_v31, 4  ;;  %v6611_v4 = vperm.slane %v6603_v55, %v13339_v60  ;;  %v15102_v24 = vperm.slane %v6545_v0, %v13339_v60 }
 0x8d4   : > { %v6601_v56 = vsel %vm1016_vm0, %v6600_v7, %v6575_v2  ;;  %v6559_v59 = vsel %vm1016_vm0, 0, %v6558_v37  ;;  %v6359_v14 = vperm.slane %v14931_v18, %v13331_v49  ;;  %v16290_v55 = vrot.slane %v14956_v21, 4 }
 0x8d5   : > { %v6615_v53 = vsel %vm1016_vm0, 0, %v6614_v6  ;;  %v6618_v20 = vrot.slane %v6611_v4, 4  ;;  %v15111_v15 = vperm.slane %v6601_v56, %v13339_v60  ;;  %v6560_v54 = vrot.slane %v15102_v24, 4 }
 0x8d6   : > { %12222 = vxpose.binary.xlu2.c.b16.start.end [1/2] (short) (narrow) %v6615_v53, %v6559_v59, 16  ;;  %v15119_v2 = vsel %vm1016_vm0, %v6307_v29, %v16290_v55  ;;  %v6310_v27 = vrot.slane %v14973_v47, 4  ;;  %v6563_v37 = vsel %vm1016_vm0, 0, %v6562_v22  ;;  %v6490_v6 = vrot.slane %v15019_v1, 4 }
 0x8d7   : > { %v6619_v0 = vsel %vm1016_vm0, 0, %v6618_v20  ;;  %v6616_v7 = vrot.slane %v15111_v15, 4  ;;  %v6308_v56 = vrot.slane %v6303_v46, 4  ;;  %v16291_v18 = vrot.slane %v14987_v16, 4 }
 0x8d8   : > { %12219 = vxpose.binary.xlu0.c.b16.start.end [1/2] (short) (narrow) %v6619_v0, %v6563_v37, 16  ;;  %v6363_v53 = vperm.slane %v14934_v51, %v13331_v49  ;;  %v6366_v55 = vrot.slane %v14984_v8, 4  ;;  %v6532_v22 = vrot.slane %v15059_v25, 4  ;;  %v6561_v20 = vsel %vm1016_vm0, 0, %v6560_v54 }
 0x8d9   : > { %v6435_v59 = vsel %vm1016_vm0, %v15099_v38, %v16291_v18  ;;  %v6617_v10 = vsel %vm1016_vm0, 0, %v6616_v7  ;;  %v6491_v11 = vsel %vm1016_vm0, %v15106_v3, %v6490_v6  ;;  %v6588_v37 = vrot.slane %v6583_v33, 4 }
 0x8da   : > { %12225 = vxpose.binary.xlu1.c.b16.start.end [1/2] (short) (narrow) %v6617_v10, %v6561_v20, 16  ;;  %v16292_v0 = vrot.slane %v14978_v35, 4  ;;  %v15144_v51 = vsel %vm1016_vm0, %v6303_v46, %v6310_v27  ;;  %v15147_v61 = vsel %vm1016_vm0, %v6359_v14, %v6366_v55  ;;  %v6320_v25 = vrot.slane %v6307_v29, 4 }
 0x8db   : > { %v6443_v54 = vperm.slane %v6435_v59, %v13339_v60  ;;  %v6499_v7 = vperm.slane %v6491_v11, %v13339_v60  ;;  %v6376_v48 = vrot.slane %v6363_v53, 4  ;;  %v6533_v10 = vsel %vm1016_vm0, %v6532_v22, %v15022_v41 }
 0x8dc   : > { %v15141_v18 = vsel %vm1016_vm0, %v6363_v53, %v16292_v0  ;;  %v6589_v33 = vsel %vm1016_vm0, %v6588_v37, %v15044_v58  ;;  %v15157_v6 = vsel %vm1016_vm0, %v6320_v25, %v14956_v21  ;;  %v15161_v46 = vsel %vm1016_vm0, %v6308_v56, %v14973_v47 }
 0x8dd   : > { %v15165_v29 = vsel %vm1016_vm0, %v6376_v48, %v14978_v35  ;;  %v6396_v11 = vrot.slane %v14950_v63, 4  ;;  %v6452_v27 = vrot.slane %v14964_v19, 4  ;;  %v6364_v41 = vrot.slane %v6359_v14, 4 }
 0x8de   : > { %v6450_v59 = vrot.slane %v6443_v54, 4  ;;  %v6506_v53 = vrot.slane %v6499_v7, 4  ;;  %v6539_v58 = vperm.slane %v6533_v10, %v13339_v60  ;;  %v6595_v21 = vperm.slane %v6589_v33, %v13339_v60 }
 0x8df   : > { %v15173_v55 = vsel %vm1016_vm0, %v6364_v41, %v14984_v8  ;;  %v6397_v47 = vsel %vm1016_vm0, %v6396_v11, %v14938_v9  ;;  %v6453_v48 = vsel %vm1016_vm0, %v6452_v27, %v14947_v42  ;;  %v6408_v63 = vrot.slane %v15054_v26, 4 }
 0x8e0   : > { %v6464_v19 = vrot.slane %v15056_v17, 4  ;;  %v6451_v35 = vsel %vm1016_vm0, 0, %v6450_v59  ;;  %v6507_v14 = vsel %vm1016_vm0, 0, %v6506_v53  ;;  %v6556_v56 = vrot.slane %v6539_v58, 4 }
 0x8e1   : > { %v6612_v22 = vrot.slane %v6595_v21, 4  ;;  %v6409_v8 = vsel %vm1016_vm0, %v6408_v63, %v15035_v45  ;;  %v6403_v20 = vperm.slane %v6397_v47, %v13331_v49  ;;  %v6459_v42 = vperm.slane %v6453_v48, %v13331_v49 }
 0x8e2   : > { %v6465_v9 = vsel %vm1016_vm0, %v6464_v19, %v15041_v62  ;;  %v6557_v26 = vsel %vm1016_vm0, 0, %v6556_v56  ;;  %v6415_v37 = vperm.slane %v6409_v8, %v13331_v49  ;;  %v6432_v27 = vrot.slane %v15099_v38, 4 }
 0x8e3   : > { %v6613_v17 = vsel %vm1016_vm0, 0, %v6612_v22  ;;  %v6471_v0 = vperm.slane %v6465_v9, %v13331_v49  ;;  %v6422_v25 = vrot.slane %v6403_v20, 4  ;;  %v6478_v45 = vrot.slane %v6459_v42, 4 }
 0x8e4   : > { %v6488_v41 = vrot.slane %v15106_v3, 4  ;;  %v6433_v47 = vsel %vm1016_vm0, %v6432_v27, %v14987_v16  ;;  %v6420_v38 = vrot.slane %v6415_v37, 4  ;;  %v6331_v56 = vperm.slane %v15119_v2, %v13339_v60 }
 0x8e5   : > { %v6423_v10 = vsel %vm1016_vm0, %v6415_v37, %v6422_v25  ;;  %v6479_v62 = vsel %vm1016_vm0, %v6471_v0, %v6478_v45  ;;  %v6476_v3 = vrot.slane %v6471_v0, 4  ;;  %v6319_v2 = vperm.slane %v15144_v51, %v13339_v60 }
 0x8e6   : > { %12231 = vxpose.binary.xlu2.c.b16.start.end [1/2] (short) (narrow) %v6507_v14, %v6451_v35, 16  ;;  %v6431_v33 = vperm.slane %v6423_v10, %v13339_v60  ;;  %v6487_v11 = vperm.slane %v6479_v62, %v13339_v60  ;;  %v6489_v48 = vsel %vm1016_vm0, %v6488_v41, %v15019_v1  ;;  %v6338_v8 = vrot.slane %v6331_v56, 4 }
 0x8e7   : > { %v6421_v16 = vsel %vm1016_vm0, %v6420_v38, %v6403_v20  ;;  %v6477_v35 = vsel %vm1016_vm0, %v6476_v3, %v6459_v42  ;;  %v6327_v37 = vperm.slane %v15157_v6, %v13339_v60  ;;  %v6383_v0 = vperm.slane %v15165_v29, %v13339_v60 }
 0x8e8   : > { %12228 = vxpose.binary.xlu0.c.b16.start.end [1/2] (short) (narrow) %v6611_v4, %v15086_v31, 16  ;;  %v6446_v31 = vrot.slane %v6431_v33, 4  ;;  %v6502_v4 = vrot.slane %v6487_v11, 4  ;;  %v6427_v1 = vperm.slane %v6421_v16, %v13339_v60  ;;  %v6483_v14 = vperm.slane %v6477_v35, %v13339_v60 }
 0x8e9   : > { %v6339_v20 = vsel %vm1016_vm0, 0, %v6338_v8  ;;  %v6336_v10 = vrot.slane %v6327_v37, 4  ;;  %v6392_v62 = vrot.slane %v6383_v0, 4  ;;  %v6275_v6 = vperm.slane %v15009_v57, %v13339_v60 }
 0x8ea   : > { %12234 = vxpose.binary.xlu1.c.b16.start.end [1/2] (short) (narrow) %v6613_v17, %v6557_v26, 16  ;;  %v6447_v59 = vsel %vm1016_vm0, 0, %v6446_v31  ;;  %v6503_v53 = vsel %vm1016_vm0, 0, %v6502_v4  ;;  %v6500_v22 = vrot.slane %v6483_v14, 4  ;;  %v6334_v26 = vrot.slane %v6319_v2, 4 }
 0x8eb   : > { %v6337_v51 = vsel %vm1016_vm0, 0, %v6336_v10  ;;  %v6315_v27 = vperm.slane %v15161_v46, %v13339_v60  ;;  %v6371_v41 = vperm.slane %v15173_v55, %v13339_v60  ;;  %v6207_v46 = vperm.slane %v14994_v52, %v13339_v60 }
 0x8ec   : > { %v6335_v25 = vsel %vm1016_vm0, 0, %v6334_v26  ;;  %v6263_v55 = vperm.slane %v15015_v30, %v13339_v60  ;;  %v6203_v52 = vperm.slane %v15039_v43, %v13339_v60  ;;  %v6259_v30 = vperm.slane %v15048_v40, %v13339_v60 }
 0x8f6   : > { %12240 = vxpose.binary.xlu2.c.b16.start.end [1/2] (short) (narrow) %v15111_v15, %v15102_v24, 16  ;;  %v6439_v24 = vperm.slane %v6433_v47, %v13339_v60  ;;  %v6495_v15 = vperm.slane %v6489_v48, %v13339_v60  ;;  %v6215_v47 = vperm.slane %v15012_v39, %v13339_v60 }
 0x8f7   : > { %v6271_v48 = vperm.slane %v15028_v50, %v13339_v60  ;;  %v6220_v50 = vrot.slane %v6203_v52, 4 }
 0x8f8   : > { %12237 = vxpose.binary.xlu0.c.b16.start.end [1/2] (short) (narrow) %v15083_v44, %v15074_v28, 16  ;;  %v6448_v28 = vrot.slane %v6439_v24, 4  ;;  %v6504_v44 = vrot.slane %v6495_v15, 4 }
 0x8f9   : > { %v6221_v16 = vsel %vm1016_vm0, 0, %v6220_v50 }
 0x8fa   : > { %12243 = vxpose.binary.xlu1.c.b16.start.end [1/2] (short) (narrow) %v6503_v53, %v6447_v59, 16  ;;  %v6449_v63 = vsel %vm1016_vm0, 0, %v6448_v28  ;;  %v6505_v19 = vsel %vm1016_vm0, 0, %v6504_v44  ;;  %v6332_v59 = vrot.slane %v6315_v27, 4  ;;  %v6222_v28 = vrot.slane %v6207_v46, 4 }
 0x8fb   : > { %v6278_v44 = vrot.slane %v6263_v55, 4 }
 0x8fc   : > { %v6333_v57 = vsel %vm1016_vm0, 0, %v6332_v59  ;;  %v6223_v39 = vsel %vm1016_vm0, 0, %v6222_v28 }
 0x906   : > { %12249 = vxpose.binary.xlu2.c.b16.start.end [1/2] (short) (narrow) %v6499_v7, %v6443_v54, 16  ;;  %v6387_v54 = vperm.slane %v15141_v18, %v13339_v60  ;;  %v6444_v7 = vrot.slane %v6427_v1, 4  ;;  %v6375_v18 = vperm.slane %v15147_v61, %v13339_v60  ;;  %v6393_v61 = vsel %vm1016_vm0, 0, %v6392_v62 }
 0x908   : > { %12246 = vxpose.binary.xlu0.c.b16.start.end [1/2] (short) (narrow) %v6505_v19, %v6449_v63, 16  ;;  %v6394_v9 = vrot.slane %v6387_v54, 4  ;;  %v6390_v17 = vrot.slane %v6375_v18, 4  ;;  %v6279_v63 = vsel %vm1016_vm0, 0, %v6278_v44  ;;  %v6276_v19 = vrot.slane %v6259_v30, 4 }
 0x90a   : > { %12252 = vxpose.binary.xlu1.c.b16.start.end [1/2] (short) (narrow) %v6595_v21, %v6539_v58, 16  ;;  %v6445_v58 = vsel %vm1016_vm0, 0, %v6444_v7  ;;  %v6501_v21 = vsel %vm1016_vm0, 0, %v6500_v22  ;;  %v6395_v42 = vsel %vm1016_vm0, 0, %v6394_v9  ;;  %v6391_v45 = vsel %vm1016_vm0, 0, %v6390_v17 }
 0x90b   : > { %v6277_v35 = vsel %vm1016_vm0, 0, %v6276_v19 }
 0x916   : > { %12258 = vxpose.binary.xlu2.c.b16.start.end [1/2] (short) (narrow) %v6501_v21, %v6445_v58, 16 }
 0x918   : > { %12255 = vxpose.binary.xlu0.c.b16.start.end [1/2] (short) (narrow) %v6395_v42, %v6339_v20, 16 }
 0x91a   : > { %12261 = vxpose.binary.xlu1.c.b16.start.end [1/2] (short) (narrow) %v6487_v11, %v6431_v33, 16  ;;  %v6219_v33 = vperm.slane %v15002_v23, %v13339_v60  ;;  %v6282_v11 = vrot.slane %v6275_v6, 4  ;;  %v6388_v23 = vrot.slane %v6371_v41, 4 }
 0x91c   : > { %v6226_v29 = vrot.slane %v6219_v33, 4  ;;  %v6283_v4 = vsel %vm1016_vm0, 0, %v6282_v11  ;;  %v6389_v53 = vsel %vm1016_vm0, 0, %v6388_v23 }
 0x91e   : > { %v6227_v31 = vsel %vm1016_vm0, 0, %v6226_v29 }
 0x926   : > { %12267 = vxpose.binary.xlu2.c.b16.start.end [1/2] (short) (narrow) %v6391_v45, %v6335_v25, 16 }
 0x928   : > { %12264 = vxpose.binary.xlu0.c.b16.start.end [1/2] (short) (narrow) %v6495_v15, %v6439_v24, 16  ;;  %v6224_v24 = vrot.slane %v6215_v47, 4  ;;  %v6280_v15 = vrot.slane %v6271_v48, 4 }
 0x92a   : > { %12270 = vxpose.binary.xlu1.c.b16.start.end [1/2] (short) (narrow) %v6393_v61, %v6337_v51, 16  ;;  %v6225_v38 = vsel %vm1016_vm0, 0, %v6224_v24  ;;  %v6281_v3 = vsel %vm1016_vm0, 0, %v6280_v15 }
 0x936   : > { %12276 = vxpose.binary.xlu2.c.b16.start.end [1/2] (short) (narrow) %v6483_v14, %v6427_v1, 16  ;;  %v5832_v1 = vrot.slane %v14767_v34, 4 }
 0x938   : > { %12273 = vxpose.binary.xlu0.c.b16.start.end [1/2] (short) (narrow) %v6387_v54, %v6331_v56, 16  ;;  %v5833_v14 = vsel %vm1016_vm0, %v5832_v1, %v14758_v13 }
 0x939   : > { %v5839_v43 = vperm.slane %v5833_v14, %v13339_v60 }
 0x93a   : > { %12279 = vxpose.binary.xlu1.c.b16.start.end [1/2] (short) (narrow) %v6283_v4, %v6227_v31, 16 }
 0x93b   : > { %v5856_v40 = vrot.slane %v5839_v43, 4  ;;  %v5864_v8 = vpack.c.bf16 %v5839_v43, %v5839_v43 }
 0x93d   : > { %v5857_v7 = vsel %vm1016_vm0, 0.0, %v5856_v40 }
 0x93e   : > { %v5865_v9 = vpack.c.bf16 %v5857_v7, %v5857_v7 }
 0x946   : > { %12285 = vxpose.binary.xlu2.c.b16.start.end [1/2] (short) (narrow) %v6375_v18, %v6319_v2, 16 }
 0x948   : > { %12282 = vxpose.binary.xlu0.c.b16.start.end [1/2] (short) (narrow) %v6389_v53, %v6333_v57, 16 }
 0x94a   : > { %12288 = vxpose.binary.xlu1.c.b16.start.end [1/2] (short) (narrow) %v6383_v0, %v6327_v37, 16 }
 0x956   : > { %12294 = vxpose.binary.xlu2.c.b16.start.end [1/2] (short) (narrow) %v6281_v3, %v6225_v38, 16 }
 0x958   : > { %12291 = vxpose.binary.xlu0.c.b16.start.end [1/2] (short) (narrow) %v6279_v63, %v6223_v39, 16  ;;  %v5843_v39 = vperm.slane %v14771_v36, %v13339_v60 }
 0x95a   : > { %12297 = vxpose.binary.xlu1.c.b16.start.end [1/2] (short) (narrow) %v6275_v6, %v6219_v33, 16 }
 0x966   : > { %12303 = vxpose.binary.xlu2.c.b16.start.end [1/2] (short) (narrow) %v6277_v35, %v6221_v16, 16 }
 0x968   : > { %12300 = vxpose.binary.xlu0.c.b16.start.end [1/2] (short) (narrow) %v6371_v41, %v6315_v27, 16 }
 0x96a   : > { %12306 = vxpose.binary.xlu1.c.b16.start.end [1/2] (short) (narrow) %v6263_v55, %v6207_v46, 16 }
 0x976   : > { %12312 = vxpose.binary.xlu2.c.b16.start.end [1/2] (short) (narrow) %v6259_v30, %v6203_v52, 16 }
 0x977   : > { %v12223_v56 = vpop.trf.xlu2 }
 0x978   : > { %12309 = vxpose.binary.xlu0.c.b16.start.end [1/2] (short) (narrow) %v6271_v48, %v6215_v47, 16  ;;  %v7878_v29 = vrot.slane %v12223_v56, 4  ;;  %v5858_v56 = vrot.slane %v5843_v39, 4 }
 0x97f   : > { %v12224_v54 = vpop.trf.xlu2 }
 0x980   : > { %v7916_v24 = vrot.slane %v12224_v54, 4 }
 0x984   : > { %v12220_v22 = vpop.trf.xlu0 }
 0x985   : > { %v7890_v62 = vrot.slane %v12220_v22, 4 }
 0x986   : > { %v12226_v58 = vpop.trf.xlu1  ;;  %12315 = vxpose.binary.xlu2.c.b16.start.end [1/2] (short) (narrow) %v5865_v9, %v5864_v8, 64 }
 0x987   : > { %v15273_v21 = vpop.trf.xlu2  ;;  %v7891_v11 = vsel %vm1016_vm0, %v7890_v62, %v12226_v58  ;;  %v5859_v58 = vsel %vm1016_vm0, 0.0, %v5858_v56 }
 0x988   : > { %v7895_v59 = vperm.slane %v7891_v11, %v13331_v49 }
 0x98a   : > { %v7902_v44 = vrot.slane %v7895_v59, 4 }
 0x98c   : > { %v12221_v34 = vpop.trf.xlu0 }
 0x98d   : > { %v7928_v61 = vrot.slane %v12221_v34, 4 }
 0x98e   : > { %v12227_v20 = vpop.trf.xlu1 }
 0x98f   : > { %v15275_v42 = vpop.trf.xlu2  ;;  %v7929_v4 = vsel %vm1016_vm0, %v7928_v61, %v12227_v20 }
 0x990   : > { %v7933_v47 = vperm.slane %v7929_v4, %v13331_v49  ;;  %v7814_v4 = vrot.slane %v15273_v21, 4 }
 0x992   : > { %v7940_v52 = vrot.slane %v7933_v47, 4 }
 0x994   : > { %v12229_v13 = vpop.trf.xlu0 }
 0x995   : > { %v7884_v33 = vrot.slane %v12229_v13, 4 }
 0x996   : > { %v12235_v2 = vpop.trf.xlu1 }
 0x997   : > { %v12241_v18 = vpop.trf.xlu2  ;;  %v7879_v27 = vsel %vm1016_vm0, %v7878_v29, %v12235_v2 }
 0x998   : > { %v7885_v41 = vsel %vm1016_vm0, %v7884_v33, %v12241_v18  ;;  %v7883_v48 = vperm.slane %v7879_v27, %v13331_v49 }
 0x999   : > { %v7889_v46 = vperm.slane %v7885_v41, %v13331_v49 }
 0x99a   : > { %v7896_v30 = vrot.slane %v7883_v48, 4 }
 0x99b   : > { %v7903_v50 = vsel %vm1016_vm0, %v7902_v44, %v7889_v46 }
 0x99c   : > { %v12230_v26 = vpop.trf.xlu0  ;;  %v7907_v43 = vperm.slane %v7903_v50, %v13339_v60 }
 0x99d   : > { %v7922_v31 = vrot.slane %v12230_v26, 4 }
 0x99e   : > { %v12236_v17 = vpop.trf.xlu1  ;;  %v7908_v34 = vrot.slane %v7907_v43, 4 }
 0x99f   : > { %v12242_v37 = vpop.trf.xlu2  ;;  %v7917_v63 = vsel %vm1016_vm0, %v7916_v24, %v12236_v17  ;;  %v5866_v17 = vpack.c.bf16 %v5843_v39, %v5843_v39  ;;  %v7852_v24 = vrot.slane %v15275_v42, 4 }
 0x9a0   : > { %v7923_v57 = vsel %vm1016_vm0, %v7922_v31, %v12242_v37  ;;  %v7921_v19 = vperm.slane %v7917_v63, %v13331_v49  ;;  %v5867_v37 = vpack.c.bf16 %v5859_v58, %v5859_v58 }
 0x9a1   : > { %v7927_v38 = vperm.slane %v7923_v57, %v13331_v49 }
 0x9a2   : > { %v7934_v8 = vrot.slane %v7921_v19, 4 }
 0x9a3   : > { %v7941_v16 = vsel %vm1016_vm0, %v7940_v52, %v7927_v38 }
 0x9a4   : > { %v12238_v0 = vpop.trf.xlu0  ;;  %v7945_v22 = vperm.slane %v7941_v16, %v13339_v60 }
 0x9a5   : > { %v7872_v53 = vrot.slane %v12238_v0, 4 }
 0x9a6   : > { %v15277_v25 = vpop.trf.xlu1  ;;  %v7946_v18 = vrot.slane %v7945_v22, 4 }
 0x9a7   : > { %v15279_v45 = vpop.trf.xlu2  ;;  %v7802_v59 = vrot.slane %v15277_v25, 4 }
 0x9ac   : > { %v12239_v10 = vpop.trf.xlu0 }
 0x9ad   : > { %v7910_v14 = vrot.slane %v12239_v10, 4 }
 0x9ae   : > { %v15281_v51 = vpop.trf.xlu1 }
 0x9af   : > { %v15283_v6 = vpop.trf.xlu2  ;;  %v7840_v21 = vrot.slane %v15281_v51, 4 }
 0x9b0   : > { %v7846_v52 = vrot.slane %v15283_v6, 4 }
 0x9b4   : > { %v12247_v23 = vpop.trf.xlu0 }
 0x9b5   : > { %v7815_v57 = vsel %vm1016_vm0, %v7814_v4, %v12247_v23 }
 0x9b6   : > { %v12253_v55 = vpop.trf.xlu1  ;;  %v7819_v47 = vperm.slane %v7815_v57, %v13331_v49  ;;  %v5812_v57 = vrot.slane %v16283_v12, 4 }
 0x9b7   : > { %v7873_v15 = vsel %vm1016_vm0, %v7872_v53, %v12253_v55  ;;  %v12259_v28 = vpop.trf.xlu2  ;;  %v7808_v53 = vrot.slane %v15279_v45, 4 }
 0x9b8   : > { %v7877_v3 = vperm.slane %v7873_v15, %v13331_v49  ;;  %v7803_v48 = vsel %vm1016_vm0, %v7802_v59, %v12259_v28  ;;  %v7826_v25 = vrot.slane %v7819_v47, 4 }
 0x9b9   : > { %v7807_v23 = vperm.slane %v7803_v48, %v13331_v49 }
 0x9ba   : > { %v7897_v35 = vsel %vm1016_vm0, %v7896_v30, %v7877_v3 }
 0x9bb   : > { %v7901_v7 = vperm.slane %v7897_v35, %v13339_v60  ;;  %v7820_v30 = vrot.slane %v7807_v23, 4 }
 0x9bc   : > { %v12248_v1 = vpop.trf.xlu0 }
 0x9bd   : > { %v7909_v13 = vsel %vm1016_vm0, %v7908_v34, %v7901_v7  ;;  %v7853_v45 = vsel %vm1016_vm0, %v7852_v24, %v12248_v1 }
 0x9be   : > { %v12254_v40 = vpop.trf.xlu1  ;;  %v7976_v61 = vshrl.u32 %v7909_v13, 16  ;;  %v7857_v63 = vperm.slane %v7853_v45, %v13331_v49  ;;  %v12155_v45 = vunpack.i.l.bf16 %v14760_v5 }
 0x9bf   : > { %v7911_v36 = vsel %vm1016_vm0, %v7910_v14, %v12254_v40  ;;  %v12260_v54 = vpop.trf.xlu2 }
 0x9c0   : > { %v7915_v9 = vperm.slane %v7911_v36, %v13331_v49  ;;  %v7841_v51 = vsel %vm1016_vm0, %v7840_v21, %v12260_v54  ;;  %v7864_v56 = vrot.slane %v7857_v63, 4  ;;  %v5694_v63 = vrot.slane %v12155_v45, 4 }
 0x9c1   : > { %v7845_v35 = vperm.slane %v7841_v51, %v13331_v49 }
 0x9c2   : > { %v7935_v20 = vsel %vm1016_vm0, %v7934_v8, %v7915_v9 }
 0x9c3   : > { %v7939_v2 = vperm.slane %v7935_v20, %v13339_v60  ;;  %v7858_v8 = vrot.slane %v7845_v35, 4 }
 0x9c4   : > { %v15313_v26 = vpop.trf.xlu0 }
 0x9c5   : > { %v7947_v0 = vsel %vm1016_vm0, %v7946_v18, %v7939_v2 }
 0x9c6   : > { %v12262_v10 = vpop.trf.xlu1  ;;  %12324 = vxpose.binary.xlu2.c.b16.start.end [1/2] (short) (narrow) %v5867_v37, %v5866_v17, 64  ;;  %v7974_v62 = vpack.i.b16 %v7947_v0, %v7909_v13  ;;  %v7977_v33 = vshrl.u32 %v7947_v0, 16  ;;  %v16293_v0 = vunpack.i.h.bf16 %v14760_v5 }
 0x9c7   : > { %v15316_v29 = vpop.trf.xlu2  ;;  %v7796_v46 = vrot.slane %v12262_v10, 4 }
 0x9c8   : > { %v7978_v11 = vpack.i.b16 %v7977_v33, %v7976_v61  ;;  %7987 = vmatpush.bf16.msrb.mxu2 %v7974_v62  ;;  %v5822_v10 = vrot.slane %v16293_v0, 4 }
 0x9ca   : > { %8003 = vmatpush.bf16.msra.mxu3 %v7978_v11 }
 0x9cc   : > { %v15318_v31 = vpop.trf.xlu0 }
 0x9ce   : > { %v12263_v27 = vpop.trf.xlu1 }
 0x9cf   : > { %v15321_v41 = vpop.trf.xlu2  ;;  %v7834_v50 = vrot.slane %v12263_v27, 4  ;;  %v5823_v27 = vsel %vm1016_vm0, 0.0, %v5822_v10 }
 0x9d4   : > { %v12265_v55 = vpop.trf.xlu0 }
 0x9d5   : > { %v7809_v15 = vsel %vm1016_vm0, %v7808_v53, %v12265_v55  ;;  %v15369_v53 = vperm.slane %v5823_v27, %v13331_v49 }
 0x9d6   : > { %v7813_v44 = vperm.slane %v7809_v15, %v13331_v49  ;;  %v15332_v38 = vpop.trf.xlu1 }
 0x9d7   : > { %v12277_v3 = vpop.trf.xlu2  ;;  %v5844_v55 = vrot.slane %v15369_v53, 4 }
 0x9d8   : > { %v7797_v28 = vsel %vm1016_vm0, %v7796_v46, %v12277_v3  ;;  %v7827_v39 = vsel %vm1016_vm0, %v7826_v25, %v7813_v44  ;;  %v5813_v46 = vsel %vm1016_vm0, 0.0, %v5812_v57 }
 0x9d9   : > { %v7801_v42 = vperm.slane %v7797_v28, %v13331_v49  ;;  %v7831_v16 = vperm.slane %v7827_v39, %v13339_v60  ;;  %v15378_v24 = vperm.slane %v5813_v46, %v13331_v49 }
 0x9db   : > { %v7821_v1 = vsel %vm1016_vm0, %v7820_v30, %v7801_v42  ;;  %v7832_v22 = vrot.slane %v7831_v16, 4  ;;  %v5845_v44 = vsel %vm1016_vm0, %v5844_v55, %v15378_v24  ;;  %v5684_v42 = vrot.slane %v16284_v32, 4 }
 0x9dc   : > { %v12266_v19 = vpop.trf.xlu0  ;;  %v7825_v7 = vperm.slane %v7821_v1, %v13339_v60  ;;  %v5851_v25 = vperm.slane %v5845_v44, %v13339_v60  ;;  %v5695_v16 = vsel %vm1016_vm0, 0.0, %v5694_v63 }
 0x9dd   : > { %v7847_v14 = vsel %vm1016_vm0, %v7846_v52, %v12266_v19  ;;  %v5685_v52 = vsel %vm1016_vm0, 0.0, %v5684_v42 }
 0x9de   : > { %v7851_v43 = vperm.slane %v7847_v14, %v13331_v49  ;;  %v15347_v40 = vpop.trf.xlu1  ;;  %v7833_v2 = vsel %vm1016_vm0, %v7832_v22, %v7825_v7  ;;  %v5860_v3 = vrot.slane %v5851_v25, 4  ;;  %v5693_v5 = vperm.slane %v5685_v52, %v13331_v49 }
 0x9df   : > { %v12278_v36 = vpop.trf.xlu2  ;;  %v7968_v33 = vshrl.u32 %v7833_v2, 16  ;;  %v5703_v14 = vperm.slane %v5695_v16, %v13331_v49  ;;  %v7738_v22 = vrot.slane %v15313_v26, 4 }
 0x9e0   : > { %v7865_v54 = vsel %vm1016_vm0, %v7864_v56, %v7851_v43  ;;  %v7835_v6 = vsel %vm1016_vm0, %v7834_v50, %v12278_v36  ;;  %v5861_v51 = vsel %vm1016_vm0, 0.0, %v5860_v3  ;;  %v5868_v50 = vpack.c.bf16 %v5851_v25, %v5851_v25 }
 0x9e1   : > { %v7839_v9 = vperm.slane %v7835_v6, %v13331_v49  ;;  %v7869_v58 = vperm.slane %v7865_v54, %v13339_v60  ;;  %v5869_v19 = vpack.c.bf16 %v5861_v51, %v5861_v51  ;;  %v5689_v56 = vperm.slane %v16284_v32, %v13331_v49 }
 0x9e2   : > { %v5699_v43 = vperm.slane %v12155_v45, %v13331_v49  ;;  %v5718_v36 = vrot.slane %v5693_v5, 4  ;;  %v5716_v54 = vrot.slane %v5703_v14, 4  ;;  %v7739_v32 = vsel %vm1016_vm0, %v7738_v22, %v15332_v38 }
 0x9e3   : > { %v7859_v34 = vsel %vm1016_vm0, %v7858_v8, %v7839_v9  ;;  %v7870_v20 = vrot.slane %v7869_v58, 4  ;;  %v5706_v8 = vrot.slane %v5689_v56, 4 }
 0x9e4   : > { %v15355_v13 = vpop.trf.xlu0  ;;  %v7863_v18 = vperm.slane %v7859_v34, %v13339_v60  ;;  %v5719_v7 = vsel %vm1016_vm0, %v5703_v14, %v5718_v36  ;;  %v5704_v9 = vrot.slane %v5699_v43, 4  ;;  %v7726_v34 = vrot.slane %v15316_v29, 4 }
 0x9e5   : > { %v5717_v0 = vsel %vm1016_vm0, %v5716_v54, %v5693_v5  ;;  %v5727_v26 = vperm.slane %v5719_v7, %v13339_v60 }
 0x9e6   : > { %v15359_v17 = vpop.trf.xlu1  ;;  %v7871_v37 = vsel %vm1016_vm0, %v7870_v20, %v7863_v18  ;;  %v7776_v20 = vrot.slane %v15318_v31, 4  ;;  %v5705_v38 = vsel %vm1016_vm0, %v5704_v9, %v5689_v56 }
 0x9e7   : > { %v15364_v62 = vpop.trf.xlu2  ;;  %v7966_v61 = vpack.i.b16 %v7871_v37, %v7833_v2  ;;  %v7969_v11 = vshrl.u32 %v7871_v37, 16  ;;  %v7732_v2 = vrot.slane %v15355_v13, 4  ;;  %v5707_v37 = vsel %vm1016_vm0, %v5699_v43, %v5706_v8 }
 0x9e8   : > { %v7777_v10 = vsel %vm1016_vm0, %v7776_v20, %v15347_v40  ;;  %v7743_v13 = vperm.slane %v7739_v32, %v13331_v49  ;;  %v15429_v27 = vperm.slane %v5707_v37, %v13339_v60  ;;  %v15435_v55 = vperm.slane %v5705_v38, %v13339_v60 }
 0x9e9   : > { %7988 = vmatpush.bf16.msrb.mxu2 %v7966_v61  ;;  %v7970_v4 = vpack.i.b16 %v7969_v11, %v7968_v33  ;;  %v5723_v33 = vperm.slane %v5717_v0, %v13339_v60  ;;  %v7720_v11 = vrot.slane %v15364_v62, 4  ;;  %v7781_v40 = vperm.slane %v7777_v10, %v13331_v49 }
 0x9ea   : > { %v7750_v44 = vrot.slane %v7743_v13, 4  ;;  %v5730_v63 = vrot.slane %v15429_v27, 4  ;;  %v7662_v43 = vrot.slane %v15359_v17, 4  ;;  %v5742_v22 = vpack.c.bf16 %v5727_v26, %v5727_v26 }
 0x9eb   : > { %8004 = vmatpush.bf16.msra.mxu3 %v7970_v4  ;;  %v5732_v3 = vrot.slane %v5723_v33, 4  ;;  %v7788_v51 = vrot.slane %v7781_v40, 4  ;;  %v5740_v37 = vpack.c.bf16 %v5723_v33, %v5723_v33  ;;  %v5738_v10 = vpack.c.bf16 %v15429_v27, %v15429_v27 }
 0x9ec   : > { %v12275_v59 = vpop.trf.xlu0  ;;  %v5731_v7 = vsel %vm1016_vm0, 0.0, %v5730_v63  ;;  %v5880_v13 = vrot.slane %v5742_v22, 4 }
 0x9ed   : > { %v7770_v61 = vrot.slane %v12275_v59, 4 }
 0x9ee   : > { %v15371_v47 = vpop.trf.xlu1 }
 0x9ef   : > { %v15373_v48 = vpop.trf.xlu2 }
 0x9f0   : > { %v7758_v36 = vrot.slane %v15373_v48, 4 }
 0x9f4   : > { %v12283_v15 = vpop.trf.xlu0 }
 0x9f5   : > { %v7727_v29 = vsel %vm1016_vm0, %v7726_v34, %v12283_v15  ;;  %v5734_v15 = vrot.slane %v5727_v26, 4 }
 0x9f6   : > { %v12289_v21 = vpop.trf.xlu1  ;;  %v7731_v59 = vperm.slane %v7727_v29, %v13331_v49 }
 0x9f7   : > { %v15382_v12 = vpop.trf.xlu2  ;;  %v7733_v31 = vsel %vm1016_vm0, %v7732_v2, %v12289_v21  ;;  %v7764_v21 = vrot.slane %v15321_v41, 4  ;;  %v5728_v41 = vrot.slane %v15435_v55, 4  ;;  %v5735_v16 = vsel %vm1016_vm0, 0.0, %v5734_v15 }
 0x9f8   : > { %v7737_v57 = vperm.slane %v7733_v31, %v13331_v49  ;;  %v7744_v52 = vrot.slane %v7731_v59, 4  ;;  %v5743_v8 = vpack.c.bf16 %v5735_v16, %v5735_v16  ;;  %v7663_v26 = vsel %vm1016_vm0, %v7662_v43, %v15382_v12 }
 0x9f9   : > { %v5729_v34 = vsel %vm1016_vm0, 0.0, %v5728_v41  ;;  %v7700_v15 = vrot.slane %v15371_v47, 4  ;;  %v7667_v12 = vperm.slane %v7663_v26, %v13331_v49 }
 0x9fa   : > { %v5737_v38 = vpack.c.bf16 %v5729_v34, %v5729_v34 }
 0x9fc   : > { %v12284_v23 = vpop.trf.xlu0 }
 0x9fe   : > { %v12290_v28 = vpop.trf.xlu1 }
 0x9ff   : > { %v15386_v39 = vpop.trf.xlu2  ;;  %v7771_v4 = vsel %vm1016_vm0, %v7770_v61, %v12290_v28  ;;  %v7765_v28 = vsel %vm1016_vm0, %v7764_v21, %v12284_v23  ;;  %v5733_v23 = vsel %vm1016_vm0, 0.0, %v5732_v3  ;;  %v5739_v61 = vpack.c.bf16 %v5731_v7, %v5731_v7 }
 0xa00   : > { %v7775_v25 = vperm.slane %v7771_v4, %v13331_v49  ;;  %v7769_v5 = vperm.slane %v7765_v28, %v13331_v49  ;;  %v5741_v0 = vpack.c.bf16 %v5733_v23, %v5733_v23  ;;  %v5736_v23 = vpack.c.bf16 %v15435_v55, %v15435_v55 }
 0xa02   : > { %v7789_v14 = vsel %vm1016_vm0, %v7788_v51, %v7775_v25  ;;  %v7782_v17 = vrot.slane %v7769_v5, 4  ;;  %v5892_v27 = vrot.slane %v5741_v0, 4 }
 0xa03   : > { %v7793_v2 = vperm.slane %v7789_v14, %v13339_v60 }
 0xa04   : > { %v15391_v30 = vpop.trf.xlu0 }
 0xa05   : > { %v7650_v33 = vrot.slane %v15391_v30, 4 }
 0xa06   : > { %v15394_v35 = vpop.trf.xlu1  ;;  %12333 = vxpose.binary.xlu2.c.b16.start.end [1/2] (short) (narrow) %v5869_v19, %v5868_v50, 64  ;;  %v7751_v50 = vsel %vm1016_vm0, %v7750_v44, %v7737_v57  ;;  %v7794_v57 = vrot.slane %v7793_v2, 4 }
 0xa07   : > { %v15397_v1 = vpop.trf.xlu2  ;;  %v7755_v54 = vperm.slane %v7751_v50, %v13339_v60 }
 0xa08   : > { %v7651_v47 = vsel %vm1016_vm0, %v7650_v33, %v15397_v1 }
 0xa09   : > { %v7756_v31 = vrot.slane %v7755_v54, 4  ;;  %v7655_v43 = vperm.slane %v7651_v47, %v13331_v49 }
 0xa0c   : > { %v15403_v6 = vpop.trf.xlu0 }
 0xa0d   : > { %v7688_v44 = vrot.slane %v15403_v6, 4  ;;  %v7701_v6 = vsel %vm1016_vm0, %v7700_v15, %v15386_v39 }
 0xa0e   : > { %v15407_v58 = vpop.trf.xlu1  ;;  %v7705_v54 = vperm.slane %v7701_v6, %v13331_v49 }
 0xa0f   : > { %v15414_v18 = vpop.trf.xlu2  ;;  %v7694_v55 = vrot.slane %v15407_v58, 4 }
 0xa10   : > { %v7689_v5 = vsel %vm1016_vm0, %v7688_v44, %v15414_v18  ;;  %v7712_v0 = vrot.slane %v7705_v54, 4 }
 0xa14   : > { %v12301_v46 = vpop.trf.xlu0 }
 0xa15   : > { %v7721_v62 = vsel %vm1016_vm0, %v7720_v11, %v12301_v46  ;;  %v5898_v11 = vrot.slane %v5743_v8, 4  ;;  %v5874_v46 = vrot.slane %v5740_v37, 4 }
 0xa16   : > { %v7725_v45 = vperm.slane %v7721_v62, %v13331_v49  ;;  %v12307_v19 = vpop.trf.xlu1  ;;  %v7656_v62 = vrot.slane %v15394_v35, 4  ;;  %v7674_v35 = vrot.slane %v7667_v12, 4 }
 0xa17   : > { %v15442_v42 = vpop.trf.xlu2  ;;  %v7644_v25 = vrot.slane %v12307_v19, 4  ;;  %v5899_v51 = vsel %vm1016_vm0, %v5898_v11, %v5739_v61  ;;  %v5875_v8 = vsel %vm1016_vm0, %v5874_v46, %v5736_v23 }
 0xa18   : > { %v7745_v56 = vsel %vm1016_vm0, %v7744_v52, %v7725_v45  ;;  %v5881_v52 = vsel %vm1016_vm0, %v5880_v13, %v5738_v10 }
 0xa19   : > { %v7749_v32 = vperm.slane %v7745_v56, %v13339_v60  ;;  %v7645_v14 = vsel %vm1016_vm0, %v7644_v25, %v15442_v42  ;;  %v5903_v56 = vperm.slane %v5899_v51, %v13331_v49  ;;  %v5885_v7 = vperm.slane %v5881_v52, %v13331_v49 }
 0xa1a   : > { %v7693_v42 = vperm.slane %v7689_v5, %v13331_v49  ;;  %v7649_v22 = vperm.slane %v7645_v14, %v13331_v49 }
 0xa1b   : > { %v7757_v40 = vsel %vm1016_vm0, %v7756_v31, %v7749_v32  ;;  %v7668_v32 = vrot.slane %v7655_v43, 4  ;;  %v5886_v10 = vrot.slane %v5885_v7, 4 }
 0xa1c   : > { %v12302_v9 = vpop.trf.xlu0  ;;  %v7960_v28 = vshrl.u32 %v7757_v40, 16  ;;  %v7706_v61 = vrot.slane %v7693_v42, 4 }
 0xa1d   : > { %v7759_v20 = vsel %vm1016_vm0, %v7758_v36, %v12302_v9  ;;  %v5893_v36 = vsel %vm1016_vm0, %v5892_v27, %v5737_v38  ;;  %v7669_v26 = vsel %vm1016_vm0, %v7668_v32, %v7649_v22 }
 0xa1e   : > { %v7763_v48 = vperm.slane %v7759_v20, %v13331_v49  ;;  %v12308_v21 = vpop.trf.xlu1  ;;  %v5897_v34 = vperm.slane %v5893_v36, %v13331_v49  ;;  %v5904_v20 = vrot.slane %v5903_v56, 4 }
 0xa1f   : > { %v12314_v29 = vpop.trf.xlu2  ;;  %v7682_v50 = vrot.slane %v12308_v21, 4 }
 0xa20   : > { %v7783_v4 = vsel %vm1016_vm0, %v7782_v17, %v7763_v48  ;;  %v5879_v48 = vperm.slane %v5875_v8, %v13331_v49  ;;  %v5905_v38 = vsel %vm1016_vm0, %v5904_v20, %v5897_v34 }
 0xa21   : > { %v7787_v59 = vperm.slane %v7783_v4, %v13339_v60  ;;  %v7683_v18 = vsel %vm1016_vm0, %v7682_v50, %v12314_v29 }
 0xa22   : > { %v7687_v2 = vperm.slane %v7683_v18, %v13331_v49  ;;  %v5887_v46 = vsel %vm1016_vm0, %v5886_v10, %v5879_v48 }
 0xa23   : > { %v7795_v45 = vsel %vm1016_vm0, %v7794_v57, %v7787_v59  ;;  %v7673_v59 = vperm.slane %v7669_v26, %v13339_v60  ;;  %v5891_v25 = vperm.slane %v5887_v46, %v13339_v60 }
 0xa24   : > { %v12310_v30 = vpop.trf.xlu0  ;;  %v7958_v3 = vpack.i.b16 %v7795_v45, %v7757_v40  ;;  %v7961_v63 = vshrl.u32 %v7795_v45, 16  ;;  %v7707_v11 = vsel %vm1016_vm0, %v7706_v61, %v7687_v2 }
 0xa25   : > { %v7657_v41 = vsel %vm1016_vm0, %v7656_v62, %v12310_v30  ;;  %v7711_v12 = vperm.slane %v7707_v11, %v13339_v60  ;;  %v5909_v62 = vperm.slane %v5905_v38, %v13339_v60  ;;  %v5913_v52 = vshrl.u32 %v5891_v25, 16 }
 0xa26   : > { %v7661_v19 = vperm.slane %v7657_v41, %v13331_v49  ;;  %7989 = vmatpush.bf16.msrb.mxu2 %v7958_v3  ;;  %v7962_v16 = vpack.i.b16 %v7961_v63, %v7960_v28 }
 0xa27   : > { %v12316_v1 = vpop.trf.xlu2  ;;  %v5914_v28 = vshrl.u32 %v5909_v62, 16  ;;  %v5912_v51 = vpack.i.b16 %v5909_v62, %v5891_v25 }
 0xa28   : > { %v7675_v39 = vsel %vm1016_vm0, %v7674_v35, %v7661_v19  ;;  %8005 = vmatpush.bf16.msra.mxu3 %v7962_v16  ;;  %v8174_v29 = vshrl.u32 %v12316_v1, 16 }
 0xa29   : > { %v7679_v9 = vperm.slane %v7675_v39, %v13339_v60  ;;  %v5915_v47 = vpack.i.b16 %v5914_v28, %v5913_v52  ;;  %v16294_v39 = vld [vmem:[#allocation53_spill] sm:$0xff] }
 0xa2b   : > { %v7680_v31 = vrot.slane %v7679_v9, 4 }
 0xa2c   : > { %v12311_v37 = vpop.trf.xlu0 }
 0xa2d   : > { %v7695_v17 = vsel %vm1016_vm0, %v7694_v55, %v12311_v37  ;;  %v7681_v15 = vsel %vm1016_vm0, %v7680_v31, %v7673_v59 }
 0xa2e   : > { %v7699_v58 = vperm.slane %v7695_v17, %v13331_v49  ;;  %v7952_v30 = vshrl.u32 %v7681_v15, 16 }
 0xa2f   : > { %v12317_v13 = vpop.trf.xlu2 }
 0xa30   : > { %v7713_v4 = vsel %vm1016_vm0, %v7712_v0, %v7699_v58  ;;  %v15509_v33 = vpack.i.b16 %v12317_v13, %v12316_v1  ;;  %v8175_v40 = vshrl.u32 %v12317_v13, 16  ;;  %v8012_v1 = vstv %s11408_s9 }
 0xa31   : > { %v7717_v57 = vperm.slane %v7713_v4, %v13339_v60  ;;  %vm8013_vm4 = vcmp.lt.s32.totalorder %v16294_v39, %v8012_v1 }
 0xa32   : > { %v15514_v27 = vpack.i.b16 %v8175_v40, %v8174_v29  ;;  %v5846_v29 = vrot.slane %v15378_v24, 4 }
 0xa33   : > { %v7718_v21 = vrot.slane %v7717_v57, 4 }
 0xa34   : > { %v5847_v38 = vsel %vm1016_vm0, %v15369_v53, %v5846_v29 }
 0xa35   : > { %v7719_v44 = vsel %vm1016_vm0, %v7718_v21, %v7711_v12  ;;  %v5855_v40 = vperm.slane %v5847_v38, %v13339_v60 }
 0xa36   : > { %v7950_v45 = vpack.i.b16 %v7719_v44, %v7681_v15  ;;  %v7953_v3 = vshrl.u32 %v7719_v44, 16 }
 0xa37   : > { %v15523_v50 = vpop.trf.xlu2  ;;  %v5862_v57 = vrot.slane %v5855_v40, 4  ;;  %v5870_v12 = vpack.c.bf16 %v5855_v40, %v5855_v40 }
 0xa38   : > { %7990 = vmatpush.bf16.msrb.mxu2 %v7950_v45  ;;  %v7954_v63 = vpack.i.b16 %v7953_v3, %v7952_v30  ;;  %v8206_v39 = vshrl.u32 %v15523_v50, 16 }
 0xa39   : > { %v5863_v15 = vsel %vm1016_vm0, 0.0, %v5862_v57 }
 0xa3a   : > { %8006 = vmatpush.bf16.msra.mxu3 %v7954_v63  ;;  %v5871_v21 = vpack.c.bf16 %v5863_v15, %v5863_v15 }
 0xa3b   : > { %11409 = vmatmul.msk.bf16.vlgmr.msrb.gmra.mxu2 %vm3313_vm1, %v5912_v51 }
 0xa3d   : > { %11410 = vmatmul.msk.bf16.vlgmr.msra.gmra.mxu3 %vm3313_vm1, %v5915_v47 }
 0xa3f   : > { %v15525_v41 = vpop.trf.xlu2 }
 0xa47   : > { %v12320_v35 = vpop.trf.xlu2 }
 0xa48   : > { %v8238_v6 = vshrl.u32 %v12320_v35, 16 }
 0xa4f   : > { %v12321_v19 = vpop.trf.xlu2 }
 0xa50   : > { %v15527_v16 = vpack.i.b16 %v12321_v19, %v12320_v35  ;;  %v8239_v5 = vshrl.u32 %v12321_v19, 16 }
 0xa52   : > { %v15529_v14 = vpack.i.b16 %v8239_v5, %v8238_v6 }
 0xa57   : > { %v12322_v56 = vpop.trf.xlu2 }
 0xa58   : > { %v8270_v23 = vshrl.u32 %v12322_v56, 16 }
 0xa5f   : > { %v12323_v43 = vpop.trf.xlu2 }
 0xa60   : > { %v15532_v36 = vpack.i.b16 %v12323_v43, %v12322_v56  ;;  %v8271_v54 = vshrl.u32 %v12323_v43, 16 }
 0xa62   : > { %v15534_v7 = vpack.i.b16 %v8271_v54, %v8270_v23  ;;  %v8207_v54 = vshrl.u32 %v15525_v41, 16 }
 0xa67   : > { %v15538_v34 = vpop.trf.xlu2 }
 0xa6f   : > { %v15540_v2 = vpop.trf.xlu2 }
 0xa70   : > { %v15544_v37 = vpack.i.b16 %v15540_v2, %v15538_v34 }
 0xa72   : > { %v8312_v38 = vrot.slane %v15544_v37, 4 }
 0xa77   : > { %v12327_v0 = vpop.trf.xlu2 }
 0xa78   : > { %v8214_v17 = vshrl.u32 %v12327_v0, 16 }
 0xa7f   : > { %v12328_v48 = vpop.trf.xlu2 }
 0xa80   : > { %v15546_v10 = vpack.i.b16 %v12328_v48, %v12327_v0  ;;  %v8215_v61 = vshrl.u32 %v12328_v48, 16  ;;  %v15581_v0 = vpack.i.b16 %v8207_v54, %v8206_v39 }
 0xa82   : > { %v15548_v26 = vpack.i.b16 %v8215_v61, %v8214_v17 }
 0xa87   : > { %v12329_v58 = vpop.trf.xlu2 }
 0xa88   : > { %v8246_v31 = vshrl.u32 %v12329_v58, 16 }
 0xa8f   : > { %v12330_v13 = vpop.trf.xlu2 }
 0xa90   : > { %v15553_v11 = vpack.i.b16 %v12330_v13, %v12329_v58  ;;  %v8247_v4 = vshrl.u32 %v12330_v13, 16 }
 0xa92   : > { %v15556_v59 = vpack.i.b16 %v8247_v4, %v8246_v31 }
 0xa97   : > { %v12331_v46 = vpop.trf.xlu2 }
 0xa98   : > { %v8278_v62 = vshrl.u32 %v12331_v46, 16 }
 0xa9f   : > { %v12332_v24 = vpop.trf.xlu2 }
 0xaa0   : > { %v15559_v44 = vpack.i.b16 %v12332_v24, %v12331_v46  ;;  %v8279_v53 = vshrl.u32 %v12332_v24, 16 }
 0xaa2   : > { %v15561_v25 = vpack.i.b16 %v8279_v53, %v8278_v62 }
 0xaa7   : > { %v12334_v19 = vpop.trf.xlu2 }
 0xaa8   : > { %v8190_v56 = vshrl.u32 %v12334_v19, 16 }
 0xaaf   : > { %v12335_v5 = vpop.trf.xlu2 }
 0xab0   : > { %v8188_v1 = vpack.i.b16 %v12335_v5, %v12334_v19  ;;  %v8191_v23 = vshrl.u32 %v12335_v5, 16 }
 0xab7   : > { %v12336_v43 = vpop.trf.xlu2 }
 0xabe   : > { %v7992_v18 = vpop.f32.mrf.mxu2 }
 0xabf   : > { %v8016_v42 = vsel %vm8013_vm4, %v7992_v18, -1000000.0 }
 0xac0   : > { %v8018_v22 = vsel %vm3352_vm3, %v8016_v42, -inf  ;;  %v8008_v8 = vpop.f32.mrf.mxu3 }
 0xac1   : > { %v8017_v55 = vsel %vm8013_vm4, %v8008_v8, -1000000.0  ;;  %8019 = vmax.xlane.f32.xlu1 %v8018_v22  ;;  %v8356_v22 = vrot.slane %v15514_v27, 4  ;;  %v8192_v8 = vpack.i.b16 %v8191_v23, %v8190_v56 }
 0xac2   : > { %v8021_v9 = vsel %vm3352_vm3, %v8017_v55, -inf }
 0xac3   : > { %8022 = vmax.xlane.f32.xlu0 %v8021_v9  ;;  %v8182_v9 = vshrl.u32 %v15538_v34, 16  ;;  %v8354_v61 = vrot.slane %v8192_v8, 4  ;;  %v8357_v58 = vsel %vm1016_vm0, %v8192_v8, %v8356_v22  ;;  %v8468_v34 = vrot.slane %v15581_v0, 4 }
 0xac4   : > { %v8365_v13 = vperm.slane %v8357_v58, %v13331_v49 }
 0xac5   : > { %v8355_v4 = vsel %vm1016_vm0, %v8354_v61, %v15514_v27 }
 0xac6   : > { %v7994_v20 = vpop.f32.mrf.mxu2 }
 0xac7   : > { %v8183_v20 = vshrl.u32 %v15540_v2, 16  ;;  %v12337_v2 = vpop.trf.xlu2 }
 0xac8   : > { %v8010_v32 = vpop.f32.mrf.mxu3  ;;  %v15596_v62 = vpack.i.b16 %v12337_v2, %v12336_v43  ;;  %v8223_v24 = vshrl.u32 %v12337_v2, 16 }
 0xac9   : > { %v15579_v32 = vpack.i.b16 %v15525_v41, %v15523_v50  ;;  %v8184_v29 = vpack.i.b16 %v8183_v20, %v8182_v9 }
 0xaca   : > { %v8410_v39 = vrot.slane %v15596_v62, 4 }
 0xacb   : > { %v8412_v31 = vrot.slane %v15579_v32, 4  ;;  %v8368_v15 = vrot.slane %v8184_v29, 4 }
 0xafb   : > { %12342 = vxpose.binary.xlu1.c.b16.start.end [1/2] (short) (narrow) %v5871_v21, %v5870_v12, 64  ;;  %v8424_v12 = vrot.slane %v15546_v10, 4  ;;  %v8222_v21 = vshrl.u32 %v12336_v43, 16 }
 0xafd   : > { %v8224_v43 = vpack.i.b16 %v8223_v24, %v8222_v21 }
 0xb34   : > { %v8020_v45 = vpop.xlane.xlu1 %8019 }
 0xb35   : > { %v8024_v30 = vsub.f32 %v8016_v42, %v8020_v45  ;;  %v8300_v42 = vrot.slane %v15509_v33, 4 }
 0xb36   : > { %v8023_v3 = vpop.xlane.xlu0 %8022 }
 0xb37   : > { %v8026_v28 = vmul.f32 1.442695, %v8024_v30  ;;  %v8025_v63 = vsub.f32 %v8017_v55, %v8023_v3  ;;  %v8298_v55 = vrot.slane %v8188_v1, 4  ;;  %v8301_v48 = vsel %vm1016_vm0, %v8188_v1, %v8300_v42 }
 0xb38   : > { %v8309_v41 = vperm.slane %v8301_v48, %v13331_v49 }
 0xb39   : > { %12476 = vpow2.f32 %v8026_v28  ;;  %v8028_v51 = vmul.f32 1.442695, %v8025_v63  ;;  %v8299_v17 = vsel %vm1016_vm0, %v8298_v55, %v15509_v33  ;;  %v8361_v63 = vperm.slane %v8355_v4, %v13331_v49 }
 0xb3a   : > { %v8305_v50 = vperm.slane %v8299_v17, %v13331_v49  ;;  %v8336_v28 = vrot.slane %v8309_v41, 4 }
 0xb3b   : > { %12478 = vpow2.f32 %v8028_v51  ;;  %v8392_v51 = vrot.slane %v8365_v13, 4  ;;  %v8380_v48 = vrot.slane %v8361_v63, 4 }
 0xb3c   : > { %v8324_v3 = vrot.slane %v8305_v50, 4 }
 0xb3f   : > { %v15563_v52 = vpop.eup %12476 }
 0xb40   : > { %v8030_v47 = vsel %vm3352_vm3, %v15563_v52, 0.0 }
 0xb41   : > { %8031 = vadd.xlane.f32.xlu0 %v8030_v47  ;;  %v15567_v35 = vpop.eup %12478 }
 0xb42   : > { %v8033_v6 = vsel %vm3352_vm3, %v15567_v35, 0.0 }
 0xb49   : > { %8034 = vadd.xlane.f32.xlu0 %v8033_v6 }
 0xba7   : > { %v12343_v18 = vpop.trf.xlu1 }
 0xba8   : > { %v8198_v40 = vshrl.u32 %v12343_v18, 16 }
 0xbaf   : > { %v12344_v33 = vpop.trf.xlu1 }
 0xbb0   : > { %v8196_v57 = vpack.i.b16 %v12344_v33, %v12343_v18  ;;  %v8199_v46 = vshrl.u32 %v12344_v33, 16 }
 0xbb2   : > { %v8200_v53 = vpack.i.b16 %v8199_v46, %v8198_v40  ;;  %v8310_v45 = vrot.slane %v8196_v57, 4  ;;  %v8313_v30 = vsel %vm1016_vm0, %v8196_v57, %v8312_v38  ;;  %v8466_v57 = vrot.slane %v8224_v43, 4 }
 0xbb3   : > { %v8321_v27 = vperm.slane %v8313_v30, %v13331_v49 }
 0xbb4   : > { %v8311_v47 = vsel %vm1016_vm0, %v8310_v45, %v15544_v37  ;;  %v8366_v6 = vrot.slane %v8200_v53, 4  ;;  %v8369_v19 = vsel %vm1016_vm0, %v8200_v53, %v8368_v15  ;;  %v8032_v5 = vpop.xlane.xlu0 %8031 }
 0xbb5   : > { %v8317_v56 = vperm.slane %v8311_v47, %v13331_v49  ;;  %v8334_v1 = vrot.slane %v8321_v27, 4  ;;  %v8377_v23 = vperm.slane %v8369_v19, %v13331_v49  ;;  %12480 = vrcp.f32 %v8032_v5 }
 0xbb6   : > { %v8367_v54 = vsel %vm1016_vm0, %v8366_v6, %v8184_v29  ;;  %v8337_v18 = vsel %vm1016_vm0, %v8321_v27, %v8336_v28  ;;  %v8411_v19 = vsel %vm1016_vm0, %v8410_v39, %v15579_v32  ;;  %v8413_v39 = vsel %vm1016_vm0, %v15596_v62, %v8412_v31  ;;  %v12338_v32 = vpop.trf.xlu2 }
 0xbb7   : > { %v8322_v42 = vrot.slane %v8317_v56, 4  ;;  %v8373_v37 = vperm.slane %v8367_v54, %v13331_v49  ;;  %v8390_v22 = vrot.slane %v8377_v23, 4  ;;  %v12345_v8 = vpop.trf.xlu1  ;;  %v15611_v55 = vperm.slane %v8337_v18, %v13339_v60 }
 0xbb8   : > { %v8393_v9 = vsel %vm1016_vm0, %v8377_v23, %v8392_v51  ;;  %v8335_v20 = vsel %vm1016_vm0, %v8334_v1, %v8309_v41  ;;  %v8325_v17 = vsel %vm1016_vm0, %v8317_v56, %v8324_v3 }
 0xbb9   : > { %v8352_v61 = vrot.slane %v15611_v55, 4  ;;  %v15618_v58 = vperm.slane %v8393_v9, %v13339_v60  ;;  %v15621_v29 = vperm.slane %v8335_v20, %v13339_v60  ;;  %v8391_v2 = vsel %vm1016_vm0, %v8390_v22, %v8365_v13 }
 0xbba   : > { %v15625_v38 = vperm.slane %v8391_v2, %v13339_v60  ;;  %v15628_v33 = vperm.slane %v8325_v17, %v13339_v60  ;;  %v8381_v41 = vsel %vm1016_vm0, %v8373_v37, %v8380_v48  ;;  %v15632_v4 = vsel %vm1016_vm0, %v8322_v42, %v8305_v50 }
 0xbbb   : > { %v12481_v40 = vpop.eup %12480  ;;  %v8408_v46 = vrot.slane %v15618_v58, 4  ;;  %v8350_v15 = vrot.slane %v15621_v29, 4  ;;  %v15637_v21 = vperm.slane %v8381_v41, %v13339_v60  ;;  %v8230_v13 = vshrl.u32 %v12345_v8, 16 }
 0xbbc   : > { %v8035_v24 = vpop.xlane.xlu0 %8034  ;;  %v8406_v53 = vrot.slane %v15625_v38, 4  ;;  %v8348_v45 = vrot.slane %v15628_v33, 4  ;;  %v8038_v30 = vmul.f32 %v12481_v40, %v15563_v52  ;;  %v8353_v50 = vsel %vm1016_vm0, 0, %v8352_v61 }
 0xbbd   : > { %12482 = vrcp.f32 %v8035_v24  ;;  %v8409_v3 = vsel %vm1016_vm0, 0, %v8408_v46  ;;  %v8404_v28 = vrot.slane %v15637_v21, 4  ;;  %v8351_v27 = vsel %vm1016_vm0, 0, %v8350_v15 }
 0xbbe   : > { %12351 = vxpose.binary.xlu0.c.b16.start.end [1/2] (short) (narrow) %v8409_v3, %v8353_v50, 16  ;;  %v8407_v51 = vsel %vm1016_vm0, 0, %v8406_v53  ;;  %v8040_v47 = vpack.c.bf16 %v8038_v30, %v8038_v30  ;;  %v8378_v6 = vrot.slane %v8373_v37, 4  ;;  %v8467_v52 = vsel %vm1016_vm0, %v8466_v57, %v15581_v0 }
 0xbbf   : > { %12357 = vxpose.binary.xlu1.c.b16.start.end [1/2] (short) (narrow) %v8407_v51, %v8351_v27, 16  ;;  %v8349_v5 = vsel %vm1016_vm0, 0, %v8348_v45  ;;  %v8405_v56 = vsel %vm1016_vm0, 0, %v8404_v28  ;;  %v12346_v1 = vpop.trf.xlu1  ;;  %v8480_v37 = vrot.slane %v15548_v26, 4  ;;  %v8417_v22 = vperm.slane %v8411_v19, %v13331_v49  ;;  %v12339_v27 = vpop.trf.xlu2 }
 0xbc0   : > { %12354 = vxpose.binary.xlu2.c.b16.start.end [1/2] (short) (narrow) %v8405_v56, %v8349_v5, 16  ;;  %v8228_v23 = vpack.i.b16 %v12346_v1, %v12345_v8  ;;  %v8231_v54 = vshrl.u32 %v12346_v1, 16  ;;  %v10111_v18 = vsel %vm3352_vm3, %v8040_v47, 0  ;;  %v8379_v42 = vsel %vm1016_vm0, %v8378_v6, %v8361_v63 }
 0xbc1   : > { %10120 = vmatpush.bf16.xpose.msra.mxu2 %v10111_v18  ;;  %v8469_v63 = vsel %vm1016_vm0, %v8224_v43, %v8468_v34  ;;  %v8473_v48 = vperm.slane %v8467_v52, %v13331_v49  ;;  %v8436_v43 = vrot.slane %v8417_v22, 4  ;;  %v8385_v51 = vperm.slane %v8379_v42, %v13339_v60 }
 0xbc2   : > { %v8232_v9 = vpack.i.b16 %v8231_v54, %v8230_v13  ;;  %v8422_v20 = vrot.slane %v8228_v23, 4  ;;  %v8425_v8 = vsel %vm1016_vm0, %v8228_v23, %v8424_v12  ;;  %v8421_v12 = vperm.slane %v8413_v39, %v13331_v49 }
 0xbc3   : > { %v12483_v17 = vpop.eup %12482  ;;  %v8433_v61 = vperm.slane %v8425_v8, %v13331_v49  ;;  %v8477_v57 = vperm.slane %v8469_v63, %v13331_v49  ;;  %v8492_v53 = vrot.slane %v8473_v48, 4  ;;  %v8254_v56 = vshrl.u32 %v12338_v32, 16 }
 0xbc4   : > { %v8423_v31 = vsel %vm1016_vm0, %v8422_v20, %v15546_v10  ;;  %v8478_v62 = vrot.slane %v8232_v9, 4  ;;  %v8481_v2 = vsel %vm1016_vm0, %v8232_v9, %v8480_v37  ;;  %v8039_v41 = vmul.f32 %v12483_v17, %v15567_v35 }
 0xbc5   : > { %v8429_v40 = vperm.slane %v8423_v31, %v13331_v49  ;;  %v8446_v0 = vrot.slane %v8433_v61, 4  ;;  %v8489_v34 = vperm.slane %v8481_v2, %v13331_v49  ;;  %v8448_v47 = vrot.slane %v8421_v12, 4 }
 0xbc6   : > { %v8479_v46 = vsel %vm1016_vm0, %v8478_v62, %v15548_v26  ;;  %v8041_v15 = vpack.c.bf16 %v8039_v41, %v8039_v41  ;;  %v8329_v26 = vperm.slane %v15632_v4, %v13339_v60  ;;  %v8504_v6 = vrot.slane %v8477_v57, 4 }
 0xbc7   : > { %v8485_v10 = vperm.slane %v8479_v46, %v13331_v49  ;;  %v8502_v13 = vrot.slane %v8489_v34, 4  ;;  %v12347_v24 = vpop.trf.xlu1  ;;  %v8447_v35 = vsel %vm1016_vm0, %v8446_v0, %v8421_v12  ;;  %v8437_v30 = vsel %vm1016_vm0, %v8429_v40, %v8436_v43 }
 0xbc8   : > { %v10155_v45 = vsel %vm3352_vm3, %v8041_v15, 0  ;;  %v8434_v28 = vrot.slane %v8429_v40, 4  ;;  %v8255_v1 = vshrl.u32 %v12339_v27, 16  ;;  %v15694_v23 = vsel %vm1016_vm0, %v8433_v61, %v8448_v47 }
 0xbc9   : > { %10164 = vmatpush.bf16.xpose.msrb.mxu3 %v10155_v45  ;;  %v8503_v50 = vsel %vm1016_vm0, %v8502_v13, %v8477_v57  ;;  %v8493_v3 = vsel %vm1016_vm0, %v8485_v10, %v8492_v53  ;;  %v8490_v5 = vrot.slane %v8485_v10, 4  ;;  %v8262_v4 = vshrl.u32 %v12347_v24, 16 }
 0xbca   : > { %v8435_v52 = vsel %vm1016_vm0, %v8434_v28, %v8417_v22  ;;  %v8580_v42 = vrot.slane %v15529_v14, 4  ;;  %v8252_v37 = vpack.i.b16 %v12339_v27, %v12338_v32  ;;  %v8256_v39 = vpack.i.b16 %v8255_v1, %v8254_v56 }
 0xbcb   : > { %v8491_v18 = vsel %vm1016_vm0, %v8490_v5, %v8473_v48  ;;  %v15705_v20 = vperm.slane %v8447_v35, %v13339_v60  ;;  %v15708_v8 = vperm.slane %v8503_v50, %v13339_v60  ;;  %v8445_v48 = vperm.slane %v8437_v30, %v13339_v60 }
 0xbcc   : > { %v8581_v63 = vsel %vm1016_vm0, %v8256_v39, %v8580_v42  ;;  %v8501_v32 = vperm.slane %v8493_v3, %v13339_v60  ;;  %v8346_v62 = vrot.slane %v8329_v26, 4  ;;  %v8402_v2 = vrot.slane %v8385_v51, 4 }
 0xbcd   : > { %v8589_v12 = vperm.slane %v8581_v63, %v13331_v49  ;;  %v8462_v40 = vrot.slane %v15705_v20, 4  ;;  %v8518_v0 = vrot.slane %v15708_v8, 4  ;;  %v15731_v28 = vperm.slane %v8435_v52, %v13339_v60 }
 0xbce   : > { %12360 = vxpose.binary.xlu0.c.b16.start.end [1/2] (short) (narrow) %v15618_v58, %v15611_v55, 16  ;;  %v15698_v55 = vsel %vm1016_vm0, %v8489_v34, %v8504_v6  ;;  %v8524_v58 = vrot.slane %v15527_v16, 4  ;;  %v8460_v34 = vrot.slane %v8445_v48, 4  ;;  %v8516_v43 = vrot.slane %v8501_v32, 4 }
 0xbcf   : > { %12372 = vxpose.binary.xlu1.c.b16.start.end [1/2] (short) (narrow) %v8385_v51, %v8329_v26, 16  ;;  %v12348_v19 = vpop.trf.xlu1  ;;  %v8347_v15 = vsel %vm1016_vm0, 0, %v8346_v62  ;;  %v8403_v10 = vsel %vm1016_vm0, 0, %v8402_v2  ;;  %v8463_v35 = vsel %vm1016_vm0, 0, %v8462_v40  ;;  %v8519_v53 = vsel %vm1016_vm0, 0, %v8518_v0  ;;  %v12340_v26 = vpop.trf.xlu2 }
 0xbd0   : > { %12369 = vxpose.binary.xlu2.c.b16.start.end [1/2] (short) (narrow) %v15625_v38, %v15621_v29, 16  ;;  %v8263_v54 = vshrl.u32 %v12348_v19, 16  ;;  %v8260_v22 = vpack.i.b16 %v12348_v19, %v12347_v24  ;;  %v8536_v29 = vrot.slane %v15553_v11, 4  ;;  %v8592_v38 = vrot.slane %v15556_v59, 4 }
 0xbd1   : > { %v8525_v17 = vsel %vm1016_vm0, %v8252_v37, %v8524_v58  ;;  %v8616_v24 = vrot.slane %v8589_v12, 4  ;;  %v8461_v45 = vsel %vm1016_vm0, 0, %v8460_v34  ;;  %v8517_v30 = vsel %vm1016_vm0, 0, %v8516_v43 }
 0xbd2   : > { %v8264_v9 = vpack.i.b16 %v8263_v54, %v8262_v4  ;;  %v8537_v61 = vsel %vm1016_vm0, %v8260_v22, %v8536_v29  ;;  %v8533_v41 = vperm.slane %v8525_v17, %v13331_v49  ;;  %v15734_v27 = vperm.slane %v8491_v18, %v13339_v60 }
 0xbd3   : > { %v8545_v57 = vperm.slane %v8537_v61, %v13331_v49  ;;  %v8458_v19 = vrot.slane %v15731_v28, 4  ;;  %v8522_v56 = vrot.slane %v8252_v37, 4  ;;  %v8534_v1 = vrot.slane %v8260_v22, 4 }
 0xbd4   : > { %v8593_v31 = vsel %vm1016_vm0, %v8264_v9, %v8592_v38  ;;  %v8560_v13 = vrot.slane %v8533_v41, 4  ;;  %v8514_v5 = vrot.slane %v15734_v27, 4  ;;  %v8578_v4 = vrot.slane %v8256_v39, 4 }
 0xbd5   : > { %v8601_v46 = vperm.slane %v8593_v31, %v13331_v49  ;;  %v8558_v51 = vrot.slane %v8545_v57, 4  ;;  %v8459_v52 = vsel %vm1016_vm0, 0, %v8458_v19  ;;  %v8523_v42 = vsel %vm1016_vm0, %v8522_v56, %v15527_v16 }
 0xbd6   : > { %v8561_v50 = vsel %vm1016_vm0, %v8545_v57, %v8560_v13  ;;  %v8515_v54 = vsel %vm1016_vm0, 0, %v8514_v5  ;;  %v8535_v37 = vsel %vm1016_vm0, %v8534_v1, %v15553_v11  ;;  %v8590_v39 = vrot.slane %v8264_v9, 4 }
 0xbd7   : > { %v8617_v3 = vsel %vm1016_vm0, %v8601_v46, %v8616_v24  ;;  %v8614_v47 = vrot.slane %v8601_v46, 4  ;;  %v12349_v6 = vpop.trf.xlu1  ;;  %v15743_v18 = vsel %vm1016_vm0, %v8558_v51, %v8533_v41  ;;  %v12341_v22 = vpop.trf.xlu2  ;;  %v8541_v29 = vperm.slane %v8535_v37, %v13331_v49 }
 0xbd8   : > { %v8591_v38 = vsel %vm1016_vm0, %v8590_v39, %v15556_v59  ;;  %v15761_v16 = vperm.slane %v15694_v23, %v13339_v60  ;;  %v15765_v11 = vperm.slane %v15698_v55, %v13339_v60  ;;  %v8287_v9 = vshrl.u32 %v12341_v22, 16 }
 0xbd9   : > { %v15746_v58 = vsel %vm1016_vm0, %v8614_v47, %v8589_v12  ;;  %v8284_v61 = vpack.i.b16 %v12341_v22, %v12340_v26  ;;  %v8546_v31 = vrot.slane %v8541_v29, 4  ;;  %v8597_v62 = vperm.slane %v8591_v38, %v13331_v49 }
 0xbda   : > { %v8636_v23 = vrot.slane %v15532_v36, 4  ;;  %v8294_v2 = vshrl.u32 %v12349_v6, 16  ;;  %v8464_v55 = vrot.slane %v15761_v16, 4  ;;  %v8520_v40 = vrot.slane %v15765_v11, 4 }
 0xbdb   : > { %v8692_v43 = vrot.slane %v15534_v7, 4 }
 0xbdc   : > { %v8521_v51 = vsel %vm1016_vm0, 0, %v8520_v40 }
 0xbde   : > { %12363 = vxpose.binary.xlu0.c.b16.start.end [1/2] (short) (narrow) %v8403_v10, %v8347_v15, 16  ;;  %v8634_v10 = vrot.slane %v8284_v61, 4 }
 0xbdf   : > { %12381 = vxpose.binary.xlu1.c.b16.start.end [1/2] (short) (narrow) %v8519_v53, %v8463_v35, 16  ;;  %v12350_v63 = vpop.trf.xlu1  ;;  %v8602_v35 = vrot.slane %v8597_v62, 4  ;;  %v8648_v53 = vrot.slane %v15559_v44, 4 }
 0xbe0   : > { %12378 = vxpose.binary.xlu2.c.b16.start.end [1/2] (short) (narrow) %v8517_v30, %v8461_v45, 16  ;;  %v8292_v41 = vpack.i.b16 %v12350_v63, %v12349_v6  ;;  %v8295_v12 = vshrl.u32 %v12350_v63, 16  ;;  %v8704_v45 = vrot.slane %v15561_v25, 4  ;;  %v8635_v1 = vsel %vm1016_vm0, %v8634_v10, %v15532_v36 }
 0xbe2   : > { %v8296_v30 = vpack.i.b16 %v8295_v12, %v8294_v2  ;;  %v8649_v19 = vsel %vm1016_vm0, %v8292_v41, %v8648_v53 }
 0xbe3   : > { %v8657_v39 = vperm.slane %v8649_v19, %v13331_v49 }
 0xbee   : > { %12366 = vxpose.binary.xlu0.c.b16.start.end [1/2] (short) (narrow) %v15637_v21, %v15628_v33, 16  ;;  %v8579_v33 = vsel %vm1016_vm0, %v8578_v4, %v15529_v14  ;;  %v8529_v21 = vperm.slane %v8523_v42, %v13331_v49  ;;  %v8286_v14 = vshrl.u32 %v12340_v26, 16  ;;  %v8465_v26 = vsel %vm1016_vm0, 0, %v8464_v55 }
 0xbef   : > { %12390 = vxpose.binary.xlu1.c.b16.start.end [1/2] (short) (narrow) %v8501_v32, %v8445_v48, 16  ;;  %v8585_v17 = vperm.slane %v8579_v33, %v13331_v49  ;;  %v15768_v48 = vperm.slane %v8561_v50, %v13339_v60  ;;  %v15771_v32 = vperm.slane %v8617_v3, %v13339_v60  ;;  %v8646_v50 = vrot.slane %v8292_v41, 4 }
 0xbf0   : > { %12387 = vxpose.binary.xlu2.c.b16.start.end [1/2] (short) (narrow) %v8515_v54, %v8459_v52, 16  ;;  %v8548_v59 = vrot.slane %v8529_v21, 4  ;;  %v8288_v57 = vpack.i.b16 %v8287_v9, %v8286_v14  ;;  %v15785_v24 = vsel %vm1016_vm0, %v8546_v31, %v8529_v21  ;;  %v8637_v3 = vsel %vm1016_vm0, %v8284_v61, %v8636_v23 }
 0xbf1   : > { %v8604_v34 = vrot.slane %v8585_v17, 4  ;;  %v8576_v46 = vrot.slane %v15768_v48, 4  ;;  %v8632_v15 = vrot.slane %v15771_v32, 4  ;;  %v15793_v47 = vsel %vm1016_vm0, %v8602_v35, %v8585_v17 }
 0xbf2   : > { %v15778_v0 = vsel %vm1016_vm0, %v8541_v29, %v8548_v59  ;;  %v8690_v6 = vrot.slane %v8288_v57, 4  ;;  %v8693_v4 = vsel %vm1016_vm0, %v8288_v57, %v8692_v43  ;;  %v8647_v52 = vsel %vm1016_vm0, %v8646_v50, %v15559_v44 }
 0xbf3   : > { %v8605_v13 = vsel %vm1016_vm0, %v8597_v62, %v8604_v34  ;;  %v8577_v5 = vsel %vm1016_vm0, 0, %v8576_v46  ;;  %v8633_v56 = vsel %vm1016_vm0, 0, %v8632_v15  ;;  %v8702_v54 = vrot.slane %v8296_v30, 4 }
 0xbf4   : > { %v8705_v42 = vsel %vm1016_vm0, %v8296_v30, %v8704_v45  ;;  %v8645_v37 = vperm.slane %v8637_v3, %v13331_v49  ;;  %v8641_v33 = vperm.slane %v8635_v1, %v13331_v49  ;;  %v8691_v36 = vsel %vm1016_vm0, %v8690_v6, %v15534_v7 }
 0xbf5   : > { %v8701_v21 = vperm.slane %v8693_v4, %v13331_v49  ;;  %v8653_v22 = vperm.slane %v8647_v52, %v13331_v49  ;;  %v8713_v44 = vperm.slane %v8705_v42, %v13331_v49  ;;  %v8703_v29 = vsel %vm1016_vm0, %v8702_v54, %v15561_v25 }
 0xbf6   : > { %v8672_v38 = vrot.slane %v8645_v37, 4  ;;  %v8660_v17 = vrot.slane %v8641_v33, 4  ;;  %v8565_v14 = vperm.slane %v15743_v18, %v13339_v60  ;;  %v8621_v7 = vperm.slane %v15746_v58, %v13339_v60 }
 0xbf7   : > { %v8728_v63 = vrot.slane %v8701_v21, 4  ;;  %v8658_v9 = vrot.slane %v8653_v22, 4  ;;  %v8709_v59 = vperm.slane %v8703_v29, %v13331_v49  ;;  %v8726_v61 = vrot.slane %v8713_v44, 4 }
 0xbf8   : > { %v8673_v31 = vsel %vm1016_vm0, %v8657_v39, %v8672_v38  ;;  %v8661_v62 = vsel %vm1016_vm0, %v8653_v22, %v8660_v17  ;;  %v8574_v41 = vrot.slane %v8565_v14, 4  ;;  %v8630_v12 = vrot.slane %v8621_v7, 4 }
 0xbf9   : > { %v8729_v25 = vsel %vm1016_vm0, %v8713_v44, %v8728_v63  ;;  %v8659_v55 = vsel %vm1016_vm0, %v8658_v9, %v8641_v33  ;;  %v8714_v58 = vrot.slane %v8709_v59, 4  ;;  %v8727_v40 = vsel %vm1016_vm0, %v8726_v61, %v8701_v21 }
 0xbfa   : > { %v8575_v43 = vsel %vm1016_vm0, 0, %v8574_v41  ;;  %v8631_v57 = vsel %vm1016_vm0, 0, %v8630_v12  ;;  %v8557_v46 = vperm.slane %v15778_v0, %v13339_v60  ;;  %v8613_v15 = vperm.slane %v8605_v13, %v13339_v60 }
 0xbfb   : > { %v8609_v6 = vperm.slane %v15793_v47, %v13339_v60  ;;  %v8665_v19 = vperm.slane %v8659_v55, %v13339_v60 }
 0xbfc   : > { %v8572_v10 = vrot.slane %v8557_v46, 4  ;;  %v8628_v35 = vrot.slane %v8613_v15, 4 }
 0xbfd   : > { %v8626_v1 = vrot.slane %v8609_v6, 4  ;;  %v8682_v4 = vrot.slane %v8665_v19, 4 }
 0xbfe   : > { %12375 = vxpose.binary.xlu0.c.b16.start.end [1/2] (short) (narrow) %v8521_v51, %v8465_v26, 16  ;;  %v8573_v0 = vsel %vm1016_vm0, 0, %v8572_v10  ;;  %v8629_v13 = vsel %vm1016_vm0, 0, %v8628_v35  ;;  %v8553_v51 = vperm.slane %v15785_v24, %v13339_v60 }
 0xbff   : > { %12399 = vxpose.binary.xlu1.c.b16.start.end [1/2] (short) (narrow) %v8633_v56, %v8577_v5, 16  ;;  %v8627_v42 = vsel %vm1016_vm0, 0, %v8626_v1 }
 0xc00   : > { %12396 = vxpose.binary.xlu2.c.b16.start.end [1/2] (short) (narrow) %v15734_v27, %v15731_v28, 16  ;;  %v8697_v28 = vperm.slane %v8691_v36, %v13331_v49  ;;  %v8670_v27 = vrot.slane %v8657_v39, 4  ;;  %v8570_v56 = vrot.slane %v8553_v51, 4  ;;  %v8733_v39 = vperm.slane %v8727_v40, %v13339_v60 }
 0xc02   : > { %v8716_v23 = vrot.slane %v8697_v28, 4  ;;  %v8671_v2 = vsel %vm1016_vm0, %v8670_v27, %v8645_v37  ;;  %v8715_v34 = vsel %vm1016_vm0, %v8714_v58, %v8697_v28  ;;  %v8571_v54 = vsel %vm1016_vm0, 0, %v8570_v56 }
 0xc03   : > { %v8721_v5 = vperm.slane %v8715_v34, %v13339_v60  ;;  %v8683_v37 = vsel %vm1016_vm0, 0, %v8682_v4  ;;  %v8677_v47 = vperm.slane %v8671_v2, %v13339_v60  ;;  %v8742_v36 = vrot.slane %v8733_v39, 4 }
 0xc04   : > { %v8717_v18 = vsel %vm1016_vm0, %v8709_v59, %v8716_v23 }
 0xc05   : > { %v8738_v52 = vrot.slane %v8721_v5, 4  ;;  %v8686_v33 = vrot.slane %v8677_v47, 4  ;;  %v8743_v22 = vsel %vm1016_vm0, 0, %v8742_v36 }
 0xc07   : > { %v8739_v24 = vsel %vm1016_vm0, 0, %v8738_v52  ;;  %v8687_v21 = vsel %vm1016_vm0, 0, %v8686_v33 }
 0xc0e   : > { %12384 = vxpose.binary.xlu0.c.b16.start.end [1/2] (short) (narrow) %v15765_v11, %v15761_v16, 16  ;;  %v8669_v16 = vperm.slane %v8661_v62, %v13339_v60  ;;  %v8725_v11 = vperm.slane %v8717_v18, %v13339_v60 }
 0xc0f   : > { %12408 = vxpose.binary.xlu1.c.b16.start.end [1/2] (short) (narrow) %v15771_v32, %v15768_v48, 16  ;;  %v8681_v48 = vperm.slane %v8673_v31, %v13339_v60  ;;  %v8737_v32 = vperm.slane %v8729_v25, %v13339_v60 }
 0xc10   : > { %12405 = vxpose.binary.xlu2.c.b16.start.end [1/2] (short) (narrow) %v8631_v57, %v8575_v43, 16  ;;  %v8684_v53 = vrot.slane %v8669_v16, 4  ;;  %v8740_v45 = vrot.slane %v8725_v11, 4 }
 0xc12   : > { %v8685_v30 = vsel %vm1016_vm0, 0, %v8684_v53  ;;  %v8741_v50 = vsel %vm1016_vm0, 0, %v8740_v45 }
 0xc1e   : > { %12393 = vxpose.binary.xlu0.c.b16.start.end [1/2] (short) (narrow) %v15708_v8, %v15705_v20, 16  ;;  %v8688_v20 = vrot.slane %v8681_v48, 4  ;;  %v8744_v8 = vrot.slane %v8737_v32, 4 }
 0xc1f   : > { %12417 = vxpose.binary.xlu1.c.b16.start.end [1/2] (short) (narrow) %v8621_v7, %v8565_v14, 16 }
 0xc20   : > { %12414 = vxpose.binary.xlu2.c.b16.start.end [1/2] (short) (narrow) %v8613_v15, %v8557_v46, 16  ;;  %v8689_v3 = vsel %vm1016_vm0, 0, %v8688_v20  ;;  %v8745_v26 = vsel %vm1016_vm0, 0, %v8744_v8 }
 0xc2e   : > { %12402 = vxpose.binary.xlu0.c.b16.start.end [1/2] (short) (narrow) %v8629_v13, %v8573_v0, 16 }
 0xc2f   : > { %12426 = vxpose.binary.xlu1.c.b16.start.end [1/2] (short) (narrow) %v8741_v50, %v8685_v30, 16 }
 0xc30   : > { %12423 = vxpose.binary.xlu2.c.b16.start.end [1/2] (short) (narrow) %v8745_v26, %v8689_v3, 16 }
 0xc3e   : > { %12411 = vxpose.binary.xlu0.c.b16.start.end [1/2] (short) (narrow) %v8627_v42, %v8571_v54, 16 }
 0xc3f   : > { %12435 = vxpose.binary.xlu1.c.b16.start.end [1/2] (short) (narrow) %v8739_v24, %v8683_v37, 16 }
 0xc40   : > { %12432 = vxpose.binary.xlu2.c.b16.start.end [1/2] (short) (narrow) %v8737_v32, %v8681_v48, 16 }
 0xc4e   : > { %12420 = vxpose.binary.xlu0.c.b16.start.end [1/2] (short) (narrow) %v8609_v6, %v8553_v51, 16 }
 0xc4f   : > { %12444 = vxpose.binary.xlu1.c.b16.start.end [1/2] (short) (narrow) %v8721_v5, %v8665_v19, 16 }
 0xc50   : > { %12441 = vxpose.binary.xlu2.c.b16.start.end [1/2] (short) (narrow) %v8733_v39, %v8677_v47, 16 }
 0xc5e   : > { %12429 = vxpose.binary.xlu0.c.b16.start.end [1/2] (short) (narrow) %v8743_v22, %v8687_v21, 16 }
 0xc61   : > { %v12355_v44 = vpop.trf.xlu2 }
 0xc62   : > { %v9776_v12 = vrot.slane %v12355_v44, 4 }
 0xc69   : > { %v12356_v29 = vpop.trf.xlu2 }
 0xc6a   : > { %v12352_v38 = vpop.trf.xlu0  ;;  %v9814_v48 = vrot.slane %v12356_v29, 4 }
 0xc6b   : > { %v12358_v28 = vpop.trf.xlu1  ;;  %v9788_v41 = vrot.slane %v12352_v38, 4 }
 0xc6d   : > { %v9789_v58 = vsel %vm1016_vm0, %v9788_v41, %v12358_v28 }
 0xc6e   : > { %12438 = vxpose.binary.xlu0.c.b16.start.end [1/2] (short) (narrow) %v8725_v11, %v8669_v16, 16  ;;  %v9793_v15 = vperm.slane %v9789_v58, %v13331_v49 }
 0xc70   : > { %v9800_v8 = vrot.slane %v9793_v15, 4 }
 0xc71   : > { %v12370_v17 = vpop.trf.xlu2 }
 0xc72   : > { %v12353_v27 = vpop.trf.xlu0 }
 0xc73   : > { %v12359_v63 = vpop.trf.xlu1  ;;  %v9826_v18 = vrot.slane %v12353_v27, 4 }
 0xc75   : > { %v9827_v57 = vsel %vm1016_vm0, %v9826_v18, %v12359_v63 }
 0xc76   : > { %v9831_v53 = vperm.slane %v9827_v57, %v13331_v49 }
 0xc78   : > { %v9838_v3 = vrot.slane %v9831_v53, 4 }
 0xc79   : > { %v12371_v7 = vpop.trf.xlu2 }
 0xc7a   : > { %v12361_v14 = vpop.trf.xlu0 }
 0xc7b   : > { %v12373_v9 = vpop.trf.xlu1  ;;  %v9782_v55 = vrot.slane %v12361_v14, 4 }
 0xc7d   : > { %v9783_v43 = vsel %vm1016_vm0, %v9782_v55, %v12370_v17 }
 0xc7e   : > { %v9787_v35 = vperm.slane %v9783_v43, %v13331_v49 }
 0xc80   : > { %v9801_v50 = vsel %vm1016_vm0, %v9800_v8, %v9787_v35 }
 0xc81   : > { %v15865_v61 = vpop.trf.xlu2  ;;  %v9805_v1 = vperm.slane %v9801_v50, %v13339_v60 }
 0xc82   : > { %v12362_v59 = vpop.trf.xlu0  ;;  %v9852_v18 = vrot.slane %v15865_v61, 4 }
 0xc83   : > { %v12374_v31 = vpop.trf.xlu1  ;;  %v9820_v40 = vrot.slane %v12362_v59, 4  ;;  %v9806_v39 = vrot.slane %v9805_v1, 4 }
 0xc85   : > { %v9821_v32 = vsel %vm1016_vm0, %v9820_v40, %v12371_v7 }
 0xc86   : > { %v9825_v0 = vperm.slane %v9821_v32, %v13331_v49 }
 0xc88   : > { %v9839_v51 = vsel %vm1016_vm0, %v9838_v3, %v9825_v0 }
 0xc89   : > { %v15867_v62 = vpop.trf.xlu2  ;;  %v9843_v54 = vperm.slane %v9839_v51, %v13339_v60 }
 0xc8a   : > { %v12364_v25 = vpop.trf.xlu0  ;;  %v9890_v58 = vrot.slane %v15867_v62, 4 }
 0xc8b   : > { %v15869_v23 = vpop.trf.xlu1  ;;  %v9777_v46 = vsel %vm1016_vm0, %v9776_v12, %v12364_v25  ;;  %v9844_v36 = vrot.slane %v9843_v54, 4 }
 0xc8c   : > { %v9781_v45 = vperm.slane %v9777_v46, %v13331_v49 }
 0xc8e   : > { %v9794_v26 = vrot.slane %v9781_v45, 4 }
 0xc91   : > { %v15872_v34 = vpop.trf.xlu2 }
 0xc92   : > { %v12365_v2 = vpop.trf.xlu0  ;;  %v9853_v57 = vsel %vm1016_vm0, %v9852_v18, %v15872_v34 }
 0xc93   : > { %v15878_v11 = vpop.trf.xlu1  ;;  %v9815_v30 = vsel %vm1016_vm0, %v9814_v48, %v12365_v2 }
 0xc94   : > { %v9819_v6 = vperm.slane %v9815_v30, %v13331_v49 }
 0xc96   : > { %v9832_v24 = vrot.slane %v9819_v6, 4 }
 0xc99   : > { %v12389_v56 = vpop.trf.xlu2 }
 0xc9a   : > { %v12367_v16 = vpop.trf.xlu0  ;;  %v9891_v32 = vsel %vm1016_vm0, %v9890_v58, %v12389_v56 }
 0xc9b   : > { %v9770_v10 = vrot.slane %v12367_v16, 4  ;;  %v12391_v52 = vpop.trf.xlu1 }
 0xc9c   : > { %v9846_v46 = vrot.slane %v12391_v52, 4 }
 0xc9d   : > { %v9771_v20 = vsel %vm1016_vm0, %v9770_v10, %v12373_v9 }
 0xc9e   : > { %v9775_v13 = vperm.slane %v9771_v20, %v13331_v49  ;;  %v9895_v20 = vperm.slane %v9891_v32, %v13331_v49 }
 0xca0   : > { %v9795_v19 = vsel %vm1016_vm0, %v9794_v26, %v9775_v13  ;;  %v9908_v51 = vrot.slane %v9895_v20, 4 }
 0xca1   : > { %v9799_v42 = vperm.slane %v9795_v19, %v13339_v60  ;;  %v12397_v17 = vpop.trf.xlu2 }
 0xca2   : > { %v12368_v5 = vpop.trf.xlu0  ;;  %v9847_v34 = vsel %vm1016_vm0, %v9846_v46, %v12397_v17 }
 0xca3   : > { %v9808_v4 = vrot.slane %v12368_v5, 4  ;;  %v9807_v22 = vsel %vm1016_vm0, %v9806_v39, %v9799_v42  ;;  %v12392_v14 = vpop.trf.xlu1  ;;  %v9851_v50 = vperm.slane %v9847_v34, %v13331_v49 }
 0xca4   : > { %v10077_v28 = vshrl.u32 %v9807_v22, 16  ;;  %v9884_v10 = vrot.slane %v12392_v14, 4 }
 0xca5   : > { %v9809_v37 = vsel %vm1016_vm0, %v9808_v4, %v12374_v31 }
 0xca6   : > { %v9813_v47 = vperm.slane %v9809_v37, %v13331_v49 }
 0xca8   : > { %v9833_v33 = vsel %vm1016_vm0, %v9832_v24, %v9813_v47 }
 0xca9   : > { %v9837_v21 = vperm.slane %v9833_v33, %v13339_v60  ;;  %v12398_v9 = vpop.trf.xlu2 }
 0xcaa   : > { %v12376_v44 = vpop.trf.xlu0  ;;  %v9885_v0 = vsel %vm1016_vm0, %v9884_v10, %v12398_v9 }
 0xcab   : > { %v9845_v29 = vsel %vm1016_vm0, %v9844_v36, %v9837_v21  ;;  %v15903_v59 = vpop.trf.xlu1  ;;  %v9864_v2 = vrot.slane %v12376_v44, 4  ;;  %v9889_v6 = vperm.slane %v9885_v0, %v13331_v49 }
 0xcac   : > { %v10076_v38 = vpack.i.b16 %v9845_v29, %v9807_v22  ;;  %v10078_v27 = vshrl.u32 %v9845_v29, 16 }
 0xcad   : > { %v9865_v55 = vsel %vm1016_vm0, %v9864_v2, %v15869_v23  ;;  %v9857_v23 = vperm.slane %v9853_v57, %v13331_v49  ;;  %v9909_v54 = vsel %vm1016_vm0, %v9908_v51, %v9889_v6 }
 0xcae   : > { %11411 = vmatmul.msk.bf16.vlgmr.msra.gmra.mxu2 %vm3352_vm3, %v10076_v38  ;;  %v10079_v63 = vpack.i.b16 %v10078_v27, %v10077_v28  ;;  %v9869_v40 = vperm.slane %v9865_v55, %v13331_v49  ;;  %v9913_v39 = vperm.slane %v9909_v54, %v13339_v60 }
 0xcaf   : > { %v9870_v13 = vrot.slane %v9857_v23, 4 }
 0xcb0   : > { %11415 = vmatmul.msk.bf16.vlgmr.msrb.gmra.mxu3 %vm3352_vm3, %v10079_v63  ;;  %v9876_v35 = vrot.slane %v9869_v40, 4 }
 0xcb1   : > { %v15905_v25 = vpop.trf.xlu2  ;;  %v9871_v1 = vsel %vm1016_vm0, %v9870_v13, %v9851_v50 }
 0xcb2   : > { %v12377_v7 = vpop.trf.xlu0  ;;  %v9875_v24 = vperm.slane %v9871_v1, %v13339_v60 }
 0xcb3   : > { %v15907_v41 = vpop.trf.xlu1  ;;  %v9902_v15 = vrot.slane %v12377_v7, 4 }
 0xcb5   : > { %v9903_v45 = vsel %vm1016_vm0, %v9902_v15, %v15878_v11 }
 0xcb6   : > { %v9907_v30 = vperm.slane %v9903_v45, %v13331_v49 }
 0xcb8   : > { %v9914_v56 = vrot.slane %v9907_v30, 4 }
 0xcb9   : > { %v15914_v43 = vpop.trf.xlu2 }
 0xcba   : > { %v12385_v31 = vpop.trf.xlu0 }
 0xcbb   : > { %v9858_v16 = vrot.slane %v12385_v31, 4  ;;  %v12409_v62 = vpop.trf.xlu1  ;;  %v9940_v31 = vrot.slane %v15903_v59, 4 }
 0xcbc   : > { %v9934_v58 = vrot.slane %v12409_v62, 4 }
 0xcbd   : > { %v9941_v40 = vsel %vm1016_vm0, %v9940_v31, %v15905_v25 }
 0xcc1   : > { %v12415_v19 = vpop.trf.xlu2 }
 0xcc2   : > { %v12386_v12 = vpop.trf.xlu0  ;;  %v9922_v32 = vrot.slane %v12415_v19, 4 }
 0xcc3   : > { %v9896_v3 = vrot.slane %v12386_v12, 4  ;;  %v12410_v42 = vpop.trf.xlu1  ;;  %v9978_v12 = vrot.slane %v15907_v41, 4 }
 0xcc4   : > { %v9972_v57 = vrot.slane %v12410_v42, 4 }
 0xcc5   : > { %v9979_v46 = vsel %vm1016_vm0, %v9978_v12, %v15914_v43 }
 0xcc6   : > { %v9983_v41 = vperm.slane %v9979_v46, %v13331_v49 }
 0xcc8   : > { %v9990_v45 = vrot.slane %v9983_v41, 4 }
 0xcc9   : > { %v12416_v28 = vpop.trf.xlu2 }
 0xcca   : > { %v12394_v48 = vpop.trf.xlu0  ;;  %v9960_v6 = vrot.slane %v12416_v28, 4 }
 0xccb   : > { %v9859_v61 = vsel %vm1016_vm0, %v9858_v16, %v12394_v48  ;;  %v12418_v17 = vpop.trf.xlu1  ;;  %v9945_v16 = vperm.slane %v9941_v40, %v13331_v49 }
 0xccc   : > { %v9863_v53 = vperm.slane %v9859_v61, %v13331_v49  ;;  %v9935_v59 = vsel %vm1016_vm0, %v9934_v58, %v12418_v17 }
 0xccd   : > { %v9952_v61 = vrot.slane %v9945_v16, 4  ;;  %v9939_v23 = vperm.slane %v9935_v59, %v13331_v49 }
 0xcce   : > { %v9877_v8 = vsel %vm1016_vm0, %v9876_v35, %v9863_v53 }
 0xccf   : > { %v9881_v26 = vperm.slane %v9877_v8, %v13339_v60  ;;  %v9953_v13 = vsel %vm1016_vm0, %v9952_v61, %v9939_v23 }
 0xcd0   : > { %v9957_v51 = vperm.slane %v9953_v13, %v13339_v60 }
 0xcd1   : > { %v9882_v52 = vrot.slane %v9881_v26, 4  ;;  %v15944_v14 = vpop.trf.xlu2 }
 0xcd2   : > { %v12395_v11 = vpop.trf.xlu0  ;;  %v9958_v54 = vrot.slane %v9957_v51, 4  ;;  %v10016_v17 = vrot.slane %v15944_v14, 4 }
 0xcd3   : > { %v9897_v5 = vsel %vm1016_vm0, %v9896_v3, %v12395_v11  ;;  %v9883_v36 = vsel %vm1016_vm0, %v9882_v52, %v9875_v24  ;;  %v12419_v7 = vpop.trf.xlu1 }
 0xcd4   : > { %v9901_v4 = vperm.slane %v9897_v5, %v13331_v49  ;;  %v10083_v29 = vshrl.u32 %v9883_v36, 16  ;;  %v9973_v10 = vsel %vm1016_vm0, %v9972_v57, %v12419_v7 }
 0xcd5   : > { %v9977_v34 = vperm.slane %v9973_v10, %v13331_v49 }
 0xcd6   : > { %v9915_v37 = vsel %vm1016_vm0, %v9914_v56, %v9901_v4 }
 0xcd7   : > { %v9919_v47 = vperm.slane %v9915_v37, %v13339_v60  ;;  %v9991_v50 = vsel %vm1016_vm0, %v9990_v45, %v9977_v34 }
 0xcd8   : > { %v9995_v19 = vperm.slane %v9991_v50, %v13339_v60 }
 0xcd9   : > { %v9920_v33 = vrot.slane %v9919_v47, 4  ;;  %v15947_v2 = vpop.trf.xlu2 }
 0xcda   : > { %v12403_v21 = vpop.trf.xlu0  ;;  %v9996_v24 = vrot.slane %v9995_v19, 4 }
 0xcdb   : > { %v9921_v22 = vsel %vm1016_vm0, %v9920_v33, %v9913_v39  ;;  %v15950_v55 = vpop.trf.xlu1  ;;  %v9928_v15 = vrot.slane %v12403_v21, 4 }
 0xcdc   : > { %v10082_v44 = vpack.i.b16 %v9921_v22, %v9883_v36  ;;  %v10084_v38 = vshrl.u32 %v9921_v22, 16  ;;  %v10004_v7 = vrot.slane %v15950_v55, 4 }
 0xcde   : > { %11412 = vmatmul.msk.bf16.gmra.mxu2 %vm3352_vm3, %v10082_v44  ;;  %v10085_v27 = vpack.i.b16 %v10084_v38, %v10083_v29 }
 0xce0   : > { %11416 = vmatmul.msk.bf16.gmra.mxu3 %vm3352_vm3, %v10085_v27 }
 0xce1   : > { %v12433_v62 = vpop.trf.xlu2 }
 0xce2   : > { %v12404_v63 = vpop.trf.xlu0 }
 0xce3   : > { %v9966_v43 = vrot.slane %v12404_v63, 4  ;;  %v12428_v8 = vpop.trf.xlu1  ;;  %v10054_v63 = vrot.slane %v15947_v2, 4 }
 0xce4   : > { %v10042_v2 = vrot.slane %v12428_v8, 4 }
 0xce9   : > { %v12434_v52 = vpop.trf.xlu2 }
 0xcea   : > { %v12412_v9 = vpop.trf.xlu0  ;;  %v10048_v12 = vrot.slane %v12434_v52, 4 }
 0xceb   : > { %v9929_v48 = vsel %vm1016_vm0, %v9928_v15, %v12412_v9  ;;  %v12436_v37 = vpop.trf.xlu1  ;;  %v10010_v9 = vrot.slane %v12433_v62, 4 }
 0xcec   : > { %v9933_v25 = vperm.slane %v9929_v48, %v13331_v49  ;;  %v10005_v46 = vsel %vm1016_vm0, %v10004_v7, %v12436_v37 }
 0xced   : > { %v10009_v48 = vperm.slane %v10005_v46, %v13331_v49 }
 0xcee   : > { %v9946_v30 = vrot.slane %v9933_v25, 4 }
 0xcef   : > { %v10022_v62 = vrot.slane %v10009_v48, 4 }
 0xcf1   : > { %v12442_v38 = vpop.trf.xlu2 }
 0xcf2   : > { %v12413_v18 = vpop.trf.xlu0  ;;  %v10011_v15 = vsel %vm1016_vm0, %v10010_v9, %v12442_v38 }
 0xcf3   : > { %v9967_v0 = vsel %vm1016_vm0, %v9966_v43, %v12413_v18  ;;  %v12437_v28 = vpop.trf.xlu1 }
 0xcf4   : > { %v9971_v3 = vperm.slane %v9967_v0, %v13331_v49 }
 0xcf6   : > { %v9984_v1 = vrot.slane %v9971_v3, 4 }
 0xcf9   : > { %v12443_v40 = vpop.trf.xlu2 }
 0xcfa   : > { %v12421_v35 = vpop.trf.xlu0  ;;  %v10049_v55 = vsel %vm1016_vm0, %v10048_v12, %v12443_v40 }
 0xcfb   : > { %v9923_v53 = vsel %vm1016_vm0, %v9922_v32, %v12421_v35  ;;  %v12445_v57 = vpop.trf.xlu1  ;;  %v10015_v32 = vperm.slane %v10011_v15, %v13331_v49  ;;  %v10053_v23 = vperm.slane %v10049_v55, %v13331_v49  ;;  %v10043_v35 = vsel %vm1016_vm0, %v10042_v2, %v12437_v28  ;;  %v11688_v15 = vld [vmem:[%s13263_s24 + $0x38] sm:$0xff] }
 0xcfc   : > { %v9927_v20 = vperm.slane %v9923_v53, %v13331_v49  ;;  %v10047_v53 = vperm.slane %v10043_v35, %v13331_v49  ;;  %10411 = vmatpush.bf16.msra.mxu0 %v11688_v15 }
 0xcfe   : > { %v9947_v26 = vsel %vm1016_vm0, %v9946_v30, %v9927_v20 }
 0xcff   : > { %v9951_v5 = vperm.slane %v9947_v26, %v13339_v60  ;;  %v10060_v26 = vrot.slane %v10047_v53, 4 }
 0xd01   : > { %v9959_v39 = vsel %vm1016_vm0, %v9958_v54, %v9951_v5 }
 0xd02   : > { %v12422_v11 = vpop.trf.xlu0  ;;  %v10089_v22 = vshrl.u32 %v9959_v39, 16 }
 0xd03   : > { %v9961_v56 = vsel %vm1016_vm0, %v9960_v6, %v12422_v11  ;;  %v12446_v8 = vpop.trf.xlu1 }
 0xd04   : > { %v9965_v4 = vperm.slane %v9961_v56, %v13331_v49 }
 0xd06   : > { %v9985_v42 = vsel %vm1016_vm0, %v9984_v1, %v9965_v4 }
 0xd07   : > { %v9989_v47 = vperm.slane %v9985_v42, %v13339_v60 }
 0xd09   : > { %v9997_v33 = vsel %vm1016_vm0, %v9996_v24, %v9989_v47 }
 0xd0a   : > { %v12430_v36 = vpop.trf.xlu0  ;;  %v10088_v21 = vpack.i.b16 %v9997_v33, %v9959_v39  ;;  %v10090_v44 = vshrl.u32 %v9997_v33, 16 }
 0xd0b   : > { %v10017_v31 = vsel %vm1016_vm0, %v10016_v17, %v12430_v36 }
 0xd0c   : > { %11413 = vmatmul.msk.bf16.gmra.mxu2 %vm3352_vm3, %v10088_v21  ;;  %v10091_v29 = vpack.i.b16 %v10090_v44, %v10089_v22  ;;  %v10021_v58 = vperm.slane %v10017_v31, %v13331_v49 }
 0xd0e   : > { %11417 = vmatmul.msk.bf16.gmra.mxu3 %vm3352_vm3, %v10091_v29  ;;  %v10028_v41 = vrot.slane %v10021_v58, 4 }
 0xd10   : > { %v10029_v43 = vsel %vm1016_vm0, %v10028_v41, %v10015_v32 }
 0xd11   : > { %v10033_v0 = vperm.slane %v10029_v43, %v13339_v60 }
 0xd12   : > { %v12431_v27 = vpop.trf.xlu0 }
 0xd13   : > { %v10055_v18 = vsel %vm1016_vm0, %v10054_v63, %v12431_v27  ;;  %v10034_v6 = vrot.slane %v10033_v0, 4 }
 0xd14   : > { %v10059_v14 = vperm.slane %v10055_v18, %v13331_v49 }
 0xd16   : > { %v10066_v61 = vrot.slane %v10059_v14, 4  ;;  %v11687_v14 = vld [vmem:[%s13263_s24 + $0x30] sm:$0xff] }
 0xd17   : > { %10412 = vmatpush.bf16.msra.mxu0 %v11687_v14 }
 0xd18   : > { %v10067_v45 = vsel %vm1016_vm0, %v10066_v61, %v10053_v23 }
 0xd19   : > { %v10071_v30 = vperm.slane %v10067_v45, %v13339_v60 }
 0xd1a   : > { %v12439_v16 = vpop.trf.xlu0 }
 0xd1b   : > { %v9998_v59 = vrot.slane %v12439_v16, 4  ;;  %v10072_v19 = vrot.slane %v10071_v30, 4  ;;  %v11684_v30 = vld [vmem:[%s13263_s24 + $0x18] sm:$0xff] }
 0xd1d   : > { %v9999_v10 = vsel %vm1016_vm0, %v9998_v59, %v12445_v57  ;;  %v11686_v59 = vld [vmem:[%s13263_s24 + $0x28] sm:$0xff] }
 0xd1e   : > { %v10003_v25 = vperm.slane %v9999_v10, %v13331_v49  ;;  %10413 = vmatpush.bf16.msra.mxu0 %v11686_v59 }
 0xd20   : > { %v10023_v34 = vsel %vm1016_vm0, %v10022_v62, %v10003_v25  ;;  %v11685_v62 = vld [vmem:[%s13263_s24 + $0x20] sm:$0xff] }
 0xd21   : > { %v10027_v50 = vperm.slane %v10023_v34, %v13339_v60 }
 0xd22   : > { %v12440_v20 = vpop.trf.xlu0  ;;  %10414 = vmatpush.bf16.msra.mxu0 %v11685_v62 }
 0xd23   : > { %v10036_v13 = vrot.slane %v12440_v20, 4  ;;  %v10035_v56 = vsel %vm1016_vm0, %v10034_v6, %v10027_v50 }
 0xd24   : > { %v10095_v52 = vshrl.u32 %v10035_v56, 16 }
 0xd25   : > { %v10037_v3 = vsel %vm1016_vm0, %v10036_v13, %v12446_v8 }
 0xd26   : > { %v10041_v51 = vperm.slane %v10037_v3, %v13331_v49  ;;  %10415 = vmatpush.bf16.msra.mxu0 %v11684_v30  ;;  %v11701_v30 = vld [vmem:[%s13265_s27 + $0x64] sm:$0xf] }
 0xd28   : > { %v10061_v11 = vsel %vm1016_vm0, %v10060_v26, %v10041_v51 }
 0xd29   : > { %v10065_v5 = vperm.slane %v10061_v11, %v13339_v60 }
 0xd2b   : > { %v10073_v1 = vsel %vm1016_vm0, %v10072_v19, %v10065_v5 }
 0xd2c   : > { %v10094_v4 = vpack.i.b16 %v10073_v1, %v10035_v56  ;;  %v10096_v54 = vshrl.u32 %v10073_v1, 16 }
 0xd2e   : > { %11414 = vmatmul.msk.bf16.gmra.mxu2 %vm3352_vm3, %v10094_v4  ;;  %v10097_v42 = vpack.i.b16 %v10096_v54, %v10095_v52  ;;  %v11683_v4 = vld [vmem:[%s13263_s24 + $0x10] sm:$0xff] }
 0xd2f   : > { %10416 = vmatpush.bf16.msra.mxu0 %v11683_v4 }
 0xd30   : > { %11418 = vmatmul.msk.bf16.gmra.mxu3 %vm3352_vm3, %v10097_v42 }
 0xd31   : > { %v10122_v37 = vpop.f32.mrf.mxu2 }
 0xd33   : > { %v10166_v24 = vpop.f32.mrf.mxu3 }
 0xd34   : > { %v12447_v47 = vpack.i.bf16 %v10166_v24, %v10122_v37 }
 0xd36   : > { %12448 = vxpose.xlu0.b32.start [1/8] (short) (narrow) %v12447_v47, 8 }
 0xd39   : > { %v10124_v39 = vpop.f32.mrf.mxu2 }
 0xd3b   : > { %v10168_v33 = vpop.f32.mrf.mxu3 }
 0xd3c   : > { %v12449_v36 = vpack.i.bf16 %v10168_v33, %v10124_v39  ;;  %v11682_v33 = vld [vmem:[%s13263_s24 + $0x8] sm:$0xff] }
 0xd3d   : > { %10417 = vmatpush.bf16.msra.mxu0 %v11682_v33  ;;  %v11699_v33 = vld [vmem:[%s13265_s27 + $0x54] sm:$0xf] }
 0xd3e   : > { %12450 = vxpose.xlu0.b32.cont [2/8] (short) (narrow) %v12449_v36, 8 }
 0xd61   : > { %v10127_v21 = vpop.f32.mrf.mxu2 }
 0xd63   : > { %v10171_v22 = vpop.f32.mrf.mxu3 }
 0xd64   : > { %v12451_v44 = vpack.i.bf16 %v10171_v22, %v10127_v21 }
 0xd66   : > { %12452 = vxpose.xlu0.b32.cont [3/8] (short) (narrow) %v12451_v44, 8 }
 0xd69   : > { %v10129_v29 = vpop.f32.mrf.mxu2 }
 0xd6b   : > { %v10173_v38 = vpop.f32.mrf.mxu3 }
 0xd6c   : > { %v12453_v28 = vpack.i.bf16 %v10173_v38, %v10129_v29 }
 0xd6e   : > { %12454 = vxpose.xlu0.b32.cont [4/8] (short) (narrow) %v12453_v28, 8 }
 0xd8f   : > { %v10132_v27 = vpop.f32.mrf.mxu2 }
 0xd91   : > { %v10176_v17 = vpop.f32.mrf.mxu3 }
 0xd92   : > { %v12455_v63 = vpack.i.bf16 %v10176_v17, %v10132_v27 }
 0xd94   : > { %12456 = vxpose.xlu0.b32.cont [5/8] (short) (narrow) %v12455_v63, 8 }
 0xd97   : > { %v10134_v7 = vpop.f32.mrf.mxu2 }
 0xd99   : > { %v10178_v9 = vpop.f32.mrf.mxu3 }
 0xd9a   : > { %v12457_v31 = vpack.i.bf16 %v10178_v9, %v10134_v7 }
 0xd9c   : > { %12458 = vxpose.xlu0.b32.cont [6/8] (short) (narrow) %v12457_v31, 8 }
 0xdb1   : > { %v10137_v12 = vpop.f32.mrf.mxu2 }
 0xdb3   : > { %v10181_v18 = vpop.f32.mrf.mxu3 }
 0xdb4   : > { %v12459_v58 = vpack.i.bf16 %v10181_v18, %v10137_v12 }
 0xdb6   : > { %12460 = vxpose.xlu0.b32.cont [7/8] (short) (narrow) %v12459_v58, 8  ;;  %v11681_v58 = vld [vmem:[%s13263_s24] sm:$0xff] }
 0xdb7   : > { %10418 = vmatpush.bf16.msra.mxu0 %v11681_v58  ;;  %v11469_v58 = vld [vmem:[%s13265_s27 + $0x20] sm:$0xf] }
 0xdb9   : > { %v10139_v40 = vpop.f32.mrf.mxu2 }
 0xdbb   : > { %v10183_v57 = vpop.f32.mrf.mxu3 }
 0xdbc   : > { %v12461_v46 = vpack.i.bf16 %v10183_v57, %v10139_v40 }
 0xdbe   : > { %12462 = vxpose.xlu0.b32.end [8/8] (short) (narrow) %v12461_v46, 8  ;;  %v16296_v46 = vld [vmem:[#allocation52_spill] sm:$0xff] }
 0xe2a   : > { %v12463_v16 = vpop.trf.xlu0 }
 0xe2b   : > { %v12467_v2 = vunpack.i.h.bf16 %v12463_v16  ;;  %v12464_v55 = vunpack.i.l.bf16 %v12463_v16 }
 0xe2d   : > { %v10260_v48 = vrot.slane %v12467_v2, 4  ;;  %v10265_v41 = vperm.slane %v12467_v2, %v13331_v49  ;;  %v10250_v32 = vrot.slane %v12464_v55, 4  ;;  %v10255_v10 = vperm.slane %v12464_v55, %v13331_v49 }
 0xe2f   : > { %v10261_v61 = vsel %vm1016_vm0, 0.0, %v10260_v48  ;;  %v10270_v23 = vrot.slane %v10265_v41, 4  ;;  %v10251_v25 = vsel %vm1016_vm0, 0.0, %v10250_v32  ;;  %v10272_v35 = vrot.slane %v10255_v10, 4  ;;  %v12495_v48 = vld [vmem:[#allocation21] sm:$0xff] }
 0xe30   : > { %v10269_v43 = vperm.slane %v10261_v61, %v13331_v49  ;;  %v10259_v53 = vperm.slane %v10251_v25, %v13331_v49  ;;  %v12496_v61 = vld [vmem:[#allocation21 + $0x8] sm:$0xff]  ;;  %v12968_v25 = vmov 128.0  }
 0xe31   : > { %v10271_v45 = vsel %vm1016_vm0, %v10270_v23, %v10255_v10  ;;  %v10273_v34 = vsel %vm1016_vm0, %v10265_v41, %v10272_v35  ;;  %12484 = vrcp.f32 %v12968_v25  ;;  %v11720_v25 = vld [vmem:[%s13271_s20 + $0x78] sm:$0xff] }
 0xe32   : > { %v10282_v20 = vrot.slane %v10269_v43, 4  ;;  %v10277_v8 = vperm.slane %v10271_v45, %v13339_v60  ;;  %v10281_v0 = vperm.slane %v10273_v34, %v13339_v60  ;;  %v10284_v13 = vrot.slane %v10259_v53, 4  ;;  %v11703_v45 = vld [vmem:[%s13265_s27 + $0x74] sm:$0xf]  ;;  %10756 = vmatpush.bf16.msrb.mxu0 %v11720_v25 }
 0xe34   : > { %v10283_v50 = vsel %vm1016_vm0, %v10282_v20, %v10259_v53  ;;  %v10285_v3 = vsel %vm1016_vm0, %v10269_v43, %v10284_v13  ;;  %v10294_v26 = vrot.slane %v10277_v8, 4  ;;  %v10296_v51 = vrot.slane %v10281_v0, 4  ;;  %v11509_v43 = vld [vmem:[%s13265_s27 + $0x70] sm:$0xf]  ;;  %v11704_v53 = vld [vmem:[%s13265_s27 + $0x74] sm:$0xf0] }
 0xe35   : > { %v10289_v6 = vperm.slane %v10283_v50, %v13339_v60  ;;  %v10293_v11 = vperm.slane %v10285_v3, %v13339_v60  ;;  %v11510_v34 = vor.u32 %v11704_v53, %v11509_v43  ;;  %v11511_v20 = vld [vmem:[%s13265_s27 + $0x78] sm:$0xf0]  ;;  %v11702_v0 = vld [vmem:[%s13265_s27 + $0x64] sm:$0xf0]  ;;  %v11503_v50 = vld [vmem:[%s13265_s27 + $0x68] sm:$0xf0] }
 0xe36   : > { %v10297_v19 = vsel %vm1016_vm0, 0.0, %v10296_v51  ;;  %v10295_v52 = vsel %vm1016_vm0, 0.0, %v10294_v26  ;;  %v10302_v42 = vsel %vm1016_vm0, %v10296_v51, %v10277_v8  ;;  %v11501_v8 = vld [vmem:[%s13265_s27 + $0x60] sm:$0xf]  ;;  %v11514_v13 = vor.u32 %v11703_v45, %v11511_v20  ;;  %v11719_v53 = vld [vmem:[%s13271_s20 + $0x70] sm:$0xff] }
 0xe37   : > { %v10298_v5 = vrot.slane %v10289_v6, 4  ;;  %v10300_v56 = vrot.slane %v10293_v11, 4  ;;  %v10307_v1 = vrot.slane %v10297_v19, 4  ;;  %v10306_v36 = vperm.slane %v10302_v42, %v13331_v49  ;;  %v12485_v35 = vpop.eup %12484  ;;  %10579 = vmatpush.bf16.msrb.mxu1 %v11510_v34  ;;  %v11700_v11 = vld [vmem:[%s13265_s27 + $0x54] sm:$0xf0]  ;;  %10757 = vmatpush.bf16.msrb.mxu0 %v11719_v53 }
 0xe38   : > { %v10432_v62 = vmul.f32 128.0, %v12485_v35  ;;  %v11502_v26 = vor.u32 %v11702_v0, %v11501_v8  ;;  %10593 = vmatpush.bf16.msrb.mxu2 %v11514_v13  ;;  %v11506_v51 = vor.u32 %v11701_v30, %v11503_v50  ;;  %vm10436_vm5 = vweird.f32 %v12485_v35  ;;  %v11689_v8 = vld [vmem:[%s13265_s27 + $0x4] sm:$0xf]  ;;  %v11455_v0 = vld [vmem:[%s13265_s27 + $0x8] sm:$0xf0] }
 0xe39   : > { %v10301_v54 = vsel %vm1016_vm0, 0.0, %v10300_v56  ;;  %v10308_v37 = vsel %vm1016_vm0, %v10307_v1, %v10295_v52  ;;  %v10299_v39 = vsel %vm1016_vm0, 0.0, %v10298_v5  ;;  %v10313_v21 = vsel %vm1016_vm0, %v10300_v56, %v10289_v6  ;;  %v11493_v6 = vld [vmem:[%s13265_s27 + $0x50] sm:$0xf]  ;;  %v11710_v30 = vld [vmem:[%s13271_s20 + $0x28] sm:$0xff] }
 0xe3a   : > { %v10318_v24 = vrot.slane %v10301_v54, 4  ;;  %v10312_v47 = vperm.slane %v10308_v37, %v13331_v49  ;;  %v10317_v28 = vperm.slane %v10313_v21, %v13331_v49  ;;  %v10433_v3 = vsub.f32 1.0, %v10432_v62  ;;  %v11485_v21 = vld [vmem:[%s13265_s27 + $0x40] sm:$0xf]  ;;  %v11711_v62 = vld [vmem:[%s13271_s20 + $0x30] sm:$0xff] }
 0xe3b   : > { %10580 = vmatpush.bf16.msrb.mxu1 %v11502_v26  ;;  %v11494_v5 = vor.u32 %v11700_v11, %v11493_v6  ;;  %v11718_v26 = vld [vmem:[%s13271_s20 + $0x68] sm:$0xff]  ;;  %v11709_v6 = vld [vmem:[%s13271_s20 + $0x20] sm:$0xff] }
 0xe3c   : > { %v10319_v22 = vsel %vm1016_vm0, %v10318_v24, %v10299_v39  ;;  %v10324_v44 = vrot.slane %v10312_v47, 4  ;;  %v10434_v19 = vmul.f32 %v12485_v35, %v10433_v3  ;;  %10594 = vmatpush.bf16.msrb.mxu2 %v11506_v51  ;;  %v11458_v3 = vor.u32 %v11689_v8, %v11455_v0  ;;  %10758 = vmatpush.bf16.msrb.mxu0 %v11718_v26 }
 0xe3d   : > { %v10323_v29 = vperm.slane %v10319_v22, %v13331_v49  ;;  %v16295_v49 = vld [vmem:[#allocation55_spill] sm:$0xff] }
 0xe3e   : > { %v10325_v38 = vsel %vm1016_vm0, %v10324_v44, %v10306_v36  ;;  %v12181_v40 = vunpack.i.l.bf16 %v16295_v49  ;;  %v10435_v56 = vadd.f32 %v12485_v35, %v10434_v19  ;;  %v11495_v36 = vld [vmem:[%s13265_s27 + $0x58] sm:$0xf0]  ;;  %v11698_v44 = vld [vmem:[%s13265_s27 + $0x44] sm:$0xf0] }
 0xe3f   : > { %v10329_v27 = vperm.slane %v10325_v38, %v13339_v60  ;;  %v10330_v17 = vrot.slane %v10323_v29, 4  ;;  %10581 = vmatpush.bf16.msrb.mxu1 %v11494_v5  ;;  %v11498_v22 = vor.u32 %v11699_v33, %v11495_v36  ;;  %v11486_v29 = vor.u32 %v11698_v44, %v11485_v21  ;;  %v11697_v38 = vld [vmem:[%s13265_s27 + $0x44] sm:$0xf]  ;;  %v11694_v49 = vld [vmem:[%s13265_s27 + $0x24] sm:$0xf0] }
 0xe40   : > { %v5679_v15 = vsel %vm3313_vm1, %v16296_v46, %v12181_v40  ;;  %v16072_v1 = vsel %vm10436_vm5, %v12485_v35, %v10435_v56  ;;  %v11470_v46 = vor.u32 %v11694_v49, %v11469_v58 }
 0xe41   : > { %v10331_v63 = vsel %vm1016_vm0, %v10330_v17, %v10317_v28  ;;  %v10338_v7 = vrot.slane %v10329_v27, 4  ;;  %10595 = vmatpush.bf16.msrb.mxu2 %v11498_v22  ;;  %v11487_v28 = vld [vmem:[%s13265_s27 + $0x48] sm:$0xf0] }
 0xe42   : > { %v10335_v9 = vperm.slane %v10331_v63, %v13339_v60  ;;  %v16059_v60 = vld [vmem:[%s13273_s6] sm:$0xff]  ;;  %v11490_v63 = vor.u32 %v11697_v38, %v11487_v28 }
 0xe43   : > { %v10362_v2 = vperm.slane %v16059_v60, 3  ;;  %10582 = vmatpush.bf16.msrb.mxu1 %v11486_v29  ;;  %v10474_v33 = vperm.slane %v16059_v60, 4  ;;  %v10477_v29 = vperm.slane %v16059_v60, 5  ;;  %v10497_v49 = vperm.slane %v16059_v60, 6 }
 0xe44   : > { %v10339_v31 = vsel %vm1016_vm0, %v10335_v9, %v10338_v7  ;;  %v10336_v12 = vrot.slane %v10335_v9, 4  ;;  %v11696_v7 = vld [vmem:[%s13265_s27 + $0x34] sm:$0xf0]  ;;  %v11695_v9 = vld [vmem:[%s13265_s27 + $0x34] sm:$0xf]  ;;  %v10645_v25 = vperm.slane %v16059_v60, 7 }
 0xe45   : > { %10341 = vrot.lane.b32.xlu2 %v10339_v31, %s12965_s17  ;;  %v11479_v31 = vld [vmem:[%s13265_s27 + $0x38] sm:$0xf0]  ;;  %10596 = vmatpush.bf16.msrb.mxu2 %v11490_v63  ;;  %v11717_v63 = vld [vmem:[%s13271_s20 + $0x60] sm:$0xff] }
 0xe46   : > { %v10337_v18 = vsel %vm1016_vm0, %v10336_v12, %v10329_v27  ;;  %v11477_v27 = vld [vmem:[%s13265_s27 + $0x30] sm:$0xf]  ;;  %v11482_v40 = vor.u32 %v11695_v9, %v11479_v31  ;;  %10759 = vmatpush.bf16.msrb.mxu0 %v11717_v63  ;;  %v11705_v31 = vld [vmem:[%s13271_s20] sm:$0xff] }
 0xe47   : > { %v11715_v9 = vld [vmem:[%s13271_s20 + $0x50] sm:$0xff] }
 0xe49   : > { %10597 = vmatpush.bf16.msrb.mxu2 %v11482_v40  ;;  %v767_v40 = vld [vmem:[%s13273_s6 + $0x8] sm:$0xff] }
 0xe9f   : > { %v10342_v57 = vpop.permute.xlu2 %10341 }
 0xea0   : > { %v10344_v14 = vsel %vm3313_vm1, %v10337_v18, %v10342_v57  ;;  %v11478_v18 = vor.u32 %v11696_v7, %v11477_v27  ;;  %v11716_v7 = vld [vmem:[%s13271_s20 + $0x58] sm:$0xff] }
 0xea1   : > { %v10345_v16 = vpack.c.bf16 %v10344_v14, %v5679_v15  ;;  %v11693_v15 = vld [vmem:[%s13265_s27 + $0x24] sm:$0xf]  ;;  %v11471_v14 = vld [vmem:[%s13265_s27 + $0x28] sm:$0xf0]  ;;  %10760 = vmatpush.bf16.msrb.mxu0 %v11716_v7 }
 0xea2   : > { %10583 = vmatpush.bf16.msrb.mxu1 %v11478_v18  ;;  %v11713_v18 = vld [vmem:[%s13271_s20 + $0x40] sm:$0xff] }
 0xea3   : > { %10419 = vmatmul.bf16.vlgmr.msra.gmra.mxu0 %v10345_v16  ;;  %v11461_v16 = vld [vmem:[%s13265_s27 + $0x10] sm:$0xf] }
 0xea5   : > { %10761 = vmatpush.bf16.msrb.mxu0 %v11715_v9 }
 0xea6   : > { %10584 = vmatpush.bf16.msrb.mxu1 %v11470_v46 }
 0xf20   : > { %v10420_v55 = vpop.f32.mrf.mxu0 }
 0xf21   : > { %v10421_v59 = vadd.f32 %v10420_v55, %v10362_v2  ;;  %v11474_v55 = vor.u32 %v11693_v15, %v11471_v14  ;;  %v10498_v14 = vperm.slane %v767_v40, 6 }
 0xf23   : > { %v10425_v41 = vadd.f32 %v12495_v48, %v10421_v59  ;;  %v11691_v48 = vld [vmem:[%s13265_s27 + $0x14] sm:$0xf]  ;;  %10598 = vmatpush.bf16.msrb.mxu2 %v11474_v55 }
 0xf25   : > { %10427 = vadd.xlane.f32.xlu1 %v10425_v41 }
 0xf28   : > { %v10422_v32 = vpop.f32.mrf.mxu0 }
 0xf29   : > { %v10423_v10 = vadd.f32 %v10422_v32, %v10362_v2  ;;  %v11692_v2 = vld [vmem:[%s13265_s27 + $0x14] sm:$0xf0] }
 0xf2a   : > { %v11462_v59 = vor.u32 %v11692_v2, %v11461_v16  ;;  %v11712_v32 = vld [vmem:[%s13271_s20 + $0x38] sm:$0xff] }
 0xf2b   : > { %v10426_v23 = vadd.f32 %v12496_v61, %v10423_v10  ;;  %v11453_v61 = vld [vmem:[%s13265_s27] sm:$0xf]  ;;  %10742 = vmatpush.bf16.msra.mxu3 %v11712_v32 }
 0xf2c   : > { %10585 = vmatpush.bf16.msrb.mxu1 %v11462_v59 }
 0xf2d   : > { %10429 = vadd.xlane.f32.xlu0 %v10426_v23 }
 0xf2f   : > { %10743 = vmatpush.bf16.msra.mxu3 %v11711_v62 }
 0xf33   : > { %10744 = vmatpush.bf16.msra.mxu3 %v11710_v30 }
 0xf37   : > { %10745 = vmatpush.bf16.msra.mxu3 %v11709_v6 }
 0xf98   : > { %v10428_v4 = vpop.xlane.xlu1 %10427 }
 0xf99   : > { %v10438_v52 = vmul.f32 %v16072_v1, %v10428_v4  ;;  %v11708_v4 = vld [vmem:[%s13271_s20 + $0x18] sm:$0xff] }
 0xf9a   : > { %10746 = vmatpush.bf16.msra.mxu3 %v11708_v4 }
 0xf9b   : > { %v16075_v54 = vsub.f32 %v10425_v41, %v10438_v52  ;;  %v11463_v41 = vld [vmem:[%s13265_s27 + $0x18] sm:$0xf0] }
 0xf9c   : > { %v11466_v43 = vor.u32 %v11691_v48, %v11463_v41 }
 0xf9d   : > { %v10442_v42 = vmul.f32 %v16075_v54, %v16075_v54 }
 0xf9e   : > { %10599 = vmatpush.bf16.msrb.mxu2 %v11466_v43 }
 0xf9f   : > { %10444 = vadd.xlane.f32.xlu1 %v10442_v42 }
 0xfa0   : > { %v10430_v37 = vpop.xlane.xlu0 %10429 }
 0xfa1   : > { %v10439_v24 = vmul.f32 %v16072_v1, %v10430_v37 }
 0xfa2   : > { %10600 = vmatpush.bf16.msrb.mxu2 %v11458_v3 }
 0xfa3   : > { %v16080_v47 = vsub.f32 %v10426_v23, %v10439_v24  ;;  %v11690_v23 = vld [vmem:[%s13265_s27 + $0x4] sm:$0xf0] }
 0xfa4   : > { %v11454_v20 = vor.u32 %v11690_v23, %v11453_v61 }
 0xfa5   : > { %v10443_v39 = vmul.f32 %v16080_v47, %v16080_v47 }
 0xfa6   : > { %10586 = vmatpush.bf16.msrb.mxu1 %v11454_v20 }
 0xfa7   : > { %10446 = vadd.xlane.f32.xlu2 %v10443_v39 }
0x1012   : > { %v10445_v17 = vpop.xlane.xlu1 %10444 }
0x1013   : > { %v10448_v12 = vmul.f32 %v10445_v17, %v16072_v1  ;;  %v11707_v17 = vld [vmem:[%s13271_s20 + $0x10] sm:$0xff] }
0x1014   : > { %10747 = vmatpush.bf16.msra.mxu3 %v11707_v17 }
0x1015   : > { %v10450_v57 = vadd.f32 1e-05, %v10448_v12  ;;  %v11714_v12 = vld [vmem:[%s13271_s20 + $0x48] sm:$0xff] }
0x1016   : > { %10762 = vmatpush.bf16.msrb.mxu0 %v11714_v12 }
0x1017   : > { %12486 = vrsqrt.f32 %v10450_v57  ;;  %vm10458_vm7 = vweird.f32 %v10450_v57 }
0x101a   : > { %v10447_v10 = vpop.xlane.xlu2 %10446  ;;  %10763 = vmatpush.bf16.msrb.mxu0 %v11713_v18 }
0x101b   : > { %v10449_v35 = vmul.f32 %v10447_v10, %v16072_v1 }
0x101d   : > { %v12487_v45 = vpop.eup %12486  ;;  %v10451_v34 = vadd.f32 1e-05, %v10449_v35 }
0x101e   : > { %v10453_v13 = vmul.f32 %v12487_v45, %v10450_v57  ;;  %vm10459_vm6 = vweird.f32 %v12487_v45 }
0x101f   : > { %12488 = vrsqrt.f32 %v10451_v34  ;;  %vm10460_vm8 = vmor %vm10458_vm7, %vm10459_vm6  ;;  %vm10468_vm10 = vweird.f32 %v10451_v34 }
0x1020   : > { %v10454_v50 = vmul.f32 %v12487_v45, %v10453_v13 }
0x1022   : > { %v10455_v51 = vmul.f32 0.5, %v10454_v50 }
0x1024   : > { %v10456_v11 = vsub.f32 1.5, %v10455_v51 }
0x1025   : > { %v12489_v19 = vpop.eup %12488 }
0x1026   : > { %v10457_v5 = vmul.f32 %v12487_v45, %v10456_v11  ;;  %v10463_v56 = vmul.f32 %v12489_v19, %v10451_v34  ;;  %vm10469_vm9 = vweird.f32 %v12489_v19 }
0x1027   : > { %vm10470_vm11 = vmor %vm10468_vm10, %vm10469_vm9 }
0x1028   : > { %v10464_v52 = vmul.f32 %v12489_v19, %v10463_v56  ;;  %v10461_v42 = vsel %vm10460_vm8, %v12487_v45, %v10457_v5 }
0x1029   : > { %v10472_v39 = vmul.f32 %v10461_v42, %v16075_v54 }
0x102a   : > { %v10465_v37 = vmul.f32 0.5, %v10464_v52 }
0x102b   : > { %v10475_v44 = vmul.f32 %v10474_v33, %v10472_v39 }
0x102c   : > { %v10466_v24 = vsub.f32 1.5, %v10465_v37 }
0x102d   : > { %v10478_v28 = vadd.f32 %v10477_v29, %v10475_v44 }
0x102e   : > { %v10467_v36 = vmul.f32 %v12489_v19, %v10466_v24 }
0x1030   : > { %v10471_v21 = vsel %vm10470_vm11, %v12489_v19, %v10467_v36  ;;  %v768_v36 = vld [vmem:[%s13273_s6 + $0x10] sm:$0xff] }
0x1031   : > { %v10473_v22 = vmul.f32 %v10471_v21, %v16080_v47  ;;  %v11706_v47 = vld [vmem:[%s13271_s20 + $0x8] sm:$0xff] }
0x1032   : > { %10748 = vmatpush.bf16.msra.mxu3 %v11706_v47 }
0x1033   : > { %v10476_v38 = vmul.f32 %v10474_v33, %v10473_v22 }
0x1035   : > { %v10479_v27 = vadd.f32 %v10477_v29, %v10476_v38  ;;  %v10812_v38 = vperm.slane %v768_v36, 0 }
0x1036   : > { %10749 = vmatpush.bf16.msra.mxu3 %v11705_v31 }
0x1037   : > { %v10480_v54 = vpack.c.bf16 %v10479_v27, %v10478_v28 }
0x1039   : > { %10587 = vmatmul.bf16.vlgmr.msrb.gmra.mxu1 %v10480_v54  ;;  %10601 = vmatmul.bf16.vlgmr.msrb.gmra.mxu2 %v10480_v54  ;;  %v10815_v54 = vperm.slane %v768_v36, 1 }
0x10b6   : > { %v10588_v58 = vpop.f32.mrf.mxu1 }
0x10b7   : > { %v10589_v46 = vadd.f32 %v10588_v58, %v10497_v49 }
0x10b9   : > { %v10607_v2 = vmax.f32 %v10589_v46, 0.0 }
0x10bc   : > { %v10602_v57 = vpop.f32.mrf.mxu2 }
0x10bd   : > { %v10603_v59 = vadd.f32 %v10602_v57, %v10498_v14 }
0x10be   : > { %v10590_v15 = vpop.f32.mrf.mxu1 }
0x10bf   : > { %v10591_v16 = vadd.f32 %v10590_v15, %v10497_v49  ;;  %v10608_v10 = vmax.f32 %v10603_v59, 0.0 }
0x10c1   : > { %v10609_v55 = vmax.f32 %v10591_v16, 0.0 }
0x10c3   : > { %v10611_v48 = vpack.c.bf16 %v10609_v55, %v10607_v2 }
0x10c4   : > { %v10604_v41 = vpop.f32.mrf.mxu2 }
0x10c5   : > { %v10605_v32 = vadd.f32 %v10604_v41, %v10498_v14  ;;  %10750 = vmatmul.bf16.vlgmr.msra.gmra.mxu3 %v10611_v48 }
0x10c7   : > { %v10610_v61 = vmax.f32 %v10605_v32, 0.0 }
0x10c9   : > { %v10612_v23 = vpack.c.bf16 %v10610_v61, %v10608_v10 }
0x10cb   : > { %10764 = vmatmul.bf16.vlgmr.msrb.gmra.mxu0 %v10612_v23 }
0x1148   : > { %v10751_v35 = vpop.f32.mrf.mxu3  ;;  %v10765_v62 = vpop.f32.mrf.mxu0 }
0x1149   : > { %v10752_v43 = vadd.f32 %v10751_v35, %v10645_v25 }
0x114b   : > { %v10766_v53 = vadd.f32 %v10765_v62, %v10752_v43 }
0x114d   : > { %v10770_v45 = vadd.f32 %v10766_v53, %v10478_v28 }
0x114f   : > { %10772 = vadd.xlane.f32.xlu1 %v10770_v45 }
0x1150   : > { %v10753_v34 = vpop.f32.mrf.mxu3  ;;  %v10767_v8 = vpop.f32.mrf.mxu0 }
0x1151   : > { %v10754_v20 = vadd.f32 %v10753_v34, %v10645_v25 }
0x1153   : > { %v10768_v0 = vadd.f32 %v10767_v8, %v10754_v20 }
0x1155   : > { %v10771_v13 = vadd.f32 %v10768_v0, %v10479_v27 }
0x1157   : > { %10774 = vadd.xlane.f32.xlu1 %v10771_v13 }
0x11c2   : > { %v10773_v30 = vpop.xlane.xlu1 %10772 }
0x11c3   : > { %v10776_v50 = vmul.f32 %v10773_v30, %v16072_v1 }
0x11c5   : > { %v10778_v3 = vsub.f32 %v10770_v45, %v10776_v50 }
0x11c7   : > { %v10780_v26 = vmul.f32 %v10778_v3, %v10778_v3 }
0x11c9   : > { %10782 = vadd.xlane.f32.xlu1 %v10780_v26 }
0x11ca   : > { %v10775_v51 = vpop.xlane.xlu1 %10774 }
0x11cb   : > { %v10777_v60 = vmul.f32 %v10775_v51, %v16072_v1 }
0x11cd   : > { %v10779_v6 = vsub.f32 %v10771_v13, %v10777_v60 }
0x11cf   : > { %v10781_v11 = vmul.f32 %v10779_v6, %v10779_v6 }
0x11d1   : > { %10784 = vadd.xlane.f32.xlu1 %v10781_v11 }
0x123c   : > { %v10783_v19 = vpop.xlane.xlu1 %10782 }
0x123d   : > { %v10786_v5 = vmul.f32 %v10783_v19, %v16072_v1 }
0x123f   : > { %v10788_v56 = vadd.f32 1e-05, %v10786_v5 }
0x1241   : > { %12490 = vrsqrt.f32 %v10788_v56  ;;  %vm10796_vm13 = vweird.f32 %v10788_v56 }
0x1244   : > { %v10785_v4 = vpop.xlane.xlu1 %10784 }
0x1245   : > { %v10787_v52 = vmul.f32 %v10785_v4, %v16072_v1 }
0x1247   : > { %v12491_v42 = vpop.eup %12490  ;;  %v10789_v37 = vadd.f32 1e-05, %v10787_v52 }
0x1248   : > { %v10791_v24 = vmul.f32 %v12491_v42, %v10788_v56  ;;  %vm10797_vm12 = vweird.f32 %v12491_v42 }
0x1249   : > { %12492 = vrsqrt.f32 %v10789_v37  ;;  %vm10798_vm14 = vmor %vm10796_vm13, %vm10797_vm12  ;;  %vm10806_vm0 = vweird.f32 %v10789_v37 }
0x124a   : > { %v10792_v39 = vmul.f32 %v12491_v42, %v10791_v24 }
0x124c   : > { %v10793_v33 = vmul.f32 0.5, %v10792_v39 }
0x124e   : > { %v10794_v21 = vsub.f32 1.5, %v10793_v33 }
0x124f   : > { %v12493_v22 = vpop.eup %12492 }
0x1250   : > { %v10795_v44 = vmul.f32 %v12491_v42, %v10794_v21  ;;  %v10801_v29 = vmul.f32 %v12493_v22, %v10789_v37  ;;  %vm10807_vm15 = vweird.f32 %v12493_v22 }
0x1251   : > { %vm10808_vm1 = vmor %vm10806_vm0, %vm10807_vm15 }
0x1252   : > { %v10799_v28 = vsel %vm10798_vm14, %v12491_v42, %v10795_v44  ;;  %v10802_v27 = vmul.f32 %v12493_v22, %v10801_v29 }
0x1253   : > { %v10810_v17 = vmul.f32 %v10799_v28, %v10778_v3 }
0x1254   : > { %v10803_v1 = vmul.f32 0.5, %v10802_v27 }
0x1255   : > { %v10813_v63 = vmul.f32 %v10812_v38, %v10810_v17 }
0x1256   : > { %v10804_v7 = vsub.f32 1.5, %v10803_v1 }
0x1257   : > { %v10816_v47 = vadd.f32 %v10815_v54, %v10813_v63 }
0x1258   : > { %v10805_v9 = vmul.f32 %v12493_v22, %v10804_v7 }
0x1259   : > { %10818 = vst [vmem:[#allocation21] sm:$0xff] %v10816_v47 }
0x125a   : > { %v10809_v31 = vsel %vm10808_vm1, %v12493_v22, %v10805_v9 }
0x125b   : > { %v10811_v12 = vmul.f32 %v10809_v31, %v10779_v6 }
0x125d   : > { %v10814_v18 = vmul.f32 %v10812_v38, %v10811_v12  ;;  %10823 = sbr.rel (%p11579_p1) target bundleno = 5009 (0x1391), region = 112 }
0x125f   : > { %v10817_v58 = vadd.f32 %v10815_v54, %v10814_v18 }
0x1261   : > { %10819 = vst [vmem:[#allocation21 + $0x8] sm:$0xff] %v10817_v58 }
0x1262   : > { %v11728_v49 = vld [vmem:[#allocation18 + $0x38] sm:$0xff]  ;;  %v11727_v40 = vld [vmem:[#allocation18 + $0x30] sm:$0xff]  ;;  %v11726_v15 = vld [vmem:[#allocation18 + $0x28] sm:$0xff]  ;;  %vm10852_vm2 = vcmask 1041409  }
0x1263   : > { %10904 = vmatpush.bf16.msra.mxu0 %v11728_v49  ;;  %v11736_v57 = vld [vmem:[#allocation19 + $0x38] sm:$0xff]  ;;  %v11735_v46 = vld [vmem:[#allocation19 + $0x30] sm:$0xff]  ;;  %v11734_v14 = vld [vmem:[#allocation19 + $0x28] sm:$0xff] }
0x1264   : > { %10984 = vmatpush.bf16.msra.mxu1 %v11736_v57  ;;  %v11725_v16 = vld [vmem:[#allocation18 + $0x20] sm:$0xff]  ;;  %v11724_v59 = vld [vmem:[#allocation18 + $0x18] sm:$0xff]  ;;  %v11723_v10 = vld [vmem:[#allocation18 + $0x10] sm:$0xff] }
0x1265   : > { %v11733_v55 = vld [vmem:[#allocation19 + $0x20] sm:$0xff]  ;;  %v11732_v32 = vld [vmem:[#allocation19 + $0x18] sm:$0xff]  ;;  %v11722_v25 = vld [vmem:[#allocation18 + $0x8] sm:$0xff] }
0x1266   : > { %v10824_v41 = vld [vmem:[#allocation21] sm:$0x1]  ;;  %v11731_v34 = vld [vmem:[#allocation19 + $0x10] sm:$0xff]  ;;  %v11730_v20 = vld [vmem:[#allocation19 + $0x8] sm:$0xff] }
0x1267   : > { %10905 = vmatpush.bf16.msra.mxu0 %v11727_v40  ;;  %v10828_v61 = vpack.c.bf16 %v10824_v41, %v10824_v41  ;;  %v11721_v43 = vld [vmem:[#allocation18] sm:$0xff]  ;;  %v12497_v0 = vld [vmem:[%s16298_s21] ss:$0 sm:$0xff]  ;;  %v12498_v51 = vld [vmem:[%s16298_s21 + $0x1] ss:$0 sm:$0xff] }
0x1268   : > { %10985 = vmatpush.bf16.msra.mxu1 %v11735_v46  ;;  %v10825_v2 = vld [vmem:[#allocation21 + $0x8] sm:$0x1]  ;;  %v11729_v8 = vld [vmem:[#allocation19] sm:$0xff] }
0x1269   : > { %v10829_v48 = vpack.c.bf16 %v10825_v2, %v10825_v2  ;;  %v10849_v35 = vunpack.c.l.b16 %v10828_v61 }
0x126b   : > { %10906 = vmatpush.bf16.msra.mxu0 %v11726_v15  ;;  %v10850_v23 = vunpack.c.l.b16 %v10829_v48 }
0x126c   : > { %10986 = vmatpush.bf16.msra.mxu1 %v11734_v14 }
0x126d   : > { %v10851_v62 = vrot.slane %v10850_v23, 7 }
0x126f   : > { %10907 = vmatpush.bf16.msra.mxu0 %v11725_v16  ;;  %v10853_v53 = vsel %vm10852_vm2, %v10851_v62, %v10849_v35 }
0x1270   : > { %10987 = vmatpush.bf16.msra.mxu1 %v11733_v55  ;;  %v10854_v45 = vpack.c.b16 %v10853_v53, %v10853_v53 }
0x1273   : > { %10908 = vmatpush.bf16.msra.mxu0 %v11724_v59 }
0x1274   : > { %10988 = vmatpush.bf16.msra.mxu1 %v11732_v32 }
0x1277   : > { %10909 = vmatpush.bf16.msra.mxu0 %v11723_v10 }
0x1278   : > { %10989 = vmatpush.bf16.msra.mxu1 %v11731_v34 }
0x127b   : > { %10910 = vmatpush.bf16.msra.mxu0 %v11722_v25 }
0x127c   : > { %10990 = vmatpush.bf16.msra.mxu1 %v11730_v20 }
0x127f   : > { %10911 = vmatpush.bf16.msra.mxu0 %v11721_v43 }
0x1280   : > { %10991 = vmatpush.bf16.msra.mxu1 %v11729_v8 }
0x1282   : > { %10912 = vmatmul.bf16.vlgmr.msra.gmra.mxu0 %v10854_v45 }
0x12ff   : > { %v10913_v13 = vpop.f32.mrf.mxu0 }
0x1300   : > { %v10914_v30 = vadd.f32 %v12497_v0, %v10913_v13 }
0x1302   : > { %12499 = vtanh.f32 %v10914_v30 }
0x1307   : > { %v10915_v50 = vpop.f32.mrf.mxu0 }
0x1308   : > { %v12500_v3 = vpop.eup %12499 }
0x1309   : > { %v10918_v26 = vpack.c.bf16 %v12500_v3, %v12500_v3 }
0x130b   : > { %10992 = vmatmul.bf16.vlgmr.msra.gmra.mxu1 %v10918_v26 }
0x1388   : > { %v10993_v60 = vpop.f32.mrf.mxu1 }
0x1389   : > { %v10994_v6 = vadd.f32 %v12498_v51, %v10993_v60 }
0x138b   : > { %10997 = vst [vmem:[#allocation22] sm:$0x3] %v10994_v6 }
0x1390   : > { %v10995_v11 = vpop.f32.mrf.mxu1 }
0x1391 PF: > { %s16299_s18 = sld [smem:[#allocation38_spill]]  ;;  %s12969_s12 = smov [#allocation21]  }
0x1392   : > { %s16300_s29 = sld [smem:[#allocation61_spill]]  ;;  %s11006_s14 = sshll.u32 %s12969_s12, 4  ;;  %s11007_s14 = int_to_ptr.vmem [resolvable:$true] %s11006_s14 }
0x1393   : > { %s12970_s24 = smov 128   ;;  %s12971_s16 = smov 8  }
0x1394   : > { %s12972_s27 = smov [#allocation22]   ;;  %s16301_s6 = sld [smem:[#allocation62_spill]] }
0x1395   : > { %s11023_s11 = sshll.u32 %s12972_s27, 4  ;;  %s11024_s11 = int_to_ptr.vmem [resolvable:$true] %s11023_s11 }
0x1397   : > { %p11811_p3 = scmp.eq.s32.totalorder %s16299_s18, 1 }
0x1398   : > { %s11008_s26 = sshll.u32 %s16300_s29, 4  ;;  %s11009_s26 = int_to_ptr.hbm [resolvable:$true] %s11008_s26 }
0x1399   : > { %11765 = dma.vmem_to_hbm [thread:$0]  (%p11811_p3), %s11007_s14, 256, %s11009_s26, [#allocation6], %s12970_s24, %s12970_s24, %s12971_s16  }
0x139a   : > { %s11025_s0 = sshll.u32 %s16301_s6, 4  ;;  %s11026_s0 = int_to_ptr.hbm [resolvable:$true] %s11025_s0 }
0x139b   : > { %11767 = dma.vmem_to_hbm [thread:$0]  (%p11811_p3), %s11024_s11, 32, %s11026_s0, [#allocation23]  }
0x139c   : > { %12924 = dma.done.wait (%p11811_p3), [#allocation6], 256  }
0x139d   : > { %12926 = vsyncadd (%p11811_p3), [#allocation6], 4294967040 }
0x139e   : > { %12928 = dma.done.wait (%p11811_p3), [#allocation23], 32  }
0x139f   : > { %12930 = vsyncadd (%p11811_p3), [#allocation23], 4294967264 }
0x13a0 PF: > { %s16302_s17 = sld [smem:[#allocation37_spill]]  ;;  %s16307_s14 = smov %s12949_s15 }
0x13a1   : > { %s16303_s29 = sld [smem:[#allocation34_spill]] }
0x13a2   : > { %s16304_s0 = sld [smem:[#allocation35_spill]] }
0x13a3   : > { %s16305_s30 = sld [smem:[#allocation42_spill]] }
0x13a4   : > { %s16306_s22 = sld [smem:[#allocation41_spill]] }
0x13a6   : > { %s48_s16 = sadd.s32 1, %s16302_s17  }
0x13a7   : > { %p45_p4 = scmp.ge.s32.totalorder %s48_s16, 4  }
0x13a9   :  { %47 = sbr.rel (!%p45_p4) target bundleno = 26 (0x1a), region = 205 }
0x13aa   : > { %s16308_s15 = smov %s16306_s22 }
0x13ae   :  { %11044 = vsyncpa [#allocation5], 1 }
0x13af   :  { %11046 = vsyncpa [#allocation5 + $0x1], 1 }
0x13b0   :  { %11047 = vsyncpa [#allocation8], 1 }
0x13b1   :  { %11049 = vsyncpa [#allocation8 + $0x1], 1 }
0x13b2   :  { %11050 = vsyncpa [#allocation11], 1 }
0x13b3   :  { %11052 = vsyncpa [#allocation11 + $0x1], 1 }
0x13b4   :  { %11053 = vsyncpa [#allocation14], 1 }
0x13b5   :  { %11055 = vsyncpa [#allocation14 + $0x1], 1 }
0x13b6   :  { %11056 = vsyncpa [#allocation17], 1 }
0x13b7   :  { %11058 = vsyncpa [#allocation17 + $0x1], 1 }
0x13b8   :  { %11059 = vsyncpa [#allocation20], 1 }
0x13b9   :  { %11060 = vsyncpa [#allocation6], 1 }
0x13ba   :  { %11062 = vsyncpa [#allocation6 + $0x1], 1 }
0x13bb   :  { %11063 = vsyncpa [#allocation23], 1 }

</bundles_post_ra>
